<compile_context>
chip_gen: v7x
topology: tpu7x:2x2x1
jax: 0.10.0
libtpu: 0.0.40
codegen_flags: <defaults>
</compile_context>

<pallas_src>
import functools
import math

import jax
import jax.numpy as jnp
from jax.experimental import pallas as pl
from jax.experimental.pallas import tpu as pltpu

EPS = 1e-5
MAX_ROW_TILE = 1024                # mem-bound matmuls want the largest tile that fits


def _cdiv(a, b):
    return -(-a // b)


def _round_up(a, b):
    return _cdiv(a, b) * b


def _query_tpu_info():
    try:
        return pltpu.get_tpu_info()
    except Exception:      # interpreter / CPU host / older jax: fall back to safe defaults
        return None


_TPU_INFO = _query_tpu_info()
_VMEM_CAP = getattr(_TPU_INFO, "vmem_capacity_bytes", 64 << 20) or (64 << 20)
_NUM_CORES = getattr(_TPU_INFO, "num_cores", 1) or 1
# leave ~16 MiB headroom for compiler scratch; v5e/v6e (128 MiB) -> 96 MiB, v7x -> 48 MiB
VMEM_LIMIT = int(min(max(_VMEM_CAP - (16 << 20), 32 << 20), 96 << 20))


def _row_tile(m):
    """Largest row tile up to MAX_ROW_TILE, multiple of 16 (bf16 sublane packing).
    Only split the grid to >=2 steps when the chip actually has >=2 TensorCores."""
    mp = _round_up(m, 16)
    t = min(MAX_ROW_TILE, mp)
    if _NUM_CORES >= 2 and mp // t < 2 and mp >= 32:
        t = _round_up(_cdiv(mp, 2), 16)
    return t


# ----------------------------------------------------------------------------
# Pallas kernels
# ----------------------------------------------------------------------------
def _mm_kernel(*refs, in_affine, in_relu, relu, has_res):
    """out = maybe_relu((pre(A) @ W) * out_scale + out_shift [+ residual]);
    pre(A) = maybe_relu(A * in_scale + in_shift) when in_affine (fused BN+ReLU).
    Residual is added before the optional output ReLU."""
    it = iter(refs)
    a_ref = next(it)
    if in_affine:
        isc_ref = next(it)
        ish_ref = next(it)
    w_ref = next(it)
    osc_ref = next(it)
    osh_ref = next(it)
    r_ref = next(it) if has_res else None
    o_ref = next(it)

    a = a_ref[...]
    if in_affine:
        a = a.astype(jnp.float32) * isc_ref[...] + ish_ref[...]
        if in_relu:
            a = jnp.maximum(a, 0.0)
        # small precision loss vs f32-input torch BN: dot runs in bf16 on the MXU
        a = a.astype(w_ref.dtype)
    acc = jnp.dot(a, w_ref[...], preferred_element_type=jnp.float32)
    acc = acc * osc_ref[...] + osh_ref[...]
    if has_res:
        acc = acc + r_ref[...].astype(jnp.float32)
    if relu:
        acc = jnp.maximum(acc, 0.0)
    o_ref[...] = acc.astype(o_ref.dtype)


def _conv3x3_kernel(x_ref, w_ref, sc_ref, sh_ref, o_ref, *, relu):
    """Direct 3x3 conv, stride 1, pad 1 (zero padding applied by the wrapper).
    One (Ho*Wo, Cin)@(Cin, Cout) dot per tap -> 9 MXU calls per image (M batched).
    x_ref: (1, Ho+2, Wo+2, Cin); w_ref: (9, Cin, Cout); o_ref: (1, Ho, Wo, Cout)."""
    _, Ho, Wo, Cout = o_ref.shape
    Cin = x_ref.shape[3]
    x = x_ref[...][0]                                   # (Ho+2, Wo+2, Cin)
    w = w_ref[...]                                      # (9, Cin, Cout)
    acc = jnp.zeros((Ho * Wo, Cout), jnp.float32)
    for di in range(3):
        for dj in range(3):
            tap = x[di:di + Ho, dj:dj + Wo, :].reshape(Ho * Wo, Cin)
            acc = acc + jnp.dot(tap, w[di * 3 + dj],
                                preferred_element_type=jnp.float32)
    acc = acc * sc_ref[...] + sh_ref[...]
    if relu:
        acc = jnp.maximum(acc, 0.0)
    o_ref[...] = acc.reshape(1, Ho, Wo, Cout).astype(o_ref.dtype)


def _pool_mm_kernel(x_ref, w_ref, sc_ref, sh_ref, o_ref, *, relu):
    """MaxPool2d(3, stride=1, pad=1) fused with 1x1 conv + folded BN + ReLU.
    x_ref: (1, H+2, W+2, C) padded with -inf; o_ref: (1, H, W, Cout).
    The pooled feature map never leaves VMEM."""
    _, H, W, Cout = o_ref.shape
    C = x_ref.shape[3]
    x = x_ref[...][0]                                   # (H+2, W+2, C)
    m = x[0:H, 0:W, :]
    for di in range(3):
        for dj in range(3):
            if di == 0 and dj == 0:
                continue
            m = jnp.maximum(m, x[di:di + H, dj:dj + W, :])
    pooled = m.reshape(H * W, C).astype(w_ref.dtype)
    acc = jnp.dot(pooled, w_ref[...], preferred_element_type=jnp.float32)
    acc = acc * sc_ref[...] + sh_ref[...]
    if relu:
        acc = jnp.maximum(acc, 0.0)
    o_ref[...] = acc.reshape(1, H, W, Cout).astype(o_ref.dtype)


def _maxpool3s2_kernel(x_ref, o_ref):
    """MaxPool2d(kernel=3, stride=2, pad=1).  Input is pre-padded with -inf to exactly
    (2*Ho+2, 2*Wo+2).  Stride-2 decimation uses contiguous slices + reshapes only."""
    _, Ho, Wo, C = o_ref.shape
    x = x_ref[...][0]                                   # (2Ho+2, 2Wo+2, C)
    Hp = 2 * Ho + 2
    # pool along W: columns 2j, 2j+1, 2j+2
    a = x[:, 0:2 * Wo, :].reshape(Hp, Wo, 2, C)
    b = x[:, 2:2 * Wo + 2, :].reshape(Hp, Wo, 2, C)
    wmax = jnp.maximum(jnp.maximum(a[:, :, 0, :], a[:, :, 1, :]), b[:, :, 0, :])
    # pool along H: rows 2h, 2h+1, 2h+2
    c = wmax[0:2 * Ho].reshape(Ho, 2, Wo, C)
    d = wmax[2:2 * Ho + 2].reshape(Ho, 2, Wo, C)
    out = jnp.maximum(jnp.maximum(c[:, 0], c[:, 1]), d[:, 0])
    o_ref[...] = out.reshape(1, Ho, Wo, C).astype(o_ref.dtype)


def _avgpool2s2_kernel(x_ref, o_ref):
    """AvgPool2d(kernel=2, stride=2, pad=0) via reshape decimation (no strided loads)."""
    _, Ho, Wo, C = o_ref.shape
    x = x_ref[...][0].astype(jnp.float32)               # (2Ho, 2Wo, C)
    xw = x.reshape(2 * Ho, Wo, 2, C)
    w = xw[:, :, 0, :] + xw[:, :, 1, :]
    h = w.reshape(Ho, 2, Wo, C)
    out = (h[:, 0] + h[:, 1]) * 0.25
    o_ref[...] = out.reshape(1, Ho, Wo, C).astype(o_ref.dtype)


def _head_kernel(x_ref, sc_ref, sh_ref, w_ref, b_ref, o_ref):
    """norm5 + F.relu + adaptive_avg_pool2d((1,1)) + flatten + Linear, whole batch."""
    x = x_ref[...].astype(jnp.float32)                  # (N, H*W, C)
    x = jnp.maximum(x * sc_ref[...] + sh_ref[...], 0.0)
    pooled = jnp.mean(x, axis=1)                        # (N, C)
    o_ref[...] = (jnp.dot(pooled, w_ref[...],
                          preferred_element_type=jnp.float32) + b_ref[...])


# ----------------------------------------------------------------------------
# Pallas wrappers
# ----------------------------------------------------------------------------
def fused_matmul(a, w, out_scale, out_shift, *, relu=False,
                 in_scale=None, in_shift=None, in_relu=False,
                 residual=None, out_dtype=jnp.bfloat16):
    M, K = a.shape
    Ncol = w.shape[1]
    tile = _row_tile(M)
    Mp = _round_up(M, tile)

    def pad_rows(t):
        return jnp.pad(t, ((0, Mp - M), (0, 0))) if Mp != M else t

    in_affine = in_scale is not None
    has_res = residual is not None

    inputs = [pad_rows(a)]
    in_specs = [pl.BlockSpec((tile, K), lambda i: (i, 0))]
    if in_affine:
        inputs += [in_scale.reshape(1, K).astype(jnp.float32),
                   in_shift.reshape(1, K).astype(jnp.float32)]
        in_specs += [pl.BlockSpec((1, K), lambda i: (0, 0)),
                     pl.BlockSpec((1, K), lambda i: (0, 0))]
    inputs += [w,
               out_scale.reshape(1, Ncol).astype(jnp.float32),
               out_shift.reshape(1, Ncol).astype(jnp.float32)]
    in_specs += [pl.BlockSpec((K, Ncol), lambda i: (0, 0)),
                 pl.BlockSpec((1, Ncol), lambda i: (0, 0)),
                 pl.BlockSpec((1, Ncol), lambda i: (0, 0))]
    if has_res:
        inputs.append(pad_rows(residual))
        in_specs.append(pl.BlockSpec((tile, Ncol), lambda i: (i, 0)))

    out = pl.pallas_call(
        functools.partial(_mm_kernel, in_affine=in_affine, in_relu=in_relu,
                          relu=relu, has_res=has_res),
        out_shape=jax.ShapeDtypeStruct((Mp, Ncol), out_dtype),
        grid=(Mp // tile,),
        in_specs=in_specs,
        out_specs=pl.BlockSpec((tile, Ncol), lambda i: (i, 0)),
        compiler_params=pltpu.CompilerParams(
            dimension_semantics=("parallel",),
            vmem_limit_bytes=VMEM_LIMIT),
    )(*inputs)
    return out[:M] if Mp != M else out


def conv3x3_direct(x, w9, scale, shift, relu=True):
    """3x3 conv, stride 1, pad 1.  w9: (9, Cin, Cout) tap-major weights."""
    N, H, W, Cin = x.shape
    Cout = w9.shape[-1]
    xp = jnp.pad(x, ((0, 0), (1, 1), (1, 1), (0, 0)))
    return pl.pallas_call(
        functools.partial(_conv3x3_kernel, relu=relu),
        out_shape=jax.ShapeDtypeStruct((N, H, W, Cout), jnp.bfloat16),
        grid=(N,),
        in_specs=[
            pl.BlockSpec((1, H + 2, W + 2, Cin), lambda n: (n, 0, 0, 0)),
            pl.BlockSpec((9, Cin, Cout), lambda n: (0, 0, 0)),
            pl.BlockSpec((1, Cout), lambda n: (0, 0)),
            pl.BlockSpec((1, Cout), lambda n: (0, 0)),
        ],
        out_specs=pl.BlockSpec((1, H, W, Cout), lambda n: (n, 0, 0, 0)),
        compiler_params=pltpu.CompilerParams(
            dimension_semantics=("parallel",), vmem_limit_bytes=VMEM_LIMIT),
    )(xp, w9, scale.reshape(1, Cout).astype(jnp.float32),
      shift.reshape(1, Cout).astype(jnp.float32))


def maxpool3s1_matmul(x, w, scale, shift, relu=True):
    """Fused MaxPool2d(3, stride=1, pad=1) + 1x1 conv + folded BN + ReLU."""
    N, H, W, C = x.shape
    Cout = w.shape[1]
    xp = jnp.pad(x, ((0, 0), (1, 1), (1, 1), (0, 0)),
                 constant_values=float("-inf"))
    return pl.pallas_call(
        functools.partial(_pool_mm_kernel, relu=relu),
        out_shape=jax.ShapeDtypeStruct((N, H, W, Cout), jnp.bfloat16),
        grid=(N,),
        in_specs=[
            pl.BlockSpec((1, H + 2, W + 2, C), lambda n: (n, 0, 0, 0)),
            pl.BlockSpec((C, Cout), lambda n: (0, 0)),
            pl.BlockSpec((1, Cout), lambda n: (0, 0)),
            pl.BlockSpec((1, Cout), lambda n: (0, 0)),
        ],
        out_specs=pl.BlockSpec((1, H, W, Cout), lambda n: (n, 0, 0, 0)),
        compiler_params=pltpu.CompilerParams(
            dimension_semantics=("parallel",), vmem_limit_bytes=VMEM_LIMIT),
    )(xp, w, scale.reshape(1, Cout).astype(jnp.float32),
      shift.reshape(1, Cout).astype(jnp.float32))


def maxpool_3x3_s2_p1(x):
    """PyTorch MaxPool2d(kernel_size=3, stride=2, padding=1)."""
    N, H, W, C = x.shape
    Ho = (H + 2 - 3) // 2 + 1
    Wo = (W + 2 - 3) // 2 + 1
    TH, TW = 2 * Ho + 2, 2 * Wo + 2          # exact padded extent the kernel expects
    xp = jnp.pad(x, ((0, 0), (1, TH - H - 1), (1, TW - W - 1), (0, 0)),
                 constant_values=float("-inf"))
    return pl.pallas_call(
        _maxpool3s2_kernel,
        out_shape=jax.ShapeDtypeStruct((N, Ho, Wo, C), x.dtype),
        grid=(N,),
        in_specs=[pl.BlockSpec((1, TH, TW, C), lambda n: (n, 0, 0, 0))],
        out_specs=pl.BlockSpec((1, Ho, Wo, C), lambda n: (n, 0, 0, 0)),
        compiler_params=pltpu.CompilerParams(
            dimension_semantics=("parallel",), vmem_limit_bytes=VMEM_LIMIT),
    )(xp)


def avgpool_2x2_s2(x):
    """PyTorch AvgPool2d(kernel_size=2, stride=2) (padding=0)."""
    N, H, W, C = x.shape
    Ho, Wo = H // 2, W // 2
    x = x[:, :2 * Ho, :2 * Wo, :]
    return pl.pallas_call(
        _avgpool2s2_kernel,
        out_shape=jax.ShapeDtypeStruct((N, Ho, Wo, C), x.dtype),
        grid=(N,),
        in_specs=[pl.BlockSpec((1, 2 * Ho, 2 * Wo, C), lambda n: (n, 0, 0, 0))],
        out_specs=pl.BlockSpec((1, Ho, Wo, C), lambda n: (n, 0, 0, 0)),
        compiler_params=pltpu.CompilerParams(
            dimension_semantics=("parallel",), vmem_limit_bytes=VMEM_LIMIT),
    )(x)


def _im2col(x, kh, kw, stride, pad):
    N, H, W, C = x.shape
    if pad:
        x = jnp.pad(x, ((0, 0), (pad, pad), (pad, pad), (0, 0)))
    Ho = (H + 2 * pad - kh) // stride + 1
    Wo = (W + 2 * pad - kw) // stride + 1
    cols = []
    for i in range(kh):
        for j in range(kw):
            cols.append(x[:, i:i + stride * Ho:stride, j:j + stride * Wo:stride, :])
    patches = jnp.concatenate(cols, axis=-1)            # (N, Ho, Wo, kh*kw*C)
    return patches.reshape(N * Ho * Wo, kh * kw * C), (N, Ho, Wo)


# ----------------------------------------------------------------------------
# parameter initialization (deterministic, synthetic)
# ----------------------------------------------------------------------------
class KeyGen:
    def __init__(self, key):
        self.key = key

    def __call__(self):
        self.key, sub = jax.random.split(self.key)
        return sub


def kaiming_normal(key, shape):
    # shape = (kh, kw, cin, cout); PyTorch kaiming_normal_ default: fan_in, gain sqrt(2)
    fan_in = shape[0] * shape[1] * shape[2]
    std = math.sqrt(2.0 / fan_in)
    return std * jax.random.normal(key, shape, dtype=jnp.float32)


def bn_fold(cout):
    gamma = jnp.ones((cout,), jnp.float32)
    beta = jnp.zeros((cout,), jnp.float32)
    mean = jnp.zeros((cout,), jnp.float32)
    var = jnp.ones((cout,), jnp.float32)
    scale = gamma / jnp.sqrt(var + EPS)
    shift = beta - mean * scale
    return scale, shift


def make_inception(kg, cin, slab_c, growth_rate, bn_size):
    cg = int(0.25 * growth_rate)
    c1, c2r, c2, c3r, c3 = cg, bn_size * cg, cg, bn_size * cg, cg
    c4 = growth_rate - 3 * cg

    # fused 1x1 stage over the slab (rows >= cin are zero-extended; unwritten slab
    # channels are exactly zero, so the extra rows contribute nothing)
    w1 = kaiming_normal(kg(), (1, 1, cin, c1)).reshape(cin, c1)
    w21 = kaiming_normal(kg(), (1, 1, cin, c2r)).reshape(cin, c2r)
    w31 = kaiming_normal(kg(), (1, 1, cin, c3r)).reshape(cin, c3r)
    wA = jnp.pad(jnp.concatenate([w1, w21, w31], axis=1),
                 ((0, slab_c - cin), (0, 0)))
    s1_, h1_ = bn_fold(c1)
    s2_, h2_ = bn_fold(c2r)
    s3_, h3_ = bn_fold(c3r)
    sA = jnp.concatenate([s1_, s2_, s3_])
    hA = jnp.concatenate([h1_, h2_, h3_])

    # block-diagonal 3x3 stage (branch 2 + branch 3 share a single kernel call)
    w2 = kaiming_normal(kg(), (3, 3, c2r, c2))
    w3 = kaiming_normal(kg(), (3, 3, c3r, c3))
    w23 = jnp.zeros((3, 3, c2r + c3r, c2 + c3), jnp.float32)
    w23 = w23.at[:, :, :c2r, :c2].set(w2)
    w23 = w23.at[:, :, c2r:, c2:].set(w3)
    s2o, h2o = bn_fold(c2)
    s3o, h3o = bn_fold(c3)

    # branch 4: maxpool(3,1,1) -> 1x1 conv (zero-extended to the slab width)
    w4 = kaiming_normal(kg(), (1, 1, cin, c4)).reshape(cin, c4)
    w4 = jnp.pad(w4, ((0, slab_c - cin), (0, 0)))
    s4, h4 = bn_fold(c4)

    return dict(
        wA=wA.astype(jnp.bfloat16), sA=sA, hA=hA,
        w23=w23.reshape(9, c2r + c3r, c2 + c3).astype(jnp.bfloat16),
        s23=jnp.concatenate([s2o, s3o]), h23=jnp.concatenate([h2o, h3o]),
        w4=w4.astype(jnp.bfloat16), s4=s4, h4=h4,
    )


def init_params(key, growth_rate, block_config, num_init_features, bn_size,
                num_classes):
    kg = KeyGen(key)
    p = {}
    p["conv0_w"] = kaiming_normal(kg(), (7, 7, 3, num_init_features)) \
        .reshape(7 * 7 * 3, num_init_features).astype(jnp.bfloat16)
    p["bn0"] = bn_fold(num_init_features)

    blocks = []
    nf = num_init_features
    for bi, num_layers in enumerate(block_config):
        slab_c = nf + num_layers * growth_rate
        layers = [make_inception(kg, nf + li * growth_rate, slab_c,
                                 growth_rate, bn_size)
                  for li in range(num_layers)]
        bound = 1.0 / math.sqrt(slab_c)
        res = dict(
            layers=layers,
            conv_w=kaiming_normal(kg(), (1, 1, slab_c, nf))
            .reshape(slab_c, nf).astype(jnp.bfloat16),
            conv_b=jax.random.uniform(kg(), (nf,), jnp.float32, -bound, bound),
        )
        trans = None
        if bi != len(block_config) - 1:
            trans = dict(
                bn=bn_fold(nf),
                conv_w=kaiming_normal(kg(), (1, 1, nf, nf // 2))
                .reshape(nf, nf // 2).astype(jnp.bfloat16),
            )
            nf = nf // 2
        blocks.append(dict(res=res, trans=trans))
    p["blocks"] = blocks
    p["bn5"] = bn_fold(nf)
    bound = 1.0 / math.sqrt(nf)
    p["cls_w"] = jax.random.uniform(kg(), (nf, num_classes), jnp.float32,
                                    -bound, bound)
    p["cls_b"] = jnp.zeros((num_classes,), jnp.float32)
    return p


# ----------------------------------------------------------------------------
# forward pass (mirrors DenseNetResNet.forward)
# ----------------------------------------------------------------------------
def inception_layer_fwd(lp, slab_2d, shape4):
    N, H, W, slab_c = shape4
    M = N * H * W
    # branches 1, 2-reduce, 3-reduce fused into one lane-dense 1x1 matmul
    yA = fused_matmul(slab_2d, lp["wA"], lp["sA"], lp["hA"], relu=True)
    c1 = lp["wA"].shape[1] - lp["w23"].shape[1]
    b1 = yA[:, :c1]
    y23 = yA[:, c1:].reshape(N, H, W, -1)
    # branches 2 and 3: fused block-diagonal 3x3 direct conv (no im2col)
    b23 = conv3x3_direct(y23, lp["w23"], lp["s23"], lp["h23"], relu=True)
    # branch 4: maxpool(3,1,1) + zero-extended 1x1 conv fused in one kernel
    b4 = maxpool3s1_matmul(slab_2d.reshape(N, H, W, slab_c), lp["w4"],
                           lp["s4"], lp["h4"], relu=True)
    return jnp.concatenate([b1, b23.reshape(M, -1), b4.reshape(M, -1)], axis=1)


def resblock_fwd(p, x):
    N, H, W, nf = x.shape
    slab_c = p["conv_w"].shape[0]
    M = N * H * W
    # preallocate the dense-block channel slab; each layer writes its own slice
    slab = jnp.pad(x.reshape(M, nf), ((0, 0), (0, slab_c - nf)))
    cin = nf
    for lp in p["layers"]:
        new = inception_layer_fwd(lp, slab, (N, H, W, slab_c))
        g = new.shape[1]
        slab = slab.at[:, cin:cin + g].set(new)
        cin += g
    # ResBlock: 1x1 conv (with bias) over the block output + residual, fused
    z = fused_matmul(slab, p["conv_w"],
                     jnp.ones((nf,), jnp.float32), p["conv_b"],
                     residual=x.reshape(M, nf))
    return z.reshape(N, H, W, nf)


def transition_fwd(p, x):
    N, H, W, C = x.shape
    co = p["conv_w"].shape[1]
    sc, sh = p["bn"]
    # BN + ReLU fused as a pre-dot affine into the 1x1 conv
    y = fused_matmul(x.reshape(N * H * W, C), p["conv_w"],
                     jnp.ones((co,), jnp.float32), jnp.zeros((co,), jnp.float32),
                     in_scale=sc, in_shift=sh, in_relu=True)
    return avgpool_2x2_s2(y.reshape(N, H, W, co))


def forward(params, x_nchw):
    x = jnp.transpose(x_nchw, (0, 2, 3, 1)).astype(jnp.bfloat16)  # NCHW -> NHWC
    # conv0 (7x7 s2 p3) + norm0 + relu0: im2col glue + fused matmul
    s0, h0 = params["bn0"]
    a, (N, Ho, Wo) = _im2col(x, 7, 7, 2, 3)
    x = fused_matmul(a, params["conv0_w"], s0, h0, relu=True).reshape(N, Ho, Wo, -1)
    x = maxpool_3x3_s2_p1(x)                 # pool0
    for blk in params["blocks"]:
        x = resblock_fwd(blk["res"], x)
        if blk["trans"] is not None:
            x = transition_fwd(blk["trans"], x)
    # norm5 + F.relu + adaptive_avg_pool2d + flatten + Linear: one fused kernel,
    # single grid step over the whole batch (weight DMA'd once)
    N, H, W, C = x.shape
    s5, h5 = params["bn5"]
    ncls = params["cls_w"].shape[1]
    out = pl.pallas_call(
        _head_kernel,
        out_shape=jax.ShapeDtypeStruct((N, ncls), jnp.float32),
        grid=(1,),
        in_specs=[
            pl.BlockSpec((N, H * W, C), lambda i: (0, 0, 0)),
            pl.BlockSpec((1, C), lambda i: (0, 0)),
            pl.BlockSpec((1, C), lambda i: (0, 0)),
            pl.BlockSpec((C, ncls), lambda i: (0, 0)),
            pl.BlockSpec((1, ncls), lambda i: (0, 0)),
        ],
        out_specs=pl.BlockSpec((N, ncls), lambda i: (0, 0)),
        compiler_params=pltpu.CompilerParams(vmem_limit_bytes=VMEM_LIMIT),
    )(x.reshape(N, H * W, C), s5.reshape(1, C), h5.reshape(1, C),
      params["cls_w"], params["cls_b"].reshape(1, ncls))
    return out


# ----------------------------------------------------------------------------
if __name__ == "__main__":
    # Small config consistent with the module's constructor arguments.
    growth_rate = 8
    block_config = (2, 2)
    num_init_features = 16
    bn_size = 2
    num_classes = 10

    x = jax.random.normal(jax.random.PRNGKey(0), (2, 3, 32, 32), jnp.float32)
    params = init_params(jax.random.PRNGKey(42), growth_rate, block_config,
                         num_init_features, bn_size, num_classes)

    fwd = jax.jit(forward)
    out = jax.block_until_ready(fwd(params, x))
    assert out.shape == (2, num_classes), out.shape
    assert bool(jnp.all(jnp.isfinite(out)))
    print("KERNEL_OK")
</pallas_src>

<mosaic_0001>
module attributes {stable_mosaic.version = 11 : i64} {
  func.func @_mm_kernel(%arg0: i32, %arg1: memref<512x147xbf16, #tpu.memory_space<vmem>>, %arg2: memref<147x16xbf16, #tpu.memory_space<vmem>>, %arg3: memref<1x16xf32, #tpu.memory_space<vmem>>, %arg4: memref<1x16xf32, #tpu.memory_space<vmem>>, %arg5: memref<512x16xbf16, #tpu.memory_space<vmem>>) attributes {dimension_semantics = [#tpu.dimension_semantics<parallel>], iteration_bounds = array<i64: 1>, scalar_prefetch = 0 : i64, scratch_operands = 0 : i64, tpu.core_type = #tpu.core_type<tc>, window_params = [{transform_indices = @transform_0, window_bounds = array<i64: 512, 147>}, {pipeline_mode = #tpu.pipeline_mode<synchronous>, transform_indices = @transform_1, window_bounds = array<i64: 147, 16>}, {pipeline_mode = #tpu.pipeline_mode<synchronous>, transform_indices = @transform_2, window_bounds = array<i64: 1, 16>}, {pipeline_mode = #tpu.pipeline_mode<synchronous>, transform_indices = @transform_3, window_bounds = array<i64: 1, 16>}, {transform_indices = @transform_4, window_bounds = array<i64: 512, 16>}]} {
    %c0 = arith.constant 0 : index
    %c0_0 = arith.constant 0 : index
    %0 = vector.load %arg1[%c0, %c0_0] : memref<512x147xbf16, #tpu.memory_space<vmem>>, vector<512x147xbf16>
    %c0_1 = arith.constant 0 : index
    %c0_2 = arith.constant 0 : index
    %1 = vector.load %arg2[%c0_1, %c0_2] : memref<147x16xbf16, #tpu.memory_space<vmem>>, vector<147x16xbf16>
    %cst = arith.constant dense<0.000000e+00> : vector<512x16xf32>
    %2 = tpu.matmul %0, %1, %cst {dimension_numbers = #tpu.dot_dimension_numbers<[1], [0], [0], [1], [0, 0, 1, 1], [], []>} : vector<512x147xbf16>, vector<147x16xbf16>, vector<512x16xf32> -> vector<512x16xf32>
    %c0_3 = arith.constant 0 : index
    %c0_4 = arith.constant 0 : index
    %3 = vector.load %arg3[%c0_3, %c0_4] : memref<1x16xf32, #tpu.memory_space<vmem>>, vector<1x16xf32>
    %4 = vector.broadcast %3 : vector<1x16xf32> to vector<512x16xf32>
    %5 = arith.mulf %2, %4 : vector<512x16xf32>
    %c0_5 = arith.constant 0 : index
    %c0_6 = arith.constant 0 : index
    %6 = vector.load %arg4[%c0_5, %c0_6] : memref<1x16xf32, #tpu.memory_space<vmem>>, vector<1x16xf32>
    %7 = vector.broadcast %6 : vector<1x16xf32> to vector<512x16xf32>
    %8 = arith.addf %5, %7 : vector<512x16xf32>
    %cst_7 = arith.constant 0.000000e+00 : f32
    %9 = vector.broadcast %cst_7 : f32 to vector<512x16xf32>
    %10 = arith.maximumf %8, %9 : vector<512x16xf32>
    %11 = arith.truncf %10 : vector<512x16xf32> to vector<512x16xbf16>
    %c0_8 = arith.constant 0 : index
    %c0_9 = arith.constant 0 : index
    %12 = vector.load %arg5[%c0_8, %c0_9] : memref<512x16xbf16, #tpu.memory_space<vmem>>, vector<512x16xbf16>
    tpu.vector_store %arg5[%c0_8, %c0_9], %11 {strides = array<i32>} : memref<512x16xbf16, #tpu.memory_space<vmem>>, vector<512x16xbf16>,
    return
  }
  func.func @transform_0(%arg0: i32) -> (i32, i32) {
    %c0_i32 = arith.constant 0 : i32
    %c0_i32_0 = arith.constant 0 : i32
    return %arg0, %c0_i32 : i32, i32
  }
  func.func @transform_1(%arg0: i32) -> (i32, i32) {
    %c0_i32 = arith.constant 0 : i32
    %c0_i32_0 = arith.constant 0 : i32
    %c0_i32_1 = arith.constant 0 : i32
    return %c0_i32, %c0_i32_0 : i32, i32
  }
  func.func @transform_2(%arg0: i32) -> (i32, i32) {
    %c0_i32 = arith.constant 0 : i32
    %c0_i32_0 = arith.constant 0 : i32
    %c0_i32_1 = arith.constant 0 : i32
    return %c0_i32, %c0_i32_0 : i32, i32
  }
  func.func @transform_3(%arg0: i32) -> (i32, i32) {
    %c0_i32 = arith.constant 0 : i32
    %c0_i32_0 = arith.constant 0 : i32
    %c0_i32_1 = arith.constant 0 : i32
    return %c0_i32, %c0_i32_0 : i32, i32
  }
  func.func @transform_4(%arg0: i32) -> (i32, i32) {
    %c0_i32 = arith.constant 0 : i32
    %c0_i32_0 = arith.constant 0 : i32
    return %arg0, %c0_i32 : i32, i32
  }
}

module attributes {stable_mosaic.version = 11 : i64} {
  func.func @_maxpool3s2_kernel(%arg0: i32, %arg1: memref<1x18x18x16xbf16, #tpu.memory_space<vmem>>, %arg2: memref<1x8x8x16xbf16, #tpu.memory_space<vmem>>) attributes {dimension_semantics = [#tpu.dimension_semantics<parallel>], iteration_bounds = array<i64: 2>, scalar_prefetch = 0 : i64, scratch_operands = 0 : i64, tpu.core_type = #tpu.core_type<tc>, window_params = [{transform_indices = @transform_0, window_bounds = array<i64: 1, 18, 18, 16>}, {transform_indices = @transform_1, window_bounds = array<i64: 1, 8, 8, 16>}]} {
    %c0 = arith.constant 0 : index
    %c0_0 = arith.constant 0 : index
    %c0_1 = arith.constant 0 : index
    %c0_2 = arith.constant 0 : index
    %0 = vector.load %arg1[%c0, %c0_0, %c0_1, %c0_2] : memref<1x18x18x16xbf16, #tpu.memory_space<vmem>>, vector<1x18x18x16xbf16>
    %1 = vector.shape_cast %0 : vector<1x18x18x16xbf16> to vector<18x18x16xbf16>
    %2 = vector.extract_strided_slice %1 {offsets = [0, 0, 0], sizes = [18, 16, 16], strides = [1, 1, 1]} : vector<18x18x16xbf16> to vector<18x16x16xbf16>
    %3 = vector.shape_cast %2 : vector<18x16x16xbf16> to vector<18x8x2x16xbf16>
    %4 = vector.extract_strided_slice %1 {offsets = [0, 2, 0], sizes = [18, 16, 16], strides = [1, 1, 1]} : vector<18x18x16xbf16> to vector<18x16x16xbf16>
    %5 = vector.shape_cast %4 : vector<18x16x16xbf16> to vector<18x8x2x16xbf16>
    %6 = vector.extract_strided_slice %3 {offsets = [0, 0, 0, 0], sizes = [18, 8, 1, 16], strides = [1, 1, 1, 1]} : vector<18x8x2x16xbf16> to vector<18x8x1x16xbf16>
    %7 = vector.shape_cast %6 : vector<18x8x1x16xbf16> to vector<18x8x16xbf16>
    %8 = vector.extract_strided_slice %3 {offsets = [0, 0, 1, 0], sizes = [18, 8, 1, 16], strides = [1, 1, 1, 1]} : vector<18x8x2x16xbf16> to vector<18x8x1x16xbf16>
    %9 = vector.shape_cast %8 : vector<18x8x1x16xbf16> to vector<18x8x16xbf16>
    %10 = arith.maximumf %7, %9 : vector<18x8x16xbf16>
    %11 = vector.extract_strided_slice %5 {offsets = [0, 0, 0, 0], sizes = [18, 8, 1, 16], strides = [1, 1, 1, 1]} : vector<18x8x2x16xbf16> to vector<18x8x1x16xbf16>
    %12 = vector.shape_cast %11 : vector<18x8x1x16xbf16> to vector<18x8x16xbf16>
    %13 = arith.maximumf %10, %12 : vector<18x8x16xbf16>
    %14 = vector.extract_strided_slice %13 {offsets = [0, 0, 0], sizes = [16, 8, 16], strides = [1, 1, 1]} : vector<18x8x16xbf16> to vector<16x8x16xbf16>
    %15 = vector.shape_cast %14 : vector<16x8x16xbf16> to vector<8x2x8x16xbf16>
    %16 = vector.extract_strided_slice %13 {offsets = [2, 0, 0], sizes = [16, 8, 16], strides = [1, 1, 1]} : vector<18x8x16xbf16> to vector<16x8x16xbf16>
    %17 = vector.shape_cast %16 : vector<16x8x16xbf16> to vector<8x2x8x16xbf16>
    %18 = vector.extract_strided_slice %15 {offsets = [0, 0, 0, 0], sizes = [8, 1, 8, 16], strides = [1, 1, 1, 1]} : vector<8x2x8x16xbf16> to vector<8x1x8x16xbf16>
    %19 = vector.shape_cast %18 : vector<8x1x8x16xbf16> to vector<8x8x16xbf16>
    %20 = vector.extract_strided_slice %15 {offsets = [0, 1, 0, 0], sizes = [8, 1, 8, 16], strides = [1, 1, 1, 1]} : vector<8x2x8x16xbf16> to vector<8x1x8x16xbf16>
    %21 = vector.shape_cast %20 : vector<8x1x8x16xbf16> to vector<8x8x16xbf16>
    %22 = arith.maximumf %19, %21 : vector<8x8x16xbf16>
    %23 = vector.extract_strided_slice %17 {offsets = [0, 0, 0, 0], sizes = [8, 1, 8, 16], strides = [1, 1, 1, 1]} : vector<8x2x8x16xbf16> to vector<8x1x8x16xbf16>
    %24 = vector.shape_cast %23 : vector<8x1x8x16xbf16> to vector<8x8x16xbf16>
    %25 = arith.maximumf %22, %24 : vector<8x8x16xbf16>
    %26 = vector.shape_cast %25 : vector<8x8x16xbf16> to vector<1x8x8x16xbf16>
    %c0_3 = arith.constant 0 : index
    %c0_4 = arith.constant 0 : index
    %c0_5 = arith.constant 0 : index
    %c0_6 = arith.constant 0 : index
    %27 = vector.load %arg2[%c0_3, %c0_4, %c0_5, %c0_6] : memref<1x8x8x16xbf16, #tpu.memory_space<vmem>>, vector<1x8x8x16xbf16>
    tpu.vector_store %arg2[%c0_3, %c0_4, %c0_5, %c0_6], %26 {strides = array<i32>} : memref<1x8x8x16xbf16, #tpu.memory_space<vmem>>, vector<1x8x8x16xbf16>,
    return
  }
  func.func @transform_0(%arg0: i32) -> (i32, i32, i32, i32) {
    %c0_i32 = arith.constant 0 : i32
    %c0_i32_0 = arith.constant 0 : i32
    %c0_i32_1 = arith.constant 0 : i32
    %c0_i32_2 = arith.constant 0 : i32
    return %arg0, %c0_i32, %c0_i32_0, %c0_i32_1 : i32, i32, i32, i32
  }
  func.func @transform_1(%arg0: i32) -> (i32, i32, i32, i32) {
    %c0_i32 = arith.constant 0 : i32
    %c0_i32_0 = arith.constant 0 : i32
    %c0_i32_1 = arith.constant 0 : i32
    %c0_i32_2 = arith.constant 0 : i32
    return %arg0, %c0_i32, %c0_i32_0, %c0_i32_1 : i32, i32, i32, i32
  }
}

module attributes {stable_mosaic.version = 11 : i64} {
  func.func @_mm_kernel(%arg0: i32, %arg1: memref<128x32xbf16, #tpu.memory_space<vmem>>, %arg2: memref<32x10xbf16, #tpu.memory_space<vmem>>, %arg3: memref<1x10xf32, #tpu.memory_space<vmem>>, %arg4: memref<1x10xf32, #tpu.memory_space<vmem>>, %arg5: memref<128x10xbf16, #tpu.memory_space<vmem>>) attributes {dimension_semantics = [#tpu.dimension_semantics<parallel>], iteration_bounds = array<i64: 1>, scalar_prefetch = 0 : i64, scratch_operands = 0 : i64, tpu.core_type = #tpu.core_type<tc>, window_params = [{transform_indices = @transform_0, window_bounds = array<i64: 128, 32>}, {pipeline_mode = #tpu.pipeline_mode<synchronous>, transform_indices = @transform_1, window_bounds = array<i64: 32, 10>}, {pipeline_mode = #tpu.pipeline_mode<synchronous>, transform_indices = @transform_2, window_bounds = array<i64: 1, 10>}, {pipeline_mode = #tpu.pipeline_mode<synchronous>, transform_indices = @transform_3, window_bounds = array<i64: 1, 10>}, {transform_indices = @transform_4, window_bounds = array<i64: 128, 10>}]} {
    %c0 = arith.constant 0 : index
    %c0_0 = arith.constant 0 : index
    %0 = vector.load %arg1[%c0, %c0_0] : memref<128x32xbf16, #tpu.memory_space<vmem>>, vector<128x32xbf16>
    %c0_1 = arith.constant 0 : index
    %c0_2 = arith.constant 0 : index
    %1 = vector.load %arg2[%c0_1, %c0_2] : memref<32x10xbf16, #tpu.memory_space<vmem>>, vector<32x10xbf16>
    %cst = arith.constant dense<0.000000e+00> : vector<128x10xf32>
    %2 = tpu.matmul %0, %1, %cst {dimension_numbers = #tpu.dot_dimension_numbers<[1], [0], [0], [1], [0, 0, 1, 1], [], []>} : vector<128x32xbf16>, vector<32x10xbf16>, vector<128x10xf32> -> vector<128x10xf32>
    %c0_3 = arith.constant 0 : index
    %c0_4 = arith.constant 0 : index
    %3 = vector.load %arg3[%c0_3, %c0_4] : memref<1x10xf32, #tpu.memory_space<vmem>>, vector<1x10xf32>
    %4 = vector.broadcast %3 : vector<1x10xf32> to vector<128x10xf32>
    %5 = arith.mulf %2, %4 : vector<128x10xf32>
    %c0_5 = arith.constant 0 : index
    %c0_6 = arith.constant 0 : index
    %6 = vector.load %arg4[%c0_5, %c0_6] : memref<1x10xf32, #tpu.memory_space<vmem>>, vector<1x10xf32>
    %7 = vector.broadcast %6 : vector<1x10xf32> to vector<128x10xf32>
    %8 = arith.addf %5, %7 : vector<128x10xf32>
    %cst_7 = arith.constant 0.000000e+00 : f32
    %9 = vector.broadcast %cst_7 : f32 to vector<128x10xf32>
    %10 = arith.maximumf %8, %9 : vector<128x10xf32>
    %11 = arith.truncf %10 : vector<128x10xf32> to vector<128x10xbf16>
    %c0_8 = arith.constant 0 : index
    %c0_9 = arith.constant 0 : index
    %12 = vector.load %arg5[%c0_8, %c0_9] : memref<128x10xbf16, #tpu.memory_space<vmem>>, vector<128x10xbf16>
    tpu.vector_store %arg5[%c0_8, %c0_9], %11 {strides = array<i32>} : memref<128x10xbf16, #tpu.memory_space<vmem>>, vector<128x10xbf16>,
    return
  }
  func.func @transform_0(%arg0: i32) -> (i32, i32) {
    %c0_i32 = arith.constant 0 : i32
    %c0_i32_0 = arith.constant 0 : i32
    return %arg0, %c0_i32 : i32, i32
  }
  func.func @transform_1(%arg0: i32) -> (i32, i32) {
    %c0_i32 = arith.constant 0 : i32
    %c0_i32_0 = arith.constant 0 : i32
    %c0_i32_1 = arith.constant 0 : i32
    return %c0_i32, %c0_i32_0 : i32, i32
  }
  func.func @transform_2(%arg0: i32) -> (i32, i32) {
    %c0_i32 = arith.constant 0 : i32
    %c0_i32_0 = arith.constant 0 : i32
    %c0_i32_1 = arith.constant 0 : i32
    return %c0_i32, %c0_i32_0 : i32, i32
  }
  func.func @transform_3(%arg0: i32) -> (i32, i32) {
    %c0_i32 = arith.constant 0 : i32
    %c0_i32_0 = arith.constant 0 : i32
    %c0_i32_1 = arith.constant 0 : i32
    return %c0_i32, %c0_i32_0 : i32, i32
  }
  func.func @transform_4(%arg0: i32) -> (i32, i32) {
    %c0_i32 = arith.constant 0 : i32
    %c0_i32_0 = arith.constant 0 : i32
    return %arg0, %c0_i32 : i32, i32
  }
}

module attributes {stable_mosaic.version = 11 : i64} {
  func.func @_conv3x3_kernel(%arg0: i32, %arg1: memref<1x10x10x8xbf16, #tpu.memory_space<vmem>>, %arg2: memref<9x8x4xbf16, #tpu.memory_space<vmem>>, %arg3: memref<1x4xf32, #tpu.memory_space<vmem>>, %arg4: memref<1x4xf32, #tpu.memory_space<vmem>>, %arg5: memref<1x8x8x4xbf16, #tpu.memory_space<vmem>>) attributes {dimension_semantics = [#tpu.dimension_semantics<parallel>], iteration_bounds = array<i64: 2>, scalar_prefetch = 0 : i64, scratch_operands = 0 : i64, tpu.core_type = #tpu.core_type<tc>, window_params = [{transform_indices = @transform_0, window_bounds = array<i64: 1, 10, 10, 8>}, {pipeline_mode = #tpu.pipeline_mode<synchronous>, transform_indices = @transform_1, window_bounds = array<i64: 9, 8, 4>}, {pipeline_mode = #tpu.pipeline_mode<synchronous>, transform_indices = @transform_2, window_bounds = array<i64: 1, 4>}, {pipeline_mode = #tpu.pipeline_mode<synchronous>, transform_indices = @transform_3, window_bounds = array<i64: 1, 4>}, {transform_indices = @transform_4, window_bounds = array<i64: 1, 8, 8, 4>}]} {
    %c0 = arith.constant 0 : index
    %c0_0 = arith.constant 0 : index
    %c0_1 = arith.constant 0 : index
    %c0_2 = arith.constant 0 : index
    %0 = vector.load %arg1[%c0, %c0_0, %c0_1, %c0_2] : memref<1x10x10x8xbf16, #tpu.memory_space<vmem>>, vector<1x10x10x8xbf16>
    %1 = vector.shape_cast %0 : vector<1x10x10x8xbf16> to vector<10x10x8xbf16>
    %c0_3 = arith.constant 0 : index
    %c0_4 = arith.constant 0 : index
    %c0_5 = arith.constant 0 : index
    %2 = vector.load %arg2[%c0_3, %c0_4, %c0_5] : memref<9x8x4xbf16, #tpu.memory_space<vmem>>, vector<9x8x4xbf16>
    %cst = arith.constant 0.000000e+00 : f32
    %3 = vector.broadcast %cst : f32 to vector<64x4xf32>
    %4 = vector.extract_strided_slice %1 {offsets = [0, 0, 0], sizes = [8, 8, 8], strides = [1, 1, 1]} : vector<10x10x8xbf16> to vector<8x8x8xbf16>
    %5 = vector.shape_cast %4 : vector<8x8x8xbf16> to vector<64x8xbf16>
    %6 = vector.extract_strided_slice %2 {offsets = [0, 0, 0], sizes = [1, 8, 4], strides = [1, 1, 1]} : vector<9x8x4xbf16> to vector<1x8x4xbf16>
    %7 = vector.shape_cast %6 : vector<1x8x4xbf16> to vector<8x4xbf16>
    %cst_6 = arith.constant dense<0.000000e+00> : vector<64x4xf32>
    %8 = tpu.matmul %5, %7, %cst_6 {dimension_numbers = #tpu.dot_dimension_numbers<[1], [0], [0], [1], [0, 0, 1, 1], [], []>} : vector<64x8xbf16>, vector<8x4xbf16>, vector<64x4xf32> -> vector<64x4xf32>
    %9 = arith.addf %3, %8 : vector<64x4xf32>
    %10 = vector.extract_strided_slice %1 {offsets = [0, 1, 0], sizes = [8, 8, 8], strides = [1, 1, 1]} : vector<10x10x8xbf16> to vector<8x8x8xbf16>
    %11 = vector.shape_cast %10 : vector<8x8x8xbf16> to vector<64x8xbf16>
    %12 = vector.extract_strided_slice %2 {offsets = [1, 0, 0], sizes = [1, 8, 4], strides = [1, 1, 1]} : vector<9x8x4xbf16> to vector<1x8x4xbf16>
    %13 = vector.shape_cast %12 : vector<1x8x4xbf16> to vector<8x4xbf16>
    %cst_7 = arith.constant dense<0.000000e+00> : vector<64x4xf32>
    %14 = tpu.matmul %11, %13, %cst_7 {dimension_numbers = #tpu.dot_dimension_numbers<[1], [0], [0], [1], [0, 0, 1, 1], [], []>} : vector<64x8xbf16>, vector<8x4xbf16>, vector<64x4xf32> -> vector<64x4xf32>
    %15 = arith.addf %9, %14 : vector<64x4xf32>
    %16 = vector.extract_strided_slice %1 {offsets = [0, 2, 0], sizes = [8, 8, 8], strides = [1, 1, 1]} : vector<10x10x8xbf16> to vector<8x8x8xbf16>
    %17 = vector.shape_cast %16 : vector<8x8x8xbf16> to vector<64x8xbf16>
    %18 = vector.extract_strided_slice %2 {offsets = [2, 0, 0], sizes = [1, 8, 4], strides = [1, 1, 1]} : vector<9x8x4xbf16> to vector<1x8x4xbf16>
    %19 = vector.shape_cast %18 : vector<1x8x4xbf16> to vector<8x4xbf16>
    %cst_8 = arith.constant dense<0.000000e+00> : vector<64x4xf32>
    %20 = tpu.matmul %17, %19, %cst_8 {dimension_numbers = #tpu.dot_dimension_numbers<[1], [0], [0], [1], [0, 0, 1, 1], [], []>} : vector<64x8xbf16>, vector<8x4xbf16>, vector<64x4xf32> -> vector<64x4xf32>
    %21 = arith.addf %15, %20 : vector<64x4xf32>
    %22 = vector.extract_strided_slice %1 {offsets = [1, 0, 0], sizes = [8, 8, 8], strides = [1, 1, 1]} : vector<10x10x8xbf16> to vector<8x8x8xbf16>
    %23 = vector.shape_cast %22 : vector<8x8x8xbf16> to vector<64x8xbf16>
    %24 = vector.extract_strided_slice %2 {offsets = [3, 0, 0], sizes = [1, 8, 4], strides = [1, 1, 1]} : vector<9x8x4xbf16> to vector<1x8x4xbf16>
    %25 = vector.shape_cast %24 : vector<1x8x4xbf16> to vector<8x4xbf16>
    %cst_9 = arith.constant dense<0.000000e+00> : vector<64x4xf32>
    %26 = tpu.matmul %23, %25, %cst_9 {dimension_numbers = #tpu.dot_dimension_numbers<[1], [0], [0], [1], [0, 0, 1, 1], [], []>} : vector<64x8xbf16>, vector<8x4xbf16>, vector<64x4xf32> -> vector<64x4xf32>
    %27 = arith.addf %21, %26 : vector<64x4xf32>
    %28 = vector.extract_strided_slice %1 {offsets = [1, 1, 0], sizes = [8, 8, 8], strides = [1, 1, 1]} : vector<10x10x8xbf16> to vector<8x8x8xbf16>
    %29 = vector.shape_cast %28 : vector<8x8x8xbf16> to vector<64x8xbf16>
    %30 = vector.extract_strided_slice %2 {offsets = [4, 0, 0], sizes = [1, 8, 4], strides = [1, 1, 1]} : vector<9x8x4xbf16> to vector<1x8x4xbf16>
    %31 = vector.shape_cast %30 : vector<1x8x4xbf16> to vector<8x4xbf16>
    %cst_10 = arith.constant dense<0.000000e+00> : vector<64x4xf32>
    %32 = tpu.matmul %29, %31, %cst_10 {dimension_numbers = #tpu.dot_dimension_numbers<[1], [0], [0], [1], [0, 0, 1, 1], [], []>} : vector<64x8xbf16>, vector<8x4xbf16>, vector<64x4xf32> -> vector<64x4xf32>
    %33 = arith.addf %27, %32 : vector<64x4xf32>
    %34 = vector.extract_strided_slice %1 {offsets = [1, 2, 0], sizes = [8, 8, 8], strides = [1, 1, 1]} : vector<10x10x8xbf16> to vector<8x8x8xbf16>
    %35 = vector.shape_cast %34 : vector<8x8x8xbf16> to vector<64x8xbf16>
    %36 = vector.extract_strided_slice %2 {offsets = [5, 0, 0], sizes = [1, 8, 4], strides = [1, 1, 1]} : vector<9x8x4xbf16> to vector<1x8x4xbf16>
    %37 = vector.shape_cast %36 : vector<1x8x4xbf16> to vector<8x4xbf16>
    %cst_11 = arith.constant dense<0.000000e+00> : vector<64x4xf32>
    %38 = tpu.matmul %35, %37, %cst_11 {dimension_numbers = #tpu.dot_dimension_numbers<[1], [0], [0], [1], [0, 0, 1, 1], [], []>} : vector<64x8xbf16>, vector<8x4xbf16>, vector<64x4xf32> -> vector<64x4xf32>
    %39 = arith.addf %33, %38 : vector<64x4xf32>
    %40 = vector.extract_strided_slice %1 {offsets = [2, 0, 0], sizes = [8, 8, 8], strides = [1, 1, 1]} : vector<10x10x8xbf16> to vector<8x8x8xbf16>
    %41 = vector.shape_cast %40 : vector<8x8x8xbf16> to vector<64x8xbf16>
    %42 = vector.extract_strided_slice %2 {offsets = [6, 0, 0], sizes = [1, 8, 4], strides = [1, 1, 1]} : vector<9x8x4xbf16> to vector<1x8x4xbf16>
    %43 = vector.shape_cast %42 : vector<1x8x4xbf16> to vector<8x4xbf16>
    %cst_12 = arith.constant dense<0.000000e+00> : vector<64x4xf32>
    %44 = tpu.matmul %41, %43, %cst_12 {dimension_numbers = #tpu.dot_dimension_numbers<[1], [0], [0], [1], [0, 0, 1, 1], [], []>} : vector<64x8xbf16>, vector<8x4xbf16>, vector<64x4xf32> -> vector<64x4xf32>
    %45 = arith.addf %39, %44 : vector<64x4xf32>
    %46 = vector.extract_strided_slice %1 {offsets = [2, 1, 0], sizes = [8, 8, 8], strides = [1, 1, 1]} : vector<10x10x8xbf16> to vector<8x8x8xbf16>
    %47 = vector.shape_cast %46 : vector<8x8x8xbf16> to vector<64x8xbf16>
    %48 = vector.extract_strided_slice %2 {offsets = [7, 0, 0], sizes = [1, 8, 4], strides = [1, 1, 1]} : vector<9x8x4xbf16> to vector<1x8x4xbf16>
    %49 = vector.shape_cast %48 : vector<1x8x4xbf16> to vector<8x4xbf16>
    %cst_13 = arith.constant dense<0.000000e+00> : vector<64x4xf32>
    %50 = tpu.matmul %47, %49, %cst_13 {dimension_numbers = #tpu.dot_dimension_numbers<[1], [0], [0], [1], [0, 0, 1, 1], [], []>} : vector<64x8xbf16>, vector<8x4xbf16>, vector<64x4xf32> -> vector<64x4xf32>
    %51 = arith.addf %45, %50 : vector<64x4xf32>
    %52 = vector.extract_strided_slice %1 {offsets = [2, 2, 0], sizes = [8, 8, 8], strides = [1, 1, 1]} : vector<10x10x8xbf16> to vector<8x8x8xbf16>
    %53 = vector.shape_cast %52 : vector<8x8x8xbf16> to vector<64x8xbf16>
    %54 = vector.extract_strided_slice %2 {offsets = [8, 0, 0], sizes = [1, 8, 4], strides = [1, 1, 1]} : vector<9x8x4xbf16> to vector<1x8x4xbf16>
    %55 = vector.shape_cast %54 : vector<1x8x4xbf16> to vector<8x4xbf16>
    %cst_14 = arith.constant dense<0.000000e+00> : vector<64x4xf32>
    %56 = tpu.matmul %53, %55, %cst_14 {dimension_numbers = #tpu.dot_dimension_numbers<[1], [0], [0], [1], [0, 0, 1, 1], [], []>} : vector<64x8xbf16>, vector<8x4xbf16>, vector<64x4xf32> -> vector<64x4xf32>
    %57 = arith.addf %51, %56 : vector<64x4xf32>
    %c0_15 = arith.constant 0 : index
    %c0_16 = arith.constant 0 : index
    %58 = vector.load %arg3[%c0_15, %c0_16] : memref<1x4xf32, #tpu.memory_space<vmem>>, vector<1x4xf32>
    %59 = vector.broadcast %58 : vector<1x4xf32> to vector<64x4xf32>
    %60 = arith.mulf %57, %59 : vector<64x4xf32>
    %c0_17 = arith.constant 0 : index
    %c0_18 = arith.constant 0 : index
    %61 = vector.load %arg4[%c0_17, %c0_18] : memref<1x4xf32, #tpu.memory_space<vmem>>, vector<1x4xf32>
    %62 = vector.broadcast %61 : vector<1x4xf32> to vector<64x4xf32>
    %63 = arith.addf %60, %62 : vector<64x4xf32>
    %cst_19 = arith.constant 0.000000e+00 : f32
    %64 = vector.broadcast %cst_19 : f32 to vector<64x4xf32>
    %65 = arith.maximumf %63, %64 : vector<64x4xf32>
    %66 = vector.shape_cast %65 : vector<64x4xf32> to vector<1x8x8x4xf32>
    %67 = arith.truncf %66 : vector<1x8x8x4xf32> to vector<1x8x8x4xbf16>
    %c0_20 = arith.constant 0 : index
    %c0_21 = arith.constant 0 : index
    %c0_22 = arith.constant 0 : index
    %c0_23 = arith.constant 0 : index
    %68 = vector.load %arg5[%c0_20, %c0_21, %c0_22, %c0_23] : memref<1x8x8x4xbf16, #tpu.memory_space<vmem>>, vector<1x8x8x4xbf16>
    tpu.vector_store %arg5[%c0_20, %c0_21, %c0_22, %c0_23], %67 {strides = array<i32>} : memref<1x8x8x4xbf16, #tpu.memory_space<vmem>>, vector<1x8x8x4xbf16>,
    return
  }
  func.func @transform_0(%arg0: i32) -> (i32, i32, i32, i32) {
    %c0_i32 = arith.constant 0 : i32
    %c0_i32_0 = arith.constant 0 : i32
    %c0_i32_1 = arith.constant 0 : i32
    %c0_i32_2 = arith.constant 0 : i32
    return %arg0, %c0_i32, %c0_i32_0, %c0_i32_1 : i32, i32, i32, i32
  }
  func.func @transform_1(%arg0: i32) -> (i32, i32, i32) {
    %c0_i32 = arith.constant 0 : i32
    %c0_i32_0 = arith.constant 0 : i32
    %c0_i32_1 = arith.constant 0 : i32
    %c0_i32_2 = arith.constant 0 : i32
    return %c0_i32, %c0_i32_0, %c0_i32_1 : i32, i32, i32
  }
  func.func @transform_2(%arg0: i32) -> (i32, i32) {
    %c0_i32 = arith.constant 0 : i32
    %c0_i32_0 = arith.constant 0 : i32
    %c0_i32_1 = arith.constant 0 : i32
    return %c0_i32, %c0_i32_0 : i32, i32
  }
  func.func @transform_3(%arg0: i32) -> (i32, i32) {
    %c0_i32 = arith.constant 0 : i32
    %c0_i32_0 = arith.constant 0 : i32
    %c0_i32_1 = arith.constant 0 : i32
    return %c0_i32, %c0_i32_0 : i32, i32
  }
  func.func @transform_4(%arg0: i32) -> (i32, i32, i32, i32) {
    %c0_i32 = arith.constant 0 : i32
    %c0_i32_0 = arith.constant 0 : i32
    %c0_i32_1 = arith.constant 0 : i32
    %c0_i32_2 = arith.constant 0 : i32
    return %arg0, %c0_i32, %c0_i32_0, %c0_i32_1 : i32, i32, i32, i32
  }
}

module attributes {stable_mosaic.version = 11 : i64} {
  func.func @_pool_mm_kernel(%arg0: i32, %arg1: memref<1x10x10x32xbf16, #tpu.memory_space<vmem>>, %arg2: memref<32x2xbf16, #tpu.memory_space<vmem>>, %arg3: memref<1x2xf32, #tpu.memory_space<vmem>>, %arg4: memref<1x2xf32, #tpu.memory_space<vmem>>, %arg5: memref<1x8x8x2xbf16, #tpu.memory_space<vmem>>) attributes {dimension_semantics = [#tpu.dimension_semantics<parallel>], iteration_bounds = array<i64: 2>, scalar_prefetch = 0 : i64, scratch_operands = 0 : i64, tpu.core_type = #tpu.core_type<tc>, window_params = [{transform_indices = @transform_0, window_bounds = array<i64: 1, 10, 10, 32>}, {pipeline_mode = #tpu.pipeline_mode<synchronous>, transform_indices = @transform_1, window_bounds = array<i64: 32, 2>}, {pipeline_mode = #tpu.pipeline_mode<synchronous>, transform_indices = @transform_2, window_bounds = array<i64: 1, 2>}, {pipeline_mode = #tpu.pipeline_mode<synchronous>, transform_indices = @transform_3, window_bounds = array<i64: 1, 2>}, {transform_indices = @transform_4, window_bounds = array<i64: 1, 8, 8, 2>}]} {
    %c0 = arith.constant 0 : index
    %c0_0 = arith.constant 0 : index
    %c0_1 = arith.constant 0 : index
    %c0_2 = arith.constant 0 : index
    %0 = vector.load %arg1[%c0, %c0_0, %c0_1, %c0_2] : memref<1x10x10x32xbf16, #tpu.memory_space<vmem>>, vector<1x10x10x32xbf16>
    %1 = vector.shape_cast %0 : vector<1x10x10x32xbf16> to vector<10x10x32xbf16>
    %2 = vector.extract_strided_slice %1 {offsets = [0, 0, 0], sizes = [8, 8, 32], strides = [1, 1, 1]} : vector<10x10x32xbf16> to vector<8x8x32xbf16>
    %3 = vector.extract_strided_slice %1 {offsets = [0, 1, 0], sizes = [8, 8, 32], strides = [1, 1, 1]} : vector<10x10x32xbf16> to vector<8x8x32xbf16>
    %4 = arith.maximumf %2, %3 : vector<8x8x32xbf16>
    %5 = vector.extract_strided_slice %1 {offsets = [0, 2, 0], sizes = [8, 8, 32], strides = [1, 1, 1]} : vector<10x10x32xbf16> to vector<8x8x32xbf16>
    %6 = arith.maximumf %4, %5 : vector<8x8x32xbf16>
    %7 = vector.extract_strided_slice %1 {offsets = [1, 0, 0], sizes = [8, 8, 32], strides = [1, 1, 1]} : vector<10x10x32xbf16> to vector<8x8x32xbf16>
    %8 = arith.maximumf %6, %7 : vector<8x8x32xbf16>
    %9 = vector.extract_strided_slice %1 {offsets = [1, 1, 0], sizes = [8, 8, 32], strides = [1, 1, 1]} : vector<10x10x32xbf16> to vector<8x8x32xbf16>
    %10 = arith.maximumf %8, %9 : vector<8x8x32xbf16>
    %11 = vector.extract_strided_slice %1 {offsets = [1, 2, 0], sizes = [8, 8, 32], strides = [1, 1, 1]} : vector<10x10x32xbf16> to vector<8x8x32xbf16>
    %12 = arith.maximumf %10, %11 : vector<8x8x32xbf16>
    %13 = vector.extract_strided_slice %1 {offsets = [2, 0, 0], sizes = [8, 8, 32], strides = [1, 1, 1]} : vector<10x10x32xbf16> to vector<8x8x32xbf16>
    %14 = arith.maximumf %12, %13 : vector<8x8x32xbf16>
    %15 = vector.extract_strided_slice %1 {offsets = [2, 1, 0], sizes = [8, 8, 32], strides = [1, 1, 1]} : vector<10x10x32xbf16> to vector<8x8x32xbf16>
    %16 = arith.maximumf %14, %15 : vector<8x8x32xbf16>
    %17 = vector.extract_strided_slice %1 {offsets = [2, 2, 0], sizes = [8, 8, 32], strides = [1, 1, 1]} : vector<10x10x32xbf16> to vector<8x8x32xbf16>
    %18 = arith.maximumf %16, %17 : vector<8x8x32xbf16>
    %19 = vector.shape_cast %18 : vector<8x8x32xbf16> to vector<64x32xbf16>
    %c0_3 = arith.constant 0 : index
    %c0_4 = arith.constant 0 : index
    %20 = vector.load %arg2[%c0_3, %c0_4] : memref<32x2xbf16, #tpu.memory_space<vmem>>, vector<32x2xbf16>
    %cst = arith.constant dense<0.000000e+00> : vector<64x2xf32>
    %21 = tpu.matmul %19, %20, %cst {dimension_numbers = #tpu.dot_dimension_numbers<[1], [0], [0], [1], [0, 0, 1, 1], [], []>} : vector<64x32xbf16>, vector<32x2xbf16>, vector<64x2xf32> -> vector<64x2xf32>
    %c0_5 = arith.constant 0 : index
    %c0_6 = arith.constant 0 : index
    %22 = vector.load %arg3[%c0_5, %c0_6] : memref<1x2xf32, #tpu.memory_space<vmem>>, vector<1x2xf32>
    %23 = vector.broadcast %22 : vector<1x2xf32> to vector<64x2xf32>
    %24 = arith.mulf %21, %23 : vector<64x2xf32>
    %c0_7 = arith.constant 0 : index
    %c0_8 = arith.constant 0 : index
    %25 = vector.load %arg4[%c0_7, %c0_8] : memref<1x2xf32, #tpu.memory_space<vmem>>, vector<1x2xf32>
    %26 = vector.broadcast %25 : vector<1x2xf32> to vector<64x2xf32>
    %27 = arith.addf %24, %26 : vector<64x2xf32>
    %cst_9 = arith.constant 0.000000e+00 : f32
    %28 = vector.broadcast %cst_9 : f32 to vector<64x2xf32>
    %29 = arith.maximumf %27, %28 : vector<64x2xf32>
    %30 = vector.shape_cast %29 : vector<64x2xf32> to vector<1x8x8x2xf32>
    %31 = arith.truncf %30 : vector<1x8x8x2xf32> to vector<1x8x8x2xbf16>
    %c0_10 = arith.constant 0 : index
    %c0_11 = arith.constant 0 : index
    %c0_12 = arith.constant 0 : index
    %c0_13 = arith.constant 0 : index
    %32 = vector.load %arg5[%c0_10, %c0_11, %c0_12, %c0_13] : memref<1x8x8x2xbf16, #tpu.memory_space<vmem>>, vector<1x8x8x2xbf16>
    tpu.vector_store %arg5[%c0_10, %c0_11, %c0_12, %c0_13], %31 {strides = array<i32>} : memref<1x8x8x2xbf16, #tpu.memory_space<vmem>>, vector<1x8x8x2xbf16>,
    return
  }
  func.func @transform_0(%arg0: i32) -> (i32, i32, i32, i32) {
    %c0_i32 = arith.constant 0 : i32
    %c0_i32_0 = arith.constant 0 : i32
    %c0_i32_1 = arith.constant 0 : i32
    %c0_i32_2 = arith.constant 0 : i32
    return %arg0, %c0_i32, %c0_i32_0, %c0_i32_1 : i32, i32, i32, i32
  }
  func.func @transform_1(%arg0: i32) -> (i32, i32) {
    %c0_i32 = arith.constant 0 : i32
    %c0_i32_0 = arith.constant 0 : i32
    %c0_i32_1 = arith.constant 0 : i32
    return %c0_i32, %c0_i32_0 : i32, i32
  }
  func.func @transform_2(%arg0: i32) -> (i32, i32) {
    %c0_i32 = arith.constant 0 : i32
    %c0_i32_0 = arith.constant 0 : i32
    %c0_i32_1 = arith.constant 0 : i32
    return %c0_i32, %c0_i32_0 : i32, i32
  }
  func.func @transform_3(%arg0: i32) -> (i32, i32) {
    %c0_i32 = arith.constant 0 : i32
    %c0_i32_0 = arith.constant 0 : i32
    %c0_i32_1 = arith.constant 0 : i32
    return %c0_i32, %c0_i32_0 : i32, i32
  }
  func.func @transform_4(%arg0: i32) -> (i32, i32, i32, i32) {
    %c0_i32 = arith.constant 0 : i32
    %c0_i32_0 = arith.constant 0 : i32
    %c0_i32_1 = arith.constant 0 : i32
    %c0_i32_2 = arith.constant 0 : i32
    return %arg0, %c0_i32, %c0_i32_0, %c0_i32_1 : i32, i32, i32, i32
  }
}

module attributes {stable_mosaic.version = 11 : i64} {
  func.func @_mm_kernel(%arg0: i32, %arg1: memref<128x32xbf16, #tpu.memory_space<vmem>>, %arg2: memref<32x16xbf16, #tpu.memory_space<vmem>>, %arg3: memref<1x16xf32, #tpu.memory_space<vmem>>, %arg4: memref<1x16xf32, #tpu.memory_space<vmem>>, %arg5: memref<128x16xbf16, #tpu.memory_space<vmem>>, %arg6: memref<128x16xbf16, #tpu.memory_space<vmem>>) attributes {dimension_semantics = [#tpu.dimension_semantics<parallel>], iteration_bounds = array<i64: 1>, scalar_prefetch = 0 : i64, scratch_operands = 0 : i64, tpu.core_type = #tpu.core_type<tc>, window_params = [{transform_indices = @transform_0, window_bounds = array<i64: 128, 32>}, {pipeline_mode = #tpu.pipeline_mode<synchronous>, transform_indices = @transform_1, window_bounds = array<i64: 32, 16>}, {pipeline_mode = #tpu.pipeline_mode<synchronous>, transform_indices = @transform_2, window_bounds = array<i64: 1, 16>}, {pipeline_mode = #tpu.pipeline_mode<synchronous>, transform_indices = @transform_3, window_bounds = array<i64: 1, 16>}, {transform_indices = @transform_4, window_bounds = array<i64: 128, 16>}, {transform_indices = @transform_5, window_bounds = array<i64: 128, 16>}]} {
    %c0 = arith.constant 0 : index
    %c0_0 = arith.constant 0 : index
    %0 = vector.load %arg1[%c0, %c0_0] : memref<128x32xbf16, #tpu.memory_space<vmem>>, vector<128x32xbf16>
    %c0_1 = arith.constant 0 : index
    %c0_2 = arith.constant 0 : index
    %1 = vector.load %arg2[%c0_1, %c0_2] : memref<32x16xbf16, #tpu.memory_space<vmem>>, vector<32x16xbf16>
    %cst = arith.constant dense<0.000000e+00> : vector<128x16xf32>
    %2 = tpu.matmul %0, %1, %cst {dimension_numbers = #tpu.dot_dimension_numbers<[1], [0], [0], [1], [0, 0, 1, 1], [], []>} : vector<128x32xbf16>, vector<32x16xbf16>, vector<128x16xf32> -> vector<128x16xf32>
    %c0_3 = arith.constant 0 : index
    %c0_4 = arith.constant 0 : index
    %3 = vector.load %arg3[%c0_3, %c0_4] : memref<1x16xf32, #tpu.memory_space<vmem>>, vector<1x16xf32>
    %4 = vector.broadcast %3 : vector<1x16xf32> to vector<128x16xf32>
    %5 = arith.mulf %2, %4 : vector<128x16xf32>
    %c0_5 = arith.constant 0 : index
    %c0_6 = arith.constant 0 : index
    %6 = vector.load %arg4[%c0_5, %c0_6] : memref<1x16xf32, #tpu.memory_space<vmem>>, vector<1x16xf32>
    %7 = vector.broadcast %6 : vector<1x16xf32> to vector<128x16xf32>
    %8 = arith.addf %5, %7 : vector<128x16xf32>
    %c0_7 = arith.constant 0 : index
    %c0_8 = arith.constant 0 : index
    %9 = vector.load %arg5[%c0_7, %c0_8] : memref<128x16xbf16, #tpu.memory_space<vmem>>, vector<128x16xbf16>
    %10 = arith.extf %9 : vector<128x16xbf16> to vector<128x16xf32>
    %11 = arith.addf %8, %10 : vector<128x16xf32>
    %12 = arith.truncf %11 : vector<128x16xf32> to vector<128x16xbf16>
    %c0_9 = arith.constant 0 : index
    %c0_10 = arith.constant 0 : index
    %13 = vector.load %arg6[%c0_9, %c0_10] : memref<128x16xbf16, #tpu.memory_space<vmem>>, vector<128x16xbf16>
    tpu.vector_store %arg6[%c0_9, %c0_10], %12 {strides = array<i32>} : memref<128x16xbf16, #tpu.memory_space<vmem>>, vector<128x16xbf16>,
    return
  }
  func.func @transform_0(%arg0: i32) -> (i32, i32) {
    %c0_i32 = arith.constant 0 : i32
    %c0_i32_0 = arith.constant 0 : i32
    return %arg0, %c0_i32 : i32, i32
  }
  func.func @transform_1(%arg0: i32) -> (i32, i32) {
    %c0_i32 = arith.constant 0 : i32
    %c0_i32_0 = arith.constant 0 : i32
    %c0_i32_1 = arith.constant 0 : i32
    return %c0_i32, %c0_i32_0 : i32, i32
  }
  func.func @transform_2(%arg0: i32) -> (i32, i32) {
    %c0_i32 = arith.constant 0 : i32
    %c0_i32_0 = arith.constant 0 : i32
    %c0_i32_1 = arith.constant 0 : i32
    return %c0_i32, %c0_i32_0 : i32, i32
  }
  func.func @transform_3(%arg0: i32) -> (i32, i32) {
    %c0_i32 = arith.constant 0 : i32
    %c0_i32_0 = arith.constant 0 : i32
    %c0_i32_1 = arith.constant 0 : i32
    return %c0_i32, %c0_i32_0 : i32, i32
  }
  func.func @transform_4(%arg0: i32) -> (i32, i32) {
    %c0_i32 = arith.constant 0 : i32
    %c0_i32_0 = arith.constant 0 : i32
    return %arg0, %c0_i32 : i32, i32
  }
  func.func @transform_5(%arg0: i32) -> (i32, i32) {
    %c0_i32 = arith.constant 0 : i32
    %c0_i32_0 = arith.constant 0 : i32
    return %arg0, %c0_i32 : i32, i32
  }
}

module attributes {stable_mosaic.version = 11 : i64} {
  func.func @_mm_kernel(%arg0: i32, %arg1: memref<128x16xbf16, #tpu.memory_space<vmem>>, %arg2: memref<1x16xf32, #tpu.memory_space<vmem>>, %arg3: memref<1x16xf32, #tpu.memory_space<vmem>>, %arg4: memref<16x8xbf16, #tpu.memory_space<vmem>>, %arg5: memref<1x8xf32, #tpu.memory_space<vmem>>, %arg6: memref<1x8xf32, #tpu.memory_space<vmem>>, %arg7: memref<128x8xbf16, #tpu.memory_space<vmem>>) attributes {dimension_semantics = [#tpu.dimension_semantics<parallel>], iteration_bounds = array<i64: 1>, scalar_prefetch = 0 : i64, scratch_operands = 0 : i64, tpu.core_type = #tpu.core_type<tc>, window_params = [{transform_indices = @transform_0, window_bounds = array<i64: 128, 16>}, {pipeline_mode = #tpu.pipeline_mode<synchronous>, transform_indices = @transform_1, window_bounds = array<i64: 1, 16>}, {pipeline_mode = #tpu.pipeline_mode<synchronous>, transform_indices = @transform_2, window_bounds = array<i64: 1, 16>}, {pipeline_mode = #tpu.pipeline_mode<synchronous>, transform_indices = @transform_3, window_bounds = array<i64: 16, 8>}, {pipeline_mode = #tpu.pipeline_mode<synchronous>, transform_indices = @transform_4, window_bounds = array<i64: 1, 8>}, {pipeline_mode = #tpu.pipeline_mode<synchronous>, transform_indices = @transform_5, window_bounds = array<i64: 1, 8>}, {transform_indices = @transform_6, window_bounds = array<i64: 128, 8>}]} {
    %c0 = arith.constant 0 : index
    %c0_0 = arith.constant 0 : index
    %0 = vector.load %arg1[%c0, %c0_0] : memref<128x16xbf16, #tpu.memory_space<vmem>>, vector<128x16xbf16>
    %1 = arith.extf %0 : vector<128x16xbf16> to vector<128x16xf32>
    %c0_1 = arith.constant 0 : index
    %c0_2 = arith.constant 0 : index
    %2 = vector.load %arg2[%c0_1, %c0_2] : memref<1x16xf32, #tpu.memory_space<vmem>>, vector<1x16xf32>
    %3 = vector.broadcast %2 : vector<1x16xf32> to vector<128x16xf32>
    %4 = arith.mulf %1, %3 : vector<128x16xf32>
    %c0_3 = arith.constant 0 : index
    %c0_4 = arith.constant 0 : index
    %5 = vector.load %arg3[%c0_3, %c0_4] : memref<1x16xf32, #tpu.memory_space<vmem>>, vector<1x16xf32>
    %6 = vector.broadcast %5 : vector<1x16xf32> to vector<128x16xf32>
    %7 = arith.addf %4, %6 : vector<128x16xf32>
    %cst = arith.constant 0.000000e+00 : f32
    %8 = vector.broadcast %cst : f32 to vector<128x16xf32>
    %9 = arith.maximumf %7, %8 : vector<128x16xf32>
    %10 = arith.truncf %9 : vector<128x16xf32> to vector<128x16xbf16>
    %c0_5 = arith.constant 0 : index
    %c0_6 = arith.constant 0 : index
    %11 = vector.load %arg4[%c0_5, %c0_6] : memref<16x8xbf16, #tpu.memory_space<vmem>>, vector<16x8xbf16>
    %cst_7 = arith.constant dense<0.000000e+00> : vector<128x8xf32>
    %12 = tpu.matmul %10, %11, %cst_7 {dimension_numbers = #tpu.dot_dimension_numbers<[1], [0], [0], [1], [0, 0, 1, 1], [], []>} : vector<128x16xbf16>, vector<16x8xbf16>, vector<128x8xf32> -> vector<128x8xf32>
    %c0_8 = arith.constant 0 : index
    %c0_9 = arith.constant 0 : index
    %13 = vector.load %arg5[%c0_8, %c0_9] : memref<1x8xf32, #tpu.memory_space<vmem>>, vector<1x8xf32>
    %14 = vector.broadcast %13 : vector<1x8xf32> to vector<128x8xf32>
    %15 = arith.mulf %12, %14 : vector<128x8xf32>
    %c0_10 = arith.constant 0 : index
    %c0_11 = arith.constant 0 : index
    %16 = vector.load %arg6[%c0_10, %c0_11] : memref<1x8xf32, #tpu.memory_space<vmem>>, vector<1x8xf32>
    %17 = vector.broadcast %16 : vector<1x8xf32> to vector<128x8xf32>
    %18 = arith.addf %15, %17 : vector<128x8xf32>
    %19 = arith.truncf %18 : vector<128x8xf32> to vector<128x8xbf16>
    %c0_12 = arith.constant 0 : index
    %c0_13 = arith.constant 0 : index
    %20 = vector.load %arg7[%c0_12, %c0_13] : memref<128x8xbf16, #tpu.memory_space<vmem>>, vector<128x8xbf16>
    tpu.vector_store %arg7[%c0_12, %c0_13], %19 {strides = array<i32>} : memref<128x8xbf16, #tpu.memory_space<vmem>>, vector<128x8xbf16>,
    return
  }
  func.func @transform_0(%arg0: i32) -> (i32, i32) {
    %c0_i32 = arith.constant 0 : i32
    %c0_i32_0 = arith.constant 0 : i32
    return %arg0, %c0_i32 : i32, i32
  }
  func.func @transform_1(%arg0: i32) -> (i32, i32) {
    %c0_i32 = arith.constant 0 : i32
    %c0_i32_0 = arith.constant 0 : i32
    %c0_i32_1 = arith.constant 0 : i32
    return %c0_i32, %c0_i32_0 : i32, i32
  }
  func.func @transform_2(%arg0: i32) -> (i32, i32) {
    %c0_i32 = arith.constant 0 : i32
    %c0_i32_0 = arith.constant 0 : i32
    %c0_i32_1 = arith.constant 0 : i32
    return %c0_i32, %c0_i32_0 : i32, i32
  }
  func.func @transform_3(%arg0: i32) -> (i32, i32) {
    %c0_i32 = arith.constant 0 : i32
    %c0_i32_0 = arith.constant 0 : i32
    %c0_i32_1 = arith.constant 0 : i32
    return %c0_i32, %c0_i32_0 : i32, i32
  }
  func.func @transform_4(%arg0: i32) -> (i32, i32) {
    %c0_i32 = arith.constant 0 : i32
    %c0_i32_0 = arith.constant 0 : i32
    %c0_i32_1 = arith.constant 0 : i32
    return %c0_i32, %c0_i32_0 : i32, i32
  }
  func.func @transform_5(%arg0: i32) -> (i32, i32) {
    %c0_i32 = arith.constant 0 : i32
    %c0_i32_0 = arith.constant 0 : i32
    %c0_i32_1 = arith.constant 0 : i32
    return %c0_i32, %c0_i32_0 : i32, i32
  }
  func.func @transform_6(%arg0: i32) -> (i32, i32) {
    %c0_i32 = arith.constant 0 : i32
    %c0_i32_0 = arith.constant 0 : i32
    return %arg0, %c0_i32 : i32, i32
  }
}

module attributes {stable_mosaic.version = 11 : i64} {
  func.func @_avgpool2s2_kernel(%arg0: i32, %arg1: memref<1x8x8x8xbf16, #tpu.memory_space<vmem>>, %arg2: memref<1x4x4x8xbf16, #tpu.memory_space<vmem>>) attributes {dimension_semantics = [#tpu.dimension_semantics<parallel>], iteration_bounds = array<i64: 2>, scalar_prefetch = 0 : i64, scratch_operands = 0 : i64, tpu.core_type = #tpu.core_type<tc>, window_params = [{transform_indices = @transform_0, window_bounds = array<i64: 1, 8, 8, 8>}, {transform_indices = @transform_1, window_bounds = array<i64: 1, 4, 4, 8>}]} {
    %c0 = arith.constant 0 : index
    %c0_0 = arith.constant 0 : index
    %c0_1 = arith.constant 0 : index
    %c0_2 = arith.constant 0 : index
    %0 = vector.load %arg1[%c0, %c0_0, %c0_1, %c0_2] : memref<1x8x8x8xbf16, #tpu.memory_space<vmem>>, vector<1x8x8x8xbf16>
    %1 = vector.shape_cast %0 : vector<1x8x8x8xbf16> to vector<8x8x8xbf16>
    %2 = arith.extf %1 : vector<8x8x8xbf16> to vector<8x8x8xf32>
    %3 = vector.shape_cast %2 : vector<8x8x8xf32> to vector<8x4x2x8xf32>
    %4 = vector.extract_strided_slice %3 {offsets = [0, 0, 0, 0], sizes = [8, 4, 1, 8], strides = [1, 1, 1, 1]} : vector<8x4x2x8xf32> to vector<8x4x1x8xf32>
    %5 = vector.shape_cast %4 : vector<8x4x1x8xf32> to vector<8x4x8xf32>
    %6 = vector.extract_strided_slice %3 {offsets = [0, 0, 1, 0], sizes = [8, 4, 1, 8], strides = [1, 1, 1, 1]} : vector<8x4x2x8xf32> to vector<8x4x1x8xf32>
    %7 = vector.shape_cast %6 : vector<8x4x1x8xf32> to vector<8x4x8xf32>
    %8 = arith.addf %5, %7 : vector<8x4x8xf32>
    %9 = vector.shape_cast %8 : vector<8x4x8xf32> to vector<4x2x4x8xf32>
    %10 = vector.extract_strided_slice %9 {offsets = [0, 0, 0, 0], sizes = [4, 1, 4, 8], strides = [1, 1, 1, 1]} : vector<4x2x4x8xf32> to vector<4x1x4x8xf32>
    %11 = vector.shape_cast %10 : vector<4x1x4x8xf32> to vector<4x4x8xf32>
    %12 = vector.extract_strided_slice %9 {offsets = [0, 1, 0, 0], sizes = [4, 1, 4, 8], strides = [1, 1, 1, 1]} : vector<4x2x4x8xf32> to vector<4x1x4x8xf32>
    %13 = vector.shape_cast %12 : vector<4x1x4x8xf32> to vector<4x4x8xf32>
    %14 = arith.addf %11, %13 : vector<4x4x8xf32>
    %cst = arith.constant 2.500000e-01 : f32
    %15 = vector.broadcast %cst : f32 to vector<4x4x8xf32>
    %16 = arith.mulf %14, %15 : vector<4x4x8xf32>
    %17 = vector.shape_cast %16 : vector<4x4x8xf32> to vector<1x4x4x8xf32>
    %18 = arith.truncf %17 : vector<1x4x4x8xf32> to vector<1x4x4x8xbf16>
    %c0_3 = arith.constant 0 : index
    %c0_4 = arith.constant 0 : index
    %c0_5 = arith.constant 0 : index
    %c0_6 = arith.constant 0 : index
    %19 = vector.load %arg2[%c0_3, %c0_4, %c0_5, %c0_6] : memref<1x4x4x8xbf16, #tpu.memory_space<vmem>>, vector<1x4x4x8xbf16>
    tpu.vector_store %arg2[%c0_3, %c0_4, %c0_5, %c0_6], %18 {strides = array<i32>} : memref<1x4x4x8xbf16, #tpu.memory_space<vmem>>, vector<1x4x4x8xbf16>,
    return
  }
  func.func @transform_0(%arg0: i32) -> (i32, i32, i32, i32) {
    %c0_i32 = arith.constant 0 : i32
    %c0_i32_0 = arith.constant 0 : i32
    %c0_i32_1 = arith.constant 0 : i32
    %c0_i32_2 = arith.constant 0 : i32
    return %arg0, %c0_i32, %c0_i32_0, %c0_i32_1 : i32, i32, i32, i32
  }
  func.func @transform_1(%arg0: i32) -> (i32, i32, i32, i32) {
    %c0_i32 = arith.constant 0 : i32
    %c0_i32_0 = arith.constant 0 : i32
    %c0_i32_1 = arith.constant 0 : i32
    %c0_i32_2 = arith.constant 0 : i32
    return %arg0, %c0_i32, %c0_i32_0, %c0_i32_1 : i32, i32, i32, i32
  }
}

module attributes {stable_mosaic.version = 11 : i64} {
  func.func @_mm_kernel(%arg0: i32, %arg1: memref<32x24xbf16, #tpu.memory_space<vmem>>, %arg2: memref<24x10xbf16, #tpu.memory_space<vmem>>, %arg3: memref<1x10xf32, #tpu.memory_space<vmem>>, %arg4: memref<1x10xf32, #tpu.memory_space<vmem>>, %arg5: memref<32x10xbf16, #tpu.memory_space<vmem>>) attributes {dimension_semantics = [#tpu.dimension_semantics<parallel>], iteration_bounds = array<i64: 1>, scalar_prefetch = 0 : i64, scratch_operands = 0 : i64, tpu.core_type = #tpu.core_type<tc>, window_params = [{transform_indices = @transform_0, window_bounds = array<i64: 32, 24>}, {pipeline_mode = #tpu.pipeline_mode<synchronous>, transform_indices = @transform_1, window_bounds = array<i64: 24, 10>}, {pipeline_mode = #tpu.pipeline_mode<synchronous>, transform_indices = @transform_2, window_bounds = array<i64: 1, 10>}, {pipeline_mode = #tpu.pipeline_mode<synchronous>, transform_indices = @transform_3, window_bounds = array<i64: 1, 10>}, {transform_indices = @transform_4, window_bounds = array<i64: 32, 10>}]} {
    %c0 = arith.constant 0 : index
    %c0_0 = arith.constant 0 : index
    %0 = vector.load %arg1[%c0, %c0_0] : memref<32x24xbf16, #tpu.memory_space<vmem>>, vector<32x24xbf16>
    %c0_1 = arith.constant 0 : index
    %c0_2 = arith.constant 0 : index
    %1 = vector.load %arg2[%c0_1, %c0_2] : memref<24x10xbf16, #tpu.memory_space<vmem>>, vector<24x10xbf16>
    %cst = arith.constant dense<0.000000e+00> : vector<32x10xf32>
    %2 = tpu.matmul %0, %1, %cst {dimension_numbers = #tpu.dot_dimension_numbers<[1], [0], [0], [1], [0, 0, 1, 1], [], []>} : vector<32x24xbf16>, vector<24x10xbf16>, vector<32x10xf32> -> vector<32x10xf32>
    %c0_3 = arith.constant 0 : index
    %c0_4 = arith.constant 0 : index
    %3 = vector.load %arg3[%c0_3, %c0_4] : memref<1x10xf32, #tpu.memory_space<vmem>>, vector<1x10xf32>
    %4 = vector.broadcast %3 : vector<1x10xf32> to vector<32x10xf32>
    %5 = arith.mulf %2, %4 : vector<32x10xf32>
    %c0_5 = arith.constant 0 : index
    %c0_6 = arith.constant 0 : index
    %6 = vector.load %arg4[%c0_5, %c0_6] : memref<1x10xf32, #tpu.memory_space<vmem>>, vector<1x10xf32>
    %7 = vector.broadcast %6 : vector<1x10xf32> to vector<32x10xf32>
    %8 = arith.addf %5, %7 : vector<32x10xf32>
    %cst_7 = arith.constant 0.000000e+00 : f32
    %9 = vector.broadcast %cst_7 : f32 to vector<32x10xf32>
    %10 = arith.maximumf %8, %9 : vector<32x10xf32>
    %11 = arith.truncf %10 : vector<32x10xf32> to vector<32x10xbf16>
    %c0_8 = arith.constant 0 : index
    %c0_9 = arith.constant 0 : index
    %12 = vector.load %arg5[%c0_8, %c0_9] : memref<32x10xbf16, #tpu.memory_space<vmem>>, vector<32x10xbf16>
    tpu.vector_store %arg5[%c0_8, %c0_9], %11 {strides = array<i32>} : memref<32x10xbf16, #tpu.memory_space<vmem>>, vector<32x10xbf16>,
    return
  }
  func.func @transform_0(%arg0: i32) -> (i32, i32) {
    %c0_i32 = arith.constant 0 : i32
    %c0_i32_0 = arith.constant 0 : i32
    return %arg0, %c0_i32 : i32, i32
  }
  func.func @transform_1(%arg0: i32) -> (i32, i32) {
    %c0_i32 = arith.constant 0 : i32
    %c0_i32_0 = arith.constant 0 : i32
    %c0_i32_1 = arith.constant 0 : i32
    return %c0_i32, %c0_i32_0 : i32, i32
  }
  func.func @transform_2(%arg0: i32) -> (i32, i32) {
    %c0_i32 = arith.constant 0 : i32
    %c0_i32_0 = arith.constant 0 : i32
    %c0_i32_1 = arith.constant 0 : i32
    return %c0_i32, %c0_i32_0 : i32, i32
  }
  func.func @transform_3(%arg0: i32) -> (i32, i32) {
    %c0_i32 = arith.constant 0 : i32
    %c0_i32_0 = arith.constant 0 : i32
    %c0_i32_1 = arith.constant 0 : i32
    return %c0_i32, %c0_i32_0 : i32, i32
  }
  func.func @transform_4(%arg0: i32) -> (i32, i32) {
    %c0_i32 = arith.constant 0 : i32
    %c0_i32_0 = arith.constant 0 : i32
    return %arg0, %c0_i32 : i32, i32
  }
}

module attributes {stable_mosaic.version = 11 : i64} {
  func.func @_conv3x3_kernel(%arg0: i32, %arg1: memref<1x6x6x8xbf16, #tpu.memory_space<vmem>>, %arg2: memref<9x8x4xbf16, #tpu.memory_space<vmem>>, %arg3: memref<1x4xf32, #tpu.memory_space<vmem>>, %arg4: memref<1x4xf32, #tpu.memory_space<vmem>>, %arg5: memref<1x4x4x4xbf16, #tpu.memory_space<vmem>>) attributes {dimension_semantics = [#tpu.dimension_semantics<parallel>], iteration_bounds = array<i64: 2>, scalar_prefetch = 0 : i64, scratch_operands = 0 : i64, tpu.core_type = #tpu.core_type<tc>, window_params = [{transform_indices = @transform_0, window_bounds = array<i64: 1, 6, 6, 8>}, {pipeline_mode = #tpu.pipeline_mode<synchronous>, transform_indices = @transform_1, window_bounds = array<i64: 9, 8, 4>}, {pipeline_mode = #tpu.pipeline_mode<synchronous>, transform_indices = @transform_2, window_bounds = array<i64: 1, 4>}, {pipeline_mode = #tpu.pipeline_mode<synchronous>, transform_indices = @transform_3, window_bounds = array<i64: 1, 4>}, {transform_indices = @transform_4, window_bounds = array<i64: 1, 4, 4, 4>}]} {
    %c0 = arith.constant 0 : index
    %c0_0 = arith.constant 0 : index
    %c0_1 = arith.constant 0 : index
    %c0_2 = arith.constant 0 : index
    %0 = vector.load %arg1[%c0, %c0_0, %c0_1, %c0_2] : memref<1x6x6x8xbf16, #tpu.memory_space<vmem>>, vector<1x6x6x8xbf16>
    %1 = vector.shape_cast %0 : vector<1x6x6x8xbf16> to vector<6x6x8xbf16>
    %c0_3 = arith.constant 0 : index
    %c0_4 = arith.constant 0 : index
    %c0_5 = arith.constant 0 : index
    %2 = vector.load %arg2[%c0_3, %c0_4, %c0_5] : memref<9x8x4xbf16, #tpu.memory_space<vmem>>, vector<9x8x4xbf16>
    %cst = arith.constant 0.000000e+00 : f32
    %3 = vector.broadcast %cst : f32 to vector<16x4xf32>
    %4 = vector.extract_strided_slice %1 {offsets = [0, 0, 0], sizes = [4, 4, 8], strides = [1, 1, 1]} : vector<6x6x8xbf16> to vector<4x4x8xbf16>
    %5 = vector.shape_cast %4 : vector<4x4x8xbf16> to vector<16x8xbf16>
    %6 = vector.extract_strided_slice %2 {offsets = [0, 0, 0], sizes = [1, 8, 4], strides = [1, 1, 1]} : vector<9x8x4xbf16> to vector<1x8x4xbf16>
    %7 = vector.shape_cast %6 : vector<1x8x4xbf16> to vector<8x4xbf16>
    %cst_6 = arith.constant dense<0.000000e+00> : vector<16x4xf32>
    %8 = tpu.matmul %5, %7, %cst_6 {dimension_numbers = #tpu.dot_dimension_numbers<[1], [0], [0], [1], [0, 0, 1, 1], [], []>} : vector<16x8xbf16>, vector<8x4xbf16>, vector<16x4xf32> -> vector<16x4xf32>
    %9 = arith.addf %3, %8 : vector<16x4xf32>
    %10 = vector.extract_strided_slice %1 {offsets = [0, 1, 0], sizes = [4, 4, 8], strides = [1, 1, 1]} : vector<6x6x8xbf16> to vector<4x4x8xbf16>
    %11 = vector.shape_cast %10 : vector<4x4x8xbf16> to vector<16x8xbf16>
    %12 = vector.extract_strided_slice %2 {offsets = [1, 0, 0], sizes = [1, 8, 4], strides = [1, 1, 1]} : vector<9x8x4xbf16> to vector<1x8x4xbf16>
    %13 = vector.shape_cast %12 : vector<1x8x4xbf16> to vector<8x4xbf16>
    %cst_7 = arith.constant dense<0.000000e+00> : vector<16x4xf32>
    %14 = tpu.matmul %11, %13, %cst_7 {dimension_numbers = #tpu.dot_dimension_numbers<[1], [0], [0], [1], [0, 0, 1, 1], [], []>} : vector<16x8xbf16>, vector<8x4xbf16>, vector<16x4xf32> -> vector<16x4xf32>
    %15 = arith.addf %9, %14 : vector<16x4xf32>
    %16 = vector.extract_strided_slice %1 {offsets = [0, 2, 0], sizes = [4, 4, 8], strides = [1, 1, 1]} : vector<6x6x8xbf16> to vector<4x4x8xbf16>
    %17 = vector.shape_cast %16 : vector<4x4x8xbf16> to vector<16x8xbf16>
    %18 = vector.extract_strided_slice %2 {offsets = [2, 0, 0], sizes = [1, 8, 4], strides = [1, 1, 1]} : vector<9x8x4xbf16> to vector<1x8x4xbf16>
    %19 = vector.shape_cast %18 : vector<1x8x4xbf16> to vector<8x4xbf16>
    %cst_8 = arith.constant dense<0.000000e+00> : vector<16x4xf32>
    %20 = tpu.matmul %17, %19, %cst_8 {dimension_numbers = #tpu.dot_dimension_numbers<[1], [0], [0], [1], [0, 0, 1, 1], [], []>} : vector<16x8xbf16>, vector<8x4xbf16>, vector<16x4xf32> -> vector<16x4xf32>
    %21 = arith.addf %15, %20 : vector<16x4xf32>
    %22 = vector.extract_strided_slice %1 {offsets = [1, 0, 0], sizes = [4, 4, 8], strides = [1, 1, 1]} : vector<6x6x8xbf16> to vector<4x4x8xbf16>
    %23 = vector.shape_cast %22 : vector<4x4x8xbf16> to vector<16x8xbf16>
    %24 = vector.extract_strided_slice %2 {offsets = [3, 0, 0], sizes = [1, 8, 4], strides = [1, 1, 1]} : vector<9x8x4xbf16> to vector<1x8x4xbf16>
    %25 = vector.shape_cast %24 : vector<1x8x4xbf16> to vector<8x4xbf16>
    %cst_9 = arith.constant dense<0.000000e+00> : vector<16x4xf32>
    %26 = tpu.matmul %23, %25, %cst_9 {dimension_numbers = #tpu.dot_dimension_numbers<[1], [0], [0], [1], [0, 0, 1, 1], [], []>} : vector<16x8xbf16>, vector<8x4xbf16>, vector<16x4xf32> -> vector<16x4xf32>
    %27 = arith.addf %21, %26 : vector<16x4xf32>
    %28 = vector.extract_strided_slice %1 {offsets = [1, 1, 0], sizes = [4, 4, 8], strides = [1, 1, 1]} : vector<6x6x8xbf16> to vector<4x4x8xbf16>
    %29 = vector.shape_cast %28 : vector<4x4x8xbf16> to vector<16x8xbf16>
    %30 = vector.extract_strided_slice %2 {offsets = [4, 0, 0], sizes = [1, 8, 4], strides = [1, 1, 1]} : vector<9x8x4xbf16> to vector<1x8x4xbf16>
    %31 = vector.shape_cast %30 : vector<1x8x4xbf16> to vector<8x4xbf16>
    %cst_10 = arith.constant dense<0.000000e+00> : vector<16x4xf32>
    %32 = tpu.matmul %29, %31, %cst_10 {dimension_numbers = #tpu.dot_dimension_numbers<[1], [0], [0], [1], [0, 0, 1, 1], [], []>} : vector<16x8xbf16>, vector<8x4xbf16>, vector<16x4xf32> -> vector<16x4xf32>
    %33 = arith.addf %27, %32 : vector<16x4xf32>
    %34 = vector.extract_strided_slice %1 {offsets = [1, 2, 0], sizes = [4, 4, 8], strides = [1, 1, 1]} : vector<6x6x8xbf16> to vector<4x4x8xbf16>
    %35 = vector.shape_cast %34 : vector<4x4x8xbf16> to vector<16x8xbf16>
    %36 = vector.extract_strided_slice %2 {offsets = [5, 0, 0], sizes = [1, 8, 4], strides = [1, 1, 1]} : vector<9x8x4xbf16> to vector<1x8x4xbf16>
    %37 = vector.shape_cast %36 : vector<1x8x4xbf16> to vector<8x4xbf16>
    %cst_11 = arith.constant dense<0.000000e+00> : vector<16x4xf32>
    %38 = tpu.matmul %35, %37, %cst_11 {dimension_numbers = #tpu.dot_dimension_numbers<[1], [0], [0], [1], [0, 0, 1, 1], [], []>} : vector<16x8xbf16>, vector<8x4xbf16>, vector<16x4xf32> -> vector<16x4xf32>
    %39 = arith.addf %33, %38 : vector<16x4xf32>
    %40 = vector.extract_strided_slice %1 {offsets = [2, 0, 0], sizes = [4, 4, 8], strides = [1, 1, 1]} : vector<6x6x8xbf16> to vector<4x4x8xbf16>
    %41 = vector.shape_cast %40 : vector<4x4x8xbf16> to vector<16x8xbf16>
    %42 = vector.extract_strided_slice %2 {offsets = [6, 0, 0], sizes = [1, 8, 4], strides = [1, 1, 1]} : vector<9x8x4xbf16> to vector<1x8x4xbf16>
    %43 = vector.shape_cast %42 : vector<1x8x4xbf16> to vector<8x4xbf16>
    %cst_12 = arith.constant dense<0.000000e+00> : vector<16x4xf32>
    %44 = tpu.matmul %41, %43, %cst_12 {dimension_numbers = #tpu.dot_dimension_numbers<[1], [0], [0], [1], [0, 0, 1, 1], [], []>} : vector<16x8xbf16>, vector<8x4xbf16>, vector<16x4xf32> -> vector<16x4xf32>
    %45 = arith.addf %39, %44 : vector<16x4xf32>
    %46 = vector.extract_strided_slice %1 {offsets = [2, 1, 0], sizes = [4, 4, 8], strides = [1, 1, 1]} : vector<6x6x8xbf16> to vector<4x4x8xbf16>
    %47 = vector.shape_cast %46 : vector<4x4x8xbf16> to vector<16x8xbf16>
    %48 = vector.extract_strided_slice %2 {offsets = [7, 0, 0], sizes = [1, 8, 4], strides = [1, 1, 1]} : vector<9x8x4xbf16> to vector<1x8x4xbf16>
    %49 = vector.shape_cast %48 : vector<1x8x4xbf16> to vector<8x4xbf16>
    %cst_13 = arith.constant dense<0.000000e+00> : vector<16x4xf32>
    %50 = tpu.matmul %47, %49, %cst_13 {dimension_numbers = #tpu.dot_dimension_numbers<[1], [0], [0], [1], [0, 0, 1, 1], [], []>} : vector<16x8xbf16>, vector<8x4xbf16>, vector<16x4xf32> -> vector<16x4xf32>
    %51 = arith.addf %45, %50 : vector<16x4xf32>
    %52 = vector.extract_strided_slice %1 {offsets = [2, 2, 0], sizes = [4, 4, 8], strides = [1, 1, 1]} : vector<6x6x8xbf16> to vector<4x4x8xbf16>
    %53 = vector.shape_cast %52 : vector<4x4x8xbf16> to vector<16x8xbf16>
    %54 = vector.extract_strided_slice %2 {offsets = [8, 0, 0], sizes = [1, 8, 4], strides = [1, 1, 1]} : vector<9x8x4xbf16> to vector<1x8x4xbf16>
    %55 = vector.shape_cast %54 : vector<1x8x4xbf16> to vector<8x4xbf16>
    %cst_14 = arith.constant dense<0.000000e+00> : vector<16x4xf32>
    %56 = tpu.matmul %53, %55, %cst_14 {dimension_numbers = #tpu.dot_dimension_numbers<[1], [0], [0], [1], [0, 0, 1, 1], [], []>} : vector<16x8xbf16>, vector<8x4xbf16>, vector<16x4xf32> -> vector<16x4xf32>
    %57 = arith.addf %51, %56 : vector<16x4xf32>
    %c0_15 = arith.constant 0 : index
    %c0_16 = arith.constant 0 : index
    %58 = vector.load %arg3[%c0_15, %c0_16] : memref<1x4xf32, #tpu.memory_space<vmem>>, vector<1x4xf32>
    %59 = vector.broadcast %58 : vector<1x4xf32> to vector<16x4xf32>
    %60 = arith.mulf %57, %59 : vector<16x4xf32>
    %c0_17 = arith.constant 0 : index
    %c0_18 = arith.constant 0 : index
    %61 = vector.load %arg4[%c0_17, %c0_18] : memref<1x4xf32, #tpu.memory_space<vmem>>, vector<1x4xf32>
    %62 = vector.broadcast %61 : vector<1x4xf32> to vector<16x4xf32>
    %63 = arith.addf %60, %62 : vector<16x4xf32>
    %cst_19 = arith.constant 0.000000e+00 : f32
    %64 = vector.broadcast %cst_19 : f32 to vector<16x4xf32>
    %65 = arith.maximumf %63, %64 : vector<16x4xf32>
    %66 = vector.shape_cast %65 : vector<16x4xf32> to vector<1x4x4x4xf32>
    %67 = arith.truncf %66 : vector<1x4x4x4xf32> to vector<1x4x4x4xbf16>
    %c0_20 = arith.constant 0 : index
    %c0_21 = arith.constant 0 : index
    %c0_22 = arith.constant 0 : index
    %c0_23 = arith.constant 0 : index
    %68 = vector.load %arg5[%c0_20, %c0_21, %c0_22, %c0_23] : memref<1x4x4x4xbf16, #tpu.memory_space<vmem>>, vector<1x4x4x4xbf16>
    tpu.vector_store %arg5[%c0_20, %c0_21, %c0_22, %c0_23], %67 {strides = array<i32>} : memref<1x4x4x4xbf16, #tpu.memory_space<vmem>>, vector<1x4x4x4xbf16>,
    return
  }
  func.func @transform_0(%arg0: i32) -> (i32, i32, i32, i32) {
    %c0_i32 = arith.constant 0 : i32
    %c0_i32_0 = arith.constant 0 : i32
    %c0_i32_1 = arith.constant 0 : i32
    %c0_i32_2 = arith.constant 0 : i32
    return %arg0, %c0_i32, %c0_i32_0, %c0_i32_1 : i32, i32, i32, i32
  }
  func.func @transform_1(%arg0: i32) -> (i32, i32, i32) {
    %c0_i32 = arith.constant 0 : i32
    %c0_i32_0 = arith.constant 0 : i32
    %c0_i32_1 = arith.constant 0 : i32
    %c0_i32_2 = arith.constant 0 : i32
    return %c0_i32, %c0_i32_0, %c0_i32_1 : i32, i32, i32
  }
  func.func @transform_2(%arg0: i32) -> (i32, i32) {
    %c0_i32 = arith.constant 0 : i32
    %c0_i32_0 = arith.constant 0 : i32
    %c0_i32_1 = arith.constant 0 : i32
    return %c0_i32, %c0_i32_0 : i32, i32
  }
  func.func @transform_3(%arg0: i32) -> (i32, i32) {
    %c0_i32 = arith.constant 0 : i32
    %c0_i32_0 = arith.constant 0 : i32
    %c0_i32_1 = arith.constant 0 : i32
    return %c0_i32, %c0_i32_0 : i32, i32
  }
  func.func @transform_4(%arg0: i32) -> (i32, i32, i32, i32) {
    %c0_i32 = arith.constant 0 : i32
    %c0_i32_0 = arith.constant 0 : i32
    %c0_i32_1 = arith.constant 0 : i32
    %c0_i32_2 = arith.constant 0 : i32
    return %arg0, %c0_i32, %c0_i32_0, %c0_i32_1 : i32, i32, i32, i32
  }
}

module attributes {stable_mosaic.version = 11 : i64} {
  func.func @_pool_mm_kernel(%arg0: i32, %arg1: memref<1x6x6x24xbf16, #tpu.memory_space<vmem>>, %arg2: memref<24x2xbf16, #tpu.memory_space<vmem>>, %arg3: memref<1x2xf32, #tpu.memory_space<vmem>>, %arg4: memref<1x2xf32, #tpu.memory_space<vmem>>, %arg5: memref<1x4x4x2xbf16, #tpu.memory_space<vmem>>) attributes {dimension_semantics = [#tpu.dimension_semantics<parallel>], iteration_bounds = array<i64: 2>, scalar_prefetch = 0 : i64, scratch_operands = 0 : i64, tpu.core_type = #tpu.core_type<tc>, window_params = [{transform_indices = @transform_0, window_bounds = array<i64: 1, 6, 6, 24>}, {pipeline_mode = #tpu.pipeline_mode<synchronous>, transform_indices = @transform_1, window_bounds = array<i64: 24, 2>}, {pipeline_mode = #tpu.pipeline_mode<synchronous>, transform_indices = @transform_2, window_bounds = array<i64: 1, 2>}, {pipeline_mode = #tpu.pipeline_mode<synchronous>, transform_indices = @transform_3, window_bounds = array<i64: 1, 2>}, {transform_indices = @transform_4, window_bounds = array<i64: 1, 4, 4, 2>}]} {
    %c0 = arith.constant 0 : index
    %c0_0 = arith.constant 0 : index
    %c0_1 = arith.constant 0 : index
    %c0_2 = arith.constant 0 : index
    %0 = vector.load %arg1[%c0, %c0_0, %c0_1, %c0_2] : memref<1x6x6x24xbf16, #tpu.memory_space<vmem>>, vector<1x6x6x24xbf16>
    %1 = vector.shape_cast %0 : vector<1x6x6x24xbf16> to vector<6x6x24xbf16>
    %2 = vector.extract_strided_slice %1 {offsets = [0, 0, 0], sizes = [4, 4, 24], strides = [1, 1, 1]} : vector<6x6x24xbf16> to vector<4x4x24xbf16>
    %3 = vector.extract_strided_slice %1 {offsets = [0, 1, 0], sizes = [4, 4, 24], strides = [1, 1, 1]} : vector<6x6x24xbf16> to vector<4x4x24xbf16>
    %4 = arith.maximumf %2, %3 : vector<4x4x24xbf16>
    %5 = vector.extract_strided_slice %1 {offsets = [0, 2, 0], sizes = [4, 4, 24], strides = [1, 1, 1]} : vector<6x6x24xbf16> to vector<4x4x24xbf16>
    %6 = arith.maximumf %4, %5 : vector<4x4x24xbf16>
    %7 = vector.extract_strided_slice %1 {offsets = [1, 0, 0], sizes = [4, 4, 24], strides = [1, 1, 1]} : vector<6x6x24xbf16> to vector<4x4x24xbf16>
    %8 = arith.maximumf %6, %7 : vector<4x4x24xbf16>
    %9 = vector.extract_strided_slice %1 {offsets = [1, 1, 0], sizes = [4, 4, 24], strides = [1, 1, 1]} : vector<6x6x24xbf16> to vector<4x4x24xbf16>
    %10 = arith.maximumf %8, %9 : vector<4x4x24xbf16>
    %11 = vector.extract_strided_slice %1 {offsets = [1, 2, 0], sizes = [4, 4, 24], strides = [1, 1, 1]} : vector<6x6x24xbf16> to vector<4x4x24xbf16>
    %12 = arith.maximumf %10, %11 : vector<4x4x24xbf16>
    %13 = vector.extract_strided_slice %1 {offsets = [2, 0, 0], sizes = [4, 4, 24], strides = [1, 1, 1]} : vector<6x6x24xbf16> to vector<4x4x24xbf16>
    %14 = arith.maximumf %12, %13 : vector<4x4x24xbf16>
    %15 = vector.extract_strided_slice %1 {offsets = [2, 1, 0], sizes = [4, 4, 24], strides = [1, 1, 1]} : vector<6x6x24xbf16> to vector<4x4x24xbf16>
    %16 = arith.maximumf %14, %15 : vector<4x4x24xbf16>
    %17 = vector.extract_strided_slice %1 {offsets = [2, 2, 0], sizes = [4, 4, 24], strides = [1, 1, 1]} : vector<6x6x24xbf16> to vector<4x4x24xbf16>
    %18 = arith.maximumf %16, %17 : vector<4x4x24xbf16>
    %19 = vector.shape_cast %18 : vector<4x4x24xbf16> to vector<16x24xbf16>
    %c0_3 = arith.constant 0 : index
    %c0_4 = arith.constant 0 : index
    %20 = vector.load %arg2[%c0_3, %c0_4] : memref<24x2xbf16, #tpu.memory_space<vmem>>, vector<24x2xbf16>
    %cst = arith.constant dense<0.000000e+00> : vector<16x2xf32>
    %21 = tpu.matmul %19, %20, %cst {dimension_numbers = #tpu.dot_dimension_numbers<[1], [0], [0], [1], [0, 0, 1, 1], [], []>} : vector<16x24xbf16>, vector<24x2xbf16>, vector<16x2xf32> -> vector<16x2xf32>
    %c0_5 = arith.constant 0 : index
    %c0_6 = arith.constant 0 : index
    %22 = vector.load %arg3[%c0_5, %c0_6] : memref<1x2xf32, #tpu.memory_space<vmem>>, vector<1x2xf32>
    %23 = vector.broadcast %22 : vector<1x2xf32> to vector<16x2xf32>
    %24 = arith.mulf %21, %23 : vector<16x2xf32>
    %c0_7 = arith.constant 0 : index
    %c0_8 = arith.constant 0 : index
    %25 = vector.load %arg4[%c0_7, %c0_8] : memref<1x2xf32, #tpu.memory_space<vmem>>, vector<1x2xf32>
    %26 = vector.broadcast %25 : vector<1x2xf32> to vector<16x2xf32>
    %27 = arith.addf %24, %26 : vector<16x2xf32>
    %cst_9 = arith.constant 0.000000e+00 : f32
    %28 = vector.broadcast %cst_9 : f32 to vector<16x2xf32>
    %29 = arith.maximumf %27, %28 : vector<16x2xf32>
    %30 = vector.shape_cast %29 : vector<16x2xf32> to vector<1x4x4x2xf32>
    %31 = arith.truncf %30 : vector<1x4x4x2xf32> to vector<1x4x4x2xbf16>
    %c0_10 = arith.constant 0 : index
    %c0_11 = arith.constant 0 : index
    %c0_12 = arith.constant 0 : index
    %c0_13 = arith.constant 0 : index
    %32 = vector.load %arg5[%c0_10, %c0_11, %c0_12, %c0_13] : memref<1x4x4x2xbf16, #tpu.memory_space<vmem>>, vector<1x4x4x2xbf16>
    tpu.vector_store %arg5[%c0_10, %c0_11, %c0_12, %c0_13], %31 {strides = array<i32>} : memref<1x4x4x2xbf16, #tpu.memory_space<vmem>>, vector<1x4x4x2xbf16>,
    return
  }
  func.func @transform_0(%arg0: i32) -> (i32, i32, i32, i32) {
    %c0_i32 = arith.constant 0 : i32
    %c0_i32_0 = arith.constant 0 : i32
    %c0_i32_1 = arith.constant 0 : i32
    %c0_i32_2 = arith.constant 0 : i32
    return %arg0, %c0_i32, %c0_i32_0, %c0_i32_1 : i32, i32, i32, i32
  }
  func.func @transform_1(%arg0: i32) -> (i32, i32) {
    %c0_i32 = arith.constant 0 : i32
    %c0_i32_0 = arith.constant 0 : i32
    %c0_i32_1 = arith.constant 0 : i32
    return %c0_i32, %c0_i32_0 : i32, i32
  }
  func.func @transform_2(%arg0: i32) -> (i32, i32) {
    %c0_i32 = arith.constant 0 : i32
    %c0_i32_0 = arith.constant 0 : i32
    %c0_i32_1 = arith.constant 0 : i32
    return %c0_i32, %c0_i32_0 : i32, i32
  }
  func.func @transform_3(%arg0: i32) -> (i32, i32) {
    %c0_i32 = arith.constant 0 : i32
    %c0_i32_0 = arith.constant 0 : i32
    %c0_i32_1 = arith.constant 0 : i32
    return %c0_i32, %c0_i32_0 : i32, i32
  }
  func.func @transform_4(%arg0: i32) -> (i32, i32, i32, i32) {
    %c0_i32 = arith.constant 0 : i32
    %c0_i32_0 = arith.constant 0 : i32
    %c0_i32_1 = arith.constant 0 : i32
    %c0_i32_2 = arith.constant 0 : i32
    return %arg0, %c0_i32, %c0_i32_0, %c0_i32_1 : i32, i32, i32, i32
  }
}

module attributes {stable_mosaic.version = 11 : i64} {
  func.func @_mm_kernel(%arg0: i32, %arg1: memref<32x24xbf16, #tpu.memory_space<vmem>>, %arg2: memref<24x8xbf16, #tpu.memory_space<vmem>>, %arg3: memref<1x8xf32, #tpu.memory_space<vmem>>, %arg4: memref<1x8xf32, #tpu.memory_space<vmem>>, %arg5: memref<32x8xbf16, #tpu.memory_space<vmem>>, %arg6: memref<32x8xbf16, #tpu.memory_space<vmem>>) attributes {dimension_semantics = [#tpu.dimension_semantics<parallel>], iteration_bounds = array<i64: 1>, scalar_prefetch = 0 : i64, scratch_operands = 0 : i64, tpu.core_type = #tpu.core_type<tc>, window_params = [{transform_indices = @transform_0, window_bounds = array<i64: 32, 24>}, {pipeline_mode = #tpu.pipeline_mode<synchronous>, transform_indices = @transform_1, window_bounds = array<i64: 24, 8>}, {pipeline_mode = #tpu.pipeline_mode<synchronous>, transform_indices = @transform_2, window_bounds = array<i64: 1, 8>}, {pipeline_mode = #tpu.pipeline_mode<synchronous>, transform_indices = @transform_3, window_bounds = array<i64: 1, 8>}, {transform_indices = @transform_4, window_bounds = array<i64: 32, 8>}, {transform_indices = @transform_5, window_bounds = array<i64: 32, 8>}]} {
    %c0 = arith.constant 0 : index
    %c0_0 = arith.constant 0 : index
    %0 = vector.load %arg1[%c0, %c0_0] : memref<32x24xbf16, #tpu.memory_space<vmem>>, vector<32x24xbf16>
    %c0_1 = arith.constant 0 : index
    %c0_2 = arith.constant 0 : index
    %1 = vector.load %arg2[%c0_1, %c0_2] : memref<24x8xbf16, #tpu.memory_space<vmem>>, vector<24x8xbf16>
    %cst = arith.constant dense<0.000000e+00> : vector<32x8xf32>
    %2 = tpu.matmul %0, %1, %cst {dimension_numbers = #tpu.dot_dimension_numbers<[1], [0], [0], [1], [0, 0, 1, 1], [], []>} : vector<32x24xbf16>, vector<24x8xbf16>, vector<32x8xf32> -> vector<32x8xf32>
    %c0_3 = arith.constant 0 : index
    %c0_4 = arith.constant 0 : index
    %3 = vector.load %arg3[%c0_3, %c0_4] : memref<1x8xf32, #tpu.memory_space<vmem>>, vector<1x8xf32>
    %4 = vector.broadcast %3 : vector<1x8xf32> to vector<32x8xf32>
    %5 = arith.mulf %2, %4 : vector<32x8xf32>
    %c0_5 = arith.constant 0 : index
    %c0_6 = arith.constant 0 : index
    %6 = vector.load %arg4[%c0_5, %c0_6] : memref<1x8xf32, #tpu.memory_space<vmem>>, vector<1x8xf32>
    %7 = vector.broadcast %6 : vector<1x8xf32> to vector<32x8xf32>
    %8 = arith.addf %5, %7 : vector<32x8xf32>
    %c0_7 = arith.constant 0 : index
    %c0_8 = arith.constant 0 : index
    %9 = vector.load %arg5[%c0_7, %c0_8] : memref<32x8xbf16, #tpu.memory_space<vmem>>, vector<32x8xbf16>
    %10 = arith.extf %9 : vector<32x8xbf16> to vector<32x8xf32>
    %11 = arith.addf %8, %10 : vector<32x8xf32>
    %12 = arith.truncf %11 : vector<32x8xf32> to vector<32x8xbf16>
    %c0_9 = arith.constant 0 : index
    %c0_10 = arith.constant 0 : index
    %13 = vector.load %arg6[%c0_9, %c0_10] : memref<32x8xbf16, #tpu.memory_space<vmem>>, vector<32x8xbf16>
    tpu.vector_store %arg6[%c0_9, %c0_10], %12 {strides = array<i32>} : memref<32x8xbf16, #tpu.memory_space<vmem>>, vector<32x8xbf16>,
    return
  }
  func.func @transform_0(%arg0: i32) -> (i32, i32) {
    %c0_i32 = arith.constant 0 : i32
    %c0_i32_0 = arith.constant 0 : i32
    return %arg0, %c0_i32 : i32, i32
  }
  func.func @transform_1(%arg0: i32) -> (i32, i32) {
    %c0_i32 = arith.constant 0 : i32
    %c0_i32_0 = arith.constant 0 : i32
    %c0_i32_1 = arith.constant 0 : i32
    return %c0_i32, %c0_i32_0 : i32, i32
  }
  func.func @transform_2(%arg0: i32) -> (i32, i32) {
    %c0_i32 = arith.constant 0 : i32
    %c0_i32_0 = arith.constant 0 : i32
    %c0_i32_1 = arith.constant 0 : i32
    return %c0_i32, %c0_i32_0 : i32, i32
  }
  func.func @transform_3(%arg0: i32) -> (i32, i32) {
    %c0_i32 = arith.constant 0 : i32
    %c0_i32_0 = arith.constant 0 : i32
    %c0_i32_1 = arith.constant 0 : i32
    return %c0_i32, %c0_i32_0 : i32, i32
  }
  func.func @transform_4(%arg0: i32) -> (i32, i32) {
    %c0_i32 = arith.constant 0 : i32
    %c0_i32_0 = arith.constant 0 : i32
    return %arg0, %c0_i32 : i32, i32
  }
  func.func @transform_5(%arg0: i32) -> (i32, i32) {
    %c0_i32 = arith.constant 0 : i32
    %c0_i32_0 = arith.constant 0 : i32
    return %arg0, %c0_i32 : i32, i32
  }
}

module attributes {stable_mosaic.version = 11 : i64} {
  func.func @_head_kernel(%arg0: i32, %arg1: memref<2x16x8xbf16, #tpu.memory_space<vmem>>, %arg2: memref<1x8xf32, #tpu.memory_space<vmem>>, %arg3: memref<1x8xf32, #tpu.memory_space<vmem>>, %arg4: memref<8x10xf32, #tpu.memory_space<vmem>>, %arg5: memref<1x10xf32, #tpu.memory_space<vmem>>, %arg6: memref<2x10xf32, #tpu.memory_space<vmem>>) attributes {dimension_semantics = [#tpu.dimension_semantics<arbitrary>], iteration_bounds = array<i64: 1>, scalar_prefetch = 0 : i64, scratch_operands = 0 : i64, tpu.core_type = #tpu.core_type<tc>, window_params = [{pipeline_mode = #tpu.pipeline_mode<synchronous>, transform_indices = @transform_0, window_bounds = array<i64: 2, 16, 8>}, {pipeline_mode = #tpu.pipeline_mode<synchronous>, transform_indices = @transform_1, window_bounds = array<i64: 1, 8>}, {pipeline_mode = #tpu.pipeline_mode<synchronous>, transform_indices = @transform_2, window_bounds = array<i64: 1, 8>}, {pipeline_mode = #tpu.pipeline_mode<synchronous>, transform_indices = @transform_3, window_bounds = array<i64: 8, 10>}, {pipeline_mode = #tpu.pipeline_mode<synchronous>, transform_indices = @transform_4, window_bounds = array<i64: 1, 10>}, {pipeline_mode = #tpu.pipeline_mode<synchronous>, transform_indices = @transform_5, window_bounds = array<i64: 2, 10>}]} {
    %c0 = arith.constant 0 : index
    %c0_0 = arith.constant 0 : index
    %c0_1 = arith.constant 0 : index
    %0 = vector.load %arg1[%c0, %c0_0, %c0_1] : memref<2x16x8xbf16, #tpu.memory_space<vmem>>, vector<2x16x8xbf16>
    %1 = arith.extf %0 : vector<2x16x8xbf16> to vector<2x16x8xf32>
    %c0_2 = arith.constant 0 : index
    %c0_3 = arith.constant 0 : index
    %2 = vector.load %arg2[%c0_2, %c0_3] : memref<1x8xf32, #tpu.memory_space<vmem>>, vector<1x8xf32>
    %3 = vector.shape_cast %2 : vector<1x8xf32> to vector<1x1x8xf32>
    %4 = vector.broadcast %3 : vector<1x1x8xf32> to vector<2x16x8xf32>
    %5 = arith.mulf %1, %4 : vector<2x16x8xf32>
    %c0_4 = arith.constant 0 : index
    %c0_5 = arith.constant 0 : index
    %6 = vector.load %arg3[%c0_4, %c0_5] : memref<1x8xf32, #tpu.memory_space<vmem>>, vector<1x8xf32>
    %7 = vector.shape_cast %6 : vector<1x8xf32> to vector<1x1x8xf32>
    %8 = vector.broadcast %7 : vector<1x1x8xf32> to vector<2x16x8xf32>
    %9 = arith.addf %5, %8 : vector<2x16x8xf32>
    %cst = arith.constant 0.000000e+00 : f32
    %10 = vector.broadcast %cst : f32 to vector<2x16x8xf32>
    %11 = arith.maximumf %9, %10 : vector<2x16x8xf32>
    %cst_6 = arith.constant dense<0.000000e+00> : vector<2x8xf32>
    %12 = vector.multi_reduction <add>, %11, %cst_6 [1] : vector<2x16x8xf32> to vector<2x8xf32>
    %cst_7 = arith.constant 1.600000e+01 : f32
    %13 = vector.broadcast %cst_7 : f32 to vector<2x8xf32>
    %14 = arith.divf %12, %13 : vector<2x8xf32>
    %c0_8 = arith.constant 0 : index
    %c0_9 = arith.constant 0 : index
    %15 = vector.load %arg4[%c0_8, %c0_9] : memref<8x10xf32, #tpu.memory_space<vmem>>, vector<8x10xf32>
    %cst_10 = arith.constant dense<0.000000e+00> : vector<2x10xf32>
    %16 = tpu.matmul %14, %15, %cst_10 {dimension_numbers = #tpu.dot_dimension_numbers<[1], [0], [0], [1], [0, 0, 1, 1], [], []>} : vector<2x8xf32>, vector<8x10xf32>, vector<2x10xf32> -> vector<2x10xf32>
    %c0_11 = arith.constant 0 : index
    %c0_12 = arith.constant 0 : index
    %17 = vector.load %arg5[%c0_11, %c0_12] : memref<1x10xf32, #tpu.memory_space<vmem>>, vector<1x10xf32>
    %18 = vector.broadcast %17 : vector<1x10xf32> to vector<2x10xf32>
    %19 = arith.addf %16, %18 : vector<2x10xf32>
    %c0_13 = arith.constant 0 : index
    %c0_14 = arith.constant 0 : index
    %20 = vector.load %arg6[%c0_13, %c0_14] : memref<2x10xf32, #tpu.memory_space<vmem>>, vector<2x10xf32>
    tpu.vector_store %arg6[%c0_13, %c0_14], %19 {strides = array<i32>} : memref<2x10xf32, #tpu.memory_space<vmem>>, vector<2x10xf32>,
    return
  }
  func.func @transform_0(%arg0: i32) -> (i32, i32, i32) {
    %c0_i32 = arith.constant 0 : i32
    %c0_i32_0 = arith.constant 0 : i32
    %c0_i32_1 = arith.constant 0 : i32
    %c0_i32_2 = arith.constant 0 : i32
    return %c0_i32, %c0_i32_0, %c0_i32_1 : i32, i32, i32
  }
  func.func @transform_1(%arg0: i32) -> (i32, i32) {
    %c0_i32 = arith.constant 0 : i32
    %c0_i32_0 = arith.constant 0 : i32
    %c0_i32_1 = arith.constant 0 : i32
    return %c0_i32, %c0_i32_0 : i32, i32
  }
  func.func @transform_2(%arg0: i32) -> (i32, i32) {
    %c0_i32 = arith.constant 0 : i32
    %c0_i32_0 = arith.constant 0 : i32
    %c0_i32_1 = arith.constant 0 : i32
    return %c0_i32, %c0_i32_0 : i32, i32
  }
  func.func @transform_3(%arg0: i32) -> (i32, i32) {
    %c0_i32 = arith.constant 0 : i32
    %c0_i32_0 = arith.constant 0 : i32
    %c0_i32_1 = arith.constant 0 : i32
    return %c0_i32, %c0_i32_0 : i32, i32
  }
  func.func @transform_4(%arg0: i32) -> (i32, i32) {
    %c0_i32 = arith.constant 0 : i32
    %c0_i32_0 = arith.constant 0 : i32
    %c0_i32_1 = arith.constant 0 : i32
    return %c0_i32, %c0_i32_0 : i32, i32
  }
  func.func @transform_5(%arg0: i32) -> (i32, i32) {
    %c0_i32 = arith.constant 0 : i32
    %c0_i32_0 = arith.constant 0 : i32
    %c0_i32_1 = arith.constant 0 : i32
    return %c0_i32, %c0_i32_0 : i32, i32
  }
}

</mosaic_0001>

<bundles_post_ra>
// kernel: forward.19
= control target key start
LH: loop header
LB: loop body
LE: loop exit
PB: predicated region body
PF: predicated region fallthrough
CT: control target
= control target key end

     0   :  { %v1734_v0 = vmov 0   ;;  %vm446_vm0 = vcmask 154624   ;;  %vm543_vm1 = vcmask 1040384   ;;  %vm544_vm2 = vcmask 1041408   ;;  %s2409_s1 = inlined_call_operand.vmem [shape: bf16[147,16], index: 1, kind: input, shape index: {}]   ;;  %s2410_s0 = inlined_call_operand.vmem [shape: bf16[512,147], index: 0, kind: input, shape index: {}]   ;;  %s2411_s2 = inlined_call_operand.vmem [shape: f32[1,16], index: 2, kind: input, shape index: {}]   ;;  %s2412_s3 = inlined_call_operand.vmem [shape: f32[1,16], index: 3, kind: input, shape index: {}]   ;;  %s2413_s4 = inlined_call_operand.vmem [shape: bf16[512,16], index: 4, kind: output, shape index: {}]  }
   0x1   :  { %550 = vmatprep.subr.bf16.mxu0 %v1734_v0  ;;  %1606 = vmatprep.subr.bf16.mxu1 %v1734_v0  ;;  %v1628_v1 = vld [vmem:[%s2409_s1] sm:$0xff]   ;;  %v1629_v2 = vld [vmem:[%s2409_s1 + $0x8] sm:$0xff]   ;;  %v1630_v3 = vld [vmem:[%s2409_s1 + $0x10] sm:$0xff]   ;;  %v1735_v11 = vmov 65535   ;;  %vm1301_vm3 = vcmask 125952  }
   0x2   :  { %551 = vmatpush1.bf16.msra.mxu0 %v1628_v1  ;;  %1616 = vmatpush1.bf16.msra.mxu1 %v1628_v1  ;;  %v1631_v4 = vld [vmem:[%s2409_s1 + $0x18] sm:$0xff]   ;;  %v1640_v5 = vld [vmem:[%s2410_s0 + $0x4] ss:$8 sps:$4 sm:$0xff]   ;;  %v1634_v9 = vld [vmem:[%s2409_s1 + $0x30] sm:$0xff]   ;;  %v545_v12 = vsel %vm543_vm1, 4294967295, %v1735_v11 }
   0x3   :  { %552 = vmatprep.subr.bf16.mxu0 %v1734_v0  ;;  %1607 = vmatprep.subr.bf16.mxu1 %v1734_v0  ;;  %v1643_v6 = vld [vmem:[%s2410_s0 + $0x104] ss:$8 sps:$4 sm:$0xff]   ;;  %v1635_v10 = vld [vmem:[%s2409_s1 + $0x38] sm:$0xff]   ;;  %v1637_v14 = vld [vmem:[%s2409_s1 + $0x48] ss:$0 sps:$4 sm:$0x33]  }
   0x4   :  { %1444 = vmatprep.mubr.msk.bf16.mxu0 %vm446_vm0, %v1640_v5  ;;  %v1632_v7 = vld [vmem:[%s2409_s1 + $0x20] sm:$0xff]   ;;  %1460 = vmatprep.mubr.msk.bf16.mxu1 %vm446_vm0, %v1643_v6  ;;  %v1633_v8 = vld [vmem:[%s2409_s1 + $0x28] sm:$0xff]   ;;  %v546_v15 = vsel %vm544_vm2, %v545_v12, 0  ;;  %v1644_v19 = vld [vmem:[%s2410_s0 + $0x14] ss:$8 sps:$4 sm:$0xff]  }
   0x5   :  { %v1636_v13 = vld [vmem:[%s2409_s1 + $0x40] sm:$0xff]   ;;  %v548_v16 = vand.u32 %v1637_v14, %v546_v15  ;;  %v1646_v20 = vld [vmem:[%s2410_s0 + $0x114] ss:$8 sps:$4 sm:$0xff]   ;;  %v1648_v21 = vld [vmem:[%s2410_s0 + $0x10] ss:$8 sps:$4 sm:$0xff]  }
   0x6   :  { %553 = vmatpush1.bf16.msra.mxu0 %v1629_v2  ;;  %1617 = vmatpush1.bf16.msra.mxu1 %v1629_v2  ;;  %v1638_v17 = vld [vmem:[%s2410_s0] ss:$8 sps:$4 sm:$0xff]   ;;  %v1649_v22 = vld [vmem:[%s2410_s0 + $0x110] ss:$8 sps:$4 sm:$0xff]   ;;  %v1650_v23 = vld [vmem:[%s2410_s0 + $0x24] ss:$8 sps:$4 sm:$0xff]  }
   0x7   :  { %554 = vmatprep.subr.bf16.mxu0 %v1734_v0  ;;  %1608 = vmatprep.subr.bf16.mxu1 %v1734_v0  ;;  %v1641_v18 = vld [vmem:[%s2410_s0 + $0x100] ss:$8 sps:$4 sm:$0xff]   ;;  %v1652_v24 = vld [vmem:[%s2410_s0 + $0x124] ss:$8 sps:$4 sm:$0xff]   ;;  %v1656_v27 = vld [vmem:[%s2410_s0 + $0x34] ss:$8 sps:$4 sm:$0xff]  }
   0x8   :  { %v1654_v25 = vld [vmem:[%s2410_s0 + $0x20] ss:$8 sps:$4 sm:$0xff]   ;;  %v1658_v28 = vld [vmem:[%s2410_s0 + $0x134] ss:$8 sps:$4 sm:$0xff]   ;;  %v1660_v29 = vld [vmem:[%s2410_s0 + $0x30] ss:$8 sps:$4 sm:$0xff]  }
   0x9   :  { %v1655_v26 = vld [vmem:[%s2410_s0 + $0x120] ss:$8 sps:$4 sm:$0xff]   ;;  %v1661_v30 = vld [vmem:[%s2410_s0 + $0x130] ss:$8 sps:$4 sm:$0xff]   ;;  %v1662_v31 = vld [vmem:[%s2410_s0 + $0x44] ss:$8 sps:$4 sm:$0xff]  }
   0xa   :  { %555 = vmatpush1.bf16.msra.mxu0 %v1630_v3  ;;  %1618 = vmatpush1.bf16.msra.mxu1 %v1630_v3  ;;  %v1664_v32 = vld [vmem:[%s2410_s0 + $0x144] ss:$8 sps:$4 sm:$0xff]   ;;  %v1666_v33 = vld [vmem:[%s2410_s0 + $0x40] ss:$8 sps:$4 sm:$0xff]   ;;  %v1668_v35 = vld [vmem:[%s2410_s0 + $0x54] ss:$8 sps:$4 sm:$0xff]  }
   0xb   :  { %556 = vmatprep.subr.bf16.mxu0 %v1734_v0  ;;  %1609 = vmatprep.subr.bf16.mxu1 %v1734_v0  ;;  %v1667_v34 = vld [vmem:[%s2410_s0 + $0x140] ss:$8 sps:$4 sm:$0xff]   ;;  %v1670_v36 = vld [vmem:[%s2410_s0 + $0x154] ss:$8 sps:$4 sm:$0xff]   ;;  %v1672_v37 = vld [vmem:[%s2410_s0 + $0x50] ss:$8 sps:$4 sm:$0xff]  }
   0xc   :  { %v1673_v38 = vld [vmem:[%s2410_s0 + $0x150] ss:$8 sps:$4 sm:$0xff]   ;;  %v1674_v39 = vld [vmem:[%s2410_s0 + $0x64] ss:$8 sps:$4 sm:$0xff]   ;;  %v1678_v41 = vld [vmem:[%s2410_s0 + $0x60] ss:$8 sps:$4 sm:$0xff]  }
   0xd   :  { %v1676_v40 = vld [vmem:[%s2410_s0 + $0x164] ss:$8 sps:$4 sm:$0xff]   ;;  %v1679_v42 = vld [vmem:[%s2410_s0 + $0x160] ss:$8 sps:$4 sm:$0xff]   ;;  %v1680_v43 = vld [vmem:[%s2410_s0 + $0x74] ss:$8 sps:$4 sm:$0xff]  }
   0xe   :  { %557 = vmatpush1.bf16.msra.mxu0 %v1631_v4  ;;  %1619 = vmatpush1.bf16.msra.mxu1 %v1631_v4  ;;  %v1682_v44 = vld [vmem:[%s2410_s0 + $0x174] ss:$8 sps:$4 sm:$0xff]   ;;  %v1684_v45 = vld [vmem:[%s2410_s0 + $0x70] ss:$8 sps:$4 sm:$0xff]   ;;  %v1686_v47 = vld [vmem:[%s2410_s0 + $0x84] ss:$8 sps:$4 sm:$0xff]  }
   0xf   :  { %558 = vmatprep.subr.bf16.mxu0 %v1734_v0  ;;  %1610 = vmatprep.subr.bf16.mxu1 %v1734_v0  ;;  %v1685_v46 = vld [vmem:[%s2410_s0 + $0x170] ss:$8 sps:$4 sm:$0xff]   ;;  %v1688_v48 = vld [vmem:[%s2410_s0 + $0x184] ss:$8 sps:$4 sm:$0xff]   ;;  %v1690_v49 = vld [vmem:[%s2410_s0 + $0x80] ss:$8 sps:$4 sm:$0xff]  }
  0x10   :  { %v1691_v50 = vld [vmem:[%s2410_s0 + $0x180] ss:$8 sps:$4 sm:$0xff]   ;;  %v1692_v51 = vld [vmem:[%s2410_s0 + $0x94] ss:$8 sps:$4 sm:$0xff]   ;;  %v1696_v53 = vld [vmem:[%s2410_s0 + $0x90] ss:$8 sps:$4 sm:$0xff]  }
  0x11   :  { %v1694_v52 = vld [vmem:[%s2410_s0 + $0x194] ss:$8 sps:$4 sm:$0xff]   ;;  %v1697_v54 = vld [vmem:[%s2410_s0 + $0x190] ss:$8 sps:$4 sm:$0xff]   ;;  %v1698_v55 = vld [vmem:[%s2410_s0 + $0xa4] ss:$8 sps:$4 sm:$0xff]  }
  0x12   :  { %559 = vmatpush1.bf16.msra.mxu0 %v1632_v7  ;;  %1620 = vmatpush1.bf16.msra.mxu1 %v1632_v7  ;;  %v1700_v56 = vld [vmem:[%s2410_s0 + $0x1a4] ss:$8 sps:$4 sm:$0xff]   ;;  %v1702_v57 = vld [vmem:[%s2410_s0 + $0xa0] ss:$8 sps:$4 sm:$0xff]   ;;  %v1704_v59 = vld [vmem:[%s2410_s0 + $0xb4] ss:$8 sps:$4 sm:$0xff]  }
  0x13   :  { %560 = vmatprep.subr.bf16.mxu0 %v1734_v0  ;;  %1611 = vmatprep.subr.bf16.mxu1 %v1734_v0  ;;  %v1703_v58 = vld [vmem:[%s2410_s0 + $0x1a0] ss:$8 sps:$4 sm:$0xff]   ;;  %v1706_v60 = vld [vmem:[%s2410_s0 + $0x1b4] ss:$8 sps:$4 sm:$0xff]   ;;  %v1708_v61 = vld [vmem:[%s2410_s0 + $0xb0] ss:$8 sps:$4 sm:$0xff]  }
  0x14   :  { %v1709_v62 = vld [vmem:[%s2410_s0 + $0x1b0] ss:$8 sps:$4 sm:$0xff]   ;;  %v1710_v63 = vld [vmem:[%s2410_s0 + $0xc4] ss:$8 sps:$4 sm:$0xff]   ;;  %v1714_v1 = vld [vmem:[%s2410_s0 + $0xc0] ss:$8 sps:$4 sm:$0xff]  }
  0x15   :  { %v1715_v2 = vld [vmem:[%s2410_s0 + $0x1c0] ss:$8 sps:$4 sm:$0xff]   ;;  %v1716_v3 = vld [vmem:[%s2410_s0 + $0xd4] ss:$8 sps:$4 sm:$0xff]   ;;  %v1720_v5 = vld [vmem:[%s2410_s0 + $0xd0] ss:$8 sps:$4 sm:$0xff]  }
  0x16   :  { %561 = vmatpush1.bf16.msra.mxu0 %v1633_v8  ;;  %1621 = vmatpush1.bf16.msra.mxu1 %v1633_v8  ;;  %v1718_v4 = vld [vmem:[%s2410_s0 + $0x1d4] ss:$8 sps:$4 sm:$0xff]   ;;  %v1721_v6 = vld [vmem:[%s2410_s0 + $0x1d0] ss:$8 sps:$4 sm:$0xff]   ;;  %v1722_v7 = vld [vmem:[%s2410_s0 + $0xe4] ss:$8 sps:$4 sm:$0xff]  }
  0x17   :  { %562 = vmatprep.subr.bf16.mxu0 %v1734_v0  ;;  %1612 = vmatprep.subr.bf16.mxu1 %v1734_v0  ;;  %v1724_v8 = vld [vmem:[%s2410_s0 + $0x1e4] ss:$8 sps:$4 sm:$0xff]   ;;  %v1728_v11 = vld [vmem:[%s2410_s0 + $0xf4] ss:$8 sps:$4 sm:$0xff]   ;;  %v1733_v14 = vld [vmem:[%s2410_s0 + $0x1f0] ss:$8 sps:$4 sm:$0xff]  }
  0x18   :  { %v1730_v12 = vld [vmem:[%s2410_s0 + $0x1f4] ss:$8 sps:$4 sm:$0xff]   ;;  %v2018_v15 = vld [vmem:[%s2411_s2] ss:$0 sm:$0xff] }
  0x1a   :  { %563 = vmatpush1.bf16.msra.mxu0 %v1634_v9  ;;  %1622 = vmatpush1.bf16.msra.mxu1 %v1634_v9  ;;  %v1726_v9 = vld [vmem:[%s2410_s0 + $0xe0] ss:$8 sps:$4 sm:$0xff]  }
  0x1b   :  { %564 = vmatprep.subr.bf16.mxu0 %v1734_v0  ;;  %1613 = vmatprep.subr.bf16.mxu1 %v1734_v0 }
  0x1e   :  { %565 = vmatpush1.bf16.msra.mxu0 %v1635_v10  ;;  %1623 = vmatpush1.bf16.msra.mxu1 %v1635_v10  ;;  %v1727_v10 = vld [vmem:[%s2410_s0 + $0x1e0] ss:$8 sps:$4 sm:$0xff]  }
  0x1f   :  { %566 = vmatprep.subr.bf16.mxu0 %v1734_v0  ;;  %1614 = vmatprep.subr.bf16.mxu1 %v1734_v0 }
  0x22   :  { %567 = vmatpush1.bf16.msra.mxu0 %v1636_v13  ;;  %1624 = vmatpush1.bf16.msra.mxu1 %v1636_v13  ;;  %v1732_v13 = vld [vmem:[%s2410_s0 + $0xf0] ss:$8 sps:$4 sm:$0xff]  }
  0x23   :  { %568 = vmatprep.subr.bf16.mxu0 %v1734_v0  ;;  %1615 = vmatprep.subr.bf16.mxu1 %v1734_v0  ;;  %v1712_v0 = vld [vmem:[%s2410_s0 + $0x1c4] ss:$8 sps:$4 sm:$0xff]  }
  0x26   :  { %569 = vmatpush1.bf16.msra.mxu0 %v548_v16  ;;  %1625 = vmatpush1.bf16.msra.mxu1 %v548_v16 }
  0x29   :  { %583 = vmatmul.mubr.bf16.vlgmr.msra.gmra.mrb[0].mxu0 %v1638_v17  ;;  %711 = vmatmul.mubr.bf16.vlgmr.msra.gmra.mrb[0].mxu1 %v1641_v18  ;;  %v2023_v17 = vld [vmem:[%s2412_s3] ss:$0 sm:$0xff] }
  0x2a   :  { %1445 = vmatprep.mubr.msk.bf16.mxu0 %vm446_vm0, %v1644_v19  ;;  %1461 = vmatprep.mubr.msk.bf16.mxu1 %vm446_vm0, %v1646_v20 }
  0x31   :  { %591 = vmatmul.mubr.bf16.gmra.mrb[4].mxu0 %v1648_v21  ;;  %719 = vmatmul.mubr.bf16.gmra.mrb[4].mxu1 %v1649_v22 }
  0x32   :  { %1446 = vmatprep.mubr.msk.bf16.mxu0 %vm446_vm0, %v1650_v23  ;;  %1462 = vmatprep.mubr.msk.bf16.mxu1 %vm446_vm0, %v1652_v24 }
  0x39   :  { %599 = vmatmul.mubr.bf16.gmra.mrb[8].mxu0 %v1654_v25  ;;  %727 = vmatmul.mubr.bf16.gmra.mrb[8].mxu1 %v1655_v26 }
  0x3a   :  { %1447 = vmatprep.mubr.msk.bf16.mxu0 %vm446_vm0, %v1656_v27  ;;  %1463 = vmatprep.mubr.msk.bf16.mxu1 %vm446_vm0, %v1658_v28 }
  0x41   :  { %607 = vmatmul.mubr.bf16.gmra.mrb[12].mxu0 %v1660_v29  ;;  %735 = vmatmul.mubr.bf16.gmra.mrb[12].mxu1 %v1661_v30 }
  0x42   :  { %1448 = vmatprep.mubr.msk.bf16.mxu0 %vm446_vm0, %v1662_v31  ;;  %1464 = vmatprep.mubr.msk.bf16.mxu1 %vm446_vm0, %v1664_v32 }
  0x49   :  { %615 = vmatmul.mubr.bf16.gmra.mrb[16].mxu0 %v1666_v33  ;;  %743 = vmatmul.mubr.bf16.gmra.mrb[16].mxu1 %v1667_v34 }
  0x4a   :  { %1449 = vmatprep.mubr.msk.bf16.mxu0 %vm446_vm0, %v1668_v35  ;;  %1465 = vmatprep.mubr.msk.bf16.mxu1 %vm446_vm0, %v1670_v36 }
  0x51   :  { %623 = vmatmul.mubr.bf16.gmra.mrb[20].mxu0 %v1672_v37  ;;  %751 = vmatmul.mubr.bf16.gmra.mrb[20].mxu1 %v1673_v38 }
  0x52   :  { %1450 = vmatprep.mubr.msk.bf16.mxu0 %vm446_vm0, %v1674_v39  ;;  %1466 = vmatprep.mubr.msk.bf16.mxu1 %vm446_vm0, %v1676_v40 }
  0x59   :  { %631 = vmatmul.mubr.bf16.gmra.mrb[24].mxu0 %v1678_v41  ;;  %759 = vmatmul.mubr.bf16.gmra.mrb[24].mxu1 %v1679_v42 }
  0x5a   :  { %1451 = vmatprep.mubr.msk.bf16.mxu0 %vm446_vm0, %v1680_v43  ;;  %1467 = vmatprep.mubr.msk.bf16.mxu1 %vm446_vm0, %v1682_v44 }
  0x61   :  { %639 = vmatmul.mubr.bf16.gmra.mrb[28].mxu0 %v1684_v45  ;;  %767 = vmatmul.mubr.bf16.gmra.mrb[28].mxu1 %v1685_v46 }
  0x62   :  { %1452 = vmatprep.mubr.msk.bf16.mxu0 %vm446_vm0, %v1686_v47  ;;  %1468 = vmatprep.mubr.msk.bf16.mxu1 %vm446_vm0, %v1688_v48 }
  0x69   :  { %647 = vmatmul.mubr.bf16.gmra.mrb[32].mxu0 %v1690_v49  ;;  %775 = vmatmul.mubr.bf16.gmra.mrb[32].mxu1 %v1691_v50 }
  0x6a   :  { %1453 = vmatprep.mubr.msk.bf16.mxu0 %vm446_vm0, %v1692_v51  ;;  %1469 = vmatprep.mubr.msk.bf16.mxu1 %vm446_vm0, %v1694_v52 }
  0x71   :  { %655 = vmatmul.mubr.bf16.gmra.mrb[36].mxu0 %v1696_v53  ;;  %783 = vmatmul.mubr.bf16.gmra.mrb[36].mxu1 %v1697_v54 }
  0x72   :  { %1454 = vmatprep.mubr.msk.bf16.mxu0 %vm446_vm0, %v1698_v55  ;;  %1470 = vmatprep.mubr.msk.bf16.mxu1 %vm446_vm0, %v1700_v56 }
  0x79   :  { %663 = vmatmul.mubr.bf16.gmra.mrb[40].mxu0 %v1702_v57  ;;  %791 = vmatmul.mubr.bf16.gmra.mrb[40].mxu1 %v1703_v58 }
  0x7a   :  { %1455 = vmatprep.mubr.msk.bf16.mxu0 %vm446_vm0, %v1704_v59  ;;  %1471 = vmatprep.mubr.msk.bf16.mxu1 %vm446_vm0, %v1706_v60 }
  0x81   :  { %671 = vmatmul.mubr.bf16.gmra.mrb[44].mxu0 %v1708_v61  ;;  %799 = vmatmul.mubr.bf16.gmra.mrb[44].mxu1 %v1709_v62 }
  0x82   :  { %1456 = vmatprep.mubr.msk.bf16.mxu0 %vm446_vm0, %v1710_v63  ;;  %1472 = vmatprep.mubr.msk.bf16.mxu1 %vm446_vm0, %v1712_v0 }
  0x89   :  { %679 = vmatmul.mubr.bf16.gmra.mrb[48].mxu0 %v1714_v1  ;;  %807 = vmatmul.mubr.bf16.gmra.mrb[48].mxu1 %v1715_v2 }
  0x8a   :  { %1457 = vmatprep.mubr.msk.bf16.mxu0 %vm446_vm0, %v1716_v3  ;;  %1473 = vmatprep.mubr.msk.bf16.mxu1 %vm446_vm0, %v1718_v4 }
  0x91   :  { %687 = vmatmul.mubr.bf16.gmra.mrb[52].mxu0 %v1720_v5  ;;  %815 = vmatmul.mubr.bf16.gmra.mrb[52].mxu1 %v1721_v6 }
  0x92   :  { %1458 = vmatprep.mubr.msk.bf16.mxu0 %vm446_vm0, %v1722_v7  ;;  %1474 = vmatprep.mubr.msk.bf16.mxu1 %vm446_vm0, %v1724_v8 }
  0x99   :  { %695 = vmatmul.mubr.bf16.gmra.mrb[56].mxu0 %v1726_v9  ;;  %823 = vmatmul.mubr.bf16.gmra.mrb[56].mxu1 %v1727_v10 }
  0x9a   :  { %1459 = vmatprep.mubr.msk.bf16.mxu0 %vm446_vm0, %v1728_v11  ;;  %1475 = vmatprep.mubr.msk.bf16.mxu1 %vm446_vm0, %v1730_v12 }
  0xa1   :  { %703 = vmatmul.mubr.bf16.gmra.mrb[60].mxu0 %v1732_v13  ;;  %831 = vmatmul.mubr.bf16.gmra.mrb[60].mxu1 %v1733_v14 }
  0xfc   :  { %v584_v16 = vpop.f32.mrb[0].mxu0  ;;  %v712_v18 = vpop.f32.mrb[0].mxu1 }
  0xfd   :  { %v846_v19 = vmul.f32 %v2018_v15, %v584_v16  ;;  %v878_v20 = vmul.f32 %v2018_v15, %v712_v18  ;;  %v586_v21 = vpop.f32.mrb[1].mxu0  ;;  %v714_v22 = vpop.f32.mrb[1].mxu1 }
  0xfe   :  { %v587_v23 = vpop.f32.mrb[2].mxu0  ;;  %v715_v24 = vpop.f32.mrb[2].mxu1 }
  0xff   :  { %v917_v25 = vadd.f32 %v2023_v17, %v846_v19  ;;  %v949_v26 = vadd.f32 %v2023_v17, %v878_v20  ;;  %v847_v27 = vmul.f32 %v2018_v15, %v587_v23  ;;  %v879_v28 = vmul.f32 %v2018_v15, %v715_v24  ;;  %v589_v29 = vpop.f32.mrb[3].mxu0  ;;  %v717_v30 = vpop.f32.mrb[3].mxu1 }
 0x101   :  { %v981_v31 = vmax.f32 %v917_v25, 0.0  ;;  %v1013_v32 = vmax.f32 %v949_v26, 0.0  ;;  %v918_v33 = vadd.f32 %v2023_v17, %v847_v27  ;;  %v950_v34 = vadd.f32 %v2023_v17, %v879_v28 }
 0x103   :  { %v1542_v35 = vpack.c.bf16 %v981_v31, %v981_v31  ;;  %v1574_v36 = vpack.c.bf16 %v1013_v32, %v1013_v32  ;;  %v982_v37 = vmax.f32 %v918_v33, 0.0  ;;  %v1014_v38 = vmax.f32 %v950_v34, 0.0 }
 0x104   :  { %v592_v39 = vpop.f32.mrb[4].mxu0  ;;  %v720_v40 = vpop.f32.mrb[4].mxu1 }
 0x105   :  { %1302 = vst.msk [vmem:[%s2413_s4] sm:$0xf] %vm1301_vm3, %v1542_v35  ;;  %1334 = vst.msk [vmem:[%s2413_s4 + $0x80] sm:$0xf] %vm1301_vm3, %v1574_v36  ;;  %v1543_v41 = vpack.c.bf16 %v982_v37, %v982_v37  ;;  %v1575_v42 = vpack.c.bf16 %v1014_v38, %v1014_v38  ;;  %v848_v43 = vmul.f32 %v2018_v15, %v592_v39  ;;  %v594_v45 = vpop.f32.mrb[5].mxu0  ;;  %v722_v46 = vpop.f32.mrb[5].mxu1 }
 0x106   :  { %v880_v44 = vmul.f32 %v2018_v15, %v720_v40  ;;  %v595_v47 = vpop.f32.mrb[6].mxu0  ;;  %v723_v48 = vpop.f32.mrb[6].mxu1 }
 0x107   :  { %1303 = vst.msk [vmem:[%s2413_s4 + $0x4] sm:$0xf] %vm1301_vm3, %v1543_v41  ;;  %1335 = vst.msk [vmem:[%s2413_s4 + $0x84] sm:$0xf] %vm1301_vm3, %v1575_v42  ;;  %v919_v49 = vadd.f32 %v2023_v17, %v848_v43  ;;  %v849_v51 = vmul.f32 %v2018_v15, %v595_v47  ;;  %v881_v52 = vmul.f32 %v2018_v15, %v723_v48  ;;  %v597_v53 = vpop.f32.mrb[7].mxu0  ;;  %v725_v54 = vpop.f32.mrb[7].mxu1 }
 0x108   :  { %v951_v50 = vadd.f32 %v2023_v17, %v880_v44 }
 0x109   :  { %v983_v55 = vmax.f32 %v919_v49, 0.0  ;;  %v920_v57 = vadd.f32 %v2023_v17, %v849_v51  ;;  %v952_v58 = vadd.f32 %v2023_v17, %v881_v52 }
 0x10a   :  { %v1015_v56 = vmax.f32 %v951_v50, 0.0 }
 0x10b   :  { %v1544_v59 = vpack.c.bf16 %v983_v55, %v983_v55  ;;  %v984_v61 = vmax.f32 %v920_v57, 0.0  ;;  %v1016_v62 = vmax.f32 %v952_v58, 0.0 }
 0x10c   :  { %v1576_v60 = vpack.c.bf16 %v1015_v56, %v1015_v56  ;;  %v600_v63 = vpop.f32.mrb[8].mxu0  ;;  %v728_v0 = vpop.f32.mrb[8].mxu1 }
 0x10d   :  { %1304 = vst.msk [vmem:[%s2413_s4 + $0x8] sm:$0xf] %vm1301_vm3, %v1544_v59  ;;  %v1545_v1 = vpack.c.bf16 %v984_v61, %v984_v61  ;;  %v1577_v2 = vpack.c.bf16 %v1016_v62, %v1016_v62  ;;  %v850_v3 = vmul.f32 %v2018_v15, %v600_v63  ;;  %v882_v4 = vmul.f32 %v2018_v15, %v728_v0  ;;  %v602_v5 = vpop.f32.mrb[9].mxu0  ;;  %v730_v6 = vpop.f32.mrb[9].mxu1 }
 0x10e   :  { %1336 = vst.msk [vmem:[%s2413_s4 + $0x88] sm:$0xf] %vm1301_vm3, %v1576_v60  ;;  %v603_v7 = vpop.f32.mrb[10].mxu0  ;;  %v731_v8 = vpop.f32.mrb[10].mxu1 }
 0x10f   :  { %1305 = vst.msk [vmem:[%s2413_s4 + $0xc] sm:$0xf] %vm1301_vm3, %v1545_v1  ;;  %1337 = vst.msk [vmem:[%s2413_s4 + $0x8c] sm:$0xf] %vm1301_vm3, %v1577_v2  ;;  %v921_v9 = vadd.f32 %v2023_v17, %v850_v3  ;;  %v953_v10 = vadd.f32 %v2023_v17, %v882_v4  ;;  %v851_v11 = vmul.f32 %v2018_v15, %v603_v7  ;;  %v605_v13 = vpop.f32.mrb[11].mxu0  ;;  %v733_v14 = vpop.f32.mrb[11].mxu1 }
 0x110   :  { %v883_v12 = vmul.f32 %v2018_v15, %v731_v8 }
 0x111   :  { %v985_v16 = vmax.f32 %v921_v9, 0.0  ;;  %v1017_v18 = vmax.f32 %v953_v10, 0.0  ;;  %v922_v19 = vadd.f32 %v2023_v17, %v851_v11 }
 0x112   :  { %v954_v20 = vadd.f32 %v2023_v17, %v883_v12 }
 0x113   :  { %v1546_v21 = vpack.c.bf16 %v985_v16, %v985_v16  ;;  %v1578_v22 = vpack.c.bf16 %v1017_v18, %v1017_v18  ;;  %v986_v23 = vmax.f32 %v922_v19, 0.0 }
 0x114   :  { %v1018_v24 = vmax.f32 %v954_v20, 0.0  ;;  %v608_v25 = vpop.f32.mrb[12].mxu0  ;;  %v736_v26 = vpop.f32.mrb[12].mxu1 }
 0x115   :  { %1306 = vst.msk [vmem:[%s2413_s4 + $0x10] sm:$0xf] %vm1301_vm3, %v1546_v21  ;;  %1338 = vst.msk [vmem:[%s2413_s4 + $0x90] sm:$0xf] %vm1301_vm3, %v1578_v22  ;;  %v1547_v27 = vpack.c.bf16 %v986_v23, %v986_v23  ;;  %v852_v29 = vmul.f32 %v2018_v15, %v608_v25  ;;  %v884_v30 = vmul.f32 %v2018_v15, %v736_v26  ;;  %v610_v31 = vpop.f32.mrb[13].mxu0  ;;  %v738_v32 = vpop.f32.mrb[13].mxu1 }
 0x116   :  { %v1579_v28 = vpack.c.bf16 %v1018_v24, %v1018_v24  ;;  %v611_v33 = vpop.f32.mrb[14].mxu0  ;;  %v739_v34 = vpop.f32.mrb[14].mxu1 }
 0x117   :  { %1307 = vst.msk [vmem:[%s2413_s4 + $0x14] sm:$0xf] %vm1301_vm3, %v1547_v27  ;;  %v923_v35 = vadd.f32 %v2023_v17, %v852_v29  ;;  %v955_v36 = vadd.f32 %v2023_v17, %v884_v30  ;;  %v853_v37 = vmul.f32 %v2018_v15, %v611_v33  ;;  %v885_v38 = vmul.f32 %v2018_v15, %v739_v34  ;;  %v613_v39 = vpop.f32.mrb[15].mxu0  ;;  %v741_v40 = vpop.f32.mrb[15].mxu1 }
 0x118   :  { %1339 = vst.msk [vmem:[%s2413_s4 + $0x94] sm:$0xf] %vm1301_vm3, %v1579_v28 }
 0x119   :  { %v987_v41 = vmax.f32 %v923_v35, 0.0  ;;  %v1019_v42 = vmax.f32 %v955_v36, 0.0  ;;  %v924_v43 = vadd.f32 %v2023_v17, %v853_v37  ;;  %v956_v44 = vadd.f32 %v2023_v17, %v885_v38 }
 0x11b   :  { %v1548_v45 = vpack.c.bf16 %v987_v41, %v987_v41  ;;  %v1580_v46 = vpack.c.bf16 %v1019_v42, %v1019_v42  ;;  %v988_v47 = vmax.f32 %v924_v43, 0.0  ;;  %v1020_v48 = vmax.f32 %v956_v44, 0.0 }
 0x11c   :  { %v616_v49 = vpop.f32.mrb[16].mxu0  ;;  %v744_v50 = vpop.f32.mrb[16].mxu1 }
 0x11d   :  { %1308 = vst.msk [vmem:[%s2413_s4 + $0x18] sm:$0xf] %vm1301_vm3, %v1548_v45  ;;  %1340 = vst.msk [vmem:[%s2413_s4 + $0x98] sm:$0xf] %vm1301_vm3, %v1580_v46  ;;  %v1549_v51 = vpack.c.bf16 %v988_v47, %v988_v47  ;;  %v1581_v52 = vpack.c.bf16 %v1020_v48, %v1020_v48  ;;  %v854_v53 = vmul.f32 %v2018_v15, %v616_v49  ;;  %v618_v55 = vpop.f32.mrb[17].mxu0  ;;  %v746_v56 = vpop.f32.mrb[17].mxu1 }
 0x11e   :  { %v886_v54 = vmul.f32 %v2018_v15, %v744_v50  ;;  %v619_v57 = vpop.f32.mrb[18].mxu0  ;;  %v747_v58 = vpop.f32.mrb[18].mxu1 }
 0x11f   :  { %1309 = vst.msk [vmem:[%s2413_s4 + $0x1c] sm:$0xf] %vm1301_vm3, %v1549_v51  ;;  %1341 = vst.msk [vmem:[%s2413_s4 + $0x9c] sm:$0xf] %vm1301_vm3, %v1581_v52  ;;  %v925_v59 = vadd.f32 %v2023_v17, %v854_v53  ;;  %v855_v61 = vmul.f32 %v2018_v15, %v619_v57  ;;  %v887_v62 = vmul.f32 %v2018_v15, %v747_v58  ;;  %v621_v63 = vpop.f32.mrb[19].mxu0  ;;  %v749_v0 = vpop.f32.mrb[19].mxu1 }
 0x120   :  { %v957_v60 = vadd.f32 %v2023_v17, %v886_v54 }
 0x121   :  { %v989_v1 = vmax.f32 %v925_v59, 0.0  ;;  %v926_v3 = vadd.f32 %v2023_v17, %v855_v61  ;;  %v958_v4 = vadd.f32 %v2023_v17, %v887_v62 }
 0x122   :  { %v1021_v2 = vmax.f32 %v957_v60, 0.0 }
 0x123   :  { %v1550_v5 = vpack.c.bf16 %v989_v1, %v989_v1  ;;  %v990_v7 = vmax.f32 %v926_v3, 0.0  ;;  %v1022_v8 = vmax.f32 %v958_v4, 0.0 }
 0x124   :  { %v1582_v6 = vpack.c.bf16 %v1021_v2, %v1021_v2  ;;  %v624_v9 = vpop.f32.mrb[20].mxu0  ;;  %v752_v10 = vpop.f32.mrb[20].mxu1 }
 0x125   :  { %1310 = vst.msk [vmem:[%s2413_s4 + $0x20] sm:$0xf] %vm1301_vm3, %v1550_v5  ;;  %v1551_v11 = vpack.c.bf16 %v990_v7, %v990_v7  ;;  %v1583_v12 = vpack.c.bf16 %v1022_v8, %v1022_v8  ;;  %v856_v13 = vmul.f32 %v2018_v15, %v624_v9  ;;  %v888_v14 = vmul.f32 %v2018_v15, %v752_v10  ;;  %v626_v16 = vpop.f32.mrb[21].mxu0  ;;  %v754_v18 = vpop.f32.mrb[21].mxu1 }
 0x126   :  { %1342 = vst.msk [vmem:[%s2413_s4 + $0xa0] sm:$0xf] %vm1301_vm3, %v1582_v6  ;;  %v627_v19 = vpop.f32.mrb[22].mxu0  ;;  %v755_v20 = vpop.f32.mrb[22].mxu1 }
 0x127   :  { %1311 = vst.msk [vmem:[%s2413_s4 + $0x24] sm:$0xf] %vm1301_vm3, %v1551_v11  ;;  %1343 = vst.msk [vmem:[%s2413_s4 + $0xa4] sm:$0xf] %vm1301_vm3, %v1583_v12  ;;  %v927_v21 = vadd.f32 %v2023_v17, %v856_v13  ;;  %v959_v22 = vadd.f32 %v2023_v17, %v888_v14  ;;  %v857_v23 = vmul.f32 %v2018_v15, %v627_v19  ;;  %v629_v25 = vpop.f32.mrb[23].mxu0  ;;  %v757_v26 = vpop.f32.mrb[23].mxu1 }
 0x128   :  { %v889_v24 = vmul.f32 %v2018_v15, %v755_v20 }
 0x129   :  { %v991_v27 = vmax.f32 %v927_v21, 0.0  ;;  %v1023_v28 = vmax.f32 %v959_v22, 0.0  ;;  %v928_v29 = vadd.f32 %v2023_v17, %v857_v23 }
 0x12a   :  { %v960_v30 = vadd.f32 %v2023_v17, %v889_v24 }
 0x12b   :  { %v1552_v31 = vpack.c.bf16 %v991_v27, %v991_v27  ;;  %v1584_v32 = vpack.c.bf16 %v1023_v28, %v1023_v28  ;;  %v992_v33 = vmax.f32 %v928_v29, 0.0 }
 0x12c   :  { %v1024_v34 = vmax.f32 %v960_v30, 0.0  ;;  %v632_v35 = vpop.f32.mrb[24].mxu0  ;;  %v760_v36 = vpop.f32.mrb[24].mxu1 }
 0x12d   :  { %1312 = vst.msk [vmem:[%s2413_s4 + $0x28] sm:$0xf] %vm1301_vm3, %v1552_v31  ;;  %1344 = vst.msk [vmem:[%s2413_s4 + $0xa8] sm:$0xf] %vm1301_vm3, %v1584_v32  ;;  %v1553_v37 = vpack.c.bf16 %v992_v33, %v992_v33  ;;  %v858_v39 = vmul.f32 %v2018_v15, %v632_v35  ;;  %v890_v40 = vmul.f32 %v2018_v15, %v760_v36  ;;  %v634_v41 = vpop.f32.mrb[25].mxu0  ;;  %v762_v42 = vpop.f32.mrb[25].mxu1 }
 0x12e   :  { %v1585_v38 = vpack.c.bf16 %v1024_v34, %v1024_v34  ;;  %v635_v43 = vpop.f32.mrb[26].mxu0  ;;  %v763_v44 = vpop.f32.mrb[26].mxu1 }
 0x12f   :  { %1313 = vst.msk [vmem:[%s2413_s4 + $0x2c] sm:$0xf] %vm1301_vm3, %v1553_v37  ;;  %v929_v45 = vadd.f32 %v2023_v17, %v858_v39  ;;  %v961_v46 = vadd.f32 %v2023_v17, %v890_v40  ;;  %v859_v47 = vmul.f32 %v2018_v15, %v635_v43  ;;  %v891_v48 = vmul.f32 %v2018_v15, %v763_v44  ;;  %v637_v49 = vpop.f32.mrb[27].mxu0  ;;  %v765_v50 = vpop.f32.mrb[27].mxu1 }
 0x130   :  { %1345 = vst.msk [vmem:[%s2413_s4 + $0xac] sm:$0xf] %vm1301_vm3, %v1585_v38 }
 0x131   :  { %v993_v51 = vmax.f32 %v929_v45, 0.0  ;;  %v1025_v52 = vmax.f32 %v961_v46, 0.0  ;;  %v930_v53 = vadd.f32 %v2023_v17, %v859_v47  ;;  %v962_v54 = vadd.f32 %v2023_v17, %v891_v48 }
 0x133   :  { %v1554_v55 = vpack.c.bf16 %v993_v51, %v993_v51  ;;  %v1586_v56 = vpack.c.bf16 %v1025_v52, %v1025_v52  ;;  %v994_v57 = vmax.f32 %v930_v53, 0.0  ;;  %v1026_v58 = vmax.f32 %v962_v54, 0.0 }
 0x134   :  { %v640_v59 = vpop.f32.mrb[28].mxu0  ;;  %v768_v60 = vpop.f32.mrb[28].mxu1 }
 0x135   :  { %1314 = vst.msk [vmem:[%s2413_s4 + $0x30] sm:$0xf] %vm1301_vm3, %v1554_v55  ;;  %1346 = vst.msk [vmem:[%s2413_s4 + $0xb0] sm:$0xf] %vm1301_vm3, %v1586_v56  ;;  %v1555_v61 = vpack.c.bf16 %v994_v57, %v994_v57  ;;  %v1587_v62 = vpack.c.bf16 %v1026_v58, %v1026_v58  ;;  %v860_v63 = vmul.f32 %v2018_v15, %v640_v59  ;;  %v642_v1 = vpop.f32.mrb[29].mxu0  ;;  %v770_v2 = vpop.f32.mrb[29].mxu1 }
 0x136   :  { %v892_v0 = vmul.f32 %v2018_v15, %v768_v60  ;;  %v643_v3 = vpop.f32.mrb[30].mxu0  ;;  %v771_v4 = vpop.f32.mrb[30].mxu1 }
 0x137   :  { %1315 = vst.msk [vmem:[%s2413_s4 + $0x34] sm:$0xf] %vm1301_vm3, %v1555_v61  ;;  %1347 = vst.msk [vmem:[%s2413_s4 + $0xb4] sm:$0xf] %vm1301_vm3, %v1587_v62  ;;  %v931_v5 = vadd.f32 %v2023_v17, %v860_v63  ;;  %v861_v7 = vmul.f32 %v2018_v15, %v643_v3  ;;  %v893_v8 = vmul.f32 %v2018_v15, %v771_v4  ;;  %v645_v9 = vpop.f32.mrb[31].mxu0  ;;  %v773_v10 = vpop.f32.mrb[31].mxu1 }
 0x138   :  { %v963_v6 = vadd.f32 %v2023_v17, %v892_v0 }
 0x139   :  { %v995_v11 = vmax.f32 %v931_v5, 0.0  ;;  %v932_v13 = vadd.f32 %v2023_v17, %v861_v7  ;;  %v964_v14 = vadd.f32 %v2023_v17, %v893_v8 }
 0x13a   :  { %v1027_v12 = vmax.f32 %v963_v6, 0.0 }
 0x13b   :  { %v1556_v16 = vpack.c.bf16 %v995_v11, %v995_v11  ;;  %v996_v19 = vmax.f32 %v932_v13, 0.0  ;;  %v1028_v20 = vmax.f32 %v964_v14, 0.0 }
 0x13c   :  { %v1588_v18 = vpack.c.bf16 %v1027_v12, %v1027_v12  ;;  %v648_v21 = vpop.f32.mrb[32].mxu0  ;;  %v776_v22 = vpop.f32.mrb[32].mxu1 }
 0x13d   :  { %1316 = vst.msk [vmem:[%s2413_s4 + $0x38] sm:$0xf] %vm1301_vm3, %v1556_v16  ;;  %v1557_v23 = vpack.c.bf16 %v996_v19, %v996_v19  ;;  %v1589_v24 = vpack.c.bf16 %v1028_v20, %v1028_v20  ;;  %v862_v25 = vmul.f32 %v2018_v15, %v648_v21  ;;  %v894_v26 = vmul.f32 %v2018_v15, %v776_v22  ;;  %v650_v27 = vpop.f32.mrb[33].mxu0  ;;  %v778_v28 = vpop.f32.mrb[33].mxu1 }
 0x13e   :  { %1348 = vst.msk [vmem:[%s2413_s4 + $0xb8] sm:$0xf] %vm1301_vm3, %v1588_v18  ;;  %v651_v29 = vpop.f32.mrb[34].mxu0  ;;  %v779_v30 = vpop.f32.mrb[34].mxu1 }
 0x13f   :  { %1317 = vst.msk [vmem:[%s2413_s4 + $0x3c] sm:$0xf] %vm1301_vm3, %v1557_v23  ;;  %1349 = vst.msk [vmem:[%s2413_s4 + $0xbc] sm:$0xf] %vm1301_vm3, %v1589_v24  ;;  %v933_v31 = vadd.f32 %v2023_v17, %v862_v25  ;;  %v965_v32 = vadd.f32 %v2023_v17, %v894_v26  ;;  %v863_v33 = vmul.f32 %v2018_v15, %v651_v29  ;;  %v653_v35 = vpop.f32.mrb[35].mxu0  ;;  %v781_v36 = vpop.f32.mrb[35].mxu1 }
 0x140   :  { %v895_v34 = vmul.f32 %v2018_v15, %v779_v30 }
 0x141   :  { %v997_v37 = vmax.f32 %v933_v31, 0.0  ;;  %v1029_v38 = vmax.f32 %v965_v32, 0.0  ;;  %v934_v39 = vadd.f32 %v2023_v17, %v863_v33 }
 0x142   :  { %v966_v40 = vadd.f32 %v2023_v17, %v895_v34 }
 0x143   :  { %v1558_v41 = vpack.c.bf16 %v997_v37, %v997_v37  ;;  %v1590_v42 = vpack.c.bf16 %v1029_v38, %v1029_v38  ;;  %v998_v43 = vmax.f32 %v934_v39, 0.0 }
 0x144   :  { %v1030_v44 = vmax.f32 %v966_v40, 0.0  ;;  %v656_v45 = vpop.f32.mrb[36].mxu0  ;;  %v784_v46 = vpop.f32.mrb[36].mxu1 }
 0x145   :  { %1318 = vst.msk [vmem:[%s2413_s4 + $0x40] sm:$0xf] %vm1301_vm3, %v1558_v41  ;;  %1350 = vst.msk [vmem:[%s2413_s4 + $0xc0] sm:$0xf] %vm1301_vm3, %v1590_v42  ;;  %v1559_v47 = vpack.c.bf16 %v998_v43, %v998_v43  ;;  %v864_v49 = vmul.f32 %v2018_v15, %v656_v45  ;;  %v896_v50 = vmul.f32 %v2018_v15, %v784_v46  ;;  %v658_v51 = vpop.f32.mrb[37].mxu0  ;;  %v786_v52 = vpop.f32.mrb[37].mxu1 }
 0x146   :  { %v1591_v48 = vpack.c.bf16 %v1030_v44, %v1030_v44  ;;  %v659_v53 = vpop.f32.mrb[38].mxu0  ;;  %v787_v54 = vpop.f32.mrb[38].mxu1 }
 0x147   :  { %1319 = vst.msk [vmem:[%s2413_s4 + $0x44] sm:$0xf] %vm1301_vm3, %v1559_v47  ;;  %v935_v55 = vadd.f32 %v2023_v17, %v864_v49  ;;  %v967_v56 = vadd.f32 %v2023_v17, %v896_v50  ;;  %v865_v57 = vmul.f32 %v2018_v15, %v659_v53  ;;  %v897_v58 = vmul.f32 %v2018_v15, %v787_v54  ;;  %v661_v59 = vpop.f32.mrb[39].mxu0  ;;  %v789_v60 = vpop.f32.mrb[39].mxu1 }
 0x148   :  { %1351 = vst.msk [vmem:[%s2413_s4 + $0xc4] sm:$0xf] %vm1301_vm3, %v1591_v48 }
 0x149   :  { %v999_v61 = vmax.f32 %v935_v55, 0.0  ;;  %v1031_v62 = vmax.f32 %v967_v56, 0.0  ;;  %v936_v63 = vadd.f32 %v2023_v17, %v865_v57  ;;  %v968_v0 = vadd.f32 %v2023_v17, %v897_v58 }
 0x14b   :  { %v1560_v1 = vpack.c.bf16 %v999_v61, %v999_v61  ;;  %v1592_v2 = vpack.c.bf16 %v1031_v62, %v1031_v62  ;;  %v1000_v3 = vmax.f32 %v936_v63, 0.0  ;;  %v1032_v4 = vmax.f32 %v968_v0, 0.0 }
 0x14c   :  { %v664_v5 = vpop.f32.mrb[40].mxu0  ;;  %v792_v6 = vpop.f32.mrb[40].mxu1 }
 0x14d   :  { %1320 = vst.msk [vmem:[%s2413_s4 + $0x48] sm:$0xf] %vm1301_vm3, %v1560_v1  ;;  %1352 = vst.msk [vmem:[%s2413_s4 + $0xc8] sm:$0xf] %vm1301_vm3, %v1592_v2  ;;  %v1561_v7 = vpack.c.bf16 %v1000_v3, %v1000_v3  ;;  %v1593_v8 = vpack.c.bf16 %v1032_v4, %v1032_v4  ;;  %v866_v9 = vmul.f32 %v2018_v15, %v664_v5  ;;  %v666_v11 = vpop.f32.mrb[41].mxu0  ;;  %v794_v12 = vpop.f32.mrb[41].mxu1 }
 0x14e   :  { %v898_v10 = vmul.f32 %v2018_v15, %v792_v6  ;;  %v667_v13 = vpop.f32.mrb[42].mxu0  ;;  %v795_v14 = vpop.f32.mrb[42].mxu1 }
 0x14f   :  { %1321 = vst.msk [vmem:[%s2413_s4 + $0x4c] sm:$0xf] %vm1301_vm3, %v1561_v7  ;;  %1353 = vst.msk [vmem:[%s2413_s4 + $0xcc] sm:$0xf] %vm1301_vm3, %v1593_v8  ;;  %v937_v16 = vadd.f32 %v2023_v17, %v866_v9  ;;  %v867_v19 = vmul.f32 %v2018_v15, %v667_v13  ;;  %v899_v20 = vmul.f32 %v2018_v15, %v795_v14  ;;  %v669_v21 = vpop.f32.mrb[43].mxu0  ;;  %v797_v22 = vpop.f32.mrb[43].mxu1 }
 0x150   :  { %v969_v18 = vadd.f32 %v2023_v17, %v898_v10 }
 0x151   :  { %v1001_v23 = vmax.f32 %v937_v16, 0.0  ;;  %v938_v25 = vadd.f32 %v2023_v17, %v867_v19  ;;  %v970_v26 = vadd.f32 %v2023_v17, %v899_v20 }
 0x152   :  { %v1033_v24 = vmax.f32 %v969_v18, 0.0 }
 0x153   :  { %v1562_v27 = vpack.c.bf16 %v1001_v23, %v1001_v23  ;;  %v1002_v29 = vmax.f32 %v938_v25, 0.0  ;;  %v1034_v30 = vmax.f32 %v970_v26, 0.0 }
 0x154   :  { %v1594_v28 = vpack.c.bf16 %v1033_v24, %v1033_v24  ;;  %v672_v31 = vpop.f32.mrb[44].mxu0  ;;  %v800_v32 = vpop.f32.mrb[44].mxu1 }
 0x155   :  { %1322 = vst.msk [vmem:[%s2413_s4 + $0x50] sm:$0xf] %vm1301_vm3, %v1562_v27  ;;  %v1563_v33 = vpack.c.bf16 %v1002_v29, %v1002_v29  ;;  %v1595_v34 = vpack.c.bf16 %v1034_v30, %v1034_v30  ;;  %v868_v35 = vmul.f32 %v2018_v15, %v672_v31  ;;  %v900_v36 = vmul.f32 %v2018_v15, %v800_v32  ;;  %v674_v37 = vpop.f32.mrb[45].mxu0  ;;  %v802_v38 = vpop.f32.mrb[45].mxu1 }
 0x156   :  { %1354 = vst.msk [vmem:[%s2413_s4 + $0xd0] sm:$0xf] %vm1301_vm3, %v1594_v28  ;;  %v675_v39 = vpop.f32.mrb[46].mxu0  ;;  %v803_v40 = vpop.f32.mrb[46].mxu1 }
 0x157   :  { %1323 = vst.msk [vmem:[%s2413_s4 + $0x54] sm:$0xf] %vm1301_vm3, %v1563_v33  ;;  %1355 = vst.msk [vmem:[%s2413_s4 + $0xd4] sm:$0xf] %vm1301_vm3, %v1595_v34  ;;  %v939_v41 = vadd.f32 %v2023_v17, %v868_v35  ;;  %v971_v42 = vadd.f32 %v2023_v17, %v900_v36  ;;  %v869_v43 = vmul.f32 %v2018_v15, %v675_v39  ;;  %v677_v45 = vpop.f32.mrb[47].mxu0  ;;  %v805_v46 = vpop.f32.mrb[47].mxu1 }
 0x158   :  { %v901_v44 = vmul.f32 %v2018_v15, %v803_v40 }
 0x159   :  { %v1003_v47 = vmax.f32 %v939_v41, 0.0  ;;  %v1035_v48 = vmax.f32 %v971_v42, 0.0  ;;  %v940_v49 = vadd.f32 %v2023_v17, %v869_v43 }
 0x15a   :  { %v972_v50 = vadd.f32 %v2023_v17, %v901_v44 }
 0x15b   :  { %v1564_v51 = vpack.c.bf16 %v1003_v47, %v1003_v47  ;;  %v1596_v52 = vpack.c.bf16 %v1035_v48, %v1035_v48  ;;  %v1004_v53 = vmax.f32 %v940_v49, 0.0 }
 0x15c   :  { %v1036_v54 = vmax.f32 %v972_v50, 0.0  ;;  %v680_v55 = vpop.f32.mrb[48].mxu0  ;;  %v808_v56 = vpop.f32.mrb[48].mxu1 }
 0x15d   :  { %1324 = vst.msk [vmem:[%s2413_s4 + $0x58] sm:$0xf] %vm1301_vm3, %v1564_v51  ;;  %1356 = vst.msk [vmem:[%s2413_s4 + $0xd8] sm:$0xf] %vm1301_vm3, %v1596_v52  ;;  %v1565_v57 = vpack.c.bf16 %v1004_v53, %v1004_v53  ;;  %v870_v59 = vmul.f32 %v2018_v15, %v680_v55  ;;  %v902_v60 = vmul.f32 %v2018_v15, %v808_v56  ;;  %v682_v61 = vpop.f32.mrb[49].mxu0  ;;  %v810_v62 = vpop.f32.mrb[49].mxu1 }
 0x15e   :  { %v1597_v58 = vpack.c.bf16 %v1036_v54, %v1036_v54  ;;  %v683_v63 = vpop.f32.mrb[50].mxu0  ;;  %v811_v0 = vpop.f32.mrb[50].mxu1 }
 0x15f   :  { %1325 = vst.msk [vmem:[%s2413_s4 + $0x5c] sm:$0xf] %vm1301_vm3, %v1565_v57  ;;  %v941_v1 = vadd.f32 %v2023_v17, %v870_v59  ;;  %v973_v2 = vadd.f32 %v2023_v17, %v902_v60  ;;  %v871_v3 = vmul.f32 %v2018_v15, %v683_v63  ;;  %v903_v4 = vmul.f32 %v2018_v15, %v811_v0  ;;  %v685_v5 = vpop.f32.mrb[51].mxu0  ;;  %v813_v6 = vpop.f32.mrb[51].mxu1 }
 0x160   :  { %1357 = vst.msk [vmem:[%s2413_s4 + $0xdc] sm:$0xf] %vm1301_vm3, %v1597_v58 }
 0x161   :  { %v1005_v7 = vmax.f32 %v941_v1, 0.0  ;;  %v1037_v8 = vmax.f32 %v973_v2, 0.0  ;;  %v942_v9 = vadd.f32 %v2023_v17, %v871_v3  ;;  %v974_v10 = vadd.f32 %v2023_v17, %v903_v4 }
 0x163   :  { %v1566_v11 = vpack.c.bf16 %v1005_v7, %v1005_v7  ;;  %v1598_v12 = vpack.c.bf16 %v1037_v8, %v1037_v8  ;;  %v1006_v13 = vmax.f32 %v942_v9, 0.0  ;;  %v1038_v14 = vmax.f32 %v974_v10, 0.0 }
 0x164   :  { %v688_v16 = vpop.f32.mrb[52].mxu0  ;;  %v816_v18 = vpop.f32.mrb[52].mxu1 }
 0x165   :  { %1326 = vst.msk [vmem:[%s2413_s4 + $0x60] sm:$0xf] %vm1301_vm3, %v1566_v11  ;;  %1358 = vst.msk [vmem:[%s2413_s4 + $0xe0] sm:$0xf] %vm1301_vm3, %v1598_v12  ;;  %v1567_v19 = vpack.c.bf16 %v1006_v13, %v1006_v13  ;;  %v1599_v20 = vpack.c.bf16 %v1038_v14, %v1038_v14  ;;  %v872_v21 = vmul.f32 %v2018_v15, %v688_v16  ;;  %v690_v23 = vpop.f32.mrb[53].mxu0  ;;  %v818_v24 = vpop.f32.mrb[53].mxu1 }
 0x166   :  { %v904_v22 = vmul.f32 %v2018_v15, %v816_v18  ;;  %v691_v25 = vpop.f32.mrb[54].mxu0  ;;  %v819_v26 = vpop.f32.mrb[54].mxu1 }
 0x167   :  { %1327 = vst.msk [vmem:[%s2413_s4 + $0x64] sm:$0xf] %vm1301_vm3, %v1567_v19  ;;  %1359 = vst.msk [vmem:[%s2413_s4 + $0xe4] sm:$0xf] %vm1301_vm3, %v1599_v20  ;;  %v943_v27 = vadd.f32 %v2023_v17, %v872_v21  ;;  %v873_v29 = vmul.f32 %v2018_v15, %v691_v25  ;;  %v905_v30 = vmul.f32 %v2018_v15, %v819_v26  ;;  %v693_v31 = vpop.f32.mrb[55].mxu0  ;;  %v821_v32 = vpop.f32.mrb[55].mxu1 }
 0x168   :  { %v975_v28 = vadd.f32 %v2023_v17, %v904_v22 }
 0x169   :  { %v1007_v33 = vmax.f32 %v943_v27, 0.0  ;;  %v944_v35 = vadd.f32 %v2023_v17, %v873_v29  ;;  %v976_v36 = vadd.f32 %v2023_v17, %v905_v30 }
 0x16a   :  { %v1039_v34 = vmax.f32 %v975_v28, 0.0 }
 0x16b   :  { %v1568_v37 = vpack.c.bf16 %v1007_v33, %v1007_v33  ;;  %v1008_v39 = vmax.f32 %v944_v35, 0.0  ;;  %v1040_v40 = vmax.f32 %v976_v36, 0.0 }
 0x16c   :  { %v1600_v38 = vpack.c.bf16 %v1039_v34, %v1039_v34  ;;  %v696_v41 = vpop.f32.mrb[56].mxu0  ;;  %v824_v42 = vpop.f32.mrb[56].mxu1 }
 0x16d   :  { %1328 = vst.msk [vmem:[%s2413_s4 + $0x68] sm:$0xf] %vm1301_vm3, %v1568_v37  ;;  %v1569_v43 = vpack.c.bf16 %v1008_v39, %v1008_v39  ;;  %v1601_v44 = vpack.c.bf16 %v1040_v40, %v1040_v40  ;;  %v874_v45 = vmul.f32 %v2018_v15, %v696_v41  ;;  %v906_v46 = vmul.f32 %v2018_v15, %v824_v42  ;;  %v698_v47 = vpop.f32.mrb[57].mxu0  ;;  %v826_v48 = vpop.f32.mrb[57].mxu1 }
 0x16e   :  { %1360 = vst.msk [vmem:[%s2413_s4 + $0xe8] sm:$0xf] %vm1301_vm3, %v1600_v38  ;;  %v699_v49 = vpop.f32.mrb[58].mxu0  ;;  %v827_v50 = vpop.f32.mrb[58].mxu1 }
 0x16f   :  { %1329 = vst.msk [vmem:[%s2413_s4 + $0x6c] sm:$0xf] %vm1301_vm3, %v1569_v43  ;;  %1361 = vst.msk [vmem:[%s2413_s4 + $0xec] sm:$0xf] %vm1301_vm3, %v1601_v44  ;;  %v945_v51 = vadd.f32 %v2023_v17, %v874_v45  ;;  %v977_v52 = vadd.f32 %v2023_v17, %v906_v46  ;;  %v875_v53 = vmul.f32 %v2018_v15, %v699_v49  ;;  %v701_v55 = vpop.f32.mrb[59].mxu0  ;;  %v829_v56 = vpop.f32.mrb[59].mxu1 }
 0x170   :  { %v907_v54 = vmul.f32 %v2018_v15, %v827_v50 }
 0x171   :  { %v1009_v57 = vmax.f32 %v945_v51, 0.0  ;;  %v1041_v58 = vmax.f32 %v977_v52, 0.0  ;;  %v946_v59 = vadd.f32 %v2023_v17, %v875_v53 }
 0x172   :  { %v978_v60 = vadd.f32 %v2023_v17, %v907_v54 }
 0x173   :  { %v1570_v61 = vpack.c.bf16 %v1009_v57, %v1009_v57  ;;  %v1602_v62 = vpack.c.bf16 %v1041_v58, %v1041_v58  ;;  %v1010_v63 = vmax.f32 %v946_v59, 0.0 }
 0x174   :  { %v1042_v0 = vmax.f32 %v978_v60, 0.0  ;;  %v704_v1 = vpop.f32.mrb[60].mxu0  ;;  %v832_v2 = vpop.f32.mrb[60].mxu1 }
 0x175   :  { %1330 = vst.msk [vmem:[%s2413_s4 + $0x70] sm:$0xf] %vm1301_vm3, %v1570_v61  ;;  %1362 = vst.msk [vmem:[%s2413_s4 + $0xf0] sm:$0xf] %vm1301_vm3, %v1602_v62  ;;  %v1571_v3 = vpack.c.bf16 %v1010_v63, %v1010_v63  ;;  %v876_v5 = vmul.f32 %v2018_v15, %v704_v1  ;;  %v908_v6 = vmul.f32 %v2018_v15, %v832_v2  ;;  %v706_v7 = vpop.f32.mrb[61].mxu0  ;;  %v834_v8 = vpop.f32.mrb[61].mxu1 }
 0x176   :  { %v1603_v4 = vpack.c.bf16 %v1042_v0, %v1042_v0  ;;  %v707_v9 = vpop.f32.mrb[62].mxu0  ;;  %v835_v10 = vpop.f32.mrb[62].mxu1 }
 0x177   :  { %1331 = vst.msk [vmem:[%s2413_s4 + $0x74] sm:$0xf] %vm1301_vm3, %v1571_v3  ;;  %v947_v11 = vadd.f32 %v2023_v17, %v876_v5  ;;  %v979_v12 = vadd.f32 %v2023_v17, %v908_v6  ;;  %v877_v13 = vmul.f32 %v2018_v15, %v707_v9  ;;  %v909_v14 = vmul.f32 %v2018_v15, %v835_v10  ;;  %v709_v16 = vpop.f32.mrb[63].mxu0  ;;  %v837_v18 = vpop.f32.mrb[63].mxu1 }
 0x178   :  { %1363 = vst.msk [vmem:[%s2413_s4 + $0xf4] sm:$0xf] %vm1301_vm3, %v1603_v4 }
 0x179   :  { %v1011_v19 = vmax.f32 %v947_v11, 0.0  ;;  %v1043_v20 = vmax.f32 %v979_v12, 0.0  ;;  %v948_v21 = vadd.f32 %v2023_v17, %v877_v13  ;;  %v980_v22 = vadd.f32 %v2023_v17, %v909_v14 }
 0x17b   :  { %v1572_v23 = vpack.c.bf16 %v1011_v19, %v1011_v19  ;;  %v1604_v24 = vpack.c.bf16 %v1043_v20, %v1043_v20  ;;  %v1012_v25 = vmax.f32 %v948_v21, 0.0  ;;  %v1044_v26 = vmax.f32 %v980_v22, 0.0 }
 0x17d   :  { %1332 = vst.msk [vmem:[%s2413_s4 + $0x78] sm:$0xf] %vm1301_vm3, %v1572_v23  ;;  %1364 = vst.msk [vmem:[%s2413_s4 + $0xf8] sm:$0xf] %vm1301_vm3, %v1604_v24  ;;  %v1573_v15 = vpack.c.bf16 %v1012_v25, %v1012_v25  ;;  %v1605_v27 = vpack.c.bf16 %v1044_v26, %v1044_v26 }
 0x17f   :  { %1333 = vst.msk [vmem:[%s2413_s4 + $0x7c] sm:$0xf] %vm1301_vm3, %v1573_v15  ;;  %1365 = vst.msk [vmem:[%s2413_s4 + $0xfc] sm:$0xf] %vm1301_vm3, %v1605_v27 }

// kernel: forward.21
= control target key start
LH: loop header
LB: loop body
LE: loop exit
PB: predicated region body
PF: predicated region fallthrough
CT: control target
= control target key end

     0   :  { %vm90_vm0 = vcmask 261120   ;;  %vm338_vm1 = vcmask 76800   ;;  %s624_s1 = inlined_call_operand.vmem [shape: bf16[32,10], index: 1, kind: input, shape index: {}]   ;;  %s625_s0 = inlined_call_operand.vmem [shape: bf16[128,32], index: 0, kind: input, shape index: {}]   ;;  %s626_s2 = inlined_call_operand.vmem [shape: f32[1,10], index: 2, kind: input, shape index: {}]   ;;  %s627_s3 = inlined_call_operand.vmem [shape: f32[1,10], index: 3, kind: input, shape index: {}]   ;;  %s628_s4 = inlined_call_operand.vmem [shape: bf16[128,10], index: 4, kind: output, shape index: {}]  }
   0x1   :  { %v445_v0 = vld [vmem:[%s624_s1] sm:$0xff]   ;;  %v446_v1 = vld [vmem:[%s624_s1 + $0x8] sm:$0xff]   ;;  %v451_v6 = vld [vmem:[%s625_s0 + $0x10] sm:$0xff]  }
   0x2   :  { %421 = vmatprep.subr.bf16.mxu0 %v445_v0  ;;  %441 = vmatprep.subr.bf16.mxu1 %v445_v0  ;;  %v447_v2 = vld [vmem:[%s625_s0] sm:$0xff]   ;;  %v449_v4 = vld [vmem:[%s625_s0 + $0x8] sm:$0xff]   ;;  %v452_v7 = vld [vmem:[%s625_s0 + $0x30] sm:$0xff]  }
   0x3   :  { %422 = vmatpush3.bf16.msra.mxu0 %v445_v0  ;;  %443 = vmatpush3.bf16.msra.mxu1 %v445_v0  ;;  %v448_v3 = vld [vmem:[%s625_s0 + $0x20] sm:$0xff]   ;;  %v450_v5 = vld [vmem:[%s625_s0 + $0x28] sm:$0xff]   ;;  %v453_v8 = vld [vmem:[%s625_s0 + $0x18] sm:$0xff]  }
   0x4   :  { %423 = vmatprep.subr.bf16.mxu0 %v446_v1  ;;  %442 = vmatprep.subr.bf16.mxu1 %v446_v1  ;;  %v454_v9 = vld [vmem:[%s625_s0 + $0x38] sm:$0xff]   ;;  %v521_v10 = vld [vmem:[%s626_s2] ss:$0 sm:$0xff] }
   0x5   :  { %425 = vmatprep.mubr.msk.bf16.mxu0 %vm90_vm0, %v447_v2  ;;  %433 = vmatprep.mubr.msk.bf16.mxu1 %vm90_vm0, %v448_v3  ;;  %v526_v12 = vld [vmem:[%s627_s3] ss:$0 sm:$0xff] }
   0x7   :  { %424 = vmatpush3.bf16.msra.mxu0 %v446_v1  ;;  %444 = vmatpush3.bf16.msra.mxu1 %v446_v1 }
   0xa   :  { %426 = vmatmul.mubr.msk.bf16.vlgmr.msra.gmra.mrb[0].mxu0 %vm90_vm0, %v449_v4  ;;  %434 = vmatmul.mubr.msk.bf16.vlgmr.msra.gmra.mrb[0].mxu1 %vm90_vm0, %v450_v5 }
   0xb   :  { %429 = vmatprep.mubr.msk.bf16.mxu0 %vm90_vm0, %v451_v6  ;;  %437 = vmatprep.mubr.msk.bf16.mxu1 %vm90_vm0, %v452_v7 }
  0x12   :  { %430 = vmatmul.mubr.msk.bf16.gmra.mrb[4].mxu0 %vm90_vm0, %v453_v8  ;;  %438 = vmatmul.mubr.msk.bf16.gmra.mrb[4].mxu1 %vm90_vm0, %v454_v9 }
  0xdd   :  { %v427_v11 = vpop.f32.mrb[0].mxu0  ;;  %v435_v13 = vpop.f32.mrb[0].mxu1 }
  0xde   :  { %v221_v14 = vmul.f32 %v427_v11, %v521_v10  ;;  %v229_v15 = vmul.f32 %v435_v13, %v521_v10  ;;  %v149_v16 = vpop.f32.mrb[1].mxu0  ;;  %v181_v17 = vpop.f32.mrb[1].mxu1 }
  0xdf   :  { %v219_v18 = vmul.f32 %v521_v10, %v149_v16  ;;  %v227_v19 = vmul.f32 %v521_v10, %v181_v17  ;;  %v428_v20 = vpop.f32.mrb[2].mxu0  ;;  %v436_v21 = vpop.f32.mrb[2].mxu1 }
  0xe0   :  { %v244_v22 = vadd.f32 %v526_v12, %v221_v14  ;;  %v252_v23 = vadd.f32 %v526_v12, %v229_v15  ;;  %v222_v24 = vmul.f32 %v428_v20, %v521_v10  ;;  %v230_v25 = vmul.f32 %v436_v21, %v521_v10  ;;  %v152_v26 = vpop.f32.mrb[3].mxu0  ;;  %v184_v27 = vpop.f32.mrb[3].mxu1 }
  0xe1   :  { %v242_v28 = vadd.f32 %v526_v12, %v219_v18  ;;  %v250_v29 = vadd.f32 %v526_v12, %v227_v19  ;;  %v220_v30 = vmul.f32 %v521_v10, %v152_v26  ;;  %v228_v31 = vmul.f32 %v521_v10, %v184_v27 }
  0xe2   :  { %v260_v32 = vmax.f32 %v244_v22, 0.0  ;;  %v268_v33 = vmax.f32 %v252_v23, 0.0  ;;  %v245_v34 = vadd.f32 %v526_v12, %v222_v24  ;;  %v253_v35 = vadd.f32 %v526_v12, %v230_v25 }
  0xe3   :  { %v258_v36 = vmax.f32 %v242_v28, 0.0  ;;  %v266_v37 = vmax.f32 %v250_v29, 0.0  ;;  %v243_v38 = vadd.f32 %v526_v12, %v220_v30  ;;  %v251_v39 = vadd.f32 %v526_v12, %v228_v31 }
  0xe4   :  { %v397_v40 = vpack.c.bf16 %v260_v32, %v260_v32  ;;  %v405_v41 = vpack.c.bf16 %v268_v33, %v268_v33  ;;  %v261_v42 = vmax.f32 %v245_v34, 0.0  ;;  %v269_v43 = vmax.f32 %v253_v35, 0.0 }
  0xe5   :  { %v395_v44 = vpack.c.bf16 %v258_v36, %v258_v36  ;;  %v403_v45 = vpack.c.bf16 %v266_v37, %v266_v37  ;;  %v259_v46 = vmax.f32 %v243_v38, 0.0  ;;  %v267_v47 = vmax.f32 %v251_v39, 0.0  ;;  %v431_v48 = vpop.f32.mrb[4].mxu0  ;;  %v439_v49 = vpop.f32.mrb[4].mxu1 }
  0xe6   :  { %341 = vst.msk [vmem:[%s628_s4 + $0x8] sm:$0xf] %vm338_vm1, %v397_v40  ;;  %349 = vst.msk [vmem:[%s628_s4 + $0x28] sm:$0xf] %vm338_vm1, %v405_v41  ;;  %v398_v50 = vpack.c.bf16 %v261_v42, %v261_v42  ;;  %v406_v51 = vpack.c.bf16 %v269_v43, %v269_v43  ;;  %v225_v52 = vmul.f32 %v431_v48, %v521_v10  ;;  %v165_v54 = vpop.f32.mrb[5].mxu0  ;;  %v197_v55 = vpop.f32.mrb[5].mxu1 }
  0xe7   :  { %v233_v53 = vmul.f32 %v439_v49, %v521_v10  ;;  %339 = vst.msk [vmem:[%s628_s4] sm:$0xf] %vm338_vm1, %v395_v44  ;;  %347 = vst.msk [vmem:[%s628_s4 + $0x20] sm:$0xf] %vm338_vm1, %v403_v45  ;;  %v396_v56 = vpack.c.bf16 %v259_v46, %v259_v46  ;;  %v404_v57 = vpack.c.bf16 %v267_v47, %v267_v47  ;;  %v432_v60 = vpop.f32.mrb[6].mxu0  ;;  %v440_v61 = vpop.f32.mrb[6].mxu1 }
  0xe8   :  { %v223_v58 = vmul.f32 %v521_v10, %v165_v54  ;;  %v231_v59 = vmul.f32 %v521_v10, %v197_v55  ;;  %342 = vst.msk [vmem:[%s628_s4 + $0xc] sm:$0xf] %vm338_vm1, %v398_v50  ;;  %350 = vst.msk [vmem:[%s628_s4 + $0x2c] sm:$0xf] %vm338_vm1, %v406_v51  ;;  %v248_v62 = vadd.f32 %v526_v12, %v225_v52  ;;  %v168_v2 = vpop.f32.mrb[7].mxu0  ;;  %v200_v3 = vpop.f32.mrb[7].mxu1 }
  0xe9   :  { %v256_v63 = vadd.f32 %v526_v12, %v233_v53  ;;  %v226_v0 = vmul.f32 %v432_v60, %v521_v10  ;;  %v234_v1 = vmul.f32 %v440_v61, %v521_v10  ;;  %340 = vst.msk [vmem:[%s628_s4 + $0x4] sm:$0xf] %vm338_vm1, %v396_v56  ;;  %348 = vst.msk [vmem:[%s628_s4 + $0x24] sm:$0xf] %vm338_vm1, %v404_v57 }
  0xea   :  { %v246_v4 = vadd.f32 %v526_v12, %v223_v58  ;;  %v254_v5 = vadd.f32 %v526_v12, %v231_v59  ;;  %v224_v6 = vmul.f32 %v521_v10, %v168_v2  ;;  %v232_v7 = vmul.f32 %v521_v10, %v200_v3 }
  0xeb   :  { %v264_v8 = vmax.f32 %v248_v62, 0.0  ;;  %v272_v9 = vmax.f32 %v256_v63, 0.0  ;;  %v249_v11 = vadd.f32 %v526_v12, %v226_v0  ;;  %v257_v13 = vadd.f32 %v526_v12, %v234_v1 }
  0xec   :  { %v262_v14 = vmax.f32 %v246_v4, 0.0  ;;  %v270_v15 = vmax.f32 %v254_v5, 0.0  ;;  %v247_v16 = vadd.f32 %v526_v12, %v224_v6  ;;  %v255_v17 = vadd.f32 %v526_v12, %v232_v7 }
  0xed   :  { %v401_v18 = vpack.c.bf16 %v264_v8, %v264_v8  ;;  %v409_v19 = vpack.c.bf16 %v272_v9, %v272_v9  ;;  %v265_v20 = vmax.f32 %v249_v11, 0.0  ;;  %v273_v21 = vmax.f32 %v257_v13, 0.0 }
  0xee   :  { %v399_v22 = vpack.c.bf16 %v262_v14, %v262_v14  ;;  %v407_v23 = vpack.c.bf16 %v270_v15, %v270_v15  ;;  %v263_v24 = vmax.f32 %v247_v16, 0.0  ;;  %v271_v10 = vmax.f32 %v255_v17, 0.0 }
  0xef   :  { %345 = vst.msk [vmem:[%s628_s4 + $0x18] sm:$0xf] %vm338_vm1, %v401_v18  ;;  %353 = vst.msk [vmem:[%s628_s4 + $0x38] sm:$0xf] %vm338_vm1, %v409_v19  ;;  %v402_v25 = vpack.c.bf16 %v265_v20, %v265_v20  ;;  %v410_v12 = vpack.c.bf16 %v273_v21, %v273_v21 }
  0xf0   :  { %343 = vst.msk [vmem:[%s628_s4 + $0x10] sm:$0xf] %vm338_vm1, %v399_v22  ;;  %351 = vst.msk [vmem:[%s628_s4 + $0x30] sm:$0xf] %vm338_vm1, %v407_v23  ;;  %v400_v26 = vpack.c.bf16 %v263_v24, %v263_v24  ;;  %v408_v27 = vpack.c.bf16 %v271_v10, %v271_v10 }
  0xf1   :  { %346 = vst.msk [vmem:[%s628_s4 + $0x1c] sm:$0xf] %vm338_vm1, %v402_v25  ;;  %354 = vst.msk [vmem:[%s628_s4 + $0x3c] sm:$0xf] %vm338_vm1, %v410_v12 }
  0xf2   :  { %344 = vst.msk [vmem:[%s628_s4 + $0x14] sm:$0xf] %vm338_vm1, %v400_v26  ;;  %352 = vst.msk [vmem:[%s628_s4 + $0x34] sm:$0xf] %vm338_vm1, %v408_v27 }

// kernel: forward.20
= control target key start
LH: loop header
LB: loop body
LE: loop exit
PB: predicated region body
PF: predicated region fallthrough
CT: control target
= control target key end

     0   :  { %s4094_s6 = smov 0   ;;  %s7410_s0 = inlined_call_operand.vmem [shape: bf16[2,18,18,16], index: 0, kind: input, shape index: {}]   ;;  %s7411_s1 = inlined_call_operand.vmem [shape: bf16[2,8,8,16], index: 1, kind: output, shape index: {}]  }
   0x1 LB: > { %s3865_s7 = sadd.s32 4294967295, %s4080_s6   ;;  %p3869_p0 = scmp.ge.s32.totalorder %s4080_s6, 1  ;;  %s4080_s6 = sphi %s4094_s6, %s11_s6  }
   0x2   : > { %p87_p1 = scmp.lt.s32.totalorder %s4080_s6, 3 }
   0x4   : > { %p88_p2 = pnand %p3869_p0, %p87_p1 }
   0x6   : > { %91 = sbr.rel (%p88_p2) target bundleno = 439 (0x1b7), region = 24 }
   0xd   : > { %p107_p3 = scmp.lt.s32.totalorder %s3865_s7, 1  ;;  %v213_v0 = vlaneseq  ;;  %v4082_v1 = vmov 1966171168   ;;  %vm3667_vm0 = vcmask 1041409   ;;  %vm3670_vm1 = vcmask 1042434  }
   0xe   : > { %v211_v2 = vunpack.c.l.s4 %v4082_v1  ;;  %vm3673_vm2 = vcmask 1043459   ;;  %vm3676_vm3 = vcmask 1044484   ;;  %vm3679_vm4 = vcmask 1045509  }
   0xf   : > { %s9368_s7 = smov (!%p107_p3, %s3865_s7), 1  ;;  %v4105_v4 = vshrl.u32 %v213_v0, 7  ;;  %vm3682_vm5 = vcmask 1046534   ;;  %vm3685_vm6 = vcmask 1047559   ;;  %vm3801_vm7 = vcmask 125952  }
  0x10   : > { %s4063_s8 = smul.u32 216, %s9368_s7  ;;  %v212_v3 = vunpack.c.0.s8 %v211_v2  ;;  %s4062_s12 = sshll.u32 %s9368_s7, 5 }
  0x11   : > { %7916 = vst [vmem:[#allocation2_spill] sm:$0xff] %v4105_v4  ;;  %s116_s15 = scalar_lea.vmem %s7411_s1, %s4062_s12 }
  0x12   : > { %s4110_s11 = scalar_lea.vmem %s7410_s0, %s4063_s8  ;;  %v4115_v7 = vsub.s32 %v212_v3, %v4105_v4 }
  0x13   : > { %v3873_v5 = vld.sshfl [vmem:[%s4110_s11] sm:$0x33 pattern:$0x75316420] }
  0x14   : > { %v3874_v6 = vld.sshfl [vmem:[%s4110_s11 + $0x4] sm:$0x33 pattern:$0x75316420]  ;;  %7917 = vst [vmem:[#allocation3_spill] sm:$0xff] %v4115_v7  ;;  %v209_v9 = vcombine.high %v3873_v5, %v3873_v5  ;;  %v4123_v13 = vrot.slane %v3873_v5, %v4115_v7 }
  0x15   : > { %v3875_v8 = vld.sshfl [vmem:[%s4110_s11 + $0xc] sm:$0x33 pattern:$0x75316420]  ;;  %v233_v11 = vcombine.high %v3874_v6, %v3874_v6  ;;  %v4131_v18 = vrot.slane %v3874_v6, %v4115_v7 }
  0x16   : > { %v3876_v10 = vld.sshfl [vmem:[%s4110_s11 + $0x10] sm:$0x33 pattern:$0x75316420]  ;;  %7919 = vst [vmem:[#allocation5_spill] sm:$0xff] %v4123_v13  ;;  %v257_v15 = vcombine.high %v3875_v8, %v3875_v8  ;;  %v4128_v17 = vrot.slane %v209_v9, %v4115_v7  ;;  %v4139_v22 = vcombine.high %v4123_v13, %v4123_v13  ;;  %v4142_v23 = vrot.slane %v3875_v8, %v4115_v7 }
  0x17   : > { %v4120_v12 = vld.sshfl [vmem:[%s4110_s11 + $0x8] sm:$0x1 pattern:$0x75316420]  ;;  %7921 = vst [vmem:[#allocation7_spill] sm:$0xff] %v4131_v18  ;;  %v281_v19 = vcombine.high %v3876_v10, %v3876_v10  ;;  %v4134_v20 = vrot.slane %v233_v11, %v4115_v7  ;;  %v4149_v27 = vrot.slane %v3876_v10, %v4115_v7  ;;  %v4162_v32 = vcombine.high %v4131_v18, %v4131_v18 }
  0x18   : > { %7918 = vst [vmem:[#allocation4_spill] sm:$0xff] %v4120_v12  ;;  %v3877_v14 = vld.sshfl [vmem:[%s4110_s11 + $0x18] sm:$0x33 pattern:$0x75316420]  ;;  %7920 = vst [vmem:[#allocation6_spill] sm:$0xff] %v4128_v17  ;;  %v4146_v26 = vrot.slane %v257_v15, %v4115_v7  ;;  %v4158_v31 = vcombine.high %v4128_v17, %v4128_v17  ;;  %v4180_v41 = vcombine.high %v4142_v23, %v4142_v23 }
  0x19   : > { %v3878_v16 = vld.sshfl [vmem:[%s4110_s11 + $0x1c] sm:$0x33 pattern:$0x75316420]  ;;  %7922 = vst [vmem:[#allocation8_spill] sm:$0xff] %v4134_v20  ;;  %7923 = vst [vmem:[#allocation9_spill] sm:$0xff] %v4139_v22  ;;  %v305_v24 = vcombine.high %v3877_v14, %v3877_v14  ;;  %v4165_v33 = vrot.slane %v281_v19, %v4115_v7  ;;  %v4171_v36 = vcombine.high %v4134_v20, %v4134_v20 }
  0x1a   : > { %v3879_v21 = vld.sshfl [vmem:[%s4110_s11 + $0x24] sm:$0x33 pattern:$0x75316420]  ;;  %7924 = vst [vmem:[#allocation10_spill] sm:$0xff] %v4142_v23  ;;  %7925 = vst [vmem:[#allocation11_spill] sm:$0xff] %v4146_v26  ;;  %v329_v28 = vcombine.high %v3878_v16, %v3878_v16  ;;  %v4174_v37 = vrot.slane %v3877_v14, %v4115_v7  ;;  %v4186_v43 = vrot.slane %v3878_v16, %v4115_v7 }
  0x1b   : > { %v3880_v25 = vld.sshfl [vmem:[%s4110_s11 + $0x28] sm:$0x33 pattern:$0x75316420]  ;;  %7926 = vst [vmem:[#allocation12_spill] sm:$0xff] %v4149_v27  ;;  %7928 = vst [vmem:[#allocation14_spill] sm:$0xff] %v4158_v31  ;;  %v353_v38 = vcombine.high %v3879_v21, %v3879_v21  ;;  %v4183_v42 = vrot.slane %v305_v24, %v4115_v7  ;;  %v4193_v46 = vcombine.high %v4146_v26, %v4146_v26 }
  0x1c   : > { %v4154_v30 = vld.sshfl [vmem:[%s4110_s11 + $0x14] sm:$0x1 pattern:$0x75316420]  ;;  %7929 = vst [vmem:[#allocation15_spill] sm:$0xff] %v4162_v32  ;;  %7930 = vst [vmem:[#allocation16_spill] sm:$0xff] %v4165_v33  ;;  %v377_v44 = vcombine.high %v3880_v25, %v3880_v25  ;;  %v4197_v47 = vcombine.high %v4149_v27, %v4149_v27  ;;  %v4200_v48 = vrot.slane %v329_v28, %v4115_v7 }
  0x1d   : > { %7927 = vst [vmem:[#allocation13_spill] sm:$0xff] %v4154_v30  ;;  %v3881_v35 = vld.sshfl [vmem:[%s4110_s11 + $0x30] sm:$0x33 pattern:$0x75316420]  ;;  %7931 = vst [vmem:[#allocation17_spill] sm:$0xff] %v4171_v36  ;;  %v4207_v51 = vcombine.high %v4165_v33, %v4165_v33  ;;  %v4210_v52 = vrot.slane %v3879_v21, %v4115_v7  ;;  %v4216_v56 = vcombine.high %v4174_v37, %v4174_v37 }
  0x1e   : > { %7932 = vst [vmem:[#allocation18_spill] sm:$0xff] %v4174_v37  ;;  %v3882_v40 = vld.sshfl [vmem:[%s4110_s11 + $0x34] sm:$0x33 pattern:$0x75316420]  ;;  %7933 = vst [vmem:[#allocation19_spill] sm:$0xff] %v4180_v41  ;;  %v401_v53 = vcombine.high %v3881_v35, %v3881_v35  ;;  %v4219_v57 = vrot.slane %v353_v38, %v4115_v7  ;;  %v4222_v58 = vrot.slane %v3880_v25, %v4115_v7 }
  0x1f   : > { %7934 = vst [vmem:[#allocation20_spill] sm:$0xff] %v4186_v43  ;;  %v4189_v45 = vld.sshfl [vmem:[%s4110_s11 + $0x20] sm:$0x1 pattern:$0x75316420]  ;;  %7936 = vst [vmem:[#allocation22_spill] sm:$0xff] %v4193_v46  ;;  %v425_v59 = vcombine.high %v3882_v40, %v3882_v40  ;;  %v4229_v61 = vcombine.high %v4183_v42, %v4183_v42  ;;  %v4233_v62 = vcombine.high %v4186_v43, %v4186_v43 }
  0x20   : > { %7935 = vst [vmem:[#allocation21_spill] sm:$0xff] %v4189_v45  ;;  %7937 = vst [vmem:[#allocation23_spill] sm:$0xff] %v4197_v47  ;;  %v3883_v50 = vld.sshfl [vmem:[%s4110_s11 + $0x3c] sm:$0x33 pattern:$0x75316420]  ;;  %v4236_v63 = vrot.slane %v377_v44, %v4115_v7  ;;  %v4243_v2 = vcombine.high %v4200_v48, %v4200_v48  ;;  %v4246_v3 = vrot.slane %v3881_v35, %v4115_v7 }
  0x21   : > { %7938 = vst [vmem:[#allocation24_spill] sm:$0xff] %v4207_v51  ;;  %v3884_v55 = vld.sshfl [vmem:[%s4110_s11 + $0x40] sm:$0x33 pattern:$0x75316420]  ;;  %7939 = vst [vmem:[#allocation25_spill] sm:$0xff] %v4222_v58  ;;  %v449_v5 = vcombine.high %v3883_v50, %v3883_v50  ;;  %v4252_v9 = vcombine.high %v4210_v52, %v4210_v52  ;;  %v4255_v10 = vrot.slane %v401_v53, %v4115_v7 }
  0x22   : > { %v4225_v60 = vld.sshfl [vmem:[%s4110_s11 + $0x2c] sm:$0x1 pattern:$0x75316420]  ;;  %7941 = vst [vmem:[#allocation27_spill] sm:$0xff] %v4229_v61  ;;  %7942 = vst [vmem:[#allocation28_spill] sm:$0xff] %v4236_v63  ;;  %v4258_v11 = vrot.slane %v3882_v40, %v4115_v7  ;;  %v473_v14 = vcombine.high %v3884_v55, %v3884_v55  ;;  %v4265_v16 = vcombine.high %v4219_v57, %v4219_v57 }
  0x23   : > { %7940 = vst [vmem:[#allocation26_spill] sm:$0xff] %v4225_v60  ;;  %v3885_v1 = vld.sshfl [vmem:[%s4110_s11 + $0x48] sm:$0x33 pattern:$0x75316420]  ;;  %7943 = vst [vmem:[#allocation29_spill] sm:$0xff] %v4255_v10  ;;  %v4269_v19 = vcombine.high %v4222_v58, %v4222_v58  ;;  %v4272_v21 = vrot.slane %v425_v59, %v4115_v7  ;;  %v4279_v28 = vcombine.high %v4236_v63, %v4236_v63 }
  0x24   : > { %v3886_v8 = vld.sshfl [vmem:[%s4110_s11 + $0x4c] sm:$0x33 pattern:$0x75316420]  ;;  %7945 = vst [vmem:[#allocation31_spill] sm:$0xff] %v4265_v16  ;;  %v4282_v35 = vrot.slane %v3883_v50, %v4115_v7  ;;  %v497_v38 = vcombine.high %v3885_v1, %v3885_v1  ;;  %v4288_v53 = vcombine.high %v4246_v3, %v4246_v3  ;;  %v4291_v59 = vrot.slane %v449_v5, %v4115_v7  ;;  %v8123_v37 = vld [vmem:[#allocation6_spill] sm:$0xff] }
  0x25   : > { %v4261_v15 = vld.sshfl [vmem:[%s4110_s11 + $0x38] sm:$0x1 pattern:$0x75316420]  ;;  %7946 = vst [vmem:[#allocation32_spill] sm:$0xff] %v4269_v19  ;;  %7947 = vst [vmem:[#allocation33_spill] sm:$0xff] %v4272_v21  ;;  %v4294_v24 = vrot.slane %v3884_v55, %v4115_v7  ;;  %v521_v0 = vcombine.high %v3886_v8, %v3886_v8  ;;  %v4301_v50 = vcombine.high %v4255_v10, %v4255_v10 }
  0x26   : > { %7944 = vst [vmem:[#allocation30_spill] sm:$0xff] %v4261_v15  ;;  %v3887_v25 = vld.sshfl [vmem:[%s4110_s11 + $0x54] sm:$0x33 pattern:$0x75316420]  ;;  %7948 = vst [vmem:[#allocation34_spill] sm:$0xff] %v4279_v28  ;;  %v4305_v29 = vcombine.high %v4258_v11, %v4258_v11  ;;  %v4308_v40 = vrot.slane %v473_v14, %v4115_v7  ;;  %v4315_v6 = vcombine.high %v4272_v21, %v4272_v21 }
  0x27   : > { %7949 = vst [vmem:[#allocation35_spill] sm:$0xff] %v4282_v35  ;;  %v3888_v44 = vld.sshfl [vmem:[%s4110_s11 + $0x58] sm:$0x33 pattern:$0x75316420]  ;;  %7950 = vst [vmem:[#allocation36_spill] sm:$0xff] %v4288_v53  ;;  %v4318_v54 = vrot.slane %v3885_v1, %v4115_v7  ;;  %v545_v39 = vcombine.high %v3887_v25, %v3887_v25  ;;  %v4324_v14 = vcombine.high %v4282_v35, %v4282_v35 }
  0x28   : > { %7951 = vst [vmem:[#allocation37_spill] sm:$0xff] %v4291_v59  ;;  %7952 = vst [vmem:[#allocation38_spill] sm:$0xff] %v4294_v24  ;;  %v4297_v49 = vld.sshfl [vmem:[%s4110_s11 + $0x44] sm:$0x1 pattern:$0x75316420]  ;;  %v4327_v5 = vrot.slane %v497_v38, %v4115_v7  ;;  %v4330_v15 = vrot.slane %v3886_v8, %v4115_v7  ;;  %v569_v60 = vcombine.high %v3888_v44, %v3888_v44 }
  0x29   : > { %7953 = vst [vmem:[#allocation39_spill] sm:$0xff] %v4297_v49  ;;  %7954 = vst [vmem:[#allocation40_spill] sm:$0xff] %v4301_v50  ;;  %v3889_v55 = vld.sshfl [vmem:[%s4110_s11 + $0x60] sm:$0x33 pattern:$0x75316420]  ;;  %v4337_v1 = vcombine.high %v4291_v59, %v4291_v59  ;;  %v4341_v34 = vcombine.high %v4294_v24, %v4294_v24  ;;  %v4344_v30 = vrot.slane %v521_v0, %v4115_v7 }
  0x2a   : > { %7955 = vst [vmem:[#allocation41_spill] sm:$0xff] %v4305_v29  ;;  %7956 = vst [vmem:[#allocation42_spill] sm:$0xff] %v4308_v40  ;;  %v3890_v4 = vld.sshfl [vmem:[%s4110_s11 + $0x64] sm:$0x33 pattern:$0x75316420]  ;;  %v4351_v12 = vcombine.high %v4308_v40, %v4308_v40  ;;  %v4354_v20 = vrot.slane %v3887_v25, %v4115_v7  ;;  %v593_v18 = vcombine.high %v3889_v55, %v3889_v55 }
  0x2b   : > { %7957 = vst [vmem:[#allocation43_spill] sm:$0xff] %v4315_v6  ;;  %7958 = vst [vmem:[#allocation44_spill] sm:$0xff] %v4318_v54  ;;  %v4333_v45 = vld.sshfl [vmem:[%s4110_s11 + $0x50] sm:$0x1 pattern:$0x75316420]  ;;  %v4360_v0 = vcombine.high %v4318_v54, %v4318_v54  ;;  %v4363_v38 = vrot.slane %v545_v39, %v4115_v7  ;;  %v4366_v49 = vrot.slane %v3888_v44, %v4115_v7 }
  0x2c   : > { %7959 = vst [vmem:[#allocation45_spill] sm:$0xff] %v4324_v14  ;;  %7960 = vst [vmem:[#allocation46_spill] sm:$0xff] %v4327_v5  ;;  %v3891_v8 = vld.sshfl [vmem:[%s4110_s11 + $0x6c] sm:$0x33 pattern:$0x75316420]  ;;  %v617_v17 = vcombine.high %v3890_v4, %v3890_v4  ;;  %v4373_v25 = vcombine.high %v4327_v5, %v4327_v5  ;;  %v4377_v31 = vcombine.high %v4330_v15, %v4330_v15 }
  0x2d   : > { %7961 = vst [vmem:[#allocation47_spill] sm:$0xff] %v4330_v15  ;;  %7962 = vst [vmem:[#allocation48_spill] sm:$0xff] %v4333_v45  ;;  %v3892_v22 = vld.sshfl [vmem:[%s4110_s11 + $0x70] sm:$0x33 pattern:$0x75316420]  ;;  %v4380_v32 = vrot.slane %v569_v60, %v4115_v7  ;;  %v4390_v54 = vrot.slane %v3889_v55, %v4115_v7  ;;  %v4396_v60 = vcombine.high %v4354_v20, %v4354_v20 }
  0x2e   : > { %7963 = vst [vmem:[#allocation49_spill] sm:$0xff] %v4337_v1  ;;  %7964 = vst [vmem:[#allocation50_spill] sm:$0xff] %v4341_v34  ;;  %v4369_v13 = vld.sshfl [vmem:[%s4110_s11 + $0x5c] sm:$0x1 pattern:$0x75316420]  ;;  %v4399_v39 = vrot.slane %v593_v18, %v4115_v7  ;;  %v4402_v45 = vrot.slane %v3890_v4, %v4115_v7  ;;  %v4409_v55 = vcombine.high %v4363_v38, %v4363_v38 }
  0x2f   : > { %7965 = vst [vmem:[#allocation51_spill] sm:$0xff] %v4344_v30  ;;  %7966 = vst [vmem:[#allocation52_spill] sm:$0xff] %v4351_v12  ;;  %v3893_v44 = vld.sshfl [vmem:[%s4110_s11 + $0x78] sm:$0x33 pattern:$0x75316420]  ;;  %v4413_v5 = vcombine.high %v4366_v49, %v4366_v49  ;;  %v4416_v36 = vrot.slane %v617_v17, %v4115_v7  ;;  %v4432_v17 = vcombine.high %v4390_v54, %v4390_v54 }
  0x30   : > { %7967 = vst [vmem:[#allocation53_spill] sm:$0xff] %v4354_v20  ;;  %7968 = vst [vmem:[#allocation54_spill] sm:$0xff] %v4360_v0  ;;  %v4387_v0 = vcombine.high %v4344_v30, %v4344_v30  ;;  %v665_v30 = vcombine.high %v3892_v22, %v3892_v22  ;;  %v3895_v4 = vld.sshfl [vmem:[%s4110_s11 + $0x84] sm:$0x33 pattern:$0x75316420]  ;;  %v4426_v20 = vrot.slane %v3891_v8, %v4115_v7 }
  0x31   : > { %7969 = vst [vmem:[#allocation55_spill] sm:$0xff] %v4363_v38  ;;  %7970 = vst [vmem:[#allocation56_spill] sm:$0xff] %v4366_v49  ;;  %v4449_v38 = vcombine.high %v4402_v45, %v4402_v45  ;;  %v8124_v43 = vshrl.u32 %v8123_v37, 16  ;;  %v8126_v61 = vld [vmem:[#allocation9_spill] sm:$0xff] }
  0x32   : > { %7971 = vst [vmem:[#allocation57_spill] sm:$0xff] %v4369_v13  ;;  %7972 = vst [vmem:[#allocation58_spill] sm:$0xff] %v4373_v25  ;;  %v641_v25 = vcombine.high %v3891_v8, %v3891_v8  ;;  %v4438_v13 = vrot.slane %v3892_v22, %v4115_v7  ;;  %v4445_v8 = vcombine.high %v4399_v39, %v4399_v39  ;;  %v3897_v22 = vld.sshfl [vmem:[%s4110_s11 + $0x90] sm:$0x33 pattern:$0x75316420] }
  0x33   : > { %7973 = vst [vmem:[#allocation59_spill] sm:$0xff] %v4377_v31  ;;  %7974 = vst [vmem:[#allocation60_spill] sm:$0xff] %v4380_v32  ;;  %v3894_v31 = vld.sshfl [vmem:[%s4110_s11 + $0x7c] sm:$0x33 pattern:$0x75316420]  ;;  %v4452_v23 = vrot.slane %v665_v30, %v4115_v7  ;;  %v4468_v30 = vcombine.high %v4426_v20, %v4426_v20 }
  0x34   : > { %7975 = vst [vmem:[#allocation61_spill] sm:$0xff] %v4387_v0  ;;  %7976 = vst [vmem:[#allocation62_spill] sm:$0xff] %v4390_v54  ;;  %v4405_v0 = vld.sshfl [vmem:[%s4110_s11 + $0x68] sm:$0x1 pattern:$0x75316420]  ;;  %v4435_v18 = vrot.slane %v641_v25, %v4115_v7  ;;  %v4462_v54 = vrot.slane %v3893_v44, %v4115_v7 }
  0x35   : > { %7977 = vst [vmem:[#allocation63_spill] sm:$0xff] %v4396_v60  ;;  %7978 = vst [vmem:[#allocation64_spill] sm:$0xff] %v4399_v39  ;;  %v4423_v60 = vcombine.high %v4380_v32, %v4380_v32  ;;  %v713_v32 = vcombine.high %v3894_v31, %v3894_v31  ;;  %v4485_v39 = vcombine.high %v4438_v13, %v4438_v13  ;;  %v8058_v29 = vld [vmem:[#allocation46_spill] sm:$0xff] }
  0x36   : > { %7979 = vst [vmem:[#allocation65_spill] sm:$0xff] %v4402_v45  ;;  %7980 = vst [vmem:[#allocation66_spill] sm:$0xff] %v4405_v0  ;;  %v4474_v0 = vrot.slane %v3894_v31, %v4115_v7  ;;  %v3899_v31 = vld.sshfl [vmem:[%s4110_s11 + $0x9c] sm:$0x33 pattern:$0x75316420] }
  0x37   : > { %7981 = vst [vmem:[#allocation67_spill] sm:$0xff] %v4409_v55  ;;  %7982 = vst [vmem:[#allocation68_spill] sm:$0xff] %v4413_v5  ;;  %v689_v55 = vcombine.high %v3893_v44, %v3893_v44  ;;  %v3896_v5 = vld.sshfl [vmem:[%s4110_s11 + $0x88] sm:$0x33 pattern:$0x75316420]  ;;  %v4481_v44 = vcombine.high %v4435_v18, %v4435_v18  ;;  %v4488_v26 = vrot.slane %v713_v32, %v4115_v7 }
  0x38   : > { %7983 = vst [vmem:[#allocation69_spill] sm:$0xff] %v4416_v36  ;;  %7984 = vst [vmem:[#allocation70_spill] sm:$0xff] %v4423_v60  ;;  %v4441_v60 = vld.sshfl [vmem:[%s4110_s11 + $0x74] sm:$0x1 pattern:$0x75316420]  ;;  %v4506_v32 = vcombine.high %v4462_v54, %v4462_v54  ;;  %v4521_v41 = vcombine.high %v4474_v0, %v4474_v0 }
  0x39   : > { %7985 = vst [vmem:[#allocation71_spill] sm:$0xff] %v4426_v20  ;;  %7986 = vst [vmem:[#allocation72_spill] sm:$0xff] %v4432_v17  ;;  %v4459_v17 = vcombine.high %v4416_v36, %v4416_v36  ;;  %v4471_v25 = vrot.slane %v689_v55, %v4115_v7  ;;  %v761_v36 = vcombine.high %v3896_v5, %v3896_v5  ;;  %v8065_v34 = vld [vmem:[#allocation55_spill] sm:$0xff] }
  0x3a   : > { %7987 = vst [vmem:[#allocation73_spill] sm:$0xff] %v4435_v18  ;;  %7988 = vst [vmem:[#allocation74_spill] sm:$0xff] %v4438_v13  ;;  %v4498_v20 = vrot.slane %v3895_v4, %v4115_v7 }
  0x3b   : > { %7989 = vst [vmem:[#allocation75_spill] sm:$0xff] %v4441_v60  ;;  %7990 = vst [vmem:[#allocation76_spill] sm:$0xff] %v4445_v8  ;;  %v737_v8 = vcombine.high %v3895_v4, %v3895_v4  ;;  %v4512_v60 = vrot.slane %v3896_v5, %v4115_v7  ;;  %v3900_v4 = vld.sshfl [vmem:[%s4110_s11 + $0xa0] sm:$0x33 pattern:$0x75316420]  ;;  %v4517_v18 = vcombine.high %v4471_v25, %v4471_v25 }
  0x3c   : > { %7991 = vst [vmem:[#allocation77_spill] sm:$0xff] %v4449_v38  ;;  %7992 = vst [vmem:[#allocation78_spill] sm:$0xff] %v4452_v23  ;;  %v3898_v38 = vld.sshfl [vmem:[%s4110_s11 + $0x94] sm:$0x33 pattern:$0x75316420] }
  0x3d   : > { %7993 = vst [vmem:[#allocation79_spill] sm:$0xff] %v4459_v17  ;;  %7994 = vst [vmem:[#allocation80_spill] sm:$0xff] %v4462_v54  ;;  %v4477_v17 = vld.sshfl [vmem:[%s4110_s11 + $0x80] sm:$0x1 pattern:$0x75316420]  ;;  %v4509_v55 = vrot.slane %v737_v8, %v4115_v7  ;;  %v4533_v54 = vcombine.high %v4488_v26, %v4488_v26  ;;  %v4562_v46 = vcombine.high %v4512_v60, %v4512_v60 }
  0x3e   : > { %7995 = vst [vmem:[#allocation81_spill] sm:$0xff] %v4468_v30  ;;  %7996 = vst [vmem:[#allocation82_spill] sm:$0xff] %v4471_v25  ;;  %v4495_v30 = vcombine.high %v4452_v23, %v4452_v23  ;;  %v4529_v5 = vld.sshfl [vmem:[%s4110_s11 + $0x98] sm:$0x1 pattern:$0x75316420]  ;;  %v4536_v25 = vrot.slane %v3897_v22, %v4115_v7 }
  0x3f   : > { %7997 = vst [vmem:[#allocation83_spill] sm:$0xff] %v4474_v0  ;;  %7998 = vst [vmem:[#allocation84_spill] sm:$0xff] %v4477_v17  ;;  %v4548_v17 = vrot.slane %v3898_v38, %v4115_v7  ;;  %v4558_v0 = vcombine.high %v4509_v55, %v4509_v55  ;;  %v8072_v1 = vld [vmem:[#allocation64_spill] sm:$0xff] }
  0x40   : > { %7999 = vst [vmem:[#allocation85_spill] sm:$0xff] %v4481_v44  ;;  %8000 = vst [vmem:[#allocation86_spill] sm:$0xff] %v4485_v39  ;;  %v785_v44 = vcombine.high %v3897_v22, %v3897_v22  ;;  %v4502_v39 = vld.sshfl [vmem:[%s4110_s11 + $0x8c] sm:$0x1 pattern:$0x75316420] }
  0x41   : > { %8001 = vst [vmem:[#allocation87_spill] sm:$0xff] %v4488_v26  ;;  %8002 = vst [vmem:[#allocation88_spill] sm:$0xff] %v4495_v30  ;;  %v809_v30 = vcombine.high %v3898_v38, %v3898_v38  ;;  %v4553_v22 = vld.sshfl [vmem:[%s4110_s11 + $0xa4] sm:$0x1 pattern:$0x75316420]  ;;  %v857_v38 = vcombine.high %v3900_v4, %v3900_v4 }
  0x42   : > { %8003 = vst [vmem:[#allocation89_spill] sm:$0xff] %v4498_v20  ;;  %8004 = vst [vmem:[#allocation90_spill] sm:$0xff] %v4502_v39  ;;  %v4545_v8 = vrot.slane %v785_v44, %v4115_v7  ;;  %v3902_v26 = vld.sshfl [vmem:[%s4110_s11 + $0xac] sm:$0x33 pattern:$0x75316420]  ;;  %v4573_v39 = vrot.slane %v3899_v31, %v4115_v7 }
  0x43   : > { %8005 = vst [vmem:[#allocation91_spill] sm:$0xff] %v4506_v32  ;;  %8006 = vst [vmem:[#allocation92_spill] sm:$0xff] %v4509_v55  ;;  %v4524_v32 = vrot.slane %v761_v36, %v4115_v7  ;;  %v4542_v36 = vcombine.high %v4498_v20, %v4498_v20  ;;  %v4565_v44 = vrot.slane %v809_v30, %v4115_v7  ;;  %v8073_v24 = vld [vmem:[#allocation72_spill] sm:$0xff] }
  0x44   : > { %8007 = vst [vmem:[#allocation93_spill] sm:$0xff] %v4512_v60  ;;  %8008 = vst [vmem:[#allocation94_spill] sm:$0xff] %v4517_v18  ;;  %v833_v18 = vcombine.high %v3899_v31, %v3899_v31  ;;  %v4576_v55 = vrot.slane %v3900_v4, %v4115_v7  ;;  %v4582_v30 = vcombine.high %v4536_v25, %v4536_v25 }
  0x45   : > { %8009 = vst [vmem:[#allocation95_spill] sm:$0xff] %v4521_v41  ;;  %8010 = vst [vmem:[#allocation96_spill] sm:$0xff] %v4524_v32  ;;  %v3901_v41 = vld.sshfl [vmem:[%s4110_s11 + $0xa8] sm:$0x33 pattern:$0x75316420]  ;;  %v4591_v4 = vcombine.high %v4545_v8, %v4545_v8  ;;  %v4595_v60 = vcombine.high %v4548_v17, %v4548_v17  ;;  %v905_v27 = vcombine.high %v3902_v26, %v3902_v26 }
  0x46   : > { %8011 = vst [vmem:[#allocation97_spill] sm:$0xff] %v4529_v5  ;;  %8012 = vst [vmem:[#allocation98_spill] sm:$0xff] %v4533_v54  ;;  %v4570_v54 = vcombine.high %v4524_v32, %v4524_v32  ;;  %v881_v20 = vcombine.high %v3901_v41, %v3901_v41 }
  0x47   : > { %8013 = vst [vmem:[#allocation99_spill] sm:$0xff] %v4536_v25  ;;  %8014 = vst [vmem:[#allocation100_spill] sm:$0xff] %v4542_v36  ;;  %v3903_v36 = vld.sshfl [vmem:[%s4110_s11 + $0xb4] sm:$0x33 pattern:$0x75316420]  ;;  %v4616_v25 = vrot.slane %v3901_v41, %v4115_v7  ;;  %v4634_v41 = vrot.slane %v905_v27, %v4115_v7 }
  0x48   : > { %8015 = vst [vmem:[#allocation101_spill] sm:$0xff] %v4545_v8  ;;  %8016 = vst [vmem:[#allocation102_spill] sm:$0xff] %v4548_v17  ;;  %v929_v31 = vcombine.high %v3903_v36, %v3903_v36  ;;  %v3906_v8 = vld.sshfl [vmem:[%s4110_s11 + $0xc4] sm:$0x33 pattern:$0x75316420] }
  0x49   : > { %8017 = vst [vmem:[#allocation103_spill] sm:$0xff] %v4553_v22  ;;  %8018 = vst [vmem:[#allocation104_spill] sm:$0xff] %v4558_v0  ;;  %v4585_v0 = vrot.slane %v833_v18, %v4115_v7  ;;  %v4601_v18 = vcombine.high %v4565_v44, %v4565_v44  ;;  %v1001_v33 = vcombine.high %v3906_v8, %v3906_v8 }
  0x4a   : > { %8019 = vst [vmem:[#allocation105_spill] sm:$0xff] %v4562_v46  ;;  %8020 = vst [vmem:[#allocation106_spill] sm:$0xff] %v4565_v44  ;;  %v3904_v46 = vld.sshfl [vmem:[%s4110_s11 + $0xb8] sm:$0x33 pattern:$0x75316420]  ;;  %v4628_v44 = vrot.slane %v881_v20, %v4115_v7  ;;  %v4664_v47 = vrot.slane %v3906_v8, %v4115_v7  ;;  %v4685_v8 = vcombine.high %v4634_v41, %v4634_v41 }
  0x4b   : > { %8021 = vst [vmem:[#allocation107_spill] sm:$0xff] %v4570_v54  ;;  %8022 = vst [vmem:[#allocation108_spill] sm:$0xff] %v4573_v39  ;;  %v4604_v54 = vrot.slane %v857_v38, %v4115_v7  ;;  %v953_v5 = vcombine.high %v3904_v46, %v3904_v46  ;;  %v4621_v38 = vld.sshfl [vmem:[%s4110_s11 + $0xb0] sm:$0x1 pattern:$0x75316420] }
  0x4c   : > { %8023 = vst [vmem:[#allocation109_spill] sm:$0xff] %v4576_v55  ;;  %8024 = vst [vmem:[#allocation110_spill] sm:$0xff] %v4582_v30  ;;  %v3905_v30 = vld.sshfl [vmem:[%s4110_s11 + $0xc0] sm:$0x33 pattern:$0x75316420] }
  0x4d   : > { %8025 = vst [vmem:[#allocation111_spill] sm:$0xff] %v4585_v0  ;;  %8026 = vst [vmem:[#allocation112_spill] sm:$0xff] %v4591_v4  ;;  %v4609_v4 = vcombine.high %v4573_v39, %v4573_v39  ;;  %v4641_v39 = vld.sshfl [vmem:[%s4110_s11 + $0xbc] sm:$0x1 pattern:$0x75316420]  ;;  %v4645_v20 = vcombine.high %v4604_v54, %v4604_v54  ;;  %v4654_v27 = vrot.slane %v953_v5, %v4115_v7 }
  0x4e   : > { %8027 = vst [vmem:[#allocation113_spill] sm:$0xff] %v4595_v60  ;;  %8028 = vst [vmem:[#allocation114_spill] sm:$0xff] %v4601_v18  ;;  %v4613_v60 = vcombine.high %v4576_v55, %v4576_v55  ;;  %v4625_v18 = vcombine.high %v4585_v0, %v4585_v0  ;;  %v4637_v55 = vrot.slane %v3903_v36, %v4115_v7  ;;  %v8086_v49 = vld [vmem:[#allocation91_spill] sm:$0xff]  ;;  %v8093_v40 = vld [vmem:[#allocation92_spill] sm:$0xff] }
  0x4f   : > { %8029 = vst [vmem:[#allocation115_spill] sm:$0xff] %v4604_v54  ;;  %8030 = vst [vmem:[#allocation116_spill] sm:$0xff] %v4609_v4  ;;  %v4631_v4 = vrot.slane %v3902_v26, %v4115_v7  ;;  %v4651_v26 = vrot.slane %v3904_v46, %v4115_v7  ;;  %v4658_v36 = vcombine.high %v4616_v25, %v4616_v25 }
  0x50   : > { %8031 = vst [vmem:[#allocation117_spill] sm:$0xff] %v4613_v60  ;;  %8032 = vst [vmem:[#allocation118_spill] sm:$0xff] %v4621_v38  ;;  %v977_v60 = vcombine.high %v3905_v30, %v3905_v30  ;;  %v4661_v22 = vrot.slane %v3905_v30, %v4115_v7  ;;  %v4673_v46 = vcombine.high %v4628_v44, %v4628_v44 }
  0x51   : > { %8033 = vst [vmem:[#allocation119_spill] sm:$0xff] %v4625_v18  ;;  %8034 = vst [vmem:[#allocation120_spill] sm:$0xff] %v4628_v44  ;;  %v4648_v18 = vrot.slane %v929_v31, %v4115_v7  ;;  %v4677_v5 = vcombine.high %v4631_v4, %v4631_v4  ;;  %v4689_v31 = vcombine.high %v4637_v55, %v4637_v55  ;;  %v8097_v6 = vld [vmem:[#allocation105_spill] sm:$0xff]  ;;  %v8103_v45 = vld [vmem:[#allocation106_spill] sm:$0xff]  ;;  %v8115_v44 = vmov %v4651_v26 }
  0x52   : > { %8035 = vst [vmem:[#allocation121_spill] sm:$0xff] %v4631_v4  ;;  %8036 = vst [vmem:[#allocation122_spill] sm:$0xff] %v4641_v39  ;;  %v4692_v38 = vrot.slane %v1001_v33, %v4115_v7  ;;  %v4702_v30 = vcombine.high %v4651_v26, %v4651_v26  ;;  %v4706_v51 = vcombine.high %v4654_v27, %v4654_v27  ;;  %v8106_v32 = vld [vmem:[#allocation108_spill] sm:$0xff] }
  0x53   : > { %8037 = vst [vmem:[#allocation123_spill] sm:$0xff] %v4645_v20  ;;  %8038 = vst [vmem:[#allocation124_spill] sm:$0xff] %v4648_v18  ;;  %v4669_v20 = vld.sshfl [vmem:[%s4110_s11 + $0xc8] sm:$0x1 pattern:$0x75316420]  ;;  %v4711_v33 = vcombine.high %v4661_v22, %v4661_v22  ;;  %v4715_v4 = vcombine.high %v4664_v47, %v4664_v47  ;;  %v8114_v17 = vmov %v4689_v31 }
  0x54   : > { %8039 = vst [vmem:[#allocation125_spill] sm:$0xff] %v4651_v26  ;;  %8040 = vst [vmem:[#allocation126_spill] sm:$0xff] %v4654_v27  ;;  %v8101_v13 = vld [vmem:[#allocation110_spill] sm:$0xff]  ;;  %v8109_v14 = vld [vmem:[#allocation109_spill] sm:$0xff]  ;;  %v8117_v0 = vmov %v4706_v51 }
  0x55   : > { %8041 = vst [vmem:[#allocation127_spill] sm:$0xff] %v4658_v36  ;;  %8042 = vst [vmem:[#allocation128_spill] sm:$0xff] %v4664_v47  ;;  %v4680_v36 = vrot.slane %v977_v60, %v4115_v7  ;;  %v4698_v60 = vcombine.high %v4648_v18, %v4648_v18  ;;  %v8104_v12 = vld [vmem:[#allocation113_spill] sm:$0xff]  ;;  %v8129_v26 = vld [vmem:[#allocation14_spill] sm:$0xff] }
  0x56   : > { %8043 = vst [vmem:[#allocation129_spill] sm:$0xff] %v4669_v20  ;;  %8044 = vst [vmem:[#allocation130_spill] sm:$0xff] %v4673_v46  ;;  %v8107_v35 = vld [vmem:[#allocation116_spill] sm:$0xff]  ;;  %v8120_v27 = vld [vmem:[#allocation5_spill] sm:$0xff]  ;;  %v8130_v20 = vshrl.u32 %v8129_v26, 16 }
  0x57   : > { %8045 = vst [vmem:[#allocation131_spill] sm:$0xff] %v4677_v5  ;;  %8046 = vst [vmem:[#allocation132_spill] sm:$0xff] %v4680_v36  ;;  %v8110_v23 = vld [vmem:[#allocation117_spill] sm:$0xff]  ;;  %v8132_v7 = vld [vmem:[#allocation7_spill] sm:$0xff] }
  0x58   : > { %8047 = vst [vmem:[#allocation133_spill] sm:$0xff] %v4685_v8  ;;  %8048 = vst [vmem:[#allocation134_spill] sm:$0xff] %v4689_v31  ;;  %v8108_v15 = vld [vmem:[#allocation119_spill] sm:$0xff] }
  0x59   : > { %8049 = vst [vmem:[#allocation135_spill] sm:$0xff] %v4692_v38  ;;  %8050 = vst [vmem:[#allocation136_spill] sm:$0xff] %v4698_v60  ;;  %v4864_v60 = vmax.bf16 %v8130_v20, %v8129_v26 }
  0x5a   : > { %8051 = vst [vmem:[#allocation137_spill] sm:$0xff] %v4702_v30  ;;  %8052 = vst [vmem:[#allocation138_spill] sm:$0xff] %v4706_v51  ;;  %v4722_v30 = vcombine.high %v4680_v36, %v4680_v36  ;;  %v8121_v51 = vshrl.u32 %v8120_v27, 16  ;;  %v4854_v36 = vmax.bf16 %v8124_v43, %v8123_v37 }
  0x5b   : > { %8053 = vst [vmem:[#allocation139_spill] sm:$0xff] %v4711_v33  ;;  %8054 = vst [vmem:[#allocation140_spill] sm:$0xff] %v4715_v4  ;;  %v4729_v33 = vcombine.high %v4692_v38, %v4692_v38  ;;  %v8127_v4 = vshrl.u32 %v8126_v61, 16 }
  0x5c   : > { %8055 = vst [vmem:[#allocation141_spill] sm:$0xff] %v4722_v30  ;;  %v8112_v21 = vld [vmem:[#allocation127_spill] sm:$0xff]  ;;  %v4849_v31 = vmax.bf16 %v8121_v51, %v8120_v27  ;;  %8125 = vst [vmem:[#allocation113_spill] sm:$0xff] %v4854_v36  ;;  %v8135_v27 = vld [vmem:[#allocation8_spill] sm:$0xff] }
  0x5d   : > { %8056 = vst [vmem:[#allocation142_spill] sm:$0xff] %v4729_v33  ;;  %v4859_v39 = vmax.bf16 %v8127_v4, %v8126_v61  ;;  %8131 = vst [vmem:[#allocation119_spill] sm:$0xff] %v4864_v60  ;;  %v8133_v33 = vshrl.u32 %v8132_v7, 16  ;;  %v8138_v36 = vld [vmem:[#allocation15_spill] sm:$0xff]  ;;  %v8144_v60 = vld [vmem:[#allocation10_spill] sm:$0xff] }
  0x5e   : > { %8122 = vst [vmem:[#allocation106_spill] sm:$0xff] %v4849_v31  ;;  %v8136_v31 = vshrl.u32 %v8135_v27, 16  ;;  %v8139_v37 = vshrl.u32 %v8138_v36, 16  ;;  %v8145_v26 = vshrl.u32 %v8144_v60, 16 }
  0x5f   : > { %8128 = vst [vmem:[#allocation108_spill] sm:$0xff] %v4859_v39  ;;  %v4869_v51 = vmax.bf16 %v8133_v33, %v8132_v7  ;;  %v8141_v39 = vld [vmem:[#allocation17_spill] sm:$0xff] }
  0x60   : > { %v4874_v43 = vmax.bf16 %v8136_v31, %v8135_v27  ;;  %v4879_v4 = vmax.bf16 %v8139_v37, %v8138_v36  ;;  %v8142_v61 = vshrl.u32 %v8141_v39, 16  ;;  %v4889_v33 = vmax.bf16 %v8145_v26, %v8144_v60  ;;  %v8159_v60 = vld [vmem:[#allocation16_spill] sm:$0xff] }
  0x61   : > { %v8116_v46 = vld [vmem:[#allocation137_spill] sm:$0xff]  ;;  %8134 = vst [vmem:[#allocation5_spill] sm:$0xff] %v4869_v51  ;;  %v8147_v51 = vld [vmem:[#allocation11_spill] sm:$0xff] }
  0x62   : > { %v8118_v8 = vld [vmem:[#allocation139_spill] sm:$0xff]  ;;  %8137 = vst [vmem:[#allocation143_spill] sm:$0xff] %v4874_v43  ;;  %8140 = vst [vmem:[#allocation144_spill] sm:$0xff] %v4879_v4  ;;  %v4884_v20 = vmax.bf16 %v8142_v61, %v8141_v39  ;;  %v8148_v7 = vshrl.u32 %v8147_v51, 16  ;;  %v8153_v4 = vld [vmem:[#allocation22_spill] sm:$0xff] }
  0x63   : > { %8146 = vst [vmem:[#allocation10_spill] sm:$0xff] %v4889_v33  ;;  %v8150_v43 = vld [vmem:[#allocation19_spill] sm:$0xff]  ;;  %v8154_v36 = vshrl.u32 %v8153_v4, 16  ;;  %v8160_v33 = vshrl.u32 %v8159_v60, 16 }
  0x64   : > { %8143 = vst [vmem:[#allocation145_spill] sm:$0xff] %v4884_v20  ;;  %v4894_v31 = vmax.bf16 %v8148_v7, %v8147_v51  ;;  %v8151_v27 = vshrl.u32 %v8150_v43, 16  ;;  %v8156_v20 = vld [vmem:[#allocation12_spill] sm:$0xff] }
  0x65   : > { %v4904_v61 = vmax.bf16 %v8154_v36, %v8153_v4  ;;  %v8157_v39 = vshrl.u32 %v8156_v20, 16  ;;  %v4914_v7 = vmax.bf16 %v8160_v33, %v8159_v60 }
  0x66   : > { %8149 = vst [vmem:[#allocation146_spill] sm:$0xff] %v4894_v31  ;;  %v4899_v37 = vmax.bf16 %v8151_v27, %v8150_v43  ;;  %v8162_v31 = vld [vmem:[#allocation23_spill] sm:$0xff] }
  0x67   : > { %8155 = vst [vmem:[#allocation148_spill] sm:$0xff] %v4904_v61  ;;  %v4909_v26 = vmax.bf16 %v8157_v39, %v8156_v20  ;;  %8161 = vst [vmem:[#allocation16_spill] sm:$0xff] %v4914_v7  ;;  %v8163_v51 = vshrl.u32 %v8162_v31, 16  ;;  %v8168_v61 = vld [vmem:[#allocation18_spill] sm:$0xff]  ;;  %v8172_v7 = vshrl.u32 %v4216_v56, 16 }
  0x68   : > { %8152 = vst [vmem:[#allocation147_spill] sm:$0xff] %v4899_v37  ;;  %v8165_v37 = vld [vmem:[#allocation24_spill] sm:$0xff]  ;;  %v8169_v4 = vshrl.u32 %v8168_v61, 16 }
  0x69   : > { %8158 = vst [vmem:[#allocation149_spill] sm:$0xff] %v4909_v26  ;;  %v4919_v27 = vmax.bf16 %v8163_v51, %v8162_v31  ;;  %v8166_v43 = vshrl.u32 %v8165_v37, 16  ;;  %v8170_v26 = vshrl.u32 %v4183_v42, 16  ;;  %v4939_v51 = vmax.bf16 %v8172_v7, %v4216_v56 }
  0x6a   : > { %v4929_v39 = vmax.bf16 %v8169_v4, %v8168_v61  ;;  %v8180_v61 = vshrl.u32 %v4200_v48, 16 }
  0x6b   : > { %8164 = vst [vmem:[#allocation150_spill] sm:$0xff] %v4919_v27  ;;  %v4924_v36 = vmax.bf16 %v8166_v43, %v8165_v37  ;;  %v4934_v33 = vmax.bf16 %v8170_v26, %v4183_v42  ;;  %8173 = vst [vmem:[#allocation152_spill] sm:$0xff] %v4939_v51  ;;  %v8174_v27 = vld [vmem:[#allocation27_spill] sm:$0xff]  ;;  %v8184_v51 = vshrl.u32 %v4243_v2, 16 }
  0x6c   : > { %v8175_v31 = vshrl.u32 %v8174_v27, 16  ;;  %v4954_v26 = vmax.bf16 %v8180_v61, %v4200_v48 }
  0x6d   : > { %8167 = vst [vmem:[#allocation151_spill] sm:$0xff] %v4924_v36  ;;  %8171 = vst [vmem:[#allocation18_spill] sm:$0xff] %v4934_v33  ;;  %v8177_v36 = vld [vmem:[#allocation20_spill] sm:$0xff]  ;;  %v8182_v33 = vshrl.u32 %v4233_v62, 16 }
  0x6e   : > { %v4944_v43 = vmax.bf16 %v8175_v31, %v8174_v27  ;;  %v8178_v37 = vshrl.u32 %v8177_v36, 16  ;;  %8181 = vst [vmem:[#allocation153_spill] sm:$0xff] %v4954_v26  ;;  %v4964_v31 = vmax.bf16 %v8184_v51, %v4243_v2  ;;  %v8189_v26 = vshrl.u32 %v4252_v9, 16 }
  0x6f   : > { %v4959_v7 = vmax.bf16 %v8182_v33, %v4233_v62 }
  0x70   : > { %8176 = vst [vmem:[#allocation27_spill] sm:$0xff] %v4944_v43  ;;  %v4949_v4 = vmax.bf16 %v8178_v37, %v8177_v36  ;;  %8185 = vst [vmem:[#allocation155_spill] sm:$0xff] %v4964_v31  ;;  %v8186_v43 = vshrl.u32 %v4210_v52, 16  ;;  %v4979_v33 = vmax.bf16 %v8189_v26, %v4252_v9  ;;  %v8193_v31 = vshrl.u32 %v4222_v58, 16 }
  0x71   : > { %8183 = vst [vmem:[#allocation154_spill] sm:$0xff] %v4959_v7  ;;  %v8191_v7 = vshrl.u32 %v4265_v16, 16 }
  0x72   : > { %8179 = vst [vmem:[#allocation20_spill] sm:$0xff] %v4949_v4  ;;  %v4969_v37 = vmax.bf16 %v8186_v43, %v4210_v52  ;;  %v8187_v4 = vshrl.u32 %v4219_v57, 16  ;;  %8190 = vst [vmem:[#allocation157_spill] sm:$0xff] %v4979_v33  ;;  %v4989_v52 = vmax.bf16 %v8193_v31, %v4222_v58  ;;  %v8195_v43 = vshrl.u32 %v4236_v63, 16 }
  0x73   : > { %v4984_v51 = vmax.bf16 %v8191_v7, %v4265_v16  ;;  %v8199_v33 = vshrl.u32 %v4279_v28, 16 }
  0x74   : > { %v4974_v61 = vmax.bf16 %v8187_v4, %v4219_v57  ;;  %8194 = vst [vmem:[#allocation159_spill] sm:$0xff] %v4989_v52  ;;  %v4994_v4 = vmax.bf16 %v8195_v43, %v4236_v63  ;;  %v8203_v52 = vshrl.u32 %v4255_v10, 16 }
  0x75   : > { %8192 = vst [vmem:[#allocation158_spill] sm:$0xff] %v4984_v51  ;;  %v5004_v7 = vmax.bf16 %v8199_v33, %v4279_v28  ;;  %v8201_v51 = vshrl.u32 %v4246_v3, 16 }
  0x76   : > { %8188 = vst [vmem:[#allocation156_spill] sm:$0xff] %v4974_v61  ;;  %8196 = vst [vmem:[#allocation160_spill] sm:$0xff] %v4994_v4  ;;  %v8197_v61 = vshrl.u32 %v4269_v19, 16  ;;  %v5014_v43 = vmax.bf16 %v8203_v52, %v4255_v10  ;;  %v8205_v4 = vshrl.u32 %v4288_v53, 16 }
  0x77   : > { %8200 = vst [vmem:[#allocation162_spill] sm:$0xff] %v5004_v7  ;;  %v5009_v31 = vmax.bf16 %v8201_v51, %v4246_v3  ;;  %v8209_v7 = vshrl.u32 %v4258_v11, 16  ;;  %v8211_v51 = vld [vmem:[#allocation33_spill] sm:$0xff] }
  0x78   : > { %v4999_v26 = vmax.bf16 %v8197_v61, %v4269_v19  ;;  %8204 = vst [vmem:[#allocation164_spill] sm:$0xff] %v5014_v43  ;;  %v5019_v61 = vmax.bf16 %v8205_v4, %v4288_v53  ;;  %v8214_v43 = vld [vmem:[#allocation41_spill] sm:$0xff] }
  0x79   : > { %8202 = vst [vmem:[#allocation163_spill] sm:$0xff] %v5009_v31  ;;  %v5029_v3 = vmax.bf16 %v8209_v7, %v4258_v11  ;;  %v8212_v31 = vshrl.u32 %v8211_v51, 16  ;;  %v8215_v10 = vshrl.u32 %v8214_v43, 16 }
  0x7a   : > { %8198 = vst [vmem:[#allocation161_spill] sm:$0xff] %v4999_v26  ;;  %8206 = vst [vmem:[#allocation165_spill] sm:$0xff] %v5019_v61  ;;  %v8207_v26 = vshrl.u32 %v4301_v50, 16  ;;  %v8217_v61 = vld [vmem:[#allocation43_spill] sm:$0xff] }
  0x7b   : > { %8210 = vst [vmem:[#allocation167_spill] sm:$0xff] %v5029_v3  ;;  %v5034_v52 = vmax.bf16 %v8212_v31, %v8211_v51  ;;  %v5039_v4 = vmax.bf16 %v8215_v10, %v8214_v43  ;;  %v8218_v53 = vshrl.u32 %v8217_v61, 16  ;;  %v8223_v3 = vshrl.u32 %v4291_v59, 16 }
  0x7c   : > { %v5024_v33 = vmax.bf16 %v8207_v26, %v4301_v50 }
  0x7d   : > { %8213 = vst [vmem:[#allocation168_spill] sm:$0xff] %v5034_v52  ;;  %8216 = vst [vmem:[#allocation169_spill] sm:$0xff] %v5039_v4  ;;  %v5044_v26 = vmax.bf16 %v8218_v53, %v8217_v61  ;;  %v5054_v31 = vmax.bf16 %v8223_v3, %v4291_v59  ;;  %v8225_v52 = vld [vmem:[#allocation45_spill] sm:$0xff] }
  0x7e   : > { %8208 = vst [vmem:[#allocation166_spill] sm:$0xff] %v5024_v33  ;;  %v8220_v33 = vld [vmem:[#allocation35_spill] sm:$0xff]  ;;  %v8226_v51 = vshrl.u32 %v8225_v52, 16  ;;  %v8228_v4 = vld [vmem:[#allocation49_spill] sm:$0xff] }
  0x7f   : > { %8219 = vst [vmem:[#allocation170_spill] sm:$0xff] %v5044_v26  ;;  %v8221_v50 = vshrl.u32 %v8220_v33, 16  ;;  %8224 = vst [vmem:[#allocation171_spill] sm:$0xff] %v5054_v31  ;;  %v8229_v43 = vshrl.u32 %v8228_v4, 16  ;;  %v8231_v26 = vld [vmem:[#allocation38_spill] sm:$0xff]  ;;  %v8536_v58 = vld [vmem:[#allocation164_spill] sm:$0xff] }
  0x80   : > { %v5059_v10 = vmax.bf16 %v8226_v51, %v8225_v52  ;;  %v8232_v61 = vshrl.u32 %v8231_v26, 16  ;;  %v8237_v31 = vld [vmem:[#allocation50_spill] sm:$0xff] }
  0x81   : > { %v5049_v7 = vmax.bf16 %v8221_v50, %v8220_v33  ;;  %v5064_v53 = vmax.bf16 %v8229_v43, %v8228_v4  ;;  %v8234_v33 = vld [vmem:[#allocation42_spill] sm:$0xff]  ;;  %v8238_v59 = vshrl.u32 %v8237_v31, 16  ;;  %v8539_v63 = vld [vmem:[#allocation165_spill] sm:$0xff] }
  0x82   : > { %8227 = vst [vmem:[#allocation172_spill] sm:$0xff] %v5059_v10  ;;  %v5069_v50 = vmax.bf16 %v8232_v61, %v8231_v26  ;;  %v8240_v10 = vld [vmem:[#allocation52_spill] sm:$0xff] }
  0x83   : > { %8222 = vst [vmem:[#allocation35_spill] sm:$0xff] %v5049_v7  ;;  %8230 = vst [vmem:[#allocation173_spill] sm:$0xff] %v5064_v53  ;;  %v8235_v7 = vshrl.u32 %v8234_v33, 16  ;;  %v5079_v51 = vmax.bf16 %v8238_v59, %v8237_v31  ;;  %v8241_v52 = vshrl.u32 %v8240_v10, 16  ;;  %v8243_v53 = vld [vmem:[#allocation44_spill] sm:$0xff] }
  0x84   : > { %8233 = vst [vmem:[#allocation174_spill] sm:$0xff] %v5069_v50  ;;  %v8244_v4 = vshrl.u32 %v8243_v53, 16  ;;  %v8246_v50 = vshrl.u32 %v8058_v29, 16 }
  0x85   : > { %v5074_v3 = vmax.bf16 %v8235_v7, %v8234_v33  ;;  %8239 = vst [vmem:[#allocation176_spill] sm:$0xff] %v5079_v51  ;;  %v5084_v43 = vmax.bf16 %v8241_v52, %v8240_v10  ;;  %v8251_v51 = vld [vmem:[#allocation58_spill] sm:$0xff] }
  0x86   : > { %v5089_v61 = vmax.bf16 %v8244_v4, %v8243_v53  ;;  %v5094_v7 = vmax.bf16 %v8246_v50, %v8058_v29  ;;  %v8252_v31 = vshrl.u32 %v8251_v51, 16  ;;  %v8257_v53 = vld [vmem:[#allocation51_spill] sm:$0xff] }
  0x87   : > { %8236 = vst [vmem:[#allocation175_spill] sm:$0xff] %v5074_v3  ;;  %8242 = vst [vmem:[#allocation177_spill] sm:$0xff] %v5084_v43  ;;  %v8248_v3 = vld [vmem:[#allocation54_spill] sm:$0xff]  ;;  %v8254_v43 = vld [vmem:[#allocation47_spill] sm:$0xff] }
  0x88   : > { %8245 = vst [vmem:[#allocation44_spill] sm:$0xff] %v5089_v61  ;;  %8247 = vst [vmem:[#allocation178_spill] sm:$0xff] %v5094_v7  ;;  %v8249_v33 = vshrl.u32 %v8248_v3, 16  ;;  %v5104_v52 = vmax.bf16 %v8252_v31, %v8251_v51  ;;  %v8255_v10 = vshrl.u32 %v8254_v43, 16  ;;  %v8258_v61 = vshrl.u32 %v8257_v53, 16  ;;  %v8260_v7 = vld [vmem:[#allocation59_spill] sm:$0xff] }
  0x89   : > { %v8261_v29 = vshrl.u32 %v8260_v7, 16  ;;  %v8561_v19 = vld [vmem:[#allocation172_spill] sm:$0xff] }
  0x8a   : > { %v5099_v59 = vmax.bf16 %v8249_v33, %v8248_v3  ;;  %8253 = vst [vmem:[#allocation180_spill] sm:$0xff] %v5104_v52  ;;  %v5109_v4 = vmax.bf16 %v8255_v10, %v8254_v43  ;;  %v5114_v50 = vmax.bf16 %v8258_v61, %v8257_v53  ;;  %v8266_v52 = vld [vmem:[#allocation53_spill] sm:$0xff] }
  0x8b   : > { %v5119_v33 = vmax.bf16 %v8261_v29, %v8260_v7  ;;  %v8267_v51 = vshrl.u32 %v8266_v52, 16 }
  0x8c   : > { %8250 = vst [vmem:[#allocation179_spill] sm:$0xff] %v5099_v59  ;;  %8256 = vst [vmem:[#allocation47_spill] sm:$0xff] %v5109_v4  ;;  %v8263_v59 = vld [vmem:[#allocation61_spill] sm:$0xff]  ;;  %v8269_v4 = vshrl.u32 %v8065_v34, 16 }
  0x8d   : > { %8259 = vst [vmem:[#allocation181_spill] sm:$0xff] %v5114_v50  ;;  %8262 = vst [vmem:[#allocation182_spill] sm:$0xff] %v5119_v33  ;;  %v8264_v3 = vshrl.u32 %v8263_v59, 16  ;;  %v5129_v10 = vmax.bf16 %v8267_v51, %v8266_v52  ;;  %v8271_v50 = vld [vmem:[#allocation63_spill] sm:$0xff]  ;;  %v8280_v52 = vld [vmem:[#allocation60_spill] sm:$0xff] }
  0x8e   : > { %v5134_v61 = vmax.bf16 %v8269_v4, %v8065_v34  ;;  %v8272_v53 = vshrl.u32 %v8271_v50, 16  ;;  %v8274_v33 = vld [vmem:[#allocation67_spill] sm:$0xff] }
  0x8f   : > { %v5124_v31 = vmax.bf16 %v8264_v3, %v8263_v59  ;;  %8268 = vst [vmem:[#allocation53_spill] sm:$0xff] %v5129_v10  ;;  %v8275_v7 = vshrl.u32 %v8274_v33, 16  ;;  %v8281_v10 = vshrl.u32 %v8280_v52, 16  ;;  %v8577_v26 = vld [vmem:[#allocation178_spill] sm:$0xff] }
  0x90   : > { %8270 = vst [vmem:[#allocation184_spill] sm:$0xff] %v5134_v61  ;;  %v5139_v29 = vmax.bf16 %v8272_v53, %v8271_v50  ;;  %v8283_v61 = vld [vmem:[#allocation68_spill] sm:$0xff] }
  0x91   : > { %8265 = vst [vmem:[#allocation183_spill] sm:$0xff] %v5124_v31  ;;  %v5144_v3 = vmax.bf16 %v8275_v7, %v8274_v33  ;;  %v8277_v31 = vld [vmem:[#allocation56_spill] sm:$0xff]  ;;  %v5154_v4 = vmax.bf16 %v8281_v10, %v8280_v52  ;;  %v8284_v34 = vshrl.u32 %v8283_v61, 16 }
  0x92   : > { %8273 = vst [vmem:[#allocation185_spill] sm:$0xff] %v5139_v29  ;;  %v8278_v59 = vshrl.u32 %v8277_v31, 16  ;;  %v8286_v29 = vld [vmem:[#allocation70_spill] sm:$0xff] }
  0x93   : > { %8276 = vst [vmem:[#allocation186_spill] sm:$0xff] %v5144_v3  ;;  %8282 = vst [vmem:[#allocation188_spill] sm:$0xff] %v5154_v4  ;;  %v5159_v53 = vmax.bf16 %v8284_v34, %v8283_v61  ;;  %v8287_v50 = vshrl.u32 %v8286_v29, 16  ;;  %v8289_v3 = vld [vmem:[#allocation62_spill] sm:$0xff]  ;;  %v8294_v4 = vshrl.u32 %v8073_v24, 16 }
  0x94   : > { %v5149_v51 = vmax.bf16 %v8278_v59, %v8277_v31  ;;  %v8290_v33 = vshrl.u32 %v8289_v3, 16 }
  0x95   : > { %8285 = vst [vmem:[#allocation189_spill] sm:$0xff] %v5159_v53  ;;  %v5164_v7 = vmax.bf16 %v8287_v50, %v8286_v29  ;;  %v5179_v34 = vmax.bf16 %v8294_v4, %v8073_v24  ;;  %v8296_v53 = vld [vmem:[#allocation76_spill] sm:$0xff] }
  0x96   : > { %8279 = vst [vmem:[#allocation187_spill] sm:$0xff] %v5149_v51  ;;  %v5169_v59 = vmax.bf16 %v8290_v33, %v8289_v3  ;;  %v8292_v51 = vshrl.u32 %v8072_v1, 16  ;;  %v8297_v61 = vshrl.u32 %v8296_v53, 16  ;;  %v8302_v3 = vld [vmem:[#allocation69_spill] sm:$0xff] }
  0x97   : > { %8288 = vst [vmem:[#allocation190_spill] sm:$0xff] %v5164_v7  ;;  %8295 = vst [vmem:[#allocation192_spill] sm:$0xff] %v5179_v34  ;;  %v8299_v7 = vld [vmem:[#allocation65_spill] sm:$0xff]  ;;  %v8308_v34 = vld [vmem:[#allocation79_spill] sm:$0xff] }
  0x98   : > { %8291 = vst [vmem:[#allocation62_spill] sm:$0xff] %v5169_v59  ;;  %v5174_v10 = vmax.bf16 %v8292_v51, %v8072_v1  ;;  %v5184_v50 = vmax.bf16 %v8297_v61, %v8296_v53  ;;  %v8300_v29 = vshrl.u32 %v8299_v7, 16  ;;  %v8303_v59 = vshrl.u32 %v8302_v3, 16 }
  0x99   : > { %v8309_v24 = vshrl.u32 %v8308_v34, 16 }
  0x9a   : > { %8293 = vst [vmem:[#allocation191_spill] sm:$0xff] %v5174_v10  ;;  %8298 = vst [vmem:[#allocation193_spill] sm:$0xff] %v5184_v50  ;;  %v5189_v33 = vmax.bf16 %v8300_v29, %v8299_v7  ;;  %v5194_v51 = vmax.bf16 %v8303_v59, %v8302_v3  ;;  %v8305_v10 = vld [vmem:[#allocation77_spill] sm:$0xff]  ;;  %v8311_v50 = vld [vmem:[#allocation71_spill] sm:$0xff] }
  0x9b   : > { %v8306_v1 = vshrl.u32 %v8305_v10, 16  ;;  %v5204_v61 = vmax.bf16 %v8309_v24, %v8308_v34  ;;  %v8312_v53 = vshrl.u32 %v8311_v50, 16 }
  0x9c   : > { %8301 = vst [vmem:[#allocation194_spill] sm:$0xff] %v5189_v33  ;;  %8304 = vst [vmem:[#allocation195_spill] sm:$0xff] %v5194_v51  ;;  %v8314_v33 = vld [vmem:[#allocation73_spill] sm:$0xff] }
  0x9d   : > { %v5199_v4 = vmax.bf16 %v8306_v1, %v8305_v10  ;;  %8310 = vst [vmem:[#allocation197_spill] sm:$0xff] %v5204_v61  ;;  %v5209_v29 = vmax.bf16 %v8312_v53, %v8311_v50  ;;  %v8315_v7 = vshrl.u32 %v8314_v33, 16  ;;  %v8317_v51 = vld [vmem:[#allocation81_spill] sm:$0xff]  ;;  %v8323_v61 = vld [vmem:[#allocation74_spill] sm:$0xff] }
  0x9e   : > { %v8318_v3 = vshrl.u32 %v8317_v51, 16  ;;  %v8324_v34 = vshrl.u32 %v8323_v61, 16  ;;  %v8326_v50 = vld [vmem:[#allocation78_spill] sm:$0xff]  ;;  %v8620_v52 = vld [vmem:[#allocation192_spill] sm:$0xff] }
  0x9f   : > { %8307 = vst [vmem:[#allocation196_spill] sm:$0xff] %v5199_v4  ;;  %8313 = vst [vmem:[#allocation71_spill] sm:$0xff] %v5209_v29  ;;  %v5214_v59 = vmax.bf16 %v8315_v7, %v8314_v33  ;;  %v8320_v4 = vld [vmem:[#allocation85_spill] sm:$0xff]  ;;  %v8327_v29 = vshrl.u32 %v8326_v50, 16 }
  0xa0   : > { %v5219_v1 = vmax.bf16 %v8318_v3, %v8317_v51  ;;  %v8321_v10 = vshrl.u32 %v8320_v4, 16  ;;  %v5229_v53 = vmax.bf16 %v8324_v34, %v8323_v61 }
  0xa1   : > { %8316 = vst [vmem:[#allocation198_spill] sm:$0xff] %v5214_v59  ;;  %v5234_v7 = vmax.bf16 %v8327_v29, %v8326_v50  ;;  %v8329_v59 = vld [vmem:[#allocation86_spill] sm:$0xff]  ;;  %v8617_v31 = vld [vmem:[#allocation191_spill] sm:$0xff] }
  0xa2   : > { %8319 = vst [vmem:[#allocation199_spill] sm:$0xff] %v5219_v1  ;;  %v5224_v24 = vmax.bf16 %v8321_v10, %v8320_v4  ;;  %8325 = vst [vmem:[#allocation201_spill] sm:$0xff] %v5229_v53  ;;  %v8330_v33 = vshrl.u32 %v8329_v59, 16  ;;  %v8332_v1 = vld [vmem:[#allocation88_spill] sm:$0xff]  ;;  %v8338_v53 = vld [vmem:[#allocation82_spill] sm:$0xff] }
  0xa3   : > { %8328 = vst [vmem:[#allocation202_spill] sm:$0xff] %v5234_v7  ;;  %v8333_v51 = vshrl.u32 %v8332_v1, 16  ;;  %v8339_v61 = vshrl.u32 %v8338_v53, 16  ;;  %v8341_v7 = vshrl.u32 %v8086_v49, 16 }
  0xa4   : > { %8322 = vst [vmem:[#allocation200_spill] sm:$0xff] %v5224_v24  ;;  %v5239_v3 = vmax.bf16 %v8330_v33, %v8329_v59  ;;  %v8335_v24 = vld [vmem:[#allocation80_spill] sm:$0xff] }
  0xa5   : > { %v5244_v10 = vmax.bf16 %v8333_v51, %v8332_v1  ;;  %v8336_v4 = vshrl.u32 %v8335_v24, 16  ;;  %v5254_v29 = vmax.bf16 %v8339_v61, %v8338_v53  ;;  %v5259_v33 = vmax.bf16 %v8341_v7, %v8086_v49 }
  0xa6   : > { %8331 = vst [vmem:[#allocation203_spill] sm:$0xff] %v5239_v3  ;;  %v8343_v3 = vld [vmem:[#allocation94_spill] sm:$0xff] }
  0xa7   : > { %8334 = vst [vmem:[#allocation204_spill] sm:$0xff] %v5244_v10  ;;  %v5249_v34 = vmax.bf16 %v8336_v4, %v8335_v24  ;;  %8340 = vst [vmem:[#allocation205_spill] sm:$0xff] %v5254_v29  ;;  %v8344_v59 = vshrl.u32 %v8343_v3, 16  ;;  %v8346_v10 = vld [vmem:[#allocation83_spill] sm:$0xff] }
  0xa8   : > { %8342 = vst [vmem:[#allocation206_spill] sm:$0xff] %v5259_v33  ;;  %v8347_v1 = vshrl.u32 %v8346_v10, 16  ;;  %v8349_v24 = vld [vmem:[#allocation87_spill] sm:$0xff]  ;;  %v8355_v33 = vld [vmem:[#allocation98_spill] sm:$0xff] }
  0xa9   : > { %8337 = vst [vmem:[#allocation80_spill] sm:$0xff] %v5249_v34  ;;  %v5264_v51 = vmax.bf16 %v8344_v59, %v8343_v3  ;;  %v8350_v34 = vshrl.u32 %v8349_v24, 16  ;;  %v8352_v29 = vld [vmem:[#allocation95_spill] sm:$0xff]  ;;  %v8356_v49 = vshrl.u32 %v8355_v33, 16 }
  0xaa   : > { %v5269_v4 = vmax.bf16 %v8347_v1, %v8346_v10  ;;  %v8353_v53 = vshrl.u32 %v8352_v29, 16 }
  0xab   : > { %8345 = vst [vmem:[#allocation207_spill] sm:$0xff] %v5264_v51  ;;  %v5274_v61 = vmax.bf16 %v8350_v34, %v8349_v24  ;;  %v5284_v59 = vmax.bf16 %v8356_v49, %v8355_v33  ;;  %v8358_v51 = vld [vmem:[#allocation89_spill] sm:$0xff] }
  0xac   : > { %8348 = vst [vmem:[#allocation83_spill] sm:$0xff] %v5269_v4  ;;  %v5279_v7 = vmax.bf16 %v8353_v53, %v8352_v29  ;;  %v8359_v3 = vshrl.u32 %v8358_v51, 16  ;;  %v8361_v4 = vshrl.u32 %v8093_v40, 16 }
  0xad   : > { %8351 = vst [vmem:[#allocation208_spill] sm:$0xff] %v5274_v61  ;;  %8357 = vst [vmem:[#allocation210_spill] sm:$0xff] %v5284_v59  ;;  %v8363_v61 = vld [vmem:[#allocation100_spill] sm:$0xff]  ;;  %v8369_v59 = vld [vmem:[#allocation93_spill] sm:$0xff] }
  0xae   : > { %8354 = vst [vmem:[#allocation209_spill] sm:$0xff] %v5279_v7  ;;  %v5289_v1 = vmax.bf16 %v8359_v3, %v8358_v51  ;;  %v5294_v34 = vmax.bf16 %v8361_v4, %v8093_v40  ;;  %v8364_v24 = vshrl.u32 %v8363_v61, 16  ;;  %v8366_v7 = vld [vmem:[#allocation104_spill] sm:$0xff]  ;;  %v8370_v33 = vshrl.u32 %v8369_v59, 16 }
  0xaf   : > { %v8367_v29 = vshrl.u32 %v8366_v7, 16  ;;  %v8372_v51 = vld [vmem:[#allocation96_spill] sm:$0xff]  ;;  %v8662_v50 = vld [vmem:[#allocation206_spill] sm:$0xff] }
  0xb0   : > { %8360 = vst [vmem:[#allocation89_spill] sm:$0xff] %v5289_v1  ;;  %8362 = vst [vmem:[#allocation211_spill] sm:$0xff] %v5294_v34  ;;  %v5299_v53 = vmax.bf16 %v8364_v24, %v8363_v61  ;;  %v5309_v3 = vmax.bf16 %v8370_v33, %v8369_v59  ;;  %v8373_v1 = vshrl.u32 %v8372_v51, 16  ;;  %v8375_v34 = vshrl.u32 %v8097_v6, 16 }
  0xb1   : > { %v5304_v49 = vmax.bf16 %v8367_v29, %v8366_v7 }
  0xb2   : > { %8365 = vst [vmem:[#allocation212_spill] sm:$0xff] %v5299_v53  ;;  %8371 = vst [vmem:[#allocation214_spill] sm:$0xff] %v5309_v3  ;;  %v5314_v4 = vmax.bf16 %v8373_v1, %v8372_v51  ;;  %v5319_v24 = vmax.bf16 %v8375_v34, %v8097_v6  ;;  %v8377_v53 = vld [vmem:[#allocation107_spill] sm:$0xff]  ;;  %v8382_v3 = vld [vmem:[#allocation101_spill] sm:$0xff] }
  0xb3   : > { %8368 = vst [vmem:[#allocation213_spill] sm:$0xff] %v5304_v49  ;;  %v8378_v61 = vshrl.u32 %v8377_v53, 16  ;;  %v8380_v49 = vld [vmem:[#allocation99_spill] sm:$0xff]  ;;  %v8383_v59 = vshrl.u32 %v8382_v3, 16 }
  0xb4   : > { %8374 = vst [vmem:[#allocation96_spill] sm:$0xff] %v5314_v4  ;;  %8376 = vst [vmem:[#allocation215_spill] sm:$0xff] %v5319_v24  ;;  %v8381_v7 = vshrl.u32 %v8380_v49, 16  ;;  %v8385_v4 = vshrl.u32 %v8101_v13, 16  ;;  %v8387_v24 = vld [vmem:[#allocation112_spill] sm:$0xff] }
  0xb5   : > { %v5324_v29 = vmax.bf16 %v8378_v61, %v8377_v53  ;;  %v5334_v1 = vmax.bf16 %v8383_v59, %v8382_v3  ;;  %v8388_v6 = vshrl.u32 %v8387_v24, 16 }
  0xb6   : > { %v5329_v33 = vmax.bf16 %v8381_v7, %v8380_v49  ;;  %v5339_v34 = vmax.bf16 %v8385_v4, %v8101_v13  ;;  %v8393_v49 = vshrl.u32 %v8103_v45, 16 }
  0xb7   : > { %8379 = vst [vmem:[#allocation216_spill] sm:$0xff] %v5324_v29  ;;  %8384 = vst [vmem:[#allocation99_spill] sm:$0xff] %v5334_v1  ;;  %v5344_v61 = vmax.bf16 %v8388_v6, %v8387_v24  ;;  %v8390_v29 = vld [vmem:[#allocation102_spill] sm:$0xff]  ;;  %v8395_v1 = vshrl.u32 %v8104_v12, 16 }
  0xb8   : > { %8386 = vst [vmem:[#allocation101_spill] sm:$0xff] %v5339_v34  ;;  %v8391_v53 = vshrl.u32 %v8390_v29, 16  ;;  %v5354_v59 = vmax.bf16 %v8393_v49, %v8103_v45  ;;  %v8397_v34 = vld [vmem:[#allocation114_spill] sm:$0xff] }
  0xb9   : > { %8389 = vst [vmem:[#allocation112_spill] sm:$0xff] %v5344_v61  ;;  %v5359_v4 = vmax.bf16 %v8395_v1, %v8104_v12  ;;  %v8398_v13 = vshrl.u32 %v8397_v34, 16  ;;  %v8400_v61 = vshrl.u32 %v8106_v32, 16 }
  0xba   : > { %v5349_v7 = vmax.bf16 %v8391_v53, %v8390_v29  ;;  %8394 = vst [vmem:[#allocation218_spill] sm:$0xff] %v5354_v59  ;;  %v8404_v59 = vshrl.u32 %v8107_v35, 16 }
  0xbb   : > { %8396 = vst [vmem:[#allocation219_spill] sm:$0xff] %v5359_v4  ;;  %v5364_v6 = vmax.bf16 %v8398_v13, %v8397_v34  ;;  %v5369_v53 = vmax.bf16 %v8400_v61, %v8106_v32  ;;  %v8406_v4 = vshrl.u32 %v8108_v15, 16  ;;  %v8410_v61 = vshrl.u32 %v4604_v54, 16 }
  0xbc   : > { %8392 = vst [vmem:[#allocation217_spill] sm:$0xff] %v5349_v7  ;;  %v8401_v7 = vld [vmem:[#allocation111_spill] sm:$0xff]  ;;  %v5379_v1 = vmax.bf16 %v8404_v59, %v8107_v35 }
  0xbd   : > { %8399 = vst [vmem:[#allocation114_spill] sm:$0xff] %v5364_v6  ;;  %v8402_v29 = vshrl.u32 %v8401_v7, 16  ;;  %v5384_v13 = vmax.bf16 %v8406_v4, %v8108_v15  ;;  %v8408_v6 = vshrl.u32 %v8109_v14, 16 }
  0xbe   : > { %8405 = vst [vmem:[#allocation221_spill] sm:$0xff] %v5379_v1  ;;  %v8414_v1 = vld [vmem:[#allocation123_spill] sm:$0xff]  ;;  %v8693_v40 = vld [vmem:[#allocation216_spill] sm:$0xff] }
  0xbf   : > { %v5374_v49 = vmax.bf16 %v8402_v29, %v8401_v7  ;;  %8407 = vst [vmem:[#allocation222_spill] sm:$0xff] %v5384_v13  ;;  %v5389_v32 = vmax.bf16 %v8408_v6, %v8109_v14  ;;  %v5394_v29 = vmax.bf16 %v8410_v61, %v4604_v54  ;;  %v8415_v35 = vshrl.u32 %v8414_v1, 16 }
  0xc0   : > { %v8417_v13 = vshrl.u32 %v4616_v25, 16 }
  0xc1   : > { %8403 = vst [vmem:[#allocation220_spill] sm:$0xff] %v5374_v49  ;;  %8409 = vst [vmem:[#allocation223_spill] sm:$0xff] %v5389_v32  ;;  %v8412_v49 = vshrl.u32 %v8110_v23, 16  ;;  %v5404_v4 = vmax.bf16 %v8415_v35, %v8414_v1  ;;  %v8418_v32 = vld [vmem:[#allocation120_spill] sm:$0xff] }
  0xc2   : > { %8411 = vst [vmem:[#allocation224_spill] sm:$0xff] %v5394_v29  ;;  %v5409_v6 = vmax.bf16 %v8417_v13, %v4616_v25  ;;  %v8419_v14 = vshrl.u32 %v8418_v32, 16  ;;  %v8421_v29 = vshrl.u32 %v8112_v21, 16  ;;  %v8429_v13 = vshrl.u32 %v4634_v41, 16 }
  0xc3   : > { %v5399_v59 = vmax.bf16 %v8412_v49, %v8110_v23  ;;  %8416 = vst [vmem:[#allocation226_spill] sm:$0xff] %v5404_v4  ;;  %v8426_v4 = vld [vmem:[#allocation121_spill] sm:$0xff] }
  0xc4   : > { %v5414_v61 = vmax.bf16 %v8419_v14, %v8418_v32  ;;  %v5419_v49 = vmax.bf16 %v8421_v29, %v8112_v21  ;;  %v8427_v1 = vshrl.u32 %v8426_v4, 16  ;;  %v5434_v14 = vmax.bf16 %v8429_v13, %v4634_v41 }
  0xc5   : > { %8413 = vst [vmem:[#allocation225_spill] sm:$0xff] %v5399_v59  ;;  %v8423_v59 = vld [vmem:[#allocation130_spill] sm:$0xff] }
  0xc6   : > { %8420 = vst [vmem:[#allocation120_spill] sm:$0xff] %v5414_v61  ;;  %8422 = vst [vmem:[#allocation227_spill] sm:$0xff] %v5419_v49  ;;  %v8424_v23 = vshrl.u32 %v8423_v59, 16  ;;  %v5429_v25 = vmax.bf16 %v8427_v1, %v8426_v4  ;;  %v8431_v61 = vshrl.u32 %v4677_v5, 16  ;;  %v8433_v49 = vld [vmem:[#allocation133_spill] sm:$0xff] }
  0xc7   : > { %8430 = vst [vmem:[#allocation228_spill] sm:$0xff] %v5434_v14  ;;  %v8434_v21 = vshrl.u32 %v8433_v49, 16  ;;  %v8440_v14 = vshrl.u32 %v8114_v17, 16 }
  0xc8   : > { %v5424_v35 = vmax.bf16 %v8424_v23, %v8423_v59  ;;  %8428 = vst [vmem:[#allocation121_spill] sm:$0xff] %v5429_v25  ;;  %v5439_v29 = vmax.bf16 %v8431_v61, %v4677_v5  ;;  %v8438_v25 = vshrl.u32 %v4648_v18, 16 }
  0xc9   : > { %v5444_v23 = vmax.bf16 %v8434_v21, %v8433_v49  ;;  %v5459_v61 = vmax.bf16 %v8440_v14, %v8114_v17  ;;  %v8487_v49 = vld [vmem:[#allocation4_spill] sm:$0xff] }
  0xca   : > { %8425 = vst [vmem:[#allocation130_spill] sm:$0xff] %v5424_v35  ;;  %8432 = vst [vmem:[#allocation229_spill] sm:$0xff] %v5439_v29  ;;  %v8436_v35 = vshrl.u32 %v4637_v55, 16  ;;  %v5454_v13 = vmax.bf16 %v8438_v25, %v4648_v18  ;;  %v8442_v29 = vld [vmem:[#allocation136_spill] sm:$0xff]  ;;  %v8726_v7 = vld [vmem:[#allocation226_spill] sm:$0xff] }
  0xcb   : > { %8435 = vst [vmem:[#allocation230_spill] sm:$0xff] %v5444_v23  ;;  %8441 = vst [vmem:[#allocation233_spill] sm:$0xff] %v5459_v61  ;;  %v8443_v5 = vshrl.u32 %v8442_v29, 16  ;;  %v8445_v23 = vshrl.u32 %v8115_v44, 16  ;;  %v8452_v61 = vshrl.u32 %v8117_v0, 16  ;;  %v8498_v18 = vld [vmem:[#allocation148_spill] sm:$0xff] }
  0xcc   : > { %v5449_v1 = vmax.bf16 %v8436_v35, %v4637_v55  ;;  %8439 = vst [vmem:[#allocation232_spill] sm:$0xff] %v5454_v13  ;;  %v8447_v35 = vld [vmem:[#allocation126_spill] sm:$0xff]  ;;  %v8450_v13 = vshrl.u32 %v8116_v46, 16 }
  0xcd   : > { %v5464_v21 = vmax.bf16 %v8443_v5, %v8442_v29  ;;  %v5469_v55 = vmax.bf16 %v8445_v23, %v8115_v44  ;;  %v5484_v5 = vmax.bf16 %v8452_v61, %v8117_v0  ;;  %v5568_v29 = vmax.bf16 %v4929_v39, %v4183_v42  ;;  %v8516_v39 = vld [vmem:[#allocation154_spill] sm:$0xff] }
  0xce   : > { %8437 = vst [vmem:[#allocation231_spill] sm:$0xff] %v5449_v1  ;;  %v8448_v1 = vshrl.u32 %v8447_v35, 16  ;;  %v5479_v14 = vmax.bf16 %v8450_v13, %v8116_v46  ;;  %v8494_v46 = vld [vmem:[#allocation19_spill] sm:$0xff] }
  0xcf   : > { %8444 = vst [vmem:[#allocation234_spill] sm:$0xff] %v5464_v21  ;;  %8446 = vst [vmem:[#allocation235_spill] sm:$0xff] %v5469_v55  ;;  %v8454_v21 = vshrl.u32 %v4661_v22, 16  ;;  %v8456_v55 = vld [vmem:[#allocation132_spill] sm:$0xff] }
  0xd0   : > { %v5474_v25 = vmax.bf16 %v8448_v1, %v8447_v35  ;;  %8451 = vst [vmem:[#allocation237_spill] sm:$0xff] %v5479_v14  ;;  %8453 = vst [vmem:[#allocation238_spill] sm:$0xff] %v5484_v5  ;;  %v8457_v44 = vshrl.u32 %v8456_v55, 16  ;;  %v8461_v14 = vshrl.u32 %v4722_v30, 16  ;;  %v8463_v5 = vshrl.u32 %v4664_v47, 16  ;;  %v8495_v35 = vld [vmem:[#allocation146_spill] sm:$0xff] }
  0xd1   : > { %v5489_v23 = vmax.bf16 %v8454_v21, %v4661_v22  ;;  %v8465_v21 = vshrl.u32 %v4692_v38, 16 }
  0xd2   : > { %8449 = vst [vmem:[#allocation236_spill] sm:$0xff] %v5474_v25  ;;  %v5494_v1 = vmax.bf16 %v8457_v44, %v8456_v55  ;;  %v8459_v25 = vshrl.u32 %v8118_v8, 16  ;;  %v5504_v61 = vmax.bf16 %v8461_v14, %v4722_v30  ;;  %v5509_v22 = vmax.bf16 %v8463_v5, %v4664_v47  ;;  %v8488_v55 = vld [vmem:[#allocation3_spill] sm:$0xff]  ;;  %v8490_v30 = vld [vmem:[#allocation145_spill] sm:$0xff] }
  0xd3   : > { %8455 = vst [vmem:[#allocation239_spill] sm:$0xff] %v5489_v23  ;;  %v5514_v44 = vmax.bf16 %v8465_v21, %v4692_v38  ;;  %v8492_v5 = vld [vmem:[#allocation11_spill] sm:$0xff]  ;;  %v8493_v21 = vld [vmem:[#allocation10_spill] sm:$0xff] }
  0xd4   : > { %8458 = vst [vmem:[#allocation240_spill] sm:$0xff] %v5494_v1  ;;  %v5499_v13 = vmax.bf16 %v8459_v25, %v8118_v8  ;;  %8462 = vst [vmem:[#allocation242_spill] sm:$0xff] %v5504_v61  ;;  %v8467_v1 = vld [vmem:[#allocation140_spill] sm:$0xff]  ;;  %v8489_v61 = vrot.slane %v8487_v49, %v8488_v55  ;;  %v8496_v38 = vld [vmem:[#allocation22_spill] sm:$0xff] }
  0xd5   : > { %8464 = vst [vmem:[#allocation243_spill] sm:$0xff] %v5509_v22  ;;  %8466 = vst [vmem:[#allocation244_spill] sm:$0xff] %v5514_v44  ;;  %v8468_v23 = vshrl.u32 %v8467_v1, 16  ;;  %v8501_v49 = vld [vmem:[#allocation16_spill] sm:$0xff]  ;;  %v8506_v22 = vld [vmem:[#allocation151_spill] sm:$0xff] }
  0xd6   : > { %8460 = vst [vmem:[#allocation241_spill] sm:$0xff] %v5499_v13  ;;  %v8470_v13 = vld [vmem:[#allocation142_spill] sm:$0xff]  ;;  %v5544_v47 = vmax.bf16 %v8490_v30, %v8489_v61 }
  0xd7   : > { %v5519_v25 = vmax.bf16 %v8468_v23, %v8467_v1  ;;  %v8471_v8 = vshrl.u32 %v8470_v13, 16  ;;  %v8503_v61 = vld [vmem:[#allocation150_spill] sm:$0xff]  ;;  %v8504_v23 = vld [vmem:[#allocation13_spill] sm:$0xff] }
  0xd8   : > { %8491 = vst [vmem:[#allocation4_spill] sm:$0xff] %v5544_v47  ;;  %v8505_v0 = vrot.slane %v8504_v23, %v8488_v55  ;;  %v8507_v1 = vld [vmem:[#allocation18_spill] sm:$0xff]  ;;  %v8510_v47 = vld [vmem:[#allocation27_spill] sm:$0xff]  ;;  %v8512_v23 = vld [vmem:[#allocation20_spill] sm:$0xff] }
  0xd9   : > { %8469 = vst [vmem:[#allocation245_spill] sm:$0xff] %v5519_v25  ;;  %v5524_v14 = vmax.bf16 %v8471_v8, %v8470_v13  ;;  %v8497_v25 = vld [vmem:[#allocation147_spill] sm:$0xff]  ;;  %v8499_v13 = vld [vmem:[#allocation149_spill] sm:$0xff]  ;;  %v5572_v20 = vmax.bf16 %v8507_v1, %v4216_v56  ;;  %v8508_v8 = vld [vmem:[#allocation152_spill] sm:$0xff]  ;;  %v5580_v30 = vmax.bf16 %v8510_v47, %v8177_v36  ;;  %v5592_v56 = vmax.bf16 %v8516_v39, %v4243_v2 }
  0xda   : > { %v5564_v44 = vmax.bf16 %v8506_v22, %v8505_v0  ;;  %v5576_v17 = vmax.bf16 %v8508_v8, %v8174_v27  ;;  %v5584_v0 = vmax.bf16 %v8512_v23, %v4200_v48  ;;  %v8514_v22 = vld [vmem:[#allocation153_spill] sm:$0xff]  ;;  %v8520_v8 = vld [vmem:[#allocation155_spill] sm:$0xff]  ;;  %v8522_v48 = vld [vmem:[#allocation156_spill] sm:$0xff] }
  0xdb   : > { %8472 = vst [vmem:[#allocation246_spill] sm:$0xff] %v5524_v14  ;;  %v8500_v14 = vld [vmem:[#allocation23_spill] sm:$0xff]  ;;  %8511 = vst [vmem:[#allocation145_spill] sm:$0xff] %v5580_v30  ;;  %v5588_v42 = vmax.bf16 %v8514_v22, %v4233_v62  ;;  %v8518_v1 = vld [vmem:[#allocation21_spill] sm:$0xff] }
  0xdc   : > { %8509 = vst [vmem:[#allocation3_spill] sm:$0xff] %v5576_v17  ;;  %8513 = vst [vmem:[#allocation11_spill] sm:$0xff] %v5584_v0  ;;  %v8519_v27 = vrot.slane %v8518_v1, %v8488_v55  ;;  %v8530_v0 = vld [vmem:[#allocation162_spill] sm:$0xff]  ;;  %v8532_v30 = vld [vmem:[#allocation29_spill] sm:$0xff] }
  0xdd   : > { %8515 = vst [vmem:[#allocation10_spill] sm:$0xff] %v5588_v42  ;;  %8517 = vst [vmem:[#allocation19_spill] sm:$0xff] %v5592_v56  ;;  %v8533_v62 = vld [vmem:[#allocation163_spill] sm:$0xff]  ;;  %v8535_v42 = vld [vmem:[#allocation36_spill] sm:$0xff] }
  0xde   : > { %v5598_v17 = vmax.bf16 %v8520_v8, %v8519_v27  ;;  %v5622_v16 = vmax.bf16 %v8533_v62, %v8532_v30  ;;  %v5626_v22 = vmax.bf16 %v8536_v58, %v8535_v42  ;;  %v8538_v39 = vld [vmem:[#allocation40_spill] sm:$0xff]  ;;  %v8541_v8 = vld [vmem:[#allocation166_spill] sm:$0xff]  ;;  %v8544_v27 = vld [vmem:[#allocation167_spill] sm:$0xff] }
  0xdf   : > { %v5630_v56 = vmax.bf16 %v8539_v63, %v8538_v39  ;;  %v5634_v28 = vmax.bf16 %v8541_v8, %v4258_v11  ;;  %v8549_v62 = vld [vmem:[#allocation43_spill] sm:$0xff]  ;;  %v8552_v42 = vld [vmem:[#allocation30_spill] sm:$0xff]  ;;  %v8571_v11 = vld [vmem:[#allocation177_spill] sm:$0xff] }
  0xe0   : > { %8521 = vst [vmem:[#allocation146_spill] sm:$0xff] %v5598_v17  ;;  %v8528_v17 = vld [vmem:[#allocation26_spill] sm:$0xff]  ;;  %8534 = vst [vmem:[#allocation147_spill] sm:$0xff] %v5622_v16  ;;  %v8550_v16 = vld [vmem:[#allocation169_spill] sm:$0xff]  ;;  %v8553_v63 = vrot.slane %v8552_v42, %v8488_v55 }
  0xe1   : > { %v8529_v47 = vrot.slane %v8528_v17, %v8488_v55  ;;  %8537 = vst [vmem:[#allocation148_spill] sm:$0xff] %v5626_v22  ;;  %8540 = vst [vmem:[#allocation149_spill] sm:$0xff] %v5630_v56  ;;  %v8543_v17 = vld [vmem:[#allocation33_spill] sm:$0xff]  ;;  %v5646_v58 = vmax.bf16 %v8550_v16, %v8549_v62  ;;  %v8554_v39 = vld [vmem:[#allocation170_spill] sm:$0xff] }
  0xe2   : > { %8542 = vst [vmem:[#allocation23_spill] sm:$0xff] %v5634_v28  ;;  %v5652_v56 = vmax.bf16 %v8554_v39, %v8553_v63  ;;  %v8557_v8 = vld [vmem:[#allocation35_spill] sm:$0xff]  ;;  %v8573_v22 = vld [vmem:[#allocation46_spill] sm:$0xff]  ;;  %v8609_v62 = vld [vmem:[#allocation57_spill] sm:$0xff] }
  0xe3   : > { %v5618_v36 = vmax.bf16 %v8530_v0, %v8529_v47  ;;  %v5638_v0 = vmax.bf16 %v8544_v27, %v8543_v17  ;;  %v8546_v47 = vld [vmem:[#allocation41_spill] sm:$0xff]  ;;  %8551 = vst [vmem:[#allocation13_spill] sm:$0xff] %v5646_v58  ;;  %v8559_v27 = vld [vmem:[#allocation171_spill] sm:$0xff]  ;;  %v8579_v58 = vld [vmem:[#allocation58_spill] sm:$0xff] }
  0xe4   : > { %8555 = vst [vmem:[#allocation151_spill] sm:$0xff] %v5652_v56  ;;  %v8569_v23 = vld [vmem:[#allocation39_spill] sm:$0xff]  ;;  %v8582_v56 = vld [vmem:[#allocation180_spill] sm:$0xff] }
  0xe5   : > { %8531 = vst [vmem:[#allocation22_spill] sm:$0xff] %v5618_v36  ;;  %8545 = vst [vmem:[#allocation16_spill] sm:$0xff] %v5638_v0  ;;  %v8547_v36 = vld [vmem:[#allocation168_spill] sm:$0xff]  ;;  %v8570_v28 = vrot.slane %v8569_v23, %v8488_v55  ;;  %v8580_v16 = vld [vmem:[#allocation179_spill] sm:$0xff]  ;;  %v5688_v63 = vmax.bf16 %v8582_v56, %v8254_v43 }
  0xe6   : > { %v5642_v30 = vmax.bf16 %v8547_v36, %v8546_v47  ;;  %v8574_v36 = vld [vmem:[#allocation44_spill] sm:$0xff]  ;;  %v5684_v2 = vmax.bf16 %v8580_v16, %v8579_v58  ;;  %v8584_v23 = vld [vmem:[#allocation51_spill] sm:$0xff]  ;;  %v8598_v56 = vld [vmem:[#allocation53_spill] sm:$0xff] }
  0xe7   : > { %v5672_v17 = vmax.bf16 %v8571_v11, %v8570_v28  ;;  %v5676_v0 = vmax.bf16 %v8574_v36, %v8573_v22  ;;  %8583 = vst [vmem:[#allocation153_spill] sm:$0xff] %v5688_v63  ;;  %v8585_v39 = vld [vmem:[#allocation47_spill] sm:$0xff]  ;;  %v8590_v36 = vld [vmem:[#allocation61_spill] sm:$0xff]  ;;  %v8610_v63 = vrot.slane %v8609_v62, %v8488_v55  ;;  %v8611_v43 = vld [vmem:[#allocation190_spill] sm:$0xff] }
  0xe8   : > { %8548 = vst [vmem:[#allocation150_spill] sm:$0xff] %v5642_v30  ;;  %v8576_v30 = vld [vmem:[#allocation54_spill] sm:$0xff]  ;;  %8581 = vst [vmem:[#allocation20_spill] sm:$0xff] %v5684_v2  ;;  %v5692_v28 = vmax.bf16 %v8585_v39, %v8584_v23  ;;  %v8587_v11 = vld [vmem:[#allocation59_spill] sm:$0xff] }
  0xe9   : > { %8572 = vst [vmem:[#allocation18_spill] sm:$0xff] %v5672_v17  ;;  %8575 = vst [vmem:[#allocation152_spill] sm:$0xff] %v5676_v0  ;;  %v5680_v47 = vmax.bf16 %v8577_v26, %v8576_v30  ;;  %v8588_v17 = vld [vmem:[#allocation181_spill] sm:$0xff]  ;;  %v8591_v0 = vld [vmem:[#allocation182_spill] sm:$0xff]  ;;  %v5726_v23 = vmax.bf16 %v8611_v43, %v8610_v63 }
  0xea   : > { %8586 = vst [vmem:[#allocation154_spill] sm:$0xff] %v5692_v28  ;;  %v5696_v22 = vmax.bf16 %v8588_v17, %v8587_v11  ;;  %v5700_v26 = vmax.bf16 %v8591_v0, %v8590_v36  ;;  %v8593_v30 = vld [vmem:[#allocation48_spill] sm:$0xff]  ;;  %v8595_v16 = vld [vmem:[#allocation183_spill] sm:$0xff]  ;;  %v8614_v17 = vld [vmem:[#allocation62_spill] sm:$0xff] }
  0xeb   : > { %8578 = vst [vmem:[#allocation27_spill] sm:$0xff] %v5680_v47  ;;  %v8594_v58 = vrot.slane %v8593_v30, %v8488_v55  ;;  %8612 = vst [vmem:[#allocation26_spill] sm:$0xff] %v5726_v23  ;;  %v8613_v47 = vld [vmem:[#allocation64_spill] sm:$0xff]  ;;  %v8625_v62 = vld [vmem:[#allocation69_spill] sm:$0xff] }
  0xec   : > { %8589 = vst [vmem:[#allocation21_spill] sm:$0xff] %v5696_v22  ;;  %8592 = vst [vmem:[#allocation155_spill] sm:$0xff] %v5700_v26  ;;  %v5730_v28 = vmax.bf16 %v8614_v17, %v8613_v47  ;;  %v8616_v22 = vld [vmem:[#allocation72_spill] sm:$0xff]  ;;  %v8622_v26 = vld [vmem:[#allocation65_spill] sm:$0xff] }
  0xed   : > { %v5706_v2 = vmax.bf16 %v8595_v16, %v8594_v58  ;;  %v5734_v11 = vmax.bf16 %v8617_v31, %v8616_v22  ;;  %v8619_v36 = vld [vmem:[#allocation76_spill] sm:$0xff]  ;;  %v8626_v16 = vld [vmem:[#allocation194_spill] sm:$0xff]  ;;  %v8628_v43 = vld [vmem:[#allocation77_spill] sm:$0xff] }
  0xee   : > { %8615 = vst [vmem:[#allocation162_spill] sm:$0xff] %v5730_v28  ;;  %v5738_v42 = vmax.bf16 %v8620_v52, %v8619_v36  ;;  %v5746_v63 = vmax.bf16 %v8626_v16, %v8625_v62  ;;  %v8629_v23 = vld [vmem:[#allocation195_spill] sm:$0xff]  ;;  %v8632_v28 = vld [vmem:[#allocation196_spill] sm:$0xff]  ;;  %v8634_v22 = vld [vmem:[#allocation66_spill] sm:$0xff] }
  0xef   : > { %8596 = vst [vmem:[#allocation156_spill] sm:$0xff] %v5706_v2  ;;  %8618 = vst [vmem:[#allocation29_spill] sm:$0xff] %v5734_v11  ;;  %v8623_v2 = vld [vmem:[#allocation193_spill] sm:$0xff]  ;;  %v5750_v47 = vmax.bf16 %v8629_v23, %v8628_v43  ;;  %v8631_v17 = vld [vmem:[#allocation79_spill] sm:$0xff]  ;;  %v8635_v52 = vrot.slane %v8634_v22, %v8488_v55 }
  0xf0   : > { %8621 = vst [vmem:[#allocation163_spill] sm:$0xff] %v5738_v42  ;;  %v5742_v58 = vmax.bf16 %v8623_v2, %v8622_v26  ;;  %8627 = vst [vmem:[#allocation164_spill] sm:$0xff] %v5746_v63  ;;  %v5754_v31 = vmax.bf16 %v8632_v28, %v8631_v17  ;;  %v8636_v36 = vld [vmem:[#allocation197_spill] sm:$0xff]  ;;  %v8639_v26 = vld [vmem:[#allocation71_spill] sm:$0xff] }
  0xf1   : > { %8630 = vst [vmem:[#allocation40_spill] sm:$0xff] %v5750_v47  ;;  %v5760_v42 = vmax.bf16 %v8636_v36, %v8635_v52  ;;  %v8641_v16 = vld [vmem:[#allocation198_spill] sm:$0xff]  ;;  %v8643_v30 = vld [vmem:[#allocation199_spill] sm:$0xff]  ;;  %v8653_v2 = vld [vmem:[#allocation204_spill] sm:$0xff] }
  0xf2   : > { %8624 = vst [vmem:[#allocation36_spill] sm:$0xff] %v5742_v58  ;;  %8633 = vst [vmem:[#allocation165_spill] sm:$0xff] %v5754_v31  ;;  %v8651_v39 = vld [vmem:[#allocation75_spill] sm:$0xff]  ;;  %v8655_v11 = vld [vmem:[#allocation82_spill] sm:$0xff] }
  0xf3   : > { %8637 = vst [vmem:[#allocation166_spill] sm:$0xff] %v5760_v42  ;;  %v8652_v58 = vrot.slane %v8651_v39, %v8488_v55  ;;  %v8656_v23 = vld [vmem:[#allocation80_spill] sm:$0xff]  ;;  %v8658_v0 = vld [vmem:[#allocation91_spill] sm:$0xff]  ;;  %v8659_v43 = vld [vmem:[#allocation205_spill] sm:$0xff] }
  0xf4   : > { %v5784_v63 = vmax.bf16 %v8656_v23, %v8655_v11  ;;  %v5788_v47 = vmax.bf16 %v8659_v43, %v8658_v0  ;;  %v8661_v17 = vld [vmem:[#allocation94_spill] sm:$0xff]  ;;  %v8664_v42 = vld [vmem:[#allocation207_spill] sm:$0xff]  ;;  %v8675_v43 = vld [vmem:[#allocation84_spill] sm:$0xff] }
  0xf5   : > { %v5780_v62 = vmax.bf16 %v8653_v2, %v8652_v58  ;;  %v5792_v1 = vmax.bf16 %v8662_v50, %v8661_v17  ;;  %v5796_v52 = vmax.bf16 %v8664_v42, %v8346_v10  ;;  %v8666_v39 = vld [vmem:[#allocation87_spill] sm:$0xff]  ;;  %v8672_v23 = vld [vmem:[#allocation98_spill] sm:$0xff]  ;;  %v8676_v50 = vrot.slane %v8675_v43, %v8488_v55  ;;  %v8679_v10 = vld [vmem:[#allocation89_spill] sm:$0xff] }
  0xf6   : > { %8657 = vst [vmem:[#allocation167_spill] sm:$0xff] %v5784_v63  ;;  %8660 = vst [vmem:[#allocation41_spill] sm:$0xff] %v5788_v47  ;;  %v8667_v36 = vld [vmem:[#allocation83_spill] sm:$0xff]  ;;  %v8673_v63 = vld [vmem:[#allocation209_spill] sm:$0xff] }
  0xf7   : > { %8654 = vst [vmem:[#allocation33_spill] sm:$0xff] %v5780_v62  ;;  %8663 = vst [vmem:[#allocation168_spill] sm:$0xff] %v5792_v1  ;;  %v5800_v58 = vmax.bf16 %v8667_v36, %v8666_v39  ;;  %v8669_v2 = vld [vmem:[#allocation95_spill] sm:$0xff]  ;;  %v8670_v62 = vld [vmem:[#allocation208_spill] sm:$0xff]  ;;  %v5808_v0 = vmax.bf16 %v8673_v63, %v8672_v23 }
  0xf8   : > { %8665 = vst [vmem:[#allocation43_spill] sm:$0xff] %v5796_v52  ;;  %v5804_v11 = vmax.bf16 %v8670_v62, %v8669_v2  ;;  %v8677_v17 = vld [vmem:[#allocation210_spill] sm:$0xff]  ;;  %v8680_v52 = vld [vmem:[#allocation100_spill] sm:$0xff]  ;;  %v8681_v36 = vld [vmem:[#allocation211_spill] sm:$0xff]  ;;  %v5838_v62 = vmax.bf16 %v5329_v33, %v8382_v3 }
  0xf9   : > { %8668 = vst [vmem:[#allocation169_spill] sm:$0xff] %v5800_v58  ;;  %8674 = vst [vmem:[#allocation170_spill] sm:$0xff] %v5808_v0  ;;  %v5814_v1 = vmax.bf16 %v8677_v17, %v8676_v50  ;;  %v8682_v58 = vld [vmem:[#allocation104_spill] sm:$0xff]  ;;  %v8686_v63 = vld [vmem:[#allocation214_spill] sm:$0xff] }
  0xfa   : > { %8671 = vst [vmem:[#allocation30_spill] sm:$0xff] %v5804_v11  ;;  %v8683_v47 = vld [vmem:[#allocation212_spill] sm:$0xff]  ;;  %v8690_v17 = vld [vmem:[#allocation215_spill] sm:$0xff]  ;;  %v8691_v28 = vld [vmem:[#allocation90_spill] sm:$0xff] }
  0xfb   : > { %8678 = vst [vmem:[#allocation35_spill] sm:$0xff] %v5814_v1  ;;  %v8688_v43 = vld [vmem:[#allocation96_spill] sm:$0xff]  ;;  %v8692_v42 = vrot.slane %v8691_v28, %v8488_v55  ;;  %8695 = vst [vmem:[#allocation172_spill] sm:$0xff] %v5838_v62  ;;  %v8696_v31 = vld [vmem:[#allocation110_spill] sm:$0xff] }
  0xfc   : > { %v8697_v2 = vld [vmem:[#allocation99_spill] sm:$0xff]  ;;  %v8699_v23 = vld [vmem:[#allocation101_spill] sm:$0xff]  ;;  %v8701_v0 = vld [vmem:[#allocation102_spill] sm:$0xff] }
  0xfd   : > { %v5834_v39 = vmax.bf16 %v8693_v40, %v8692_v42  ;;  %v5842_v11 = vmax.bf16 %v8697_v2, %v8696_v31  ;;  %v5846_v22 = vmax.bf16 %v8699_v23, %v8387_v24  ;;  %v8702_v1 = vld [vmem:[#allocation112_spill] sm:$0xff]  ;;  %v8704_v28 = vld [vmem:[#allocation217_spill] sm:$0xff]  ;;  %v8706_v42 = vld [vmem:[#allocation218_spill] sm:$0xff] }
  0xfe   : > { %v5850_v50 = vmax.bf16 %v8702_v1, %v8701_v0  ;;  %v5854_v40 = vmax.bf16 %v8704_v28, %v8103_v45  ;;  %v5858_v3 = vmax.bf16 %v8706_v42, %v8104_v12  ;;  %v8708_v33 = vld [vmem:[#allocation219_spill] sm:$0xff]  ;;  %v8710_v2 = vld [vmem:[#allocation97_spill] sm:$0xff]  ;;  %v8712_v23 = vld [vmem:[#allocation114_spill] sm:$0xff]  ;;  %v5892_v12 = vmax.bf16 %v5409_v6, %v8418_v32 }
  0xff   : > { %8694 = vst [vmem:[#allocation171_spill] sm:$0xff] %v5834_v39  ;;  %8698 = vst [vmem:[#allocation39_spill] sm:$0xff] %v5842_v11  ;;  %v5862_v31 = vmax.bf16 %v8708_v33, %v8397_v34  ;;  %v8711_v24 = vrot.slane %v8710_v2, %v8488_v55  ;;  %v8714_v0 = vld [vmem:[#allocation116_spill] sm:$0xff]  ;;  %v8724_v62 = vld [vmem:[#allocation103_spill] sm:$0xff]  ;;  %v8787_v2 = vmax.bf16 %v8493_v21, %v8492_v5 }
 0x100   : > { %8700 = vst [vmem:[#allocation177_spill] sm:$0xff] %v5846_v22  ;;  %8703 = vst [vmem:[#allocation46_spill] sm:$0xff] %v5850_v50  ;;  %v8715_v45 = vld [vmem:[#allocation220_spill] sm:$0xff]  ;;  %v8725_v1 = vrot.slane %v8724_v62, %v8488_v55  ;;  %v8729_v50 = vld [vmem:[#allocation127_spill] sm:$0xff] }
 0x101   : > { %8705 = vst [vmem:[#allocation44_spill] sm:$0xff] %v5854_v40  ;;  %8707 = vst [vmem:[#allocation54_spill] sm:$0xff] %v5858_v3  ;;  %v5868_v22 = vmax.bf16 %v8712_v23, %v8711_v24  ;;  %v8716_v40 = vld [vmem:[#allocation221_spill] sm:$0xff]  ;;  %v8730_v42 = vld [vmem:[#allocation120_spill] sm:$0xff] }
 0x102   : > { %8709 = vst [vmem:[#allocation178_spill] sm:$0xff] %v5862_v31  ;;  %v5888_v28 = vmax.bf16 %v8726_v7, %v8725_v1  ;;  %8728 = vst [vmem:[#allocation180_spill] sm:$0xff] %v5892_v12  ;;  %v5896_v3 = vmax.bf16 %v8730_v42, %v8729_v50  ;;  %v8732_v33 = vld [vmem:[#allocation227_spill] sm:$0xff]  ;;  %v8736_v62 = vld [vmem:[#allocation121_spill] sm:$0xff] }
 0x103   : > { %8713 = vst [vmem:[#allocation58_spill] sm:$0xff] %v5868_v22  ;;  %v5900_v11 = vmax.bf16 %v8732_v33, %v8423_v59  ;;  %v8734_v22 = vld [vmem:[#allocation130_spill] sm:$0xff]  ;;  %v5908_v7 = vmax.bf16 %v8736_v62, %v4634_v41  ;;  %v8738_v1 = vld [vmem:[#allocation131_spill] sm:$0xff]  ;;  %v8741_v6 = vld [vmem:[#allocation133_spill] sm:$0xff] }
 0x104   : > { %8727 = vst [vmem:[#allocation179_spill] sm:$0xff] %v5888_v28  ;;  %8731 = vst [vmem:[#allocation51_spill] sm:$0xff] %v5896_v3  ;;  %v5904_v24 = vmax.bf16 %v8734_v22, %v8426_v4  ;;  %v8739_v28 = vld [vmem:[#allocation228_spill] sm:$0xff]  ;;  %v8742_v12 = vld [vmem:[#allocation229_spill] sm:$0xff] }
 0x105   : > { %8733 = vst [vmem:[#allocation47_spill] sm:$0xff] %v5900_v11  ;;  %8737 = vst [vmem:[#allocation181_spill] sm:$0xff] %v5908_v7  ;;  %v5912_v32 = vmax.bf16 %v8739_v28, %v8738_v1  ;;  %v5916_v50 = vmax.bf16 %v8742_v12, %v8741_v6  ;;  %v8744_v42 = vld [vmem:[#allocation118_spill] sm:$0xff]  ;;  %v8780_v22 = vld [vmem:[#allocation129_spill] sm:$0xff] }
 0x106   : > { %8735 = vst [vmem:[#allocation59_spill] sm:$0xff] %v5904_v24  ;;  %v8745_v59 = vrot.slane %v8744_v42, %v8488_v55  ;;  %v8746_v33 = vld [vmem:[#allocation230_spill] sm:$0xff]  ;;  %v8781_v7 = vrot.slane %v8780_v22, %v8488_v55  ;;  %v8789_v42 = vld [vmem:[#allocation9_spill] sm:$0xff]  ;;  %v8797_v5 = vld [vmem:[#allocation7_spill] sm:$0xff] }
 0x107   : > { %8740 = vst [vmem:[#allocation61_spill] sm:$0xff] %v5912_v32  ;;  %8743 = vst [vmem:[#allocation182_spill] sm:$0xff] %v5916_v50  ;;  %v8762_v34 = vld [vmem:[#allocation122_spill] sm:$0xff]  ;;  %v8856_v54 = vld [vmem:[#allocation23_spill] sm:$0xff] }
 0x108   : > { %v5922_v11 = vmax.bf16 %v8746_v33, %v8745_v59  ;;  %v8763_v24 = vrot.slane %v8762_v34, %v8488_v55  ;;  %v8764_v4 = vld [vmem:[#allocation238_spill] sm:$0xff]  ;;  %v8788_v59 = vld [vmem:[#allocation113_spill] sm:$0xff]  ;;  %v8792_v55 = vld [vmem:[#allocation108_spill] sm:$0xff] }
 0x109   : > { %v8782_v3 = vld [vmem:[#allocation246_spill] sm:$0xff]  ;;  %v8790_v41 = vmax.bf16 %v8788_v59, %v8789_v42  ;;  %v8801_v59 = vld [vmem:[#allocation5_spill] sm:$0xff]  ;;  %v8844_v33 = vld [vmem:[#allocation147_spill] sm:$0xff] }
 0x10a   : > { %8747 = vst [vmem:[#allocation48_spill] sm:$0xff] %v5922_v11  ;;  %v5942_v62 = vmax.bf16 %v8764_v4, %v8763_v24  ;;  %v5962_v1 = vmax.bf16 %v8782_v3, %v8781_v7  ;;  %v8784_v23 = vld [vmem:[#allocation106_spill] sm:$0xff]  ;;  %v8795_v7 = vmax.bf16 %v8497_v25, %v8496_v38  ;;  %v8806_v38 = vld [vmem:[#allocation15_spill] sm:$0xff]  ;;  %v8848_v34 = vld [vmem:[#allocation148_spill] sm:$0xff] }
 0x10b   : > { %v8785_v12 = vld [vmem:[#allocation6_spill] sm:$0xff]  ;;  %v8852_v11 = vld [vmem:[#allocation149_spill] sm:$0xff] }
 0x10c   : > { %8765 = vst [vmem:[#allocation183_spill] sm:$0xff] %v5942_v62  ;;  %8783 = vst [vmem:[#allocation53_spill] sm:$0xff] %v5962_v1  ;;  %v8786_v32 = vmax.bf16 %v8784_v23, %v8785_v12  ;;  %v8791_v62 = vmax.bf16 %v8495_v35, %v8494_v46  ;;  %v8793_v22 = vld [vmem:[#allocation14_spill] sm:$0xff]  ;;  %v8796_v12 = vld [vmem:[#allocation119_spill] sm:$0xff] }
 0x10d   : > { %v8794_v3 = vmax.bf16 %v8792_v55, %v8793_v22  ;;  %v8798_v21 = vmax.bf16 %v8796_v12, %v8797_v5  ;;  %v8802_v46 = vld [vmem:[#allocation8_spill] sm:$0xff]  ;;  %v8805_v55 = vld [vmem:[#allocation143_spill] sm:$0xff]  ;;  %v8808_v22 = vmax.bf16 %v8501_v49, %v8500_v14  ;;  %v8816_v14 = vmax.bf16 %v8522_v48, %v4252_v9  ;;  %v8832_v9 = vld [vmem:[#allocation10_spill] sm:$0xff] }
 0x10e   : > { %v5970_v6 = vmax.bf16 %v8787_v2, %v8786_v32  ;;  %v5978_v24 = vmax.bf16 %v8791_v62, %v8790_v41  ;;  %v8799_v2 = vld [vmem:[#allocation12_spill] sm:$0xff]  ;;  %v8803_v35 = vmax.bf16 %v8801_v59, %v8802_v46  ;;  %v8804_v41 = vmax.bf16 %v8499_v13, %v8159_v60  ;;  %v8817_v46 = vld [vmem:[#allocation3_spill] sm:$0xff]  ;;  %v8858_v50 = vld [vmem:[#allocation38_spill] sm:$0xff] }
 0x10f   : > { %v5986_v23 = vmax.bf16 %v8795_v7, %v8794_v3  ;;  %v8800_v32 = vmax.bf16 %v8498_v18, %v8799_v2  ;;  %v8807_v25 = vmax.bf16 %v8805_v55, %v8806_v38  ;;  %v8809_v7 = vld [vmem:[#allocation144_spill] sm:$0xff]  ;;  %v8810_v18 = vld [vmem:[#allocation17_spill] sm:$0xff]  ;;  %v8815_v13 = vmax.bf16 %v4969_v37, %v4219_v57  ;;  %v8827_v57 = vld [vmem:[#allocation11_spill] sm:$0xff] }
 0x110   : > { %v6002_v62 = vmax.bf16 %v8804_v41, %v8803_v35  ;;  %v8811_v12 = vmax.bf16 %v8809_v7, %v8810_v18  ;;  %v8812_v5 = vld [vmem:[#allocation24_spill] sm:$0xff]  ;;  %v6032_v49 = vmax.bf16 %v8816_v14, %v5572_v20  ;;  %v8818_v35 = vld [vmem:[#allocation157_spill] sm:$0xff]  ;;  %v8828_v37 = vld [vmem:[#allocation159_spill] sm:$0xff] }
 0x111   : > { %v5994_v42 = vmax.bf16 %v8800_v32, %v8798_v21  ;;  %v6010_v3 = vmax.bf16 %v8808_v22, %v8807_v25  ;;  %v8813_v21 = vmax.bf16 %v8503_v61, %v8812_v5  ;;  %v8814_v32 = vld [vmem:[#allocation4_spill] sm:$0xff]  ;;  %v6026_v59 = vmax.bf16 %v8815_v13, %v5568_v29  ;;  %v8819_v61 = vld [vmem:[#allocation31_spill] sm:$0xff]  ;;  %v8822_v38 = vld [vmem:[#allocation145_spill] sm:$0xff] }
 0x112   : > { %v8820_v41 = vmax.bf16 %v8818_v35, %v8819_v61  ;;  %v8823_v25 = vld [vmem:[#allocation158_spill] sm:$0xff]  ;;  %v8824_v22 = vld [vmem:[#allocation25_spill] sm:$0xff]  ;;  %v8833_v48 = vld [vmem:[#allocation160_spill] sm:$0xff] }
 0x113   : > { %v6018_v2 = vmax.bf16 %v8813_v21, %v8811_v12  ;;  %v8825_v7 = vmax.bf16 %v8823_v25, %v8824_v22  ;;  %v8829_v12 = vld [vmem:[#allocation28_spill] sm:$0xff]  ;;  %v8837_v35 = vld [vmem:[#allocation19_spill] sm:$0xff]  ;;  %v8838_v61 = vld [vmem:[#allocation161_spill] sm:$0xff] }
 0x114   : > { %v6038_v55 = vmax.bf16 %v8820_v41, %v8817_v46  ;;  %v8830_v5 = vmax.bf16 %v8828_v37, %v8829_v12  ;;  %v8834_v13 = vld [vmem:[#allocation32_spill] sm:$0xff]  ;;  %v8839_v41 = vld [vmem:[#allocation34_spill] sm:$0xff]  ;;  %v8845_v37 = vld [vmem:[#allocation37_spill] sm:$0xff] }
 0x115   : > { %v6044_v18 = vmax.bf16 %v8825_v7, %v8822_v38  ;;  %v8835_v14 = vmax.bf16 %v8833_v48, %v8834_v13  ;;  %v8840_v1 = vmax.bf16 %v8838_v61, %v8839_v41  ;;  %v8842_v25 = vld [vmem:[#allocation146_spill] sm:$0xff]  ;;  %v8846_v12 = vmax.bf16 %v8557_v8, %v8845_v37  ;;  %v8849_v48 = vld [vmem:[#allocation45_spill] sm:$0xff]  ;;  %v8861_v8 = vld [vmem:[#allocation16_spill] sm:$0xff] }
 0x116   : > { %8821 = vst [vmem:[#allocation57_spill] sm:$0xff] %v6038_v55  ;;  %v6050_v21 = vmax.bf16 %v8830_v5, %v8827_v57  ;;  %v8850_v13 = vmax.bf16 %v8559_v27, %v8849_v48  ;;  %v8853_v61 = vld [vmem:[#allocation49_spill] sm:$0xff]  ;;  %v8862_v37 = vld [vmem:[#allocation174_spill] sm:$0xff]  ;;  %v8867_v48 = vld [vmem:[#allocation175_spill] sm:$0xff] }
 0x117   : > { %8826 = vst [vmem:[#allocation190_spill] sm:$0xff] %v6044_v18  ;;  %v6056_v60 = vmax.bf16 %v8835_v14, %v8832_v9  ;;  %v6062_v4 = vmax.bf16 %v8840_v1, %v8837_v35  ;;  %v6070_v5 = vmax.bf16 %v8846_v12, %v8844_v33  ;;  %v8854_v1 = vmax.bf16 %v8561_v19, %v8853_v61  ;;  %v8857_v7 = vld [vmem:[#allocation173_spill] sm:$0xff]  ;;  %v8863_v12 = vld [vmem:[#allocation42_spill] sm:$0xff]  ;;  %v8872_v61 = vld [vmem:[#allocation176_spill] sm:$0xff] }
 0x118   : > { %8831 = vst [vmem:[#allocation64_spill] sm:$0xff] %v6050_v21  ;;  %v6076_v14 = vmax.bf16 %v8850_v13, %v8848_v34  ;;  %v8859_v31 = vmax.bf16 %v8857_v7, %v8858_v50  ;;  %v8866_v27 = vld [vmem:[#allocation150_spill] sm:$0xff]  ;;  %v8871_v19 = vld [vmem:[#allocation13_spill] sm:$0xff]  ;;  %v8883_v21 = vld [vmem:[#allocation184_spill] sm:$0xff] }
 0x119   : > { %8836 = vst [vmem:[#allocation62_spill] sm:$0xff] %v6056_v60  ;;  %8841 = vst [vmem:[#allocation72_spill] sm:$0xff] %v6062_v4  ;;  %v6082_v41 = vmax.bf16 %v8854_v1, %v8852_v11  ;;  %v8868_v13 = vld [vmem:[#allocation50_spill] sm:$0xff]  ;;  %v8873_v1 = vld [vmem:[#allocation52_spill] sm:$0xff] }
 0x11a   : > { %8847 = vst [vmem:[#allocation191_spill] sm:$0xff] %v6070_v5  ;;  %8851 = vst [vmem:[#allocation76_spill] sm:$0xff] %v6076_v14  ;;  %v6088_v28 = vmax.bf16 %v8859_v31, %v8856_v54  ;;  %v8864_v5 = vmax.bf16 %v8862_v37, %v8863_v12  ;;  %v8869_v14 = vmax.bf16 %v8867_v48, %v8868_v13  ;;  %v8879_v37 = vld [vmem:[#allocation55_spill] sm:$0xff]  ;;  %v8893_v7 = vld [vmem:[#allocation186_spill] sm:$0xff] }
 0x11b   : > { %8855 = vst [vmem:[#allocation192_spill] sm:$0xff] %v6082_v41  ;;  %v8874_v41 = vmax.bf16 %v8872_v61, %v8873_v1  ;;  %v8884_v48 = vld [vmem:[#allocation63_spill] sm:$0xff]  ;;  %v8894_v50 = vld [vmem:[#allocation56_spill] sm:$0xff]  ;;  %v8987_v39 = vld [vmem:[#allocation109_spill] sm:$0xff] }
 0x11c   : > { %8860 = vst [vmem:[#allocation65_spill] sm:$0xff] %v6088_v28  ;;  %v6094_v22 = vmax.bf16 %v8864_v5, %v8861_v8  ;;  %v6100_v4 = vmax.bf16 %v8869_v14, %v8866_v27  ;;  %v8878_v28 = vld [vmem:[#allocation152_spill] sm:$0xff]  ;;  %v8880_v5 = vmax.bf16 %v8598_v56, %v8879_v37  ;;  %v8885_v14 = vmax.bf16 %v8883_v21, %v8884_v48  ;;  %v8888_v27 = vld [vmem:[#allocation185_spill] sm:$0xff]  ;;  %v8889_v61 = vld [vmem:[#allocation67_spill] sm:$0xff] }
 0x11d   : > { %v6106_v60 = vmax.bf16 %v8874_v41, %v8871_v19  ;;  %v8890_v41 = vmax.bf16 %v8888_v27, %v8889_v61  ;;  %v8895_v31 = vmax.bf16 %v8893_v7, %v8894_v50  ;;  %v8897_v56 = vld [vmem:[#allocation154_spill] sm:$0xff]  ;;  %v8898_v37 = vld [vmem:[#allocation187_spill] sm:$0xff]  ;;  %v8902_v21 = vld [vmem:[#allocation21_spill] sm:$0xff] }
 0x11e   : > { %8865 = vst [vmem:[#allocation193_spill] sm:$0xff] %v6094_v22  ;;  %8870 = vst [vmem:[#allocation69_spill] sm:$0xff] %v6100_v4  ;;  %v6114_v12 = vmax.bf16 %v8880_v5, %v8878_v28  ;;  %v8882_v22 = vld [vmem:[#allocation27_spill] sm:$0xff]  ;;  %v8887_v4 = vld [vmem:[#allocation20_spill] sm:$0xff] }
 0x11f   : > { %8875 = vst [vmem:[#allocation194_spill] sm:$0xff] %v6106_v60  ;;  %v6120_v13 = vmax.bf16 %v8885_v14, %v8882_v22  ;;  %v6126_v1 = vmax.bf16 %v8890_v41, %v8887_v4  ;;  %v8892_v60 = vld [vmem:[#allocation153_spill] sm:$0xff]  ;;  %v8899_v5 = vld [vmem:[#allocation60_spill] sm:$0xff]  ;;  %v8907_v27 = vld [vmem:[#allocation155_spill] sm:$0xff] }
 0x120   : > { %8881 = vst [vmem:[#allocation77_spill] sm:$0xff] %v6114_v12  ;;  %v6132_v19 = vmax.bf16 %v8895_v31, %v8892_v60  ;;  %v8900_v12 = vmax.bf16 %v8898_v37, %v8899_v5  ;;  %v8903_v48 = vld [vmem:[#allocation188_spill] sm:$0xff]  ;;  %v8908_v61 = vld [vmem:[#allocation189_spill] sm:$0xff]  ;;  %v8909_v41 = vld [vmem:[#allocation70_spill] sm:$0xff] }
 0x121   : > { %8886 = vst [vmem:[#allocation195_spill] sm:$0xff] %v6120_v13  ;;  %8891 = vst [vmem:[#allocation79_spill] sm:$0xff] %v6126_v1  ;;  %v8904_v14 = vld [vmem:[#allocation68_spill] sm:$0xff]  ;;  %v8910_v1 = vmax.bf16 %v8908_v61, %v8909_v41  ;;  %v8915_v37 = vld [vmem:[#allocation73_spill] sm:$0xff] }
 0x122   : > { %8896 = vst [vmem:[#allocation196_spill] sm:$0xff] %v6132_v19  ;;  %v6138_v28 = vmax.bf16 %v8900_v12, %v8897_v56  ;;  %v8905_v13 = vmax.bf16 %v8903_v48, %v8904_v14  ;;  %v8914_v19 = vld [vmem:[#allocation162_spill] sm:$0xff]  ;;  %v8916_v12 = vmax.bf16 %v8639_v26, %v8915_v37  ;;  %v8919_v48 = vld [vmem:[#allocation81_spill] sm:$0xff]  ;;  %v8927_v7 = vld [vmem:[#allocation200_spill] sm:$0xff] }
 0x123   : > { %v6150_v4 = vmax.bf16 %v8910_v1, %v8907_v27  ;;  %v8923_v61 = vld [vmem:[#allocation85_spill] sm:$0xff]  ;;  %v8928_v50 = vld [vmem:[#allocation74_spill] sm:$0xff]  ;;  %v8931_v26 = vld [vmem:[#allocation164_spill] sm:$0xff] }
 0x124   : > { %8901 = vst [vmem:[#allocation66_spill] sm:$0xff] %v6138_v28  ;;  %v6144_v22 = vmax.bf16 %v8905_v13, %v8902_v21  ;;  %v6158_v5 = vmax.bf16 %v8916_v12, %v8914_v19  ;;  %v8918_v28 = vld [vmem:[#allocation29_spill] sm:$0xff]  ;;  %v8920_v13 = vmax.bf16 %v8641_v16, %v8919_v48  ;;  %v8924_v1 = vmax.bf16 %v8643_v30, %v8923_v61  ;;  %v8933_v12 = vld [vmem:[#allocation78_spill] sm:$0xff]  ;;  %v8936_v16 = vld [vmem:[#allocation40_spill] sm:$0xff] }
 0x125   : > { %8911 = vst [vmem:[#allocation71_spill] sm:$0xff] %v6150_v4  ;;  %v8926_v4 = vld [vmem:[#allocation36_spill] sm:$0xff]  ;;  %v8929_v31 = vmax.bf16 %v8927_v7, %v8928_v50  ;;  %v8932_v37 = vld [vmem:[#allocation201_spill] sm:$0xff]  ;;  %v8937_v48 = vld [vmem:[#allocation202_spill] sm:$0xff] }
 0x126   : > { %8906 = vst [vmem:[#allocation197_spill] sm:$0xff] %v6144_v22  ;;  %8917 = vst [vmem:[#allocation198_spill] sm:$0xff] %v6158_v5  ;;  %v6164_v14 = vmax.bf16 %v8920_v13, %v8918_v28  ;;  %v8922_v22 = vld [vmem:[#allocation163_spill] sm:$0xff]  ;;  %v8934_v5 = vmax.bf16 %v8932_v37, %v8933_v12  ;;  %v8938_v13 = vld [vmem:[#allocation86_spill] sm:$0xff] }
 0x127   : > { %v6170_v41 = vmax.bf16 %v8924_v1, %v8922_v22  ;;  %v6176_v27 = vmax.bf16 %v8929_v31, %v8926_v4  ;;  %v8941_v30 = vld [vmem:[#allocation165_spill] sm:$0xff]  ;;  %v8942_v61 = vld [vmem:[#allocation203_spill] sm:$0xff]  ;;  %v8943_v1 = vld [vmem:[#allocation88_spill] sm:$0xff] }
 0x128   : > { %8921 = vst [vmem:[#allocation199_spill] sm:$0xff] %v6164_v14  ;;  %v6182_v19 = vmax.bf16 %v8934_v5, %v8931_v26  ;;  %v8939_v14 = vmax.bf16 %v8937_v48, %v8938_v13  ;;  %v8946_v31 = vld [vmem:[#allocation166_spill] sm:$0xff]  ;;  %v8949_v37 = vld [vmem:[#allocation92_spill] sm:$0xff]  ;;  %v8959_v7 = vld [vmem:[#allocation213_spill] sm:$0xff] }
 0x129   : > { %8925 = vst [vmem:[#allocation75_spill] sm:$0xff] %v6170_v41  ;;  %8930 = vst [vmem:[#allocation204_spill] sm:$0xff] %v6176_v27  ;;  %v8944_v41 = vmax.bf16 %v8942_v61, %v8943_v1  ;;  %v8948_v27 = vld [vmem:[#allocation167_spill] sm:$0xff]  ;;  %v8950_v5 = vmax.bf16 %v8679_v10, %v8949_v37  ;;  %v8955_v13 = vld [vmem:[#allocation168_spill] sm:$0xff]  ;;  %v8964_v37 = vmax.bf16 %v8686_v63, %v8372_v51 }
 0x12a   : > { %8935 = vst [vmem:[#allocation82_spill] sm:$0xff] %v6182_v19  ;;  %v6188_v28 = vmax.bf16 %v8939_v14, %v8936_v16  ;;  %v8952_v19 = vld [vmem:[#allocation41_spill] sm:$0xff]  ;;  %v8953_v14 = vmax.bf16 %v8681_v36, %v8680_v52  ;;  %v8958_v1 = vld [vmem:[#allocation43_spill] sm:$0xff]  ;;  %v8966_v52 = vld [vmem:[#allocation30_spill] sm:$0xff] }
 0x12b   : > { %v6194_v22 = vmax.bf16 %v8944_v41, %v8941_v30  ;;  %v6202_v12 = vmax.bf16 %v8950_v5, %v8948_v27  ;;  %v8956_v41 = vmax.bf16 %v8683_v47, %v8682_v58  ;;  %v8960_v50 = vld [vmem:[#allocation93_spill] sm:$0xff]  ;;  %v8970_v47 = vld [vmem:[#allocation170_spill] sm:$0xff]  ;;  %v8971_v58 = vld [vmem:[#allocation107_spill] sm:$0xff] }
 0x12c   : > { %8940 = vst [vmem:[#allocation80_spill] sm:$0xff] %v6188_v28  ;;  %v6208_v48 = vmax.bf16 %v8953_v14, %v8952_v19  ;;  %v8963_v10 = vld [vmem:[#allocation169_spill] sm:$0xff]  ;;  %v8976_v51 = vld [vmem:[#allocation111_spill] sm:$0xff]  ;;  %v9063_v11 = vld [vmem:[#allocation18_spill] sm:$0xff] }
 0x12d   : > { %8945 = vst [vmem:[#allocation91_spill] sm:$0xff] %v6194_v22  ;;  %8951 = vst [vmem:[#allocation205_spill] sm:$0xff] %v6202_v12  ;;  %v6214_v61 = vmax.bf16 %v8956_v41, %v8955_v13  ;;  %v8961_v22 = vmax.bf16 %v8959_v7, %v8960_v50  ;;  %v6226_v5 = vmax.bf16 %v8964_v37, %v8963_v10  ;;  %v8967_v36 = vld [vmem:[#allocation105_spill] sm:$0xff]  ;;  %v8975_v7 = vld [vmem:[#allocation172_spill] sm:$0xff] }
 0x12e   : > { %8954 = vst [vmem:[#allocation94_spill] sm:$0xff] %v6208_v48  ;;  %v8968_v14 = vmax.bf16 %v8688_v43, %v8967_v36  ;;  %v8972_v41 = vmax.bf16 %v8690_v17, %v8971_v58  ;;  %v8977_v63 = vmax.bf16 %v5369_v53, %v8976_v51  ;;  %v8980_v43 = vmax.bf16 %v8715_v45, %v8714_v0  ;;  %v8986_v50 = vld [vmem:[#allocation222_spill] sm:$0xff]  ;;  %v8990_v53 = vld [vmem:[#allocation44_spill] sm:$0xff]  ;;  %v8991_v51 = vld [vmem:[#allocation223_spill] sm:$0xff] }
 0x12f   : > { %8957 = vst [vmem:[#allocation206_spill] sm:$0xff] %v6214_v61  ;;  %v6220_v28 = vmax.bf16 %v8961_v22, %v8958_v1  ;;  %8965 = vst [vmem:[#allocation87_spill] sm:$0xff] %v6226_v5  ;;  %v8974_v22 = vld [vmem:[#allocation35_spill] sm:$0xff]  ;;  %v8983_v17 = vmax.bf16 %v8716_v40, %v8108_v15  ;;  %v8995_v0 = vld [vmem:[#allocation54_spill] sm:$0xff] }
 0x130   : > { %v6232_v48 = vmax.bf16 %v8968_v14, %v8966_v52  ;;  %v6238_v61 = vmax.bf16 %v8972_v41, %v8970_v47  ;;  %v6246_v37 = vmax.bf16 %v8977_v63, %v8975_v7  ;;  %v8979_v5 = vld [vmem:[#allocation39_spill] sm:$0xff]  ;;  %v8982_v14 = vld [vmem:[#allocation177_spill] sm:$0xff]  ;;  %v8985_v41 = vld [vmem:[#allocation46_spill] sm:$0xff] }
 0x131   : > { %8962 = vst [vmem:[#allocation207_spill] sm:$0xff] %v6220_v28  ;;  %v6252_v36 = vmax.bf16 %v8980_v43, %v8979_v5  ;;  %v6258_v58 = vmax.bf16 %v8983_v17, %v8982_v14  ;;  %v8992_v63 = vld [vmem:[#allocation115_spill] sm:$0xff]  ;;  %v8996_v45 = vld [vmem:[#allocation224_spill] sm:$0xff]  ;;  %v8997_v43 = vld [vmem:[#allocation117_spill] sm:$0xff] }
 0x132   : > { %8969 = vst [vmem:[#allocation83_spill] sm:$0xff] %v6232_v48  ;;  %8973 = vst [vmem:[#allocation95_spill] sm:$0xff] %v6238_v61  ;;  %v8988_v61 = vmax.bf16 %v8986_v50, %v8987_v39  ;;  %v9000_v15 = vld [vmem:[#allocation178_spill] sm:$0xff]  ;;  %v9001_v40 = vld [vmem:[#allocation225_spill] sm:$0xff] }
 0x133   : > { %8978 = vst [vmem:[#allocation208_spill] sm:$0xff] %v6246_v37  ;;  %8981 = vst [vmem:[#allocation98_spill] sm:$0xff] %v6252_v36  ;;  %v8993_v37 = vmax.bf16 %v8991_v51, %v8992_v63  ;;  %v8998_v36 = vmax.bf16 %v8996_v45, %v8997_v43  ;;  %v9002_v17 = vld [vmem:[#allocation123_spill] sm:$0xff]  ;;  %v9009_v51 = vld [vmem:[#allocation124_spill] sm:$0xff] }
 0x134   : > { %8984 = vst [vmem:[#allocation209_spill] sm:$0xff] %v6258_v58  ;;  %v6264_v48 = vmax.bf16 %v8988_v61, %v8985_v41  ;;  %v9003_v58 = vmax.bf16 %v9001_v40, %v9002_v17  ;;  %v9008_v41 = vld [vmem:[#allocation231_spill] sm:$0xff]  ;;  %v9014_v45 = vld [vmem:[#allocation134_spill] sm:$0xff]  ;;  %v9019_v40 = vld [vmem:[#allocation136_spill] sm:$0xff] }
 0x135   : > { %v6270_v28 = vmax.bf16 %v8993_v37, %v8990_v53  ;;  %v6276_v5 = vmax.bf16 %v8998_v36, %v8995_v0  ;;  %v9010_v37 = vmax.bf16 %v9008_v41, %v9009_v51  ;;  %v9013_v53 = vld [vmem:[#allocation232_spill] sm:$0xff]  ;;  %v9018_v0 = vld [vmem:[#allocation233_spill] sm:$0xff]  ;;  %v9023_v50 = vld [vmem:[#allocation234_spill] sm:$0xff] }
 0x136   : > { %8989 = vst [vmem:[#allocation84_spill] sm:$0xff] %v6264_v48  ;;  %v6282_v14 = vmax.bf16 %v9003_v58, %v9000_v15  ;;  %v9007_v48 = vld [vmem:[#allocation180_spill] sm:$0xff]  ;;  %v9015_v36 = vmax.bf16 %v9013_v53, %v9014_v45  ;;  %v9020_v58 = vmax.bf16 %v9018_v0, %v9019_v40  ;;  %v9024_v61 = vld [vmem:[#allocation125_spill] sm:$0xff]  ;;  %v9027_v51 = vld [vmem:[#allocation235_spill] sm:$0xff] }
 0x137   : > { %8994 = vst [vmem:[#allocation210_spill] sm:$0xff] %v6270_v28  ;;  %8999 = vst [vmem:[#allocation89_spill] sm:$0xff] %v6276_v5  ;;  %v6290_v63 = vmax.bf16 %v9010_v37, %v9007_v48  ;;  %v9012_v28 = vld [vmem:[#allocation51_spill] sm:$0xff]  ;;  %v9025_v39 = vmax.bf16 %v9023_v50, %v9024_v61  ;;  %v9026_v41 = vld [vmem:[#allocation181_spill] sm:$0xff] }
 0x138   : > { %9004 = vst [vmem:[#allocation100_spill] sm:$0xff] %v6282_v14  ;;  %v6296_v43 = vmax.bf16 %v9015_v36, %v9012_v28  ;;  %v9017_v5 = vld [vmem:[#allocation47_spill] sm:$0xff]  ;;  %v9028_v37 = vld [vmem:[#allocation126_spill] sm:$0xff]  ;;  %v9030_v53 = vld [vmem:[#allocation61_spill] sm:$0xff] }
 0x139   : > { %9011 = vst [vmem:[#allocation211_spill] sm:$0xff] %v6290_v63  ;;  %v6302_v17 = vmax.bf16 %v9020_v58, %v9017_v5  ;;  %v9022_v14 = vld [vmem:[#allocation59_spill] sm:$0xff]  ;;  %v9029_v63 = vmax.bf16 %v9027_v51, %v9028_v37  ;;  %v9031_v45 = vld [vmem:[#allocation236_spill] sm:$0xff]  ;;  %v9032_v36 = vld [vmem:[#allocation137_spill] sm:$0xff] }
 0x13a   : > { %9016 = vst [vmem:[#allocation104_spill] sm:$0xff] %v6296_v43  ;;  %v6308_v15 = vmax.bf16 %v9025_v39, %v9022_v14  ;;  %v9033_v43 = vmax.bf16 %v9031_v45, %v9032_v36  ;;  %v9034_v0 = vld [vmem:[#allocation182_spill] sm:$0xff]  ;;  %v9035_v40 = vld [vmem:[#allocation237_spill] sm:$0xff]  ;;  %v9038_v39 = vld [vmem:[#allocation48_spill] sm:$0xff] }
 0x13b   : > { %9021 = vst [vmem:[#allocation212_spill] sm:$0xff] %v6302_v17  ;;  %v6314_v48 = vmax.bf16 %v9029_v63, %v9026_v41  ;;  %v9036_v58 = vld [vmem:[#allocation138_spill] sm:$0xff]  ;;  %v9039_v61 = vld [vmem:[#allocation183_spill] sm:$0xff]  ;;  %v9042_v36 = vld [vmem:[#allocation64_spill] sm:$0xff] }
 0x13c   : > { %v6320_v28 = vmax.bf16 %v9033_v43, %v9030_v53  ;;  %v9037_v17 = vmax.bf16 %v9035_v40, %v9036_v58  ;;  %v9040_v40 = vmax.bf16 %v5564_v44, %v8814_v32  ;;  %v9047_v35 = vld [vmem:[#allocation151_spill] sm:$0xff]  ;;  %v9048_v37 = vld [vmem:[#allocation22_spill] sm:$0xff]  ;;  %v9062_v50 = vld [vmem:[#allocation156_spill] sm:$0xff] }
 0x13d   : > { %v9049_v33 = vmax.bf16 %v9048_v37, %v8842_v25  ;;  %v9052_v45 = vld [vmem:[#allocation191_spill] sm:$0xff]  ;;  %v9064_v34 = vmax.bf16 %v9063_v11, %v9047_v35  ;;  %v9066_v8 = vld [vmem:[#allocation77_spill] sm:$0xff]  ;;  %v9075_v18 = vld [vmem:[#allocation26_spill] sm:$0xff] }
 0x13e   : > { %v6326_v5 = vmax.bf16 %v9037_v17, %v9034_v0  ;;  %v6348_v58 = vmax.bf16 %v9040_v40, %v8842_v25  ;;  %v9054_v17 = vld [vmem:[#allocation76_spill] sm:$0xff]  ;;  %v9059_v40 = vld [vmem:[#allocation69_spill] sm:$0xff]  ;;  %v9068_v51 = vld [vmem:[#allocation195_spill] sm:$0xff]  ;;  %v9076_v55 = vmax.bf16 %v9075_v18, %v9062_v50 }
 0x13f   : > { %v6368_v43 = vmax.bf16 %v9049_v33, %v9047_v35  ;;  %v6388_v54 = vmax.bf16 %v9064_v34, %v9062_v50  ;;  %v9067_v63 = vld [vmem:[#allocation29_spill] sm:$0xff]  ;;  %v9070_v32 = vld [vmem:[#allocation79_spill] sm:$0xff]  ;;  %v9071_v25 = vld [vmem:[#allocation196_spill] sm:$0xff] }
 0x140   : > { %9041 = vst [vmem:[#allocation214_spill] sm:$0xff] %v6348_v58  ;;  %v9058_v58 = vld [vmem:[#allocation193_spill] sm:$0xff]  ;;  %v6408_v60 = vmax.bf16 %v9076_v55, %v8946_v31  ;;  %v9077_v56 = vld [vmem:[#allocation198_spill] sm:$0xff]  ;;  %v9078_v21 = vld [vmem:[#allocation199_spill] sm:$0xff] }
 0x141   : > { %9050 = vst [vmem:[#allocation96_spill] sm:$0xff] %v6368_v43  ;;  %v9072_v43 = vld [vmem:[#allocation66_spill] sm:$0xff]  ;;  %v9073_v37 = vld [vmem:[#allocation197_spill] sm:$0xff]  ;;  %v9096_v33 = vld [vmem:[#allocation83_spill] sm:$0xff] }
 0x142   : > { %v9084_v44 = vld [vmem:[#allocation33_spill] sm:$0xff]  ;;  %v9088_v16 = vld [vmem:[#allocation94_spill] sm:$0xff]  ;;  %v9100_v12 = vld [vmem:[#allocation171_spill] sm:$0xff] }
 0x143   : > { %v9085_v27 = vmax.bf16 %v9084_v44, %v8946_v31  ;;  %v9090_v30 = vld [vmem:[#allocation206_spill] sm:$0xff]  ;;  %v9101_v1 = vmax.bf16 %v9100_v12, %v8974_v22  ;;  %v9103_v10 = vld [vmem:[#allocation180_spill] sm:$0xff]  ;;  %v9113_v52 = vld [vmem:[#allocation179_spill] sm:$0xff] }
 0x144   : > { %v9099_v7 = vld [vmem:[#allocation58_spill] sm:$0xff]  ;;  %v9104_v11 = vld [vmem:[#allocation208_spill] sm:$0xff]  ;;  %v9115_v31 = vld [vmem:[#allocation239_spill] sm:$0xff] }
 0x145   : > { %v6428_v4 = vmax.bf16 %v9085_v27, %v8974_v22  ;;  %v4083_v27 = vmov 1935823168   ;;  %v6448_v13 = vmax.bf16 %v9101_v1, %v9099_v7  ;;  %v9106_v18 = vld [vmem:[#allocation98_spill] sm:$0xff]  ;;  %v9114_v47 = vmax.bf16 %v9113_v52, %v9099_v7  ;;  %v9116_v34 = vld [vmem:[#allocation132_spill] sm:$0xff]  ;;  %v9118_v55 = vld [vmem:[#allocation211_spill] sm:$0xff] }
 0x146   : > { %v2707_v44 = vunpack.c.l.s4 %v4083_v27  ;;  %v9109_v27 = vld [vmem:[#allocation84_spill] sm:$0xff]  ;;  %v9117_v50 = vmax.bf16 %v9115_v31, %v9116_v34  ;;  %v9123_v53 = vld [vmem:[#allocation241_spill] sm:$0xff]  ;;  %v9127_v52 = vld [vmem:[#allocation242_spill] sm:$0xff] }
 0x147   : > { %9086 = vst [vmem:[#allocation215_spill] sm:$0xff] %v6428_v4  ;;  %9102 = vst [vmem:[#allocation90_spill] sm:$0xff] %v6448_v13  ;;  %v6468_v35 = vmax.bf16 %v9114_v47, %v9038_v39  ;;  %v9119_v4 = vld [vmem:[#allocation240_spill] sm:$0xff]  ;;  %v9124_v13 = vld [vmem:[#allocation141_spill] sm:$0xff] }
 0x148   : > { %v2708_v19 = vunpack.c.0.s8 %v2707_v44  ;;  %v6474_v14 = vmax.bf16 %v9118_v55, %v9117_v50  ;;  %v9120_v44 = vld [vmem:[#allocation139_spill] sm:$0xff]  ;;  %v9122_v26 = vld [vmem:[#allocation104_spill] sm:$0xff]  ;;  %v9125_v0 = vmax.bf16 %v9123_v53, %v9124_v13  ;;  %v9130_v55 = vld [vmem:[#allocation2_spill] sm:$0xff] }
 0x149   : > { %v9121_v41 = vmax.bf16 %v9119_v4, %v9120_v44  ;;  %v9126_v22 = vld [vmem:[#allocation212_spill] sm:$0xff]  ;;  %v9131_v31 = vld [vmem:[#allocation243_spill] sm:$0xff] }
 0x14a   : > { %v6486_v12 = vmax.bf16 %v9126_v22, %v9125_v0  ;;  %v9128_v47 = vld [vmem:[#allocation128_spill] sm:$0xff]  ;;  %v6495_v50 = vsub.s32 %v2708_v19, %v9130_v55  ;;  %v9132_v4 = vld [vmem:[#allocation135_spill] sm:$0xff]  ;;  %v9137_v22 = vld [vmem:[#allocation245_spill] sm:$0xff] }
 0x14b   : > { %v6480_v1 = vmax.bf16 %v9122_v26, %v9121_v41  ;;  %v9129_v7 = vmax.bf16 %v9127_v52, %v9128_v47  ;;  %v9133_v44 = vmax.bf16 %v9131_v31, %v9132_v4  ;;  %v9134_v41 = vld [vmem:[#allocation244_spill] sm:$0xff]  ;;  %v9138_v52 = vld [vmem:[#allocation142_spill] sm:$0xff]  ;;  %v9140_v19 = vld [vmem:[#allocation53_spill] sm:$0xff] }
 0x14c   : > { %v9135_v13 = vld [vmem:[#allocation140_spill] sm:$0xff]  ;;  %v9139_v47 = vmax.bf16 %v9137_v22, %v9138_v52  ;;  %v9151_v52 = vld [vmem:[#allocation147_spill] sm:$0xff] }
 0x14d   : > { %v6492_v34 = vmax.bf16 %v6308_v15, %v9129_v7  ;;  %v6501_v26 = vmax.bf16 %v6314_v48, %v9133_v44  ;;  %v9136_v53 = vmax.bf16 %v9134_v41, %v9135_v13  ;;  %v9141_v7 = vmax.bf16 %v9039_v61, %v9038_v39 }
 0x14e   : > { %v6513_v15 = vmax.bf16 %v6326_v5, %v9139_v47  ;;  %v9142_v48 = vmax.bf16 %v5970_v6, %v5568_v29  ;;  %v9144_v5 = vmax.bf16 %v5986_v23, %v8817_v46  ;;  %v9145_v39 = vmax.bf16 %v5994_v42, %v8822_v38  ;;  %v9148_v23 = vld [vmem:[#allocation19_spill] sm:$0xff]  ;;  %v9150_v42 = vld [vmem:[#allocation214_spill] sm:$0xff] }
 0x14f   : > { %v6507_v0 = vmax.bf16 %v6320_v28, %v9136_v53  ;;  %v6519_v55 = vmax.bf16 %v9141_v7, %v9140_v19  ;;  %v9143_v28 = vmax.bf16 %v5978_v24, %v5572_v20  ;;  %v9146_v29 = vmax.bf16 %v6002_v62, %v8827_v57  ;;  %v9153_v7 = vld [vmem:[#allocation148_spill] sm:$0xff] }
 0x150   : > { %v6525_v31 = vrot.slane %v9142_v48, %v6495_v50  ;;  %v6537_v44 = vrot.slane %v9144_v5, %v6495_v50  ;;  %v6543_v61 = vrot.slane %v9145_v39, %v6495_v50  ;;  %v9147_v20 = vmax.bf16 %v6010_v3, %v8832_v9  ;;  %v9155_v5 = vld [vmem:[#allocation57_spill] sm:$0xff] }
 0x151   : > { %v6531_v4 = vrot.slane %v9143_v28, %v6495_v50  ;;  %v6549_v6 = vrot.slane %v9146_v29, %v6495_v50  ;;  %v9149_v46 = vmax.bf16 %v6018_v2, %v9148_v23  ;;  %v2810_v38 = vrot.slane %v9150_v42, %v6495_v50  ;;  %v9156_v39 = vld [vmem:[#allocation149_spill] sm:$0xff]  ;;  %v9158_v23 = vld [vmem:[#allocation190_spill] sm:$0xff] }
 0x152   : > { %v6555_v24 = vrot.slane %v9147_v20, %v6495_v50  ;;  %v9152_v47 = vmax.bf16 %v6026_v59, %v9151_v52  ;;  %v9154_v48 = vmax.bf16 %v6032_v49, %v9153_v7  ;;  %v9157_v29 = vmax.bf16 %v9155_v5, %v9156_v39  ;;  %v9161_v59 = vld [vmem:[#allocation16_spill] sm:$0xff]  ;;  %v9163_v49 = vld [vmem:[#allocation62_spill] sm:$0xff]  ;;  %v9167_v39 = vld [vmem:[#allocation13_spill] sm:$0xff] }
 0x153   : > { %v6561_v41 = vrot.slane %v9149_v46, %v6495_v50  ;;  %v6580_v22 = vrot.slane %v2810_v38, %v6495_v50  ;;  %v9159_v46 = vld [vmem:[#allocation23_spill] sm:$0xff]  ;;  %v9162_v52 = vmax.bf16 %v9042_v36, %v9161_v59  ;;  %v9164_v7 = vld [vmem:[#allocation150_spill] sm:$0xff]  ;;  %v9166_v5 = vld [vmem:[#allocation72_spill] sm:$0xff] }
 0x154   : > { %v6586_v19 = vrot.slane %v9152_v47, %v6495_v50  ;;  %v6592_v28 = vrot.slane %v9154_v48, %v6495_v50  ;;  %v6598_v20 = vrot.slane %v9157_v29, %v6495_v50  ;;  %v9160_v42 = vmax.bf16 %v9158_v23, %v9159_v46  ;;  %v9169_v23 = vld [vmem:[#allocation96_spill] sm:$0xff]  ;;  %v9178_v2 = vld [vmem:[#allocation153_spill] sm:$0xff] }
 0x155   : > { %v6610_v47 = vrot.slane %v9162_v52, %v6495_v50  ;;  %v9165_v48 = vmax.bf16 %v9163_v49, %v9164_v7  ;;  %v9168_v29 = vmax.bf16 %v9166_v5, %v9167_v39  ;;  %v2922_v46 = vrot.slane %v9169_v23, %v6495_v50  ;;  %v9170_v39 = vld [vmem:[#allocation152_spill] sm:$0xff]  ;;  %v9172_v52 = vld [vmem:[#allocation27_spill] sm:$0xff] }
 0x156   : > { %v6604_v38 = vrot.slane %v9160_v42, %v6495_v50  ;;  %v9173_v59 = vmax.bf16 %v9054_v17, %v9172_v52  ;;  %v9174_v7 = vld [vmem:[#allocation192_spill] sm:$0xff]  ;;  %v9182_v17 = vld [vmem:[#allocation21_spill] sm:$0xff] }
 0x157   : > { %v6616_v53 = vrot.slane %v9165_v48, %v6495_v50  ;;  %v6622_v13 = vrot.slane %v9168_v29, %v6495_v50  ;;  %v6641_v5 = vrot.slane %v2922_v46, %v6495_v50  ;;  %v9171_v29 = vmax.bf16 %v9052_v45, %v9170_v39  ;;  %v9175_v42 = vld [vmem:[#allocation20_spill] sm:$0xff]  ;;  %v9177_v46 = vld [vmem:[#allocation65_spill] sm:$0xff]  ;;  %v9180_v45 = vld [vmem:[#allocation154_spill] sm:$0xff] }
 0x158   : > { %v6653_v49 = vrot.slane %v9173_v59, %v6495_v50  ;;  %v9176_v36 = vmax.bf16 %v9174_v7, %v9175_v42  ;;  %v9179_v9 = vmax.bf16 %v9177_v46, %v9178_v2  ;;  %v9181_v39 = vmax.bf16 %v9058_v58, %v9180_v45  ;;  %v9185_v42 = vld [vmem:[#allocation155_spill] sm:$0xff] }
 0x159   : > { %v6647_v23 = vrot.slane %v9171_v29, %v6495_v50  ;;  %v9183_v59 = vmax.bf16 %v9059_v40, %v9182_v17 }
 0x15a   : > { %v6659_v48 = vrot.slane %v9176_v36, %v6495_v50  ;;  %v6665_v3 = vrot.slane %v9179_v9, %v6495_v50  ;;  %v6671_v29 = vrot.slane %v9181_v39, %v6495_v50  ;;  %v9184_v36 = vld [vmem:[#allocation194_spill] sm:$0xff]  ;;  %v3034_v9 = vrot.slane %v6388_v54, %v6495_v50  ;;  %v9190_v39 = vld [vmem:[#allocation163_spill] sm:$0xff] }
 0x15b   : > { %v6677_v52 = vrot.slane %v9183_v59, %v6495_v50  ;;  %v9186_v7 = vmax.bf16 %v9184_v36, %v9185_v42  ;;  %v9187_v59 = vld [vmem:[#allocation162_spill] sm:$0xff]  ;;  %v9191_v46 = vmax.bf16 %v9070_v32, %v9190_v39  ;;  %v9200_v32 = vld [vmem:[#allocation71_spill] sm:$0xff] }
 0x15c   : > { %v6702_v17 = vrot.slane %v3034_v9, %v6495_v50  ;;  %v9188_v36 = vmax.bf16 %v9066_v8, %v9187_v59  ;;  %v9192_v9 = vld [vmem:[#allocation36_spill] sm:$0xff] }
 0x15d   : > { %v6683_v57 = vrot.slane %v9186_v7, %v6495_v50  ;;  %v9189_v7 = vmax.bf16 %v9068_v51, %v9067_v63  ;;  %v6720_v54 = vrot.slane %v9191_v46, %v6495_v50  ;;  %v9193_v40 = vmax.bf16 %v9071_v25, %v9192_v9  ;;  %v9194_v8 = vld [vmem:[#allocation164_spill] sm:$0xff]  ;;  %v9201_v46 = vld [vmem:[#allocation165_spill] sm:$0xff] }
 0x15e   : > { %v6708_v42 = vrot.slane %v9188_v36, %v6495_v50  ;;  %v9195_v59 = vmax.bf16 %v9072_v43, %v9194_v8  ;;  %v9197_v51 = vld [vmem:[#allocation40_spill] sm:$0xff]  ;;  %v9202_v39 = vmax.bf16 %v9200_v32, %v9201_v46  ;;  %v3146_v25 = vrot.slane %v6408_v60, %v6495_v50  ;;  %v9213_v43 = vld [vmem:[#allocation43_spill] sm:$0xff] }
 0x15f   : > { %v6714_v45 = vrot.slane %v9189_v7, %v6495_v50  ;;  %v6726_v2 = vrot.slane %v9193_v40, %v6495_v50  ;;  %v9198_v63 = vmax.bf16 %v9073_v37, %v9197_v51  ;;  %v9210_v37 = vld [vmem:[#allocation168_spill] sm:$0xff] }
 0x160   : > { %v6732_v36 = vrot.slane %v9195_v59, %v6495_v50  ;;  %v6744_v58 = vrot.slane %v9202_v39, %v6495_v50  ;;  %v6763_v51 = vrot.slane %v3146_v25, %v6495_v50  ;;  %v9207_v39 = vld [vmem:[#allocation41_spill] sm:$0xff]  ;;  %v9209_v59 = vld [vmem:[#allocation75_spill] sm:$0xff]  ;;  %v9212_v25 = vld [vmem:[#allocation204_spill] sm:$0xff] }
 0x161   : > { %v6738_v7 = vrot.slane %v9198_v63, %v6495_v50  ;;  %v9205_v63 = vld [vmem:[#allocation167_spill] sm:$0xff]  ;;  %v9208_v9 = vmax.bf16 %v9078_v21, %v9207_v39  ;;  %v9211_v40 = vmax.bf16 %v9209_v59, %v9210_v37  ;;  %v9214_v62 = vmax.bf16 %v9212_v25, %v9213_v43  ;;  %v9220_v21 = vld [vmem:[#allocation80_spill] sm:$0xff]  ;;  %v9225_v37 = vld [vmem:[#allocation170_spill] sm:$0xff] }
 0x162   : > { %9196 = vst [vmem:[#allocation216_spill] sm:$0xff] %v6732_v36  ;;  %9203 = vst [vmem:[#allocation99_spill] sm:$0xff] %v6744_v58  ;;  %v9206_v32 = vmax.bf16 %v9077_v56, %v9205_v63  ;;  %v9216_v56 = vld [vmem:[#allocation82_spill] sm:$0xff]  ;;  %v9217_v63 = vld [vmem:[#allocation169_spill] sm:$0xff] }
 0x163   : > { %9199 = vst [vmem:[#allocation110_spill] sm:$0xff] %v6738_v7  ;;  %9204 = vst [vmem:[#allocation101_spill] sm:$0xff] %v6763_v51  ;;  %v6775_v8 = vrot.slane %v9208_v9, %v6495_v50  ;;  %v6781_v60 = vrot.slane %v9211_v40, %v6495_v50  ;;  %v6787_v51 = vrot.slane %v9214_v62, %v6495_v50  ;;  %v9221_v9 = vld [vmem:[#allocation30_spill] sm:$0xff]  ;;  %v9224_v40 = vld [vmem:[#allocation91_spill] sm:$0xff] }
 0x164   : > { %v6769_v46 = vrot.slane %v9206_v32, %v6495_v50  ;;  %v9218_v32 = vmax.bf16 %v9216_v56, %v9217_v63  ;;  %v9222_v39 = vmax.bf16 %v9220_v21, %v9221_v9  ;;  %v9226_v59 = vmax.bf16 %v9224_v40, %v9225_v37  ;;  %v9228_v62 = vld [vmem:[#allocation215_spill] sm:$0xff]  ;;  %v9230_v37 = vld [vmem:[#allocation205_spill] sm:$0xff] }
 0x165   : > { %9215 = vst [vmem:[#allocation102_spill] sm:$0xff] %v6787_v51  ;;  %v3258_v43 = vrot.slane %v9228_v62, %v6495_v50  ;;  %v9235_v9 = vld [vmem:[#allocation177_spill] sm:$0xff] }
 0x166   : > { %v6793_v58 = vrot.slane %v9218_v32, %v6495_v50  ;;  %v6799_v7 = vrot.slane %v9222_v39, %v6495_v50  ;;  %v6805_v36 = vrot.slane %v9226_v59, %v6495_v50  ;;  %v9231_v59 = vld [vmem:[#allocation172_spill] sm:$0xff]  ;;  %v9233_v32 = vld [vmem:[#allocation39_spill] sm:$0xff]  ;;  %v9236_v25 = vmax.bf16 %v9090_v30, %v9235_v9 }
 0x167   : > { %v6824_v40 = vrot.slane %v3258_v43, %v6495_v50  ;;  %v9232_v62 = vmax.bf16 %v9230_v37, %v9231_v59  ;;  %v9234_v56 = vmax.bf16 %v9088_v16, %v9233_v32  ;;  %v9237_v43 = vld [vmem:[#allocation207_spill] sm:$0xff]  ;;  %v9241_v59 = vld [vmem:[#allocation44_spill] sm:$0xff]  ;;  %v9244_v16 = vld [vmem:[#allocation54_spill] sm:$0xff] }
 0x168   : > { %9219 = vst [vmem:[#allocation112_spill] sm:$0xff] %v6793_v58  ;;  %9223 = vst [vmem:[#allocation217_spill] sm:$0xff] %v6799_v7  ;;  %v6842_v39 = vrot.slane %v9236_v25, %v6495_v50  ;;  %v9240_v37 = vld [vmem:[#allocation87_spill] sm:$0xff]  ;;  %v9248_v25 = vld [vmem:[#allocation178_spill] sm:$0xff] }
 0x169   : > { %9227 = vst [vmem:[#allocation218_spill] sm:$0xff] %v6805_v36  ;;  %9229 = vst [vmem:[#allocation219_spill] sm:$0xff] %v6824_v40  ;;  %v6830_v63 = vrot.slane %v9232_v62, %v6495_v50  ;;  %v6836_v21 = vrot.slane %v9234_v56, %v6495_v50  ;;  %v9238_v40 = vld [vmem:[#allocation46_spill] sm:$0xff]  ;;  %v9242_v62 = vmax.bf16 %v9240_v37, %v9241_v59  ;;  %v9247_v30 = vld [vmem:[#allocation95_spill] sm:$0xff] }
 0x16a   : > { %v9239_v36 = vmax.bf16 %v9237_v43, %v9238_v40  ;;  %v9245_v56 = vmax.bf16 %v9096_v33, %v9244_v16  ;;  %v9249_v9 = vmax.bf16 %v9247_v30, %v9248_v25  ;;  %v9253_v25 = vmax.bf16 %v9104_v11, %v9103_v10  ;;  %v9256_v16 = vld [vmem:[#allocation209_spill] sm:$0xff]  ;;  %v9257_v33 = vld [vmem:[#allocation47_spill] sm:$0xff]  ;;  %v9261_v10 = vld [vmem:[#allocation210_spill] sm:$0xff] }
 0x16b   : > { %v6854_v58 = vrot.slane %v9242_v62, %v6495_v50  ;;  %v9258_v37 = vmax.bf16 %v9256_v16, %v9257_v33  ;;  %v9262_v11 = vld [vmem:[#allocation181_spill] sm:$0xff]  ;;  %v9268_v33 = vld [vmem:[#allocation182_spill] sm:$0xff] }
 0x16c   : > { %v6848_v7 = vrot.slane %v9239_v36, %v6495_v50  ;;  %v6860_v32 = vrot.slane %v9245_v56, %v6495_v50  ;;  %v6866_v51 = vrot.slane %v9249_v9, %v6495_v50  ;;  %v9251_v36 = vld [vmem:[#allocation90_spill] sm:$0xff]  ;;  %v6891_v9 = vrot.slane %v9253_v25, %v6495_v50 }
 0x16d   : > { %9243 = vst [vmem:[#allocation97_spill] sm:$0xff] %v6854_v58  ;;  %v3370_v40 = vrot.slane %v9251_v36, %v6495_v50  ;;  %v9254_v36 = vld [vmem:[#allocation51_spill] sm:$0xff]  ;;  %v6903_v56 = vrot.slane %v9258_v37, %v6495_v50  ;;  %v9263_v25 = vmax.bf16 %v9261_v10, %v9262_v11  ;;  %v9267_v37 = vld [vmem:[#allocation100_spill] sm:$0xff]  ;;  %v9298_v10 = vld [vmem:[#allocation110_spill] sm:$0xff] }
 0x16e   : > { %9246 = vst [vmem:[#allocation114_spill] sm:$0xff] %v6860_v32  ;;  %9250 = vst [vmem:[#allocation116_spill] sm:$0xff] %v6866_v51  ;;  %v9255_v59 = vmax.bf16 %v9106_v18, %v9254_v36  ;;  %v9264_v18 = vld [vmem:[#allocation89_spill] sm:$0xff]  ;;  %v9269_v16 = vmax.bf16 %v9267_v37, %v9268_v33  ;;  %v3510_v37 = vrot.slane %v6480_v1, %v6495_v50  ;;  %v9296_v11 = vld [vmem:[#allocation216_spill] sm:$0xff] }
 0x16f   : > { %v6885_v30 = vrot.slane %v3370_v40, %v6495_v50  ;;  %v9259_v40 = vld [vmem:[#allocation59_spill] sm:$0xff]  ;;  %v6915_v51 = vrot.slane %v9263_v25, %v6495_v50  ;;  %v3524_v33 = vrot.slane %v6486_v12, %v6495_v50 }
 0x170   : > { %v6897_v62 = vrot.slane %v9255_v59, %v6495_v50  ;;  %v9260_v43 = vmax.bf16 %v9109_v27, %v9259_v40  ;;  %v9265_v59 = vld [vmem:[#allocation61_spill] sm:$0xff]  ;;  %v6927_v58 = vrot.slane %v9269_v16, %v6495_v50  ;;  %v3482_v27 = vrot.slane %v6468_v35, %v6495_v50  ;;  %v9300_v40 = vld [vmem:[#allocation99_spill] sm:$0xff] }
 0x171   : > { %9252 = vst [vmem:[#allocation220_spill] sm:$0xff] %v6885_v30  ;;  %v9266_v36 = vmax.bf16 %v9264_v18, %v9265_v59  ;;  %v3538_v16 = vrot.slane %v6492_v34, %v6495_v50  ;;  %v3552_v18 = vrot.slane %v6501_v26, %v6495_v50  ;;  %v3566_v35 = vrot.slane %v6507_v0, %v6495_v50 }
 0x172   : > { %v6909_v30 = vrot.slane %v9260_v43, %v6495_v50  ;;  %v6946_v59 = vrot.slane %v3482_v27, %v6495_v50  ;;  %v3580_v27 = vrot.slane %v6513_v15, %v6495_v50  ;;  %v6968_v12 = vrot.slane %v3510_v37, %v6495_v50  ;;  %v9312_v43 = vld [vmem:[#allocation112_spill] sm:$0xff] }
 0x173   : > { %v6921_v32 = vrot.slane %v9266_v36, %v6495_v50  ;;  %v3496_v36 = vrot.slane %v6474_v14, %v6495_v50  ;;  %v3594_v14 = vrot.slane %v6519_v55, %v6495_v50  ;;  %v6971_v34 = vrot.slane %v3524_v33, %v6495_v50 }
 0x174   : > { %v6974_v26 = vrot.slane %v3538_v16, %v6495_v50  ;;  %v6977_v0 = vrot.slane %v3552_v18, %v6495_v50  ;;  %v6980_v15 = vrot.slane %v3566_v35, %v6495_v50  ;;  %v6983_v55 = vrot.slane %v3580_v27, %v6495_v50 }
 0x175   : > { %v6965_v1 = vrot.slane %v3496_v36, %v6495_v50  ;;  %v6986_v36 = vrot.slane %v3594_v14, %v6495_v50  ;;  %v9270_v37 = vrot.slane %v6525_v31, %v6495_v50  ;;  %v9271_v16 = vrot.slane %v6531_v4, %v6495_v50 }
 0x176   : > { %v9272_v18 = vrot.slane %v6537_v44, %v6495_v50  ;;  %v9273_v27 = vrot.slane %v6543_v61, %v6495_v50  ;;  %v9274_v31 = vrot.slane %v6549_v6, %v6495_v50  ;;  %v9275_v4 = vrot.slane %v6555_v24, %v6495_v50 }
 0x177   : > { %v6991_v33 = vunpack.c.l.b16 %v9270_v37  ;;  %v6996_v25 = vunpack.c.l.b16 %v9271_v16  ;;  %v9276_v44 = vrot.slane %v6561_v41, %v6495_v50  ;;  %v9277_v61 = vrot.slane %v6586_v19, %v6495_v50 }
 0x178   : > { %v7001_v35 = vunpack.c.l.b16 %v9272_v18  ;;  %v7006_v14 = vunpack.c.l.b16 %v9273_v27  ;;  %v7011_v37 = vunpack.c.l.b16 %v9274_v31  ;;  %v7016_v16 = vunpack.c.l.b16 %v9275_v4 }
 0x179   : > { %v7021_v18 = vunpack.c.l.b16 %v9276_v44  ;;  %v7027_v27 = vunpack.c.l.b16 %v9277_v61  ;;  %v9278_v6 = vrot.slane %v6592_v28, %v6495_v50  ;;  %v9279_v24 = vrot.slane %v6598_v20, %v6495_v50 }
 0x17a   : > { %v9280_v41 = vrot.slane %v6604_v38, %v6495_v50  ;;  %v9281_v19 = vrot.slane %v6610_v47, %v6495_v50  ;;  %v9282_v28 = vrot.slane %v6616_v53, %v6495_v50  ;;  %v9283_v20 = vrot.slane %v6622_v13, %v6495_v50 }
 0x17b   : > { %v7032_v31 = vunpack.c.l.b16 %v9278_v6  ;;  %v7037_v4 = vunpack.c.l.b16 %v9279_v24  ;;  %v9284_v38 = vrot.slane %v6647_v23, %v6495_v50  ;;  %v9285_v47 = vrot.slane %v6653_v49, %v6495_v50 }
 0x17c   : > { %v7042_v44 = vunpack.c.l.b16 %v9280_v41  ;;  %v7047_v61 = vunpack.c.l.b16 %v9281_v19  ;;  %v7052_v6 = vunpack.c.l.b16 %v9282_v28  ;;  %v7057_v24 = vunpack.c.l.b16 %v9283_v20 }
 0x17d   : > { %v7063_v41 = vunpack.c.l.b16 %v9284_v38  ;;  %v7068_v19 = vunpack.c.l.b16 %v9285_v47  ;;  %v9286_v53 = vrot.slane %v6659_v48, %v6495_v50  ;;  %v9287_v13 = vrot.slane %v6665_v3, %v6495_v50 }
 0x17e   : > { %v9288_v23 = vrot.slane %v6671_v29, %v6495_v50  ;;  %v9289_v49 = vrot.slane %v6677_v52, %v6495_v50  ;;  %v9290_v48 = vrot.slane %v6683_v57, %v6495_v50  ;;  %v9291_v3 = vrot.slane %v6708_v42, %v6495_v50 }
 0x17f   : > { %v7073_v28 = vunpack.c.l.b16 %v9286_v53  ;;  %v7078_v20 = vunpack.c.l.b16 %v9287_v13  ;;  %v9293_v29 = vrot.slane %v6714_v45, %v6495_v50  ;;  %v9294_v52 = vrot.slane %v6720_v54, %v6495_v50 }
 0x180   : > { %v7083_v38 = vunpack.c.l.b16 %v9288_v23  ;;  %v7088_v47 = vunpack.c.l.b16 %v9289_v49  ;;  %v7093_v53 = vunpack.c.l.b16 %v9290_v48  ;;  %v7099_v13 = vunpack.c.l.b16 %v9291_v3 }
 0x181   : > { %v7104_v23 = vunpack.c.l.b16 %v9293_v29  ;;  %v7109_v49 = vunpack.c.l.b16 %v9294_v52  ;;  %v9295_v57 = vrot.slane %v6726_v2, %v6495_v50  ;;  %v9297_v42 = vrot.slane %v9296_v11, %v6495_v50 }
 0x182   : > { %9292 = vst [vmem:[#allocation221_spill] sm:$0xff] %v7099_v13  ;;  %v9299_v45 = vrot.slane %v9298_v10, %v6495_v50  ;;  %v9301_v54 = vrot.slane %v9300_v40, %v6495_v50  ;;  %v9303_v2 = vrot.slane %v6769_v46, %v6495_v50  ;;  %v9305_v11 = vrot.slane %v6775_v8, %v6495_v50  ;;  %v9309_v40 = vld [vmem:[#allocation102_spill] sm:$0xff] }
 0x183   : > { %v7114_v48 = vunpack.c.l.b16 %v9295_v57  ;;  %v7119_v3 = vunpack.c.l.b16 %v9297_v42  ;;  %v9307_v10 = vrot.slane %v6781_v60, %v6495_v50  ;;  %v9313_v46 = vrot.slane %v9312_v43, %v6495_v50 }
 0x184   : > { %v7124_v29 = vunpack.c.l.b16 %v9299_v45  ;;  %v7129_v52 = vunpack.c.l.b16 %v9301_v54  ;;  %v7135_v57 = vunpack.c.l.b16 %v9303_v2  ;;  %v7140_v42 = vunpack.c.l.b16 %v9305_v11 }
 0x185   : > { %v7145_v45 = vunpack.c.l.b16 %v9307_v10  ;;  %v9310_v54 = vrot.slane %v9309_v40, %v6495_v50  ;;  %v7155_v2 = vunpack.c.l.b16 %v9313_v46  ;;  %v9321_v43 = vrot.slane %v6836_v21, %v6495_v50  ;;  %v9327_v40 = vld [vmem:[#allocation97_spill] sm:$0xff] }
 0x186   : > { %9304 = vst [vmem:[#allocation103_spill] sm:$0xff] %v7135_v57  ;;  %9306 = vst [vmem:[#allocation226_spill] sm:$0xff] %v7140_v42  ;;  %v9314_v57 = vld [vmem:[#allocation217_spill] sm:$0xff]  ;;  %v9316_v42 = vld [vmem:[#allocation218_spill] sm:$0xff] }
 0x187   : > { %9308 = vst [vmem:[#allocation127_spill] sm:$0xff] %v7145_v45  ;;  %v7150_v13 = vunpack.c.l.b16 %v9310_v54  ;;  %v9315_v8 = vrot.slane %v9314_v57, %v6495_v50  ;;  %v9317_v60 = vrot.slane %v9316_v42, %v6495_v50  ;;  %v9318_v45 = vld [vmem:[#allocation219_spill] sm:$0xff]  ;;  %v9319_v54 = vrot.slane %v6830_v63, %v6495_v50 }
 0x188   : > { %v7176_v46 = vunpack.c.l.b16 %v9321_v43  ;;  %v9323_v57 = vrot.slane %v6842_v39, %v6495_v50  ;;  %v9325_v42 = vrot.slane %v6848_v7, %v6495_v50  ;;  %v9328_v63 = vrot.slane %v9327_v40, %v6495_v50 }
 0x189   : > { %9311 = vst [vmem:[#allocation120_spill] sm:$0xff] %v7150_v13  ;;  %v7160_v11 = vunpack.c.l.b16 %v9315_v8  ;;  %v7165_v10 = vunpack.c.l.b16 %v9317_v60  ;;  %v7171_v13 = vunpack.c.l.b16 %v9319_v54  ;;  %v9335_v40 = vrot.slane %v6897_v62, %v6495_v50 }
 0x18a   : > { %9322 = vst [vmem:[#allocation130_spill] sm:$0xff] %v7176_v46  ;;  %v7181_v8 = vunpack.c.l.b16 %v9323_v57  ;;  %v7186_v60 = vunpack.c.l.b16 %v9325_v42  ;;  %v7191_v54 = vunpack.c.l.b16 %v9328_v63  ;;  %v9331_v46 = vld [vmem:[#allocation116_spill] sm:$0xff]  ;;  %v9334_v42 = vrot.slane %v6891_v9, %v6495_v50 }
 0x18b   : > { %9320 = vst [vmem:[#allocation227_spill] sm:$0xff] %v7171_v13  ;;  %v9329_v13 = vld [vmem:[#allocation114_spill] sm:$0xff]  ;;  %v9332_v39 = vrot.slane %v9331_v46, %v6495_v50  ;;  %v7212_v63 = vunpack.c.l.b16 %v9335_v40  ;;  %v9337_v46 = vrot.slane %v6909_v30, %v6495_v50  ;;  %v9338_v9 = vrot.slane %v6915_v51, %v6495_v50 }
 0x18c   : > { %9324 = vst [vmem:[#allocation121_spill] sm:$0xff] %v7181_v8  ;;  %9326 = vst [vmem:[#allocation131_spill] sm:$0xff] %v7186_v60  ;;  %v9330_v21 = vrot.slane %v9329_v13, %v6495_v50  ;;  %v9333_v8 = vld [vmem:[#allocation220_spill] sm:$0xff]  ;;  %v7207_v60 = vunpack.c.l.b16 %v9334_v42  ;;  %v9336_v13 = vrot.slane %v6903_v56, %v6495_v50  ;;  %v9339_v62 = vrot.slane %v6921_v32, %v6495_v50 }
 0x18d   : > { %v7201_v57 = vunpack.c.l.b16 %v9332_v39  ;;  %v7222_v39 = vunpack.c.l.b16 %v9337_v46  ;;  %v7227_v42 = vunpack.c.l.b16 %v9338_v9  ;;  %v9341_v56 = vrot.slane %v6927_v58, %v6495_v50 }
 0x18e   : > { %v7196_v43 = vunpack.c.l.b16 %v9330_v21  ;;  %v7217_v21 = vunpack.c.l.b16 %v9336_v13  ;;  %v7232_v40 = vunpack.c.l.b16 %v9339_v62  ;;  %v3666_v58 = vrot.slane %v6996_v25, 7 }
 0x18f   : > { %v7237_v13 = vunpack.c.l.b16 %v9341_v56  ;;  %v3669_v56 = vrot.slane %v7001_v35, 6  ;;  %v3672_v46 = vrot.slane %v7006_v14, 5  ;;  %v3675_v7 = vrot.slane %v7011_v37, 4 }
 0x190   : > { %9340 = vst [vmem:[#allocation228_spill] sm:$0xff] %v7232_v40  ;;  %v3664_v40 = vunpack.c.l.b16 %v6983_v55  ;;  %v3678_v51 = vrot.slane %v7016_v16, 3  ;;  %v3681_v9 = vrot.slane %v7021_v18, 2  ;;  %v9342_v32 = vunpack.c.l.b16 %v6580_v22 }
 0x191   : > { %v3687_v62 = vrot.slane %v7032_v31, 7  ;;  %v3668_v50 = vsel %vm3667_vm0, %v3666_v58, %v6991_v33  ;;  %v3689_v25 = vrot.slane %v7037_v4, 6  ;;  %v3691_v35 = vrot.slane %v7042_v44, 5 }
 0x192   : > { %v3684_v30 = vrot.slane %v9342_v32, 1  ;;  %v3693_v14 = vrot.slane %v7047_v61, 4  ;;  %v3671_v37 = vsel %vm3670_vm1, %v3669_v56, %v3668_v50  ;;  %v3695_v18 = vrot.slane %v7052_v6, 3 }
 0x193   : > { %v3688_v16 = vsel %vm3667_vm0, %v3687_v62, %v7027_v27  ;;  %v3697_v22 = vrot.slane %v7057_v24, 2  ;;  %v3674_v31 = vsel %vm3673_vm2, %v3672_v46, %v3671_v37  ;;  %v9343_v33 = vunpack.c.l.b16 %v6641_v5 }
 0x194   : > { %v3690_v32 = vsel %vm3670_vm1, %v3689_v25, %v3688_v16  ;;  %v3701_v44 = vrot.slane %v7068_v19, 7  ;;  %v3677_v61 = vsel %vm3676_vm3, %v3675_v7, %v3674_v31  ;;  %v3703_v58 = vrot.slane %v7073_v28, 6 }
 0x195   : > { %v3699_v4 = vrot.slane %v9343_v33, 1  ;;  %v3692_v50 = vsel %vm3673_vm2, %v3691_v35, %v3690_v32  ;;  %v3705_v27 = vrot.slane %v7078_v20, 5  ;;  %v3680_v6 = vsel %vm3679_vm4, %v3678_v51, %v3677_v61  ;;  %v9346_v33 = vld [vmem:[#allocation101_spill] sm:$0xff]  ;;  %v9349_v61 = vld [vmem:[#allocation127_spill] sm:$0xff] }
 0x196   : > { %v3694_v24 = vsel %vm3676_vm3, %v3693_v14, %v3692_v50  ;;  %v3702_v46 = vsel %vm3667_vm0, %v3701_v44, %v7063_v41  ;;  %v3707_v5 = vrot.slane %v7083_v38, 4  ;;  %v3683_v62 = vsel %vm3682_vm5, %v3681_v9, %v3680_v6  ;;  %v9351_v6 = vld [vmem:[#allocation103_spill] sm:$0xff] }
 0x197   : > { %v3696_v19 = vsel %vm3679_vm4, %v3695_v18, %v3694_v24  ;;  %v3704_v7 = vsel %vm3670_vm1, %v3703_v58, %v3702_v46  ;;  %v3709_v56 = vrot.slane %v7088_v47, 3  ;;  %v7286_v28 = vsel %vm3685_vm6, %v3684_v30, %v3683_v62  ;;  %v9345_v18 = vld [vmem:[#allocation221_spill] sm:$0xff]  ;;  %v9350_v58 = vld [vmem:[#allocation120_spill] sm:$0xff] }
 0x198   : > { %v3698_v20 = vsel %vm3682_vm5, %v3697_v22, %v3696_v19  ;;  %v3706_v51 = vsel %vm3673_vm2, %v3705_v27, %v3704_v7  ;;  %v3711_v25 = vrot.slane %v7093_v53, 2  ;;  %v9344_v9 = vunpack.c.l.b16 %v6702_v17 }
 0x199   : > { %v7292_v41 = vsel %vm3685_vm6, %v3699_v4, %v3698_v20  ;;  %v3708_v38 = vsel %vm3676_vm3, %v3707_v5, %v3706_v51  ;;  %v3715_v14 = vrot.slane %v7104_v23, 7  ;;  %v3717_v30 = vrot.slane %v7109_v49, 6  ;;  %v9353_v20 = vld [vmem:[#allocation130_spill] sm:$0xff] }
 0x19a   : > { %v3713_v35 = vrot.slane %v9344_v9, 1  ;;  %v3710_v47 = vsel %vm3679_vm4, %v3709_v56, %v3708_v38  ;;  %v3719_v37 = vrot.slane %v7114_v48, 5  ;;  %v3721_v16 = vrot.slane %v7119_v3, 4  ;;  %v9348_v48 = vld [vmem:[#allocation226_spill] sm:$0xff]  ;;  %v9354_v38 = vld [vmem:[#allocation121_spill] sm:$0xff] }
 0x19b   : > { %v3712_v53 = vsel %vm3682_vm5, %v3711_v25, %v3710_v47  ;;  %v3716_v22 = vsel %vm3667_vm0, %v3715_v14, %v9345_v18  ;;  %v3723_v31 = vrot.slane %v7124_v29, 3  ;;  %v3725_v17 = vrot.slane %v7129_v52, 2  ;;  %v9356_v47 = vld [vmem:[#allocation227_spill] sm:$0xff] }
 0x19c   : > { %v7308_v32 = vsel %vm3685_vm6, %v3713_v35, %v3712_v53  ;;  %v3718_v23 = vsel %vm3670_vm1, %v3717_v30, %v3716_v22  ;;  %v9347_v49 = vunpack.c.l.b16 %v9346_v33  ;;  %v3729_v44 = vrot.slane %v9348_v48, 7  ;;  %v9355_v35 = vld [vmem:[#allocation131_spill] sm:$0xff] }
 0x19d   : > { %v3720_v3 = vsel %vm3673_vm2, %v3719_v37, %v3718_v23  ;;  %v3731_v50 = vrot.slane %v9349_v61, 6  ;;  %v3733_v27 = vrot.slane %v9350_v58, 5  ;;  %v3735_v29 = vrot.slane %v7155_v2, 4 }
 0x19e   : > { %v3727_v4 = vrot.slane %v9347_v49, 1  ;;  %v3722_v52 = vsel %vm3676_vm3, %v3721_v16, %v3720_v3  ;;  %v3730_v24 = vsel %vm3667_vm0, %v3729_v44, %v9351_v6  ;;  %v3737_v46 = vrot.slane %v7160_v11, 3  ;;  %v9358_v3 = vld [vmem:[#allocation228_spill] sm:$0xff] }
 0x19f   : > { %v3739_v5 = vrot.slane %v7165_v10, 2  ;;  %v3724_v62 = vsel %vm3679_vm4, %v3723_v31, %v3722_v52  ;;  %v3732_v19 = vsel %vm3670_vm1, %v3731_v50, %v3730_v24  ;;  %v9352_v7 = vunpack.c.l.b16 %v9318_v45 }
 0x1a0   : > { %v3743_v51 = vrot.slane %v9353_v20, 7  ;;  %v3726_v2 = vsel %vm3682_vm5, %v3725_v17, %v3724_v62  ;;  %v3734_v25 = vsel %vm3673_vm2, %v3733_v27, %v3732_v19  ;;  %v3745_v9 = vrot.slane %v9354_v38, 6 }
 0x1a1   : > { %v3741_v56 = vrot.slane %v9352_v7, 1  ;;  %v3747_v14 = vrot.slane %v9355_v35, 5  ;;  %v3728_v11 = vsel %vm3685_vm6, %v3727_v4, %v3726_v2  ;;  %v3736_v10 = vsel %vm3676_vm3, %v3735_v29, %v3734_v25 }
 0x1a2   : > { %v3744_v30 = vsel %vm3667_vm0, %v3743_v51, %v9356_v47  ;;  %v3749_v45 = vrot.slane %v7191_v54, 4  ;;  %v3738_v37 = vsel %vm3679_vm4, %v3737_v46, %v3736_v10  ;;  %v3751_v53 = vrot.slane %v7196_v43, 3 }
 0x1a3   : > { %v3746_v16 = vsel %vm3670_vm1, %v3745_v9, %v3744_v30  ;;  %v3753_v18 = vrot.slane %v7201_v57, 2  ;;  %v3740_v22 = vsel %vm3682_vm5, %v3739_v5, %v3738_v37  ;;  %v9357_v17 = vunpack.c.l.b16 %v9333_v8 }
 0x1a4   : > { %v3748_v31 = vsel %vm3673_vm2, %v3747_v14, %v3746_v16  ;;  %v3757_v33 = vrot.slane %v7212_v63, 7  ;;  %v3742_v54 = vsel %vm3685_vm6, %v3741_v56, %v3740_v22  ;;  %v3759_v4 = vrot.slane %v7217_v21, 6 }
 0x1a5   : > { %v3755_v23 = vrot.slane %v9357_v17, 1  ;;  %v3750_v49 = vsel %vm3676_vm3, %v3749_v45, %v3748_v31  ;;  %v3761_v48 = vrot.slane %v7222_v39, 5  ;;  %v3763_v44 = vrot.slane %v7227_v42, 4 }
 0x1a6   : > { %v3752_v43 = vsel %vm3679_vm4, %v3751_v53, %v3750_v49  ;;  %v3758_v57 = vsel %vm3667_vm0, %v3757_v33, %v7207_v60  ;;  %v3765_v8 = vrot.slane %v9358_v3, 3  ;;  %v3767_v50 = vrot.slane %v7237_v13, 2 }
 0x1a7   : > { %v3754_v63 = vsel %vm3682_vm5, %v3753_v18, %v3752_v43  ;;  %v3760_v61 = vsel %vm3670_vm1, %v3759_v4, %v3758_v57  ;;  %v9359_v21 = vunpack.c.l.b16 %v6946_v59  ;;  %v9360_v60 = vunpack.c.l.b16 %v6968_v12 }
 0x1a8   : > { %v3756_v39 = vsel %vm3685_vm6, %v3755_v23, %v3754_v63  ;;  %v3762_v27 = vsel %vm3673_vm2, %v3761_v48, %v3760_v61  ;;  %v9361_v42 = vunpack.c.l.b16 %v6971_v34  ;;  %v9362_v24 = vunpack.c.l.b16 %v6974_v26 }
 0x1a9   : > { %v3769_v58 = vrot.slane %v9359_v21, 1  ;;  %v3771_v29 = vrot.slane %v9360_v60, 7  ;;  %v3764_v6 = vsel %vm3676_vm3, %v3763_v44, %v3762_v27  ;;  %v9363_v13 = vunpack.c.l.b16 %v6977_v0 }
 0x1aa   : > { %v3773_v52 = vrot.slane %v9361_v42, 6  ;;  %v3775_v46 = vrot.slane %v9362_v24, 5  ;;  %v9364_v59 = vunpack.c.l.b16 %v6980_v15  ;;  %v3766_v12 = vsel %vm3679_vm4, %v3765_v8, %v3764_v6 }
 0x1ab   : > { %v3777_v5 = vrot.slane %v9363_v13, 4  ;;  %v9365_v34 = vunpack.c.l.b16 %v6965_v1  ;;  %v3781_v26 = vrot.slane %v3664_v40, 2  ;;  %v9366_v7 = vunpack.c.l.b16 %v6986_v36 }
 0x1ac   : > { %v3779_v62 = vrot.slane %v9364_v59, 3  ;;  %v3768_v56 = vsel %vm3682_vm5, %v3767_v50, %v3766_v12  ;;  %v3785_v20 = vpack.c.b16 %v7286_v28, %v7286_v28  ;;  %v3786_v51 = vpack.c.b16 %v7292_v41, %v7292_v41 }
 0x1ad   : > { %v3772_v19 = vsel %vm3667_vm0, %v3771_v29, %v9365_v34  ;;  %v3783_v0 = vrot.slane %v9366_v7, 1  ;;  %v3770_v1 = vsel %vm3685_vm6, %v3769_v58, %v3768_v56  ;;  %v3787_v55 = vpack.c.b16 %v7308_v32, %v7308_v32 }
 0x1ae   : > { %v3774_v15 = vsel %vm3670_vm1, %v3773_v52, %v3772_v19  ;;  %v3788_v40 = vpack.c.b16 %v3728_v11, %v3728_v11  ;;  %v3789_v25 = vpack.c.b16 %v3742_v54, %v3742_v54  ;;  %v3790_v38 = vpack.c.b16 %v3756_v39, %v3756_v39  ;;  %3802 = vst.msk [vmem:[%s116_s15] sm:$0xf] %vm3801_vm7, %v3785_v20 }
 0x1af   : > { %v3776_v2 = vsel %vm3673_vm2, %v3775_v46, %v3774_v15  ;;  %v3791_v9 = vpack.c.b16 %v3770_v1, %v3770_v1  ;;  %3803 = vst.msk [vmem:[%s116_s15 + $0x4] sm:$0xf] %vm3801_vm7, %v3786_v51  ;;  %3804 = vst.msk [vmem:[%s116_s15 + $0x8] sm:$0xf] %vm3801_vm7, %v3787_v55 }
 0x1b0   : > { %v3778_v36 = vsel %vm3676_vm3, %v3777_v5, %v3776_v2  ;;  %3805 = vst.msk [vmem:[%s116_s15 + $0xc] sm:$0xf] %vm3801_vm7, %v3788_v40  ;;  %3806 = vst.msk [vmem:[%s116_s15 + $0x10] sm:$0xf] %vm3801_vm7, %v3789_v25 }
 0x1b1   : > { %v3780_v28 = vsel %vm3679_vm4, %v3779_v62, %v3778_v36  ;;  %3807 = vst.msk [vmem:[%s116_s15 + $0x14] sm:$0xf] %vm3801_vm7, %v3790_v38  ;;  %3808 = vst.msk [vmem:[%s116_s15 + $0x18] sm:$0xf] %vm3801_vm7, %v3791_v9 }
 0x1b2   : > { %v3782_v41 = vsel %vm3682_vm5, %v3781_v26, %v3780_v28 }
 0x1b3   : > { %v3784_v32 = vsel %vm3685_vm6, %v3783_v0, %v3782_v41 }
 0x1b4   : > { %v3792_v35 = vpack.c.b16 %v3784_v32, %v3784_v32 }
 0x1b6   : > { %3809 = vst.msk [vmem:[%s116_s15 + $0x1c] sm:$0xf] %vm3801_vm7, %v3792_v35 }
 0x1b7 PF: > { %s11_s6 = sadd.s32 1, %s4080_s6  }
 0x1b8   : > { %p8_p4 = scmp.ge.s32.totalorder %s11_s6, 4  }
 0x1ba   :  { %10 = sbr.rel (!%p8_p4) target bundleno = 1 (0x1), region = 54 }

// kernel: forward.22
= control target key start
LH: loop header
LB: loop body
LE: loop exit
PB: predicated region body
PF: predicated region fallthrough
CT: control target
= control target key end

     0   :  { %s1700_s15 = smov 0   ;;  %s2059_s0 = inlined_call_operand.vmem [shape: bf16[2,10,10,8], index: 0, kind: input, shape index: {}]   ;;  %s2060_s1 = inlined_call_operand.vmem [shape: bf16[9,8,4], index: 1, kind: input, shape index: {}]   ;;  %s2061_s2 = inlined_call_operand.vmem [shape: f32[1,4], index: 2, kind: input, shape index: {}]   ;;  %s2062_s3 = inlined_call_operand.vmem [shape: f32[1,4], index: 3, kind: input, shape index: {}]   ;;  %s2063_s4 = inlined_call_operand.vmem [shape: bf16[2,8,8,4], index: 4, kind: output, shape index: {}]  }
   0x1 LB: > { %s1352_s16 = sadd.s32 4294967295, %s1673_s15   ;;  %p1356_p0 = scmp.ge.s32.totalorder %s1673_s15, 1  ;;  %s1673_s15 = sphi %s1700_s15, %s14_s15  }
   0x2   : > { %p162_p1 = scmp.lt.s32.totalorder %s1673_s15, 3 }
   0x4   : > { %p163_p2 = pnand %p1356_p0, %p162_p1 }
   0x5   : > { %v220_v0 = vld [vmem:[%s2060_s1 + $0x4] sm:$0xf] (!%p163_p2)  ;;  %vm368_vm0 = vcmask (!%p163_p2), 1043456   ;;  %v1714_v1 = vld [vmem:[%s2060_s1 + $0x10] sm:$0xf] (!%p163_p2)  ;;  %p188_p3 = scmp.lt.s32.totalorder (!%p163_p2), %s1352_s16, 1 }
   0x6   : > { %166 = sbr.rel (%p163_p2) target bundleno = 331 (0x14b), region = 36  ;;  %1639 = vmatprep.subr.msk.bf16.mxu1 (!%p163_p2), %vm368_vm0, %v220_v0  ;;  %1643 = vmatprep.subr.msk.bf16.mxu0 (!%p163_p2), %vm368_vm0, %v1714_v1  ;;  %v370_v2 = vsel (!%p163_p2), %vm368_vm0, %v220_v0, 0  ;;  %v1722_v3 = vsel (!%p163_p2), %vm368_vm0, %v1714_v1, 0  ;;  %v219_v4 = vld [vmem:[%s2060_s1] sm:$0xf] (!%p163_p2)  ;;  %vm355_vm3 = vcmask (!%p163_p2), 64512  }
   0x7   : > { %1484 = vmatpush3.bf16.msra.mxu1 (!%p163_p2), %v370_v2  ;;  %1524 = vmatpush3.bf16.msra.mxu0 (!%p163_p2), %v1722_v3  ;;  %v224_v5 = vld [vmem:[%s2060_s1 + $0x14] sm:$0xf] (!%p163_p2)  ;;  %vm228_vm1 = vsmask.f32 (!%p163_p2), 3328  ;;  %vm229_vm2 = vsmask.f32 (!%p163_p2), 7440 }
   0x8   : > { %1640 = vmatprep.subr.msk.bf16.mxu1 (!%p163_p2), %vm368_vm0, %v219_v4  ;;  %1645 = vmatprep.subr.msk.bf16.mxu0 (!%p163_p2), %vm368_vm0, %v224_v5  ;;  %v1763_v17 = vsel (!%p163_p2), %vm368_vm0, %v219_v4, 0  ;;  %v1766_v18 = vsel (!%p163_p2), %vm368_vm0, %v224_v5, 0  ;;  %vm1782_vm4 = vmor (!%p163_p2), %vm228_vm1, %vm229_vm2  ;;  %vm545_vm5 = vcmask (!%p163_p2), 1042432   ;;  %vm546_vm6 = vcmask (!%p163_p2), 1046532  }
   0x9   : > { %vm1853_vm7 = vmor (!%p163_p2), %vm545_vm5, %vm546_vm6  ;;  %vm1288_vm8 = vcmask (!%p163_p2), 27648  }
   0xd   : > { %s2069_s16 = smov (!%p188_p3, %s1352_s16), 1 }
   0xe   : > { %s1649_s25 = smul.u32 80, %s2069_s16  ;;  %s1437_s19 = sshll.u32 %s2069_s16, 5 }
   0xf   : > { %s2038_s22 = scalar_lea.vmem %s2063_s4, %s1437_s19 }
  0x10   : > { %s1739_s28 = scalar_lea.vmem %s2059_s0, %s1649_s25 }
  0x11   : > { %v1742_v6 = vld [vmem:[%s1739_s28] sm:$0xf]  ;;  %v1745_v7 = vld [vmem:[%s1739_s28 + $0x4] sm:$0x1]  ;;  %v1748_v8 = vld [vmem:[%s1739_s28 + $0x8] sm:$0xf] }
  0x12   : > { %v1751_v9 = vld [vmem:[%s1739_s28 + $0xc] sm:$0x1]  ;;  %v232_v10 = vshrl.u32 %v1742_v6, 16  ;;  %v235_v11 = vshll.u32 %v1742_v6, 16  ;;  %v241_v12 = vshll.u32 %v1745_v7, 16  ;;  %v246_v13 = vshrl.u32 %v1748_v8, 16 }
  0x13   : > { %v249_v14 = vshll.u32 %v1748_v8, 16  ;;  %v255_v15 = vshll.u32 %v1751_v9, 16  ;;  %v1760_v16 = vld [vmem:[%s1739_s28 + $0x10] sm:$0xf]  ;;  %v554_v22 = vrot.slane %v1751_v9, 5  ;;  %v1368_v9 = vcombine.low %v1742_v6, %v1748_v8 }
  0x14   : > { %v234_v19 = vrot.slane %v232_v10, 4  ;;  %v237_v20 = vrot.slane %v235_v11, 5  ;;  %v248_v21 = vrot.slane %v246_v13, 4  ;;  %v1770_v23 = vld [vmem:[%s1739_s28 + $0x14] sm:$0x1]  ;;  %v243_v24 = vrot.slane %v241_v12, 5 }
  0x15   : > { %v251_v25 = vrot.slane %v249_v14, 5  ;;  %v1773_v26 = vld [vmem:[%s1739_s28 + $0x18] sm:$0xf]  ;;  %v1776_v27 = vld [vmem:[%s1739_s28 + $0x1c] sm:$0x1]  ;;  %v257_v29 = vrot.slane %v255_v15, 5 }
  0x16   : > { %v238_v28 = vor.u32 %v237_v20, %v234_v19  ;;  %v260_v30 = vshrl.u32 %v1760_v16, 16  ;;  %v263_v31 = vshll.u32 %v1760_v16, 16  ;;  %v1787_v34 = vld [vmem:[%s1739_s28 + $0x20] sm:$0xf]  ;;  %v269_v35 = vshll.u32 %v1770_v23, 16 }
  0x17   : > { %v252_v33 = vor.u32 %v251_v25, %v248_v21  ;;  %v274_v36 = vshrl.u32 %v1773_v26, 16  ;;  %v277_v37 = vshll.u32 %v1773_v26, 16  ;;  %v1793_v39 = vld [vmem:[%s1739_s28 + $0x24] sm:$0x1]  ;;  %v283_v42 = vshll.u32 %v1776_v27, 16 }
  0x18   : > { %v239_v38 = vrot.slane %v238_v28, 4  ;;  %v262_v40 = vrot.slane %v260_v30, 4  ;;  %v265_v41 = vrot.slane %v263_v31, 5  ;;  %v271_v44 = vrot.slane %v269_v35, 5  ;;  %v1804_v55 = vld [vmem:[%s1739_s28 + $0x28] sm:$0xf] }
  0x19   : > { %v253_v43 = vrot.slane %v252_v33, 4  ;;  %v276_v45 = vrot.slane %v274_v36, 4  ;;  %v279_v46 = vrot.slane %v277_v37, 5  ;;  %v285_v49 = vrot.slane %v283_v42, 5  ;;  %v1808_v60 = vld [vmem:[%s1739_s28 + $0x2c] sm:$0x1] }
  0x1a   : > { %v244_v47 = vsel %vm1782_vm4, %v239_v38, %v243_v24  ;;  %v266_v48 = vor.u32 %v265_v41, %v262_v40  ;;  %v288_v50 = vshrl.u32 %v1787_v34, 16  ;;  %v291_v53 = vshll.u32 %v1787_v34, 16  ;;  %v1812_v2 = vld [vmem:[%s1739_s28 + $0x30] sm:$0xf]  ;;  %v1821_v12 = vld [vmem:[%s1739_s28 + $0x34] sm:$0x1] }
  0x1b   : > { %v258_v51 = vsel %vm1782_vm4, %v253_v43, %v257_v29  ;;  %v280_v52 = vor.u32 %v279_v46, %v276_v45  ;;  %v297_v54 = vshll.u32 %v1793_v39, 16  ;;  %v558_v59 = vrot.slane %v1770_v23, 5  ;;  %v1827_v20 = vld [vmem:[%s1739_s28 + $0x38] sm:$0xf]  ;;  %v1832_v25 = vld [vmem:[%s1739_s28 + $0x3c] sm:$0x1] }
  0x1c   : > { %v1360_v56 = vcombine.low %v244_v47, %v258_v51  ;;  %v267_v57 = vrot.slane %v266_v48, 4  ;;  %v290_v58 = vrot.slane %v288_v50, 4  ;;  %v293_v62 = vrot.slane %v291_v53, 5  ;;  %v1841_v35 = vld [vmem:[%s2060_s1 + $0x8] sm:$0xf] }
  0x1d   : > { %v281_v61 = vrot.slane %v280_v52, 4  ;;  %v299_v63 = vrot.slane %v297_v54, 5  ;;  %v562_v0 = vrot.slane %v1776_v27, 5  ;;  %v566_v5 = vrot.slane %v1793_v39, 5  ;;  %v225_v53 = vld [vmem:[%s2060_s1 + $0x18] sm:$0xf] }
  0x1e   : > { %1485 = vmatprep.mubr.msk.bf16.mxu1 %vm355_vm3, %v1360_v56  ;;  %v272_v4 = vsel %vm1782_vm4, %v267_v57, %v271_v44  ;;  %v302_v10 = vshrl.u32 %v1804_v55, 16  ;;  %v305_v11 = vshll.u32 %v1804_v55, 16  ;;  %v294_v14 = vor.u32 %v293_v62, %v290_v58 }
  0x1f   : > { %v286_v13 = vsel %vm1782_vm4, %v281_v61, %v285_v49  ;;  %v1400_v15 = vcombine.low %v258_v51, %v272_v4  ;;  %v311_v19 = vshll.u32 %v1808_v60, 16  ;;  %v316_v28 = vshrl.u32 %v1812_v2, 16  ;;  %v227_v49 = vld [vmem:[%s2060_s1 + $0x20] sm:$0xf] }
  0x20   : > { %v1829_v21 = vcombine.low %v272_v4, %v286_v13  ;;  %v304_v23 = vrot.slane %v302_v10, 4  ;;  %v307_v24 = vrot.slane %v305_v11, 5  ;;  %v295_v29 = vrot.slane %v294_v14, 4 }
  0x21   : > { %1525 = vmatprep.mubr.msk.bf16.mxu0 %vm355_vm3, %v1400_v15  ;;  %v313_v30 = vrot.slane %v311_v19, 5  ;;  %v319_v31 = vshll.u32 %v1812_v2, 16  ;;  %v325_v33 = vshll.u32 %v1821_v12, 16  ;;  %v318_v37 = vrot.slane %v316_v28, 4  ;;  %v1918_v28 = vld [vmem:[%s1739_s28 + $0x40] sm:$0xf] }
  0x22   : > { %1486 = vmatmul.mubr.msk.bf16.vlgmr.msra.gmra.mrb[0].mxu1 %vm355_vm3, %v1829_v21  ;;  %v308_v36 = vor.u32 %v307_v24, %v304_v23  ;;  %v330_v38 = vshrl.u32 %v1827_v20, 16  ;;  %v333_v40 = vshll.u32 %v1827_v20, 16  ;;  %v300_v41 = vsel %vm1782_vm4, %v295_v29, %v299_v63  ;;  %v1921_v29 = vld [vmem:[%s1739_s28 + $0x44] sm:$0x1] }
  0x23   : > { %1494 = vmatpush3.bf16.msra.mxu1 %v1763_v17  ;;  %v321_v42 = vrot.slane %v319_v31, 5  ;;  %v327_v43 = vrot.slane %v325_v33, 5  ;;  %v339_v44 = vshll.u32 %v1832_v25, 16  ;;  %v1401_v45 = vcombine.low %v286_v13, %v300_v41 }
  0x24   : > { %v309_v46 = vrot.slane %v308_v36, 4  ;;  %v332_v47 = vrot.slane %v330_v38, 4  ;;  %v335_v48 = vrot.slane %v333_v40, 5  ;;  %1641 = vmatprep.subr.msk.bf16.mxu1 %vm368_vm0, %v1841_v35  ;;  %v1377_v17 = vrot.slane %v1748_v8, 9 }
  0x25   : > { %v322_v50 = vor.u32 %v321_v42, %v318_v37  ;;  %v341_v51 = vrot.slane %v339_v44, 5  ;;  %v1378_v52 = vrot.slane %v1760_v16, 9  ;;  %1526 = vmatmul.mubr.msk.bf16.vlgmr.msra.gmra.mrb[0].mxu0 %vm355_vm3, %v1401_v45  ;;  %v1379_v57 = vrot.slane %v1773_v26, 9  ;;  %v226_v37 = vld [vmem:[%s2060_s1 + $0x1c] sm:$0xf] }
  0x26   : > { %v1867_v54 = vsel %vm1782_vm4, %v309_v46, %v313_v30  ;;  %v336_v56 = vor.u32 %v335_v48, %v332_v47  ;;  %v1380_v58 = vrot.slane %v1787_v34, 9  ;;  %1534 = vmatpush3.bf16.msra.mxu0 %v1766_v18  ;;  %v555_v63 = vsel %vm1853_vm7, %v1377_v17, %v554_v22  ;;  %v217_v44 = vld [vmem:[%s1739_s28 + $0x48] sm:$0xf]  ;;  %v218_v45 = vld [vmem:[%s1739_s28 + $0x4c] sm:$0x1] }
  0x27   : > { %v1873_v61 = vcombine.low %v300_v41, %v1867_v54  ;;  %v323_v62 = vrot.slane %v322_v50, 4  ;;  %v559_v4 = vsel %vm1853_vm7, %v1378_v52, %v558_v59  ;;  %1646 = vmatprep.subr.msk.bf16.mxu0 %vm368_vm0, %v225_v53  ;;  %v1381_v22 = vrot.slane %v1804_v55, 9 }
  0x28   : > { %v337_v10 = vrot.slane %v336_v56, 4  ;;  %v1409_v11 = vcombine.low %v555_v63, %v559_v4  ;;  %v570_v13 = vrot.slane %v1808_v60, 5  ;;  %v1382_v14 = vrot.slane %v1812_v2, 9 }
  0x29   : > { %1489 = vmatprep.mubr.msk.bf16.mxu1 %vm355_vm3, %v1873_v61  ;;  %v1886_v18 = vsel %vm1782_vm4, %v323_v62, %v327_v43  ;;  %v574_v15 = vrot.slane %v1821_v12, 5  ;;  %v563_v23 = vsel %vm1853_vm7, %v1379_v57, %v562_v0  ;;  %v567_v24 = vsel %vm1853_vm7, %v1380_v58, %v566_v5 }
  0x2a   : > { %v1893_v59 = vsel %vm1782_vm4, %v337_v10, %v341_v51  ;;  %1535 = vmatprep.mubr.msk.bf16.mxu0 %vm355_vm3, %v1409_v11  ;;  %v571_v60 = vsel %vm1853_vm7, %v1381_v22, %v570_v13  ;;  %v1410_v27 = vcombine.low %v563_v23, %v567_v24  ;;  %v1383_v39 = vrot.slane %v1827_v20, 9 }
  0x2b   : > { %v1901_v19 = vcombine.low %v1886_v18, %v1893_v59  ;;  %v1915_v12 = vsel %vm1853_vm7, %v1382_v14, %v574_v15  ;;  %v578_v5 = vrot.slane %v1832_v25, 5  ;;  %v1408_v30 = vrot.slane %v1918_v28, 9 }
  0x2c   : > { %v1411_v0 = vcombine.low %v571_v60, %v1915_v12  ;;  %v884_v31 = vrot.slane %v1921_v29, 5  ;;  %v986_v33 = vsel %vm368_vm0, %v225_v53, 0  ;;  %v1369_v36 = vcombine.low %v1760_v16, %v1773_v26 }
  0x2d   : > { %1490 = vmatmul.mubr.msk.bf16.gmra.mrb[4].mxu1 %vm355_vm3, %v1901_v19  ;;  %v605_v38 = vsel %vm368_vm0, %v1841_v35, 0  ;;  %v1370_v25 = vcombine.low %v1787_v34, %v1804_v55  ;;  %v550_v40 = vrot.slane %v1745_v7, 5  ;;  %v579_v41 = vsel %vm1853_vm7, %v1383_v39, %v578_v5  ;;  %v222_v7 = vld [vmem:[%s2060_s1 + $0xc] sm:$0xf] }
  0x2e   : > { %1495 = vmatprep.mubr.msk.bf16.mxu1 %vm355_vm3, %v1368_v9  ;;  %v1948_v42 = vsel %vm1853_vm7, %v1408_v30, %v884_v31  ;;  %v1376_v43 = vrot.slane %v1742_v6, 9  ;;  %v1427_v35 = vrot.slane %v217_v44, 9  ;;  %v1159_v46 = vrot.slane %v218_v45, 5 }
  0x2f   : > { %v1412_v47 = vcombine.low %v579_v41, %v1948_v42  ;;  %v1371_v50 = vcombine.low %v1812_v2, %v1827_v20  ;;  %v1081_v17 = vsel %vm368_vm0, %v226_v37, 0  ;;  %v1385_v52 = vcombine.low %v559_v4, %v563_v23 }
  0x30   : > { %v1962_v6 = vsel %vm1853_vm7, %v1427_v35, %v1159_v46  ;;  %v551_v48 = vsel %vm1853_vm7, %v1376_v43, %v550_v40  ;;  %v699_v53 = vsel %vm368_vm0, %v222_v7, 0  ;;  %v1386_v56 = vcombine.low %v567_v24, %v571_v60 }
  0x31   : > { %1536 = vmatmul.mubr.msk.bf16.vlgmr.msra.gmra.mrb[0].mxu0 %vm355_vm3, %v1410_v27  ;;  %v1384_v51 = vcombine.low %v551_v48, %v555_v63  ;;  %v1062_v57 = vshrl.u32 %v217_v44, 16  ;;  %v1065_v58 = vshll.u32 %v217_v44, 16  ;;  %v775_v62 = vshrl.u32 %v1918_v28, 16 }
  0x32   : > { %1544 = vmatpush3.bf16.msra.mxu0 %v986_v33  ;;  %1539 = vmatprep.mubr.msk.bf16.mxu0 %vm355_vm3, %v1411_v0  ;;  %v778_v63 = vshll.u32 %v1918_v28, 16  ;;  %v1417_v4 = vcombine.low %v1918_v28, %v217_v44  ;;  %v1387_v13 = vcombine.low %v1915_v12, %v579_v41  ;;  %v1392_v14 = vcombine.low %v1748_v8, %v1760_v16 }
  0x33   : > { %1647 = vmatprep.subr.msk.bf16.mxu0 %vm368_vm0, %v226_v37  ;;  %v777_v10 = vrot.slane %v775_v62, 4  ;;  %v1064_v9 = vrot.slane %v1062_v57, 4  ;;  %v1067_v22 = vrot.slane %v1065_v58, 5  ;;  %v784_v23 = vshll.u32 %v1921_v29, 16 }
  0x34   : > { %v780_v11 = vrot.slane %v778_v63, 5  ;;  %v1071_v60 = vshll.u32 %v218_v45, 16  ;;  %v1167_v0 = vsel %vm368_vm0, %v227_v49, 0  ;;  %v1393_v8 = vcombine.low %v1773_v26, %v1787_v34 }
  0x35   : > { %1496 = vmatmul.mubr.msk.bf16.vlgmr.msra.gmra.mrb[0].mxu1 %vm355_vm3, %v1369_v36  ;;  %v1068_v24 = vor.u32 %v1067_v22, %v1064_v9  ;;  %v786_v27 = vrot.slane %v784_v23, 5  ;;  %v1394_v16 = vcombine.low %v1804_v55, %v1812_v2  ;;  %v1395_v34 = vcombine.low %v1827_v20, %v1918_v28 }
  0x36   : > { %1504 = vmatpush3.bf16.msra.mxu1 %v605_v38  ;;  %1499 = vmatprep.mubr.msk.bf16.mxu1 %vm355_vm3, %v1370_v25  ;;  %v781_v15 = vor.u32 %v780_v11, %v777_v10  ;;  %v1073_v39 = vrot.slane %v1071_v60, 5  ;;  %v1402_v55 = vcombine.low %v1867_v54, %v1886_v18  ;;  %v1428_v32 = vcombine.low %v1948_v42, %v1962_v6 }
  0x37   : > { %1642 = vmatprep.subr.msk.bf16.mxu1 %vm368_vm0, %v222_v7  ;;  %v1069_v12 = vrot.slane %v1068_v24, 4 }
  0x39   : > { %1540 = vmatmul.mubr.msk.bf16.gmra.mrb[4].mxu0 %vm355_vm3, %v1412_v47  ;;  %v1074_v29 = vsel %vm1782_vm4, %v1069_v12, %v1073_v39 }
  0x3a   : > { %1545 = vmatprep.mubr.msk.bf16.mxu0 %vm355_vm3, %v1369_v36 }
  0x3d   : > { %1500 = vmatmul.mubr.msk.bf16.gmra.mrb[4].mxu1 %vm355_vm3, %v1371_v50 }
  0x3e   : > { %1505 = vmatprep.mubr.msk.bf16.mxu1 %vm355_vm3, %v1384_v51 }
  0x41   : > { %1546 = vmatmul.mubr.msk.bf16.vlgmr.msra.gmra.mrb[0].mxu0 %vm355_vm3, %v1370_v25 }
  0x42   : > { %1554 = vmatpush3.bf16.msra.mxu0 %v1081_v17  ;;  %1549 = vmatprep.mubr.msk.bf16.mxu0 %vm355_vm3, %v1371_v50 }
  0x43   : > { %1648 = vmatprep.subr.msk.bf16.mxu0 %vm368_vm0, %v227_v49 }
  0x45   : > { %1506 = vmatmul.mubr.msk.bf16.vlgmr.msra.gmra.mrb[0].mxu1 %vm355_vm3, %v1385_v52 }
  0x46   : > { %1514 = vmatpush3.bf16.msra.mxu1 %v699_v53  ;;  %1509 = vmatprep.mubr.msk.bf16.mxu1 %vm355_vm3, %v1386_v56 }
  0x47   : > { %1644 = vmatprep.subr.msk.bf16.mxu1 %vm368_vm0, %v1714_v1  ;;  %v782_v1 = vrot.slane %v781_v15, 4 }
  0x49   : > { %1550 = vmatmul.mubr.msk.bf16.gmra.mrb[4].mxu0 %vm355_vm3, %v1417_v4 }
  0x4a   : > { %1555 = vmatprep.mubr.msk.bf16.mxu0 %vm355_vm3, %v1829_v21  ;;  %v787_v21 = vsel %vm1782_vm4, %v782_v1, %v786_v27 }
  0x4b   : > { %v1422_v26 = vcombine.low %v787_v21, %v1074_v29 }
  0x4d   : > { %1510 = vmatmul.mubr.msk.bf16.gmra.mrb[4].mxu1 %vm355_vm3, %v1387_v13 }
  0x4e   : > { %1515 = vmatprep.mubr.msk.bf16.mxu1 %vm355_vm3, %v1392_v14 }
  0x51   : > { %1556 = vmatmul.mubr.msk.bf16.vlgmr.msra.gmra.mrb[0].mxu0 %vm355_vm3, %v1873_v61 }
  0x52   : > { %1564 = vmatpush3.bf16.msra.mxu0 %v1167_v0  ;;  %1559 = vmatprep.mubr.msk.bf16.mxu0 %vm355_vm3, %v1901_v19  ;;  %v1433_v19 = vld [vmem:[%s2061_s2] ss:$0 sm:$0xff] }
  0x55   : > { %1516 = vmatmul.mubr.msk.bf16.vlgmr.msra.gmra.mrb[0].mxu1 %vm355_vm3, %v1393_v8 }
  0x56   : > { %1574 = vmatpush3.bf16.msra.mxu1 %v1722_v3  ;;  %1519 = vmatprep.mubr.msk.bf16.mxu1 %vm355_vm3, %v1394_v16  ;;  %v1403_v3 = vcombine.low %v1893_v59, %v787_v21  ;;  %v1434_v59 = vld [vmem:[%s2062_s3] ss:$0 sm:$0xff] }
  0x59   : > { %1560 = vmatmul.mubr.msk.bf16.gmra.mrb[4].mxu0 %vm355_vm3, %v1422_v26 }
  0x5a   : > { %1565 = vmatprep.mubr.msk.bf16.mxu0 %vm355_vm3, %v1385_v52 }
  0x5d   : > { %1520 = vmatmul.mubr.msk.bf16.gmra.mrb[4].mxu1 %vm355_vm3, %v1395_v34 }
  0x5e   : > { %1529 = vmatprep.mubr.msk.bf16.mxu1 %vm355_vm3, %v1402_v55 }
  0x61   : > { %1566 = vmatmul.mubr.msk.bf16.vlgmr.msra.gmra.mrb[0].mxu0 %vm355_vm3, %v1386_v56 }
  0x62   : > { %1569 = vmatprep.mubr.msk.bf16.mxu0 %vm355_vm3, %v1387_v13 }
  0x69   : > { %1530 = vmatmul.mubr.msk.bf16.vlgmr.msra.gmra.mrb[4].mxu1 %vm355_vm3, %v1403_v3  ;;  %1570 = vmatmul.mubr.msk.bf16.gmra.mrb[4].mxu0 %vm355_vm3, %v1428_v32 }
 0x128   : > { %v1517_v2 = vpop.f32.mrb[0].mxu1 }
 0x129   : > { %v735_v20 = vpop.f32.mrb[1].mxu1 }
 0x12a   : > { %v1518_v54 = vpop.f32.mrb[2].mxu1 }
 0x12b   : > { %v738_v61 = vpop.f32.mrb[3].mxu1 }
 0x134   : > { %v1567_v18 = vpop.f32.mrb[0].mxu0 }
 0x135   : > { %v1575_v28 = vadd.f32 %v1567_v18, %v1517_v2  ;;  %v1203_v5 = vpop.f32.mrb[1].mxu0 }
 0x136   : > { %v1576_v30 = vadd.f32 %v1203_v5, %v735_v20  ;;  %v1568_v31 = vpop.f32.mrb[2].mxu0 }
 0x137   : > { %v1251_v33 = vmul.f32 %v1575_v28, %v1433_v19  ;;  %v1577_v36 = vadd.f32 %v1568_v31, %v1518_v54  ;;  %v1206_v37 = vpop.f32.mrb[3].mxu0 }
 0x138   : > { %v1249_v38 = vmul.f32 %v1576_v30, %v1433_v19  ;;  %v1578_v25 = vadd.f32 %v1206_v37, %v738_v61 }
 0x139   : > { %v1266_v40 = vadd.f32 %v1434_v59, %v1251_v33  ;;  %v1252_v41 = vmul.f32 %v1577_v36, %v1433_v19 }
 0x13a   : > { %v1264_v42 = vadd.f32 %v1434_v59, %v1249_v38  ;;  %v1250_v43 = vmul.f32 %v1578_v25, %v1433_v19 }
 0x13b   : > { %v1274_v44 = vmax.f32 %v1266_v40, 0.0  ;;  %v1267_v45 = vadd.f32 %v1434_v59, %v1252_v41 }
 0x13c   : > { %v1531_v7 = vpop.f32.mrb[4].mxu1  ;;  %v1272_v35 = vmax.f32 %v1264_v42, 0.0  ;;  %v1265_v46 = vadd.f32 %v1434_v59, %v1250_v43  ;;  %v1571_v47 = vpop.f32.mrb[4].mxu0 }
 0x13d   : > { %v858_v6 = vpop.f32.mrb[5].mxu1  ;;  %v1282_v48 = vpack.c.bf16 %v1274_v44, %v1274_v44  ;;  %v1275_v50 = vmax.f32 %v1267_v45, 0.0  ;;  %v1579_v51 = vadd.f32 %v1571_v47, %v1531_v7  ;;  %v1219_v17 = vpop.f32.mrb[5].mxu0 }
 0x13e   : > { %v1532_v52 = vpop.f32.mrb[6].mxu1  ;;  %v1280_v49 = vpack.c.bf16 %v1272_v35, %v1272_v35  ;;  %v1273_v53 = vmax.f32 %v1265_v46, 0.0  ;;  %v1580_v56 = vadd.f32 %v1219_v17, %v858_v6  ;;  %v1572_v57 = vpop.f32.mrb[6].mxu0 }
 0x13f   : > { %v861_v58 = vpop.f32.mrb[7].mxu1  ;;  %1291 = vst.msk [vmem:[%s2038_s22 + $0x8] sm:$0xf] %vm1288_vm8, %v1282_v48  ;;  %v1283_v62 = vpack.c.bf16 %v1275_v50, %v1275_v50  ;;  %v1255_v63 = vmul.f32 %v1579_v51, %v1433_v19  ;;  %v1581_v4 = vadd.f32 %v1572_v57, %v1532_v52  ;;  %v1222_v10 = vpop.f32.mrb[7].mxu0 }
 0x140   : > { %1289 = vst.msk [vmem:[%s2038_s22] sm:$0xf] %vm1288_vm8, %v1280_v49  ;;  %v1281_v11 = vpack.c.bf16 %v1273_v53, %v1273_v53  ;;  %v1253_v9 = vmul.f32 %v1580_v56, %v1433_v19  ;;  %v1582_v22 = vadd.f32 %v1222_v10, %v861_v58 }
 0x141   : > { %1292 = vst.msk [vmem:[%s2038_s22 + $0xc] sm:$0xf] %vm1288_vm8, %v1283_v62  ;;  %v1270_v13 = vadd.f32 %v1434_v59, %v1255_v63  ;;  %v1256_v14 = vmul.f32 %v1581_v4, %v1433_v19 }
 0x142   : > { %1290 = vst.msk [vmem:[%s2038_s22 + $0x4] sm:$0xf] %vm1288_vm8, %v1281_v11  ;;  %v1268_v15 = vadd.f32 %v1434_v59, %v1253_v9  ;;  %v1254_v23 = vmul.f32 %v1582_v22, %v1433_v19 }
 0x143   : > { %v1278_v24 = vmax.f32 %v1270_v13, 0.0  ;;  %v1271_v60 = vadd.f32 %v1434_v59, %v1256_v14 }
 0x144   : > { %v1276_v1 = vmax.f32 %v1268_v15, 0.0  ;;  %v1269_v27 = vadd.f32 %v1434_v59, %v1254_v23 }
 0x145   : > { %v1286_v12 = vpack.c.bf16 %v1278_v24, %v1278_v24  ;;  %v1279_v39 = vmax.f32 %v1271_v60, 0.0 }
 0x146   : > { %v1284_v0 = vpack.c.bf16 %v1276_v1, %v1276_v1  ;;  %v1277_v8 = vmax.f32 %v1269_v27, 0.0 }
 0x147   : > { %1295 = vst.msk [vmem:[%s2038_s22 + $0x18] sm:$0xf] %vm1288_vm8, %v1286_v12  ;;  %v1287_v16 = vpack.c.bf16 %v1279_v39, %v1279_v39 }
 0x148   : > { %1293 = vst.msk [vmem:[%s2038_s22 + $0x10] sm:$0xf] %vm1288_vm8, %v1284_v0  ;;  %v1285_v21 = vpack.c.bf16 %v1277_v8, %v1277_v8 }
 0x149   : > { %1296 = vst.msk [vmem:[%s2038_s22 + $0x1c] sm:$0xf] %vm1288_vm8, %v1287_v16 }
 0x14a   : > { %1294 = vst.msk [vmem:[%s2038_s22 + $0x14] sm:$0xf] %vm1288_vm8, %v1285_v21 }
 0x14b PF: > { %s14_s15 = sadd.s32 1, %s1673_s15  }
 0x14c   : > { %p11_p4 = scmp.ge.s32.totalorder %s14_s15, 4  }
 0x14e   :  { %13 = sbr.rel (!%p11_p4) target bundleno = 1 (0x1), region = 66 }

// kernel: forward.23
= control target key start
LH: loop header
LB: loop body
LE: loop exit
PB: predicated region body
PF: predicated region fallthrough
CT: control target
= control target key end

     0   :  { %s832_s15 = smov 0   ;;  %s1071_s0 = inlined_call_operand.vmem [shape: bf16[2,10,10,32], index: 0, kind: input, shape index: {}]   ;;  %s1072_s1 = inlined_call_operand.vmem [shape: bf16[32,2], index: 1, kind: input, shape index: {}]   ;;  %s1073_s2 = inlined_call_operand.vmem [shape: f32[1,2], index: 2, kind: input, shape index: {}]   ;;  %s1074_s3 = inlined_call_operand.vmem [shape: f32[1,2], index: 3, kind: input, shape index: {}]   ;;  %s1075_s4 = inlined_call_operand.vmem [shape: bf16[2,8,8,2], index: 4, kind: output, shape index: {}]  }
   0x1 LB: > { %s733_s16 = sadd.s32 4294967295, %s805_s15   ;;  %p737_p0 = scmp.ge.s32.totalorder %s805_s15, 1  ;;  %s805_s15 = sphi %s832_s15, %s14_s15  }
   0x2   : > { %p162_p1 = scmp.lt.s32.totalorder %s805_s15, 3 }
   0x4   : > { %p163_p2 = pnand %p737_p0, %p162_p1 }
   0x5   : > { %v797_v0 = vld [vmem:[%s1072_s1] sm:$0xff] (!%p163_p2)   ;;  %p188_p3 = scmp.lt.s32.totalorder (!%p163_p2), %s733_s16, 1  ;;  %v798_v1 = vld [vmem:[%s1072_s1 + $0x8] sm:$0xff] (!%p163_p2)   ;;  %vm219_vm0 = vsmask.f32 (!%p163_p2), 3328  ;;  %vm366_vm2 = vcmask (!%p163_p2), 1042432  }
   0x6   : > { %166 = sbr.rel (%p163_p2) target bundleno = 298 (0x12a), region = 36  ;;  %772 = vmatprep.subr.bf16.mxu0 (!%p163_p2), %v797_v0  ;;  %784 = vmatprep.subr.bf16.mxu1 (!%p163_p2), %v797_v0  ;;  %vm220_vm1 = vsmask.f32 (!%p163_p2), 7440  ;;  %vm367_vm3 = vcmask (!%p163_p2), 1046532   ;;  %vm545_vm6 = vcmask (!%p163_p2), 261120   ;;  %vm669_vm7 = vcmask (!%p163_p2), 11264  }
   0x7   : > { %773 = vmatpush3.bf16.msra.mxu0 (!%p163_p2), %v797_v0  ;;  %786 = vmatpush3.bf16.msra.mxu1 (!%p163_p2), %v797_v0  ;;  %vm895_vm4 = vmor (!%p163_p2), %vm219_vm0, %vm220_vm1 }
   0x8   : > { %774 = vmatprep.subr.bf16.mxu0 (!%p163_p2), %v798_v1  ;;  %785 = vmatprep.subr.bf16.mxu1 (!%p163_p2), %v798_v1  ;;  %vm915_vm5 = vmor (!%p163_p2), %vm366_vm2, %vm367_vm3 }
   0xb   : > { %775 = vmatpush3.bf16.msra.mxu0 (!%p163_p2), %v798_v1  ;;  %787 = vmatpush3.bf16.msra.mxu1 (!%p163_p2), %v798_v1 }
   0xd   : > { %s1081_s16 = smov (!%p188_p3, %s733_s16), 1 }
   0xe   : > { %s788_s21 = smul.u32 80, %s1081_s16  ;;  %s765_s29 = sshll.u32 %s1081_s16, 5 }
   0xf   : > { %s1050_s6 = scalar_lea.vmem %s1075_s4, %s765_s29 }
  0x10   : > { %s852_s24 = scalar_lea.vmem %s1071_s0, %s788_s21 }
  0x11   : > { %v855_v2 = vld [vmem:[%s852_s24] sm:$0xf]  ;;  %v858_v3 = vld [vmem:[%s852_s24 + $0x4] sm:$0x1]  ;;  %v861_v4 = vld [vmem:[%s852_s24 + $0x8] sm:$0xf] }
  0x12   : > { %v864_v5 = vld [vmem:[%s852_s24 + $0xc] sm:$0x1]  ;;  %v867_v6 = vld [vmem:[%s852_s24 + $0x10] sm:$0xf]  ;;  %v870_v7 = vld [vmem:[%s852_s24 + $0x14] sm:$0x1] }
  0x13   : > { %v873_v8 = vld [vmem:[%s852_s24 + $0x18] sm:$0xf]  ;;  %v223_v9 = vshrl.u32 %v855_v2, 16  ;;  %v226_v10 = vshll.u32 %v855_v2, 16  ;;  %v232_v11 = vshll.u32 %v858_v3, 16  ;;  %v237_v12 = vshrl.u32 %v861_v4, 16 }
  0x14   : > { %v880_v13 = vld [vmem:[%s852_s24 + $0x1c] sm:$0x1]  ;;  %v240_v14 = vshll.u32 %v861_v4, 16  ;;  %v246_v15 = vshll.u32 %v864_v5, 16  ;;  %v251_v16 = vshrl.u32 %v867_v6, 16  ;;  %v254_v17 = vshll.u32 %v867_v6, 16 }
  0x15   : > { %v887_v18 = vld [vmem:[%s852_s24 + $0x20] sm:$0xf]  ;;  %v225_v19 = vrot.slane %v223_v9, 4  ;;  %v228_v20 = vrot.slane %v226_v10, 5  ;;  %v234_v21 = vrot.slane %v232_v11, 5  ;;  %v239_v22 = vrot.slane %v237_v12, 4 }
  0x16   : > { %v242_v23 = vrot.slane %v240_v14, 5  ;;  %v248_v24 = vrot.slane %v246_v15, 5  ;;  %v253_v25 = vrot.slane %v251_v16, 4  ;;  %v256_v26 = vrot.slane %v254_v17, 5  ;;  %v208_v31 = vld [vmem:[%s852_s24 + $0x24] sm:$0x1] }
  0x17   : > { %v229_v27 = vor.u32 %v228_v20, %v225_v19  ;;  %v260_v28 = vshll.u32 %v870_v7, 16  ;;  %v265_v29 = vshrl.u32 %v873_v8, 16  ;;  %v268_v30 = vshll.u32 %v873_v8, 16  ;;  %v938_v10 = vld [vmem:[%s852_s24 + $0x28] sm:$0xf] }
  0x18   : > { %v243_v33 = vor.u32 %v242_v23, %v239_v22  ;;  %v257_v34 = vor.u32 %v256_v26, %v253_v25  ;;  %v274_v35 = vshll.u32 %v880_v13, 16  ;;  %v279_v36 = vshrl.u32 %v887_v18, 16  ;;  %v210_v22 = vld [vmem:[%s852_s24 + $0x2c] sm:$0x1]  ;;  %v955_v23 = vld [vmem:[%s852_s24 + $0x30] sm:$0xf] }
  0x19   : > { %v230_v37 = vrot.slane %v229_v27, 4  ;;  %v262_v38 = vrot.slane %v260_v28, 5  ;;  %v267_v39 = vrot.slane %v265_v29, 4  ;;  %v270_v40 = vrot.slane %v268_v30, 5 }
  0x1a   : > { %v244_v41 = vrot.slane %v243_v33, 4  ;;  %v258_v42 = vrot.slane %v257_v34, 4  ;;  %v276_v43 = vrot.slane %v274_v35, 5  ;;  %v281_v44 = vrot.slane %v279_v36, 4 }
  0x1b   : > { %v235_v45 = vsel %vm895_vm4, %v230_v37, %v234_v21  ;;  %v271_v46 = vor.u32 %v270_v40, %v267_v39  ;;  %v282_v47 = vshll.u32 %v887_v18, 16  ;;  %v288_v48 = vshll.u32 %v208_v31, 16  ;;  %v212_v40 = vld [vmem:[%s852_s24 + $0x34] sm:$0x1] }
  0x1c   : > { %v249_v49 = vsel %vm895_vm4, %v244_v41, %v248_v24  ;;  %v908_v50 = vsel %vm895_vm4, %v258_v42, %v262_v38  ;;  %v342_v51 = vmax.bf16 %v235_v45, %v855_v2  ;;  %v741_v52 = vrot.slane %v855_v2, 9  ;;  %v974_v41 = vld [vmem:[%s852_s24 + $0x38] sm:$0xf] }
  0x1d   : > { %v272_v53 = vrot.slane %v271_v46, 4  ;;  %v284_v54 = vrot.slane %v282_v47, 5  ;;  %v290_v55 = vrot.slane %v288_v48, 5  ;;  %v343_v56 = vmax.bf16 %v249_v49, %v861_v4 }
  0x1e   : > { %v344_v58 = vmax.bf16 %v908_v50, %v867_v6  ;;  %v371_v59 = vrot.slane %v858_v3, 5  ;;  %v742_v60 = vrot.slane %v861_v4, 9  ;;  %v375_v61 = vrot.slane %v864_v5, 5 }
  0x1f   : > { %v926_v62 = vsel %vm895_vm4, %v272_v53, %v276_v43  ;;  %v285_v63 = vor.u32 %v284_v54, %v281_v44  ;;  %v743_v0 = vrot.slane %v867_v6, 9  ;;  %v379_v1 = vrot.slane %v870_v7, 5  ;;  %v214_v54 = vld [vmem:[%s852_s24 + $0x3c] sm:$0x1] }
  0x20   : > { %v345_v2 = vmax.bf16 %v926_v62, %v873_v8  ;;  %v372_v3 = vsel %vm915_vm5, %v741_v52, %v371_v59  ;;  %v376_v5 = vsel %vm915_vm5, %v742_v60, %v375_v61  ;;  %v744_v9 = vrot.slane %v873_v8, 9 }
  0x21   : > { %v286_v11 = vrot.slane %v285_v63, 4  ;;  %v942_v12 = vsel %vm915_vm5, %v743_v0, %v379_v1  ;;  %v383_v7 = vrot.slane %v880_v13, 5  ;;  %v745_v14 = vrot.slane %v887_v18, 9 }
  0x22   : > { %v387_v15 = vrot.slane %v208_v31, 5  ;;  %v409_v16 = vmax.bf16 %v372_v3, %v342_v51  ;;  %v410_v17 = vmax.bf16 %v376_v5, %v343_v56  ;;  %v411_v19 = vmax.bf16 %v942_v12, %v344_v58 }
  0x23   : > { %v949_v20 = vsel %vm895_vm4, %v286_v11, %v290_v55  ;;  %v384_v21 = vsel %vm915_vm5, %v744_v9, %v383_v7  ;;  %v293_v24 = vshrl.u32 %v938_v10, 16  ;;  %v296_v13 = vshll.u32 %v938_v10, 16 }
  0x24   : > { %v346_v25 = vmax.bf16 %v949_v20, %v887_v18  ;;  %v963_v26 = vsel %vm915_vm5, %v745_v14, %v387_v15  ;;  %v412_v27 = vmax.bf16 %v384_v21, %v345_v2  ;;  %v417_v28 = vmax.bf16 %v409_v16, %v861_v4 }
  0x25   : > { %v418_v29 = vmax.bf16 %v410_v17, %v867_v6  ;;  %v419_v30 = vmax.bf16 %v411_v19, %v873_v8  ;;  %v295_v31 = vrot.slane %v293_v24, 4  ;;  %v298_v33 = vrot.slane %v296_v13, 5 }
  0x26   : > { %v420_v34 = vmax.bf16 %v412_v27, %v887_v18  ;;  %v440_v35 = vmax.bf16 %v417_v28, %v249_v49  ;;  %v302_v36 = vshll.u32 %v210_v22, 16  ;;  %v307_v37 = vshrl.u32 %v955_v23, 16  ;;  %v216_v27 = vld [vmem:[%s852_s24 + $0x44] sm:$0x1] }
  0x27   : > { %v441_v38 = vmax.bf16 %v418_v29, %v908_v50  ;;  %v442_v39 = vmax.bf16 %v419_v30, %v926_v62  ;;  %v299_v4 = vor.u32 %v298_v33, %v295_v31  ;;  %v310_v42 = vshll.u32 %v955_v23, 16 }
  0x28   : > { %v978_v43 = vmax.bf16 %v420_v34, %v949_v20  ;;  %v455_v44 = vmax.bf16 %v440_v35, %v376_v5  ;;  %v304_v45 = vrot.slane %v302_v36, 5  ;;  %v309_v46 = vrot.slane %v307_v37, 4 }
  0x29   : > { %v456_v47 = vmax.bf16 %v441_v38, %v942_v12  ;;  %v457_v48 = vmax.bf16 %v442_v39, %v384_v21  ;;  %v300_v49 = vrot.slane %v299_v4, 4  ;;  %v312_v51 = vrot.slane %v310_v42, 5 }
  0x2a   : > { %v458_v52 = vmax.bf16 %v978_v43, %v963_v26  ;;  %v463_v53 = vmax.bf16 %v455_v44, %v867_v6  ;;  %v316_v55 = vshll.u32 %v212_v40, 16  ;;  %v321_v56 = vshrl.u32 %v974_v41, 16 }
  0x2b   : > { %v464_v58 = vmax.bf16 %v456_v47, %v873_v8  ;;  %v465_v59 = vmax.bf16 %v457_v48, %v887_v18  ;;  %v990_v60 = vsel %vm895_vm4, %v300_v49, %v304_v45  ;;  %v313_v61 = vor.u32 %v312_v51, %v309_v46 }
  0x2c   : > { %v486_v63 = vmax.bf16 %v463_v53, %v908_v50  ;;  %v318_v0 = vrot.slane %v316_v55, 5  ;;  %v323_v1 = vrot.slane %v321_v56, 4  ;;  %v324_v6 = vshll.u32 %v974_v41, 16  ;;  %v215_v50 = vld [vmem:[%s852_s24 + $0x40] sm:$0xf] }
  0x2d   : > { %v487_v2 = vmax.bf16 %v464_v58, %v926_v62  ;;  %v314_v3 = vrot.slane %v313_v61, 4  ;;  %v330_v5 = vshll.u32 %v214_v54, 16  ;;  %v347_v8 = vmax.bf16 %v990_v60, %v938_v10  ;;  %v217_v55 = vld [vmem:[%s852_s24 + $0x48] sm:$0xf] }
  0x2e   : > { %v501_v18 = vmax.bf16 %v486_v63, %v942_v12  ;;  %v326_v9 = vrot.slane %v324_v6, 5  ;;  %v746_v11 = vrot.slane %v938_v10, 9  ;;  %v391_v7 = vrot.slane %v210_v22, 5 }
  0x2f   : > { %v502_v14 = vmax.bf16 %v487_v2, %v384_v21  ;;  %v319_v15 = vsel %vm895_vm4, %v314_v3, %v318_v0  ;;  %v332_v16 = vrot.slane %v330_v5, 5  ;;  %v747_v62 = vrot.slane %v955_v23, 9 }
  0x30   : > { %v327_v17 = vor.u32 %v326_v9, %v323_v1  ;;  %v348_v19 = vmax.bf16 %v319_v15, %v955_v23  ;;  %v392_v24 = vsel %vm915_vm5, %v746_v11, %v391_v7  ;;  %v395_v13 = vrot.slane %v212_v40, 5 }
  0x31   : > { %v751_v12 = vcombine.low %v501_v18, %v502_v14  ;;  %v748_v28 = vrot.slane %v974_v41, 9  ;;  %v399_v22 = vrot.slane %v214_v54, 5  ;;  %v413_v21 = vmax.bf16 %v963_v26, %v346_v25 }
  0x32   : > { %v328_v29 = vrot.slane %v327_v17, 4  ;;  %v396_v30 = vsel %vm915_vm5, %v747_v62, %v395_v13  ;;  %v414_v31 = vmax.bf16 %v392_v24, %v347_v8  ;;  %v426_v33 = vshrl.u32 %v215_v50, 16 }
  0x33   : > { %776 = vmatprep.mubr.msk.bf16.mxu0 %vm545_vm6, %v751_v12  ;;  %v400_v34 = vsel %vm915_vm5, %v748_v28, %v399_v22  ;;  %v415_v35 = vmax.bf16 %v396_v30, %v348_v19  ;;  %v421_v36 = vmax.bf16 %v413_v21, %v938_v10  ;;  %v429_v37 = vshll.u32 %v215_v50, 16 }
  0x34   : > { %v333_v38 = vsel %vm895_vm4, %v328_v29, %v332_v16  ;;  %v422_v25 = vmax.bf16 %v414_v31, %v955_v23  ;;  %v428_v39 = vrot.slane %v426_v33, 4  ;;  %v435_v40 = vshll.u32 %v216_v27, 16 }
  0x35   : > { %v349_v4 = vmax.bf16 %v333_v38, %v974_v41  ;;  %v423_v42 = vmax.bf16 %v415_v35, %v974_v41  ;;  %v431_v43 = vrot.slane %v429_v37, 5  ;;  %v444_v44 = vmax.bf16 %v421_v36, %v990_v60  ;;  %v762_v36 = vld [vmem:[%s1074_s3] ss:$0 sm:$0xff] }
  0x36   : > { %v437_v45 = vrot.slane %v435_v40, 5  ;;  %v445_v46 = vmax.bf16 %v422_v25, %v319_v15  ;;  %v466_v47 = vmax.bf16 %v458_v52, %v938_v10  ;;  %v488_v48 = vmax.bf16 %v465_v59, %v949_v20  ;;  %v218_v52 = vld [vmem:[%s852_s24 + $0x4c] sm:$0x1] }
  0x37   : > { %v416_v49 = vmax.bf16 %v400_v34, %v349_v4  ;;  %v432_v51 = vor.u32 %v431_v43, %v428_v39  ;;  %v446_v53 = vmax.bf16 %v423_v42, %v333_v38  ;;  %v459_v54 = vmax.bf16 %v444_v44, %v392_v24 }
  0x38   : > { %v460_v56 = vmax.bf16 %v445_v46, %v396_v30  ;;  %v489_v58 = vmax.bf16 %v466_v47, %v990_v60  ;;  %v503_v61 = vmax.bf16 %v488_v48, %v963_v26  ;;  %v749_v63 = vrot.slane %v215_v50, 9 }
  0x39   : > { %v424_v0 = vmax.bf16 %v416_v49, %v215_v50  ;;  %v433_v1 = vrot.slane %v432_v51, 4  ;;  %v461_v6 = vmax.bf16 %v446_v53, %v400_v34  ;;  %v467_v2 = vmax.bf16 %v459_v54, %v955_v23 }
  0x3a   : > { %v468_v10 = vmax.bf16 %v460_v56, %v974_v41  ;;  %v504_v20 = vmax.bf16 %v489_v58, %v392_v24  ;;  %v452_v59 = vrot.slane %v216_v27, 5  ;;  %v472_v3 = vshrl.u32 %v217_v55, 16 }
  0x3b   : > { %v438_v5 = vsel %vm895_vm4, %v433_v1, %v437_v45  ;;  %v469_v8 = vmax.bf16 %v461_v6, %v215_v50  ;;  %v490_v18 = vmax.bf16 %v467_v2, %v319_v15  ;;  %v475_v60 = vshll.u32 %v217_v55, 16 }
  0x3c   : > { %v447_v9 = vmax.bf16 %v438_v5, %v424_v0  ;;  %v491_v26 = vmax.bf16 %v468_v10, %v333_v38  ;;  %v752_v11 = vcombine.low %v503_v61, %v504_v20  ;;  %v453_v7 = vsel %vm915_vm5, %v749_v63, %v452_v59 }
  0x3d   : > { %v505_v14 = vmax.bf16 %v490_v18, %v396_v30  ;;  %v474_v23 = vrot.slane %v472_v3, 4  ;;  %v477_v16 = vrot.slane %v475_v60, 5  ;;  %v481_v41 = vshll.u32 %v218_v52, 16 }
  0x3e   : > { %v506_v62 = vmax.bf16 %v491_v26, %v400_v34  ;;  %777 = vmatmul.mubr.msk.bf16.vlgmr.msra.gmra.mrb[0].mxu0 %vm545_vm6, %v752_v11  ;;  %v462_v17 = vmax.bf16 %v453_v7, %v447_v9  ;;  %v750_v13 = vrot.slane %v217_v55, 9  ;;  %v498_v50 = vrot.slane %v218_v52, 5  ;;  %v761_v34 = vld [vmem:[%s1073_s2] ss:$0 sm:$0xff] }
  0x3f   : > { %v478_v19 = vor.u32 %v477_v16, %v474_v23  ;;  %v483_v24 = vrot.slane %v481_v41, 5  ;;  %v492_v27 = vmax.bf16 %v469_v8, %v438_v5 }
  0x40   : > { %v753_v15 = vcombine.low %v505_v14, %v506_v62  ;;  %v470_v12 = vmax.bf16 %v462_v17, %v217_v55  ;;  %v499_v21 = vsel %vm915_vm5, %v750_v13, %v498_v50 }
  0x41   : > { %v479_v28 = vrot.slane %v478_v19, 4  ;;  %v507_v30 = vmax.bf16 %v492_v27, %v453_v7 }
  0x42   : > { %780 = vmatprep.mubr.msk.bf16.mxu1 %vm545_vm6, %v753_v15 }
  0x43   : > { %v484_v22 = vsel %vm895_vm4, %v479_v28, %v483_v24 }
  0x44   : > { %v493_v29 = vmax.bf16 %v484_v22, %v470_v12 }
  0x46   : > { %v508_v31 = vmax.bf16 %v499_v21, %v493_v29 }
  0x48   : > { %v754_v33 = vcombine.low %v507_v30, %v508_v31 }
  0x4a   : > { %781 = vmatmul.mubr.msk.bf16.vlgmr.msra.gmra.mrb[0].mxu1 %vm545_vm6, %v754_v33 }
 0x111   : > { %v778_v35 = vpop.f32.mrb[0].mxu0 }
 0x112   : > { %v632_v32 = vmul.f32 %v778_v35, %v761_v34  ;;  %v592_v37 = vpop.f32.mrb[1].mxu0 }
 0x113   : > { %v630_v38 = vmul.f32 %v761_v34, %v592_v37  ;;  %v779_v57 = vpop.f32.mrb[2].mxu0 }
 0x114   : > { %v647_v25 = vadd.f32 %v762_v36, %v632_v32  ;;  %v633_v39 = vmul.f32 %v779_v57, %v761_v34  ;;  %v595_v40 = vpop.f32.mrb[3].mxu0 }
 0x115   : > { %v645_v4 = vadd.f32 %v762_v36, %v630_v38  ;;  %v631_v42 = vmul.f32 %v761_v34, %v595_v40 }
 0x116   : > { %v655_v43 = vmax.f32 %v647_v25, 0.0  ;;  %v648_v44 = vadd.f32 %v762_v36, %v633_v39 }
 0x117   : > { %v653_v45 = vmax.f32 %v645_v4, 0.0  ;;  %v646_v46 = vadd.f32 %v762_v36, %v631_v42 }
 0x118   : > { %v663_v47 = vpack.c.bf16 %v655_v43, %v655_v43  ;;  %v656_v48 = vmax.f32 %v648_v44, 0.0 }
 0x119   : > { %v661_v49 = vpack.c.bf16 %v653_v45, %v653_v45  ;;  %v654_v51 = vmax.f32 %v646_v46, 0.0 }
 0x11a   : > { %672 = vst.msk [vmem:[%s1050_s6 + $0x8] sm:$0xf] %vm669_vm7, %v663_v47  ;;  %v664_v53 = vpack.c.bf16 %v656_v48, %v656_v48 }
 0x11b   : > { %670 = vst.msk [vmem:[%s1050_s6] sm:$0xf] %vm669_vm7, %v661_v49  ;;  %v662_v54 = vpack.c.bf16 %v654_v51, %v654_v51 }
 0x11c   : > { %673 = vst.msk [vmem:[%s1050_s6 + $0xc] sm:$0xf] %vm669_vm7, %v664_v53 }
 0x11d   : > { %v782_v55 = vpop.f32.mrb[0].mxu1  ;;  %671 = vst.msk [vmem:[%s1050_s6 + $0x4] sm:$0xf] %vm669_vm7, %v662_v54 }
 0x11e   : > { %v636_v56 = vmul.f32 %v782_v55, %v761_v34  ;;  %v608_v58 = vpop.f32.mrb[1].mxu1 }
 0x11f   : > { %v634_v61 = vmul.f32 %v761_v34, %v608_v58  ;;  %v783_v63 = vpop.f32.mrb[2].mxu1 }
 0x120   : > { %v651_v0 = vadd.f32 %v762_v36, %v636_v56  ;;  %v637_v1 = vmul.f32 %v783_v63, %v761_v34  ;;  %v611_v6 = vpop.f32.mrb[3].mxu1 }
 0x121   : > { %v649_v2 = vadd.f32 %v762_v36, %v634_v61  ;;  %v635_v10 = vmul.f32 %v761_v34, %v611_v6 }
 0x122   : > { %v659_v20 = vmax.f32 %v651_v0, 0.0  ;;  %v652_v52 = vadd.f32 %v762_v36, %v637_v1 }
 0x123   : > { %v657_v59 = vmax.f32 %v649_v2, 0.0  ;;  %v650_v3 = vadd.f32 %v762_v36, %v635_v10 }
 0x124   : > { %v667_v5 = vpack.c.bf16 %v659_v20, %v659_v20  ;;  %v660_v8 = vmax.f32 %v652_v52, 0.0 }
 0x125   : > { %v665_v18 = vpack.c.bf16 %v657_v59, %v657_v59  ;;  %v658_v60 = vmax.f32 %v650_v3, 0.0 }
 0x126   : > { %676 = vst.msk [vmem:[%s1050_s6 + $0x18] sm:$0xf] %vm669_vm7, %v667_v5  ;;  %v668_v9 = vpack.c.bf16 %v660_v8, %v660_v8 }
 0x127   : > { %674 = vst.msk [vmem:[%s1050_s6 + $0x10] sm:$0xf] %vm669_vm7, %v665_v18  ;;  %v666_v26 = vpack.c.bf16 %v658_v60, %v658_v60 }
 0x128   : > { %677 = vst.msk [vmem:[%s1050_s6 + $0x1c] sm:$0xf] %vm669_vm7, %v668_v9 }
 0x129   : > { %675 = vst.msk [vmem:[%s1050_s6 + $0x14] sm:$0xf] %vm669_vm7, %v666_v26 }
 0x12a PF: > { %s14_s15 = sadd.s32 1, %s805_s15  }
 0x12b   : > { %p11_p4 = scmp.ge.s32.totalorder %s14_s15, 4  }
 0x12d   :  { %13 = sbr.rel (!%p11_p4) target bundleno = 1 (0x1), region = 66 }

// kernel: forward.27
= control target key start
LH: loop header
LB: loop body
LE: loop exit
PB: predicated region body
PF: predicated region fallthrough
CT: control target
= control target key end

     0   :  { %vm93_vm0 = vcmask 261120   ;;  %vm373_vm1 = vcmask 125952   ;;  %s759_s1 = inlined_call_operand.vmem [shape: bf16[32,16], index: 1, kind: input, shape index: {}]   ;;  %s760_s0 = inlined_call_operand.vmem [shape: bf16[128,32], index: 0, kind: input, shape index: {}]   ;;  %s761_s4 = inlined_call_operand.vmem [shape: bf16[128,16], index: 4, kind: input, shape index: {}]   ;;  %s762_s2 = inlined_call_operand.vmem [shape: f32[1,16], index: 2, kind: input, shape index: {}]   ;;  %s763_s3 = inlined_call_operand.vmem [shape: f32[1,16], index: 3, kind: input, shape index: {}]   ;;  %s764_s5 = inlined_call_operand.vmem [shape: bf16[128,16], index: 5, kind: output, shape index: {}]  }
   0x1   :  { %v519_v0 = vld [vmem:[%s759_s1] sm:$0xff]   ;;  %v520_v1 = vld [vmem:[%s759_s1 + $0x8] sm:$0xff]   ;;  %v525_v6 = vld [vmem:[%s760_s0 + $0x10] sm:$0xff]  }
   0x2   :  { %495 = vmatprep.subr.bf16.mxu0 %v519_v0  ;;  %515 = vmatprep.subr.bf16.mxu1 %v519_v0  ;;  %v521_v2 = vld [vmem:[%s760_s0] sm:$0xff]   ;;  %v523_v4 = vld [vmem:[%s760_s0 + $0x8] sm:$0xff]   ;;  %v526_v7 = vld [vmem:[%s760_s0 + $0x30] sm:$0xff]  }
   0x3   :  { %496 = vmatpush3.bf16.msra.mxu0 %v519_v0  ;;  %517 = vmatpush3.bf16.msra.mxu1 %v519_v0  ;;  %v522_v3 = vld [vmem:[%s760_s0 + $0x20] sm:$0xff]   ;;  %v524_v5 = vld [vmem:[%s760_s0 + $0x28] sm:$0xff]   ;;  %v527_v8 = vld [vmem:[%s760_s0 + $0x18] sm:$0xff]  }
   0x4   :  { %497 = vmatprep.subr.bf16.mxu0 %v520_v1  ;;  %516 = vmatprep.subr.bf16.mxu1 %v520_v1  ;;  %v528_v9 = vld [vmem:[%s760_s0 + $0x38] sm:$0xff]   ;;  %v478_v10 = vld [vmem:[%s761_s4 + $0x8] sm:$0xff]   ;;  %v447_v12 = vld [vmem:[%s761_s4] sm:$0xff]  }
   0x5   :  { %499 = vmatprep.mubr.msk.bf16.mxu0 %vm93_vm0, %v521_v2  ;;  %507 = vmatprep.mubr.msk.bf16.mxu1 %vm93_vm0, %v522_v3  ;;  %v482_v11 = vld [vmem:[%s761_s4 + $0x28] sm:$0xff]   ;;  %v481_v13 = vld [vmem:[%s761_s4 + $0x20] sm:$0xff]   ;;  %v612_v14 = vld [vmem:[%s761_s4 + $0x18] sm:$0xff]   ;;  %v452_v15 = vunpack.c.l.bf16 %v478_v10  ;;  %v448_v21 = vunpack.c.l.bf16 %v447_v12  ;;  %v453_v23 = vunpack.c.h.bf16 %v478_v10  ;;  %v449_v25 = vunpack.c.h.bf16 %v447_v12 }
   0x6   :  { %v617_v16 = vld [vmem:[%s761_s4 + $0x38] sm:$0xff]   ;;  %v622_v17 = vld [vmem:[%s761_s4 + $0x10] sm:$0xff]   ;;  %v632_v19 = vld [vmem:[%s762_s2] ss:$0 sm:$0xff]  ;;  %v468_v20 = vunpack.c.l.bf16 %v482_v11  ;;  %v464_v22 = vunpack.c.l.bf16 %v481_v13  ;;  %v469_v24 = vunpack.c.h.bf16 %v482_v11  ;;  %v465_v26 = vunpack.c.h.bf16 %v481_v13 }
   0x7   :  { %498 = vmatpush3.bf16.msra.mxu0 %v520_v1  ;;  %518 = vmatpush3.bf16.msra.mxu1 %v520_v1  ;;  %v627_v18 = vld [vmem:[%s761_s4 + $0x30] sm:$0xff]   ;;  %v637_v28 = vld [vmem:[%s763_s3] ss:$0 sm:$0xff]  ;;  %v460_v30 = vunpack.c.l.bf16 %v612_v14  ;;  %v476_v31 = vunpack.c.l.bf16 %v617_v16  ;;  %v456_v32 = vunpack.c.l.bf16 %v622_v17  ;;  %v461_v38 = vunpack.c.h.bf16 %v612_v14 }
   0x8   :  { %v472_v33 = vunpack.c.l.bf16 %v627_v18  ;;  %v477_v39 = vunpack.c.h.bf16 %v617_v16  ;;  %v457_v44 = vunpack.c.h.bf16 %v622_v17  ;;  %v473_v45 = vunpack.c.h.bf16 %v627_v18 }
   0xa   :  { %500 = vmatmul.mubr.msk.bf16.vlgmr.msra.gmra.mrb[0].mxu0 %vm93_vm0, %v523_v4  ;;  %508 = vmatmul.mubr.msk.bf16.vlgmr.msra.gmra.mrb[0].mxu1 %vm93_vm0, %v524_v5 }
   0xb   :  { %503 = vmatprep.mubr.msk.bf16.mxu0 %vm93_vm0, %v525_v6  ;;  %511 = vmatprep.mubr.msk.bf16.mxu1 %vm93_vm0, %v526_v7 }
  0x12   :  { %504 = vmatmul.mubr.msk.bf16.gmra.mrb[4].mxu0 %vm93_vm0, %v527_v8  ;;  %512 = vmatmul.mubr.msk.bf16.gmra.mrb[4].mxu1 %vm93_vm0, %v528_v9 }
  0xdd   :  { %v501_v27 = vpop.f32.mrb[0].mxu0  ;;  %v509_v29 = vpop.f32.mrb[0].mxu1 }
  0xde   :  { %v224_v34 = vmul.f32 %v501_v27, %v632_v19  ;;  %v232_v35 = vmul.f32 %v509_v29, %v632_v19  ;;  %v152_v36 = vpop.f32.mrb[1].mxu0  ;;  %v184_v37 = vpop.f32.mrb[1].mxu1 }
  0xdf   :  { %v222_v40 = vmul.f32 %v632_v19, %v152_v36  ;;  %v230_v41 = vmul.f32 %v632_v19, %v184_v37  ;;  %v502_v42 = vpop.f32.mrb[2].mxu0  ;;  %v510_v43 = vpop.f32.mrb[2].mxu1 }
  0xe0   :  { %v247_v46 = vadd.f32 %v637_v28, %v224_v34  ;;  %v255_v47 = vadd.f32 %v637_v28, %v232_v35  ;;  %v225_v48 = vmul.f32 %v502_v42, %v632_v19  ;;  %v233_v49 = vmul.f32 %v510_v43, %v632_v19  ;;  %v155_v50 = vpop.f32.mrb[3].mxu0  ;;  %v187_v51 = vpop.f32.mrb[3].mxu1 }
  0xe1   :  { %v245_v52 = vadd.f32 %v637_v28, %v222_v40  ;;  %v253_v53 = vadd.f32 %v637_v28, %v230_v41  ;;  %v223_v54 = vmul.f32 %v632_v19, %v155_v50  ;;  %v231_v55 = vmul.f32 %v632_v19, %v187_v51 }
  0xe2   :  { %v295_v56 = vadd.f32 %v452_v15, %v247_v46  ;;  %v303_v57 = vadd.f32 %v468_v20, %v255_v47  ;;  %v248_v58 = vadd.f32 %v637_v28, %v225_v48  ;;  %v256_v59 = vadd.f32 %v637_v28, %v233_v49 }
  0xe3   :  { %v293_v60 = vadd.f32 %v448_v21, %v245_v52  ;;  %v301_v61 = vadd.f32 %v464_v22, %v253_v53  ;;  %v246_v62 = vadd.f32 %v637_v28, %v223_v54  ;;  %v254_v63 = vadd.f32 %v637_v28, %v231_v55 }
  0xe4   :  { %v432_v0 = vpack.c.bf16 %v295_v56, %v295_v56  ;;  %v440_v1 = vpack.c.bf16 %v303_v57, %v303_v57  ;;  %v296_v2 = vadd.f32 %v453_v23, %v248_v58  ;;  %v304_v3 = vadd.f32 %v469_v24, %v256_v59 }
  0xe5   :  { %v430_v4 = vpack.c.bf16 %v293_v60, %v293_v60  ;;  %v438_v5 = vpack.c.bf16 %v301_v61, %v301_v61  ;;  %v294_v6 = vadd.f32 %v449_v25, %v246_v62  ;;  %v302_v7 = vadd.f32 %v465_v26, %v254_v63  ;;  %v505_v8 = vpop.f32.mrb[4].mxu0  ;;  %v513_v9 = vpop.f32.mrb[4].mxu1 }
  0xe6   :  { %376 = vst.msk [vmem:[%s764_s5 + $0x8] sm:$0xf] %vm373_vm1, %v432_v0  ;;  %384 = vst.msk [vmem:[%s764_s5 + $0x28] sm:$0xf] %vm373_vm1, %v440_v1  ;;  %v433_v10 = vpack.c.bf16 %v296_v2, %v296_v2  ;;  %v441_v11 = vpack.c.bf16 %v304_v3, %v304_v3  ;;  %v228_v12 = vmul.f32 %v505_v8, %v632_v19  ;;  %v168_v15 = vpop.f32.mrb[5].mxu0  ;;  %v200_v20 = vpop.f32.mrb[5].mxu1 }
  0xe7   :  { %v236_v13 = vmul.f32 %v513_v9, %v632_v19  ;;  %374 = vst.msk [vmem:[%s764_s5] sm:$0xf] %vm373_vm1, %v430_v4  ;;  %382 = vst.msk [vmem:[%s764_s5 + $0x20] sm:$0xf] %vm373_vm1, %v438_v5  ;;  %v431_v21 = vpack.c.bf16 %v294_v6, %v294_v6  ;;  %v439_v22 = vpack.c.bf16 %v302_v7, %v302_v7  ;;  %v506_v25 = vpop.f32.mrb[6].mxu0  ;;  %v514_v26 = vpop.f32.mrb[6].mxu1 }
  0xe8   :  { %v226_v23 = vmul.f32 %v632_v19, %v168_v15  ;;  %v234_v24 = vmul.f32 %v632_v19, %v200_v20  ;;  %377 = vst.msk [vmem:[%s764_s5 + $0xc] sm:$0xf] %vm373_vm1, %v433_v10  ;;  %385 = vst.msk [vmem:[%s764_s5 + $0x2c] sm:$0xf] %vm373_vm1, %v441_v11  ;;  %v251_v27 = vadd.f32 %v637_v28, %v228_v12  ;;  %v171_v36 = vpop.f32.mrb[7].mxu0  ;;  %v203_v37 = vpop.f32.mrb[7].mxu1 }
  0xe9   :  { %v259_v29 = vadd.f32 %v637_v28, %v236_v13  ;;  %v229_v34 = vmul.f32 %v506_v25, %v632_v19  ;;  %v237_v35 = vmul.f32 %v514_v26, %v632_v19  ;;  %375 = vst.msk [vmem:[%s764_s5 + $0x4] sm:$0xf] %vm373_vm1, %v431_v21  ;;  %383 = vst.msk [vmem:[%s764_s5 + $0x24] sm:$0xf] %vm373_vm1, %v439_v22 }
  0xea   :  { %v249_v40 = vadd.f32 %v637_v28, %v226_v23  ;;  %v257_v41 = vadd.f32 %v637_v28, %v234_v24  ;;  %v227_v42 = vmul.f32 %v632_v19, %v171_v36  ;;  %v235_v43 = vmul.f32 %v632_v19, %v203_v37 }
  0xeb   :  { %v299_v46 = vadd.f32 %v460_v30, %v251_v27  ;;  %v307_v47 = vadd.f32 %v476_v31, %v259_v29  ;;  %v252_v48 = vadd.f32 %v637_v28, %v229_v34  ;;  %v260_v49 = vadd.f32 %v637_v28, %v237_v35 }
  0xec   :  { %v297_v50 = vadd.f32 %v456_v32, %v249_v40  ;;  %v305_v51 = vadd.f32 %v472_v33, %v257_v41  ;;  %v250_v52 = vadd.f32 %v637_v28, %v227_v42  ;;  %v258_v19 = vadd.f32 %v637_v28, %v235_v43 }
  0xed   :  { %v436_v53 = vpack.c.bf16 %v299_v46, %v299_v46  ;;  %v444_v54 = vpack.c.bf16 %v307_v47, %v307_v47  ;;  %v300_v30 = vadd.f32 %v461_v38, %v252_v48  ;;  %v308_v31 = vadd.f32 %v477_v39, %v260_v49 }
  0xee   :  { %v434_v55 = vpack.c.bf16 %v297_v50, %v297_v50  ;;  %v442_v56 = vpack.c.bf16 %v305_v51, %v305_v51  ;;  %v298_v32 = vadd.f32 %v457_v44, %v250_v52  ;;  %v306_v33 = vadd.f32 %v473_v45, %v258_v19 }
  0xef   :  { %380 = vst.msk [vmem:[%s764_s5 + $0x18] sm:$0xf] %vm373_vm1, %v436_v53  ;;  %388 = vst.msk [vmem:[%s764_s5 + $0x38] sm:$0xf] %vm373_vm1, %v444_v54  ;;  %v437_v14 = vpack.c.bf16 %v300_v30, %v300_v30  ;;  %v445_v16 = vpack.c.bf16 %v308_v31, %v308_v31 }
  0xf0   :  { %378 = vst.msk [vmem:[%s764_s5 + $0x10] sm:$0xf] %vm373_vm1, %v434_v55  ;;  %386 = vst.msk [vmem:[%s764_s5 + $0x30] sm:$0xf] %vm373_vm1, %v442_v56  ;;  %v435_v17 = vpack.c.bf16 %v298_v32, %v298_v32  ;;  %v443_v18 = vpack.c.bf16 %v306_v33, %v306_v33 }
  0xf1   :  { %381 = vst.msk [vmem:[%s764_s5 + $0x1c] sm:$0xf] %vm373_vm1, %v437_v14  ;;  %389 = vst.msk [vmem:[%s764_s5 + $0x3c] sm:$0xf] %vm373_vm1, %v445_v16 }
  0xf2   :  { %379 = vst.msk [vmem:[%s764_s5 + $0x14] sm:$0xf] %vm373_vm1, %v435_v17  ;;  %387 = vst.msk [vmem:[%s764_s5 + $0x34] sm:$0xf] %vm373_vm1, %v443_v18 }

// kernel: forward.28
= control target key start
LH: loop header
LB: loop body
LE: loop exit
PB: predicated region body
PF: predicated region fallthrough
CT: control target
= control target key end

     0   :  { %vm134_vm0 = vcmask 130048   ;;  %vm366_vm1 = vcmask 60416   ;;  %s719_s3 = inlined_call_operand.vmem [shape: bf16[16,8], index: 3, kind: input, shape index: {}]   ;;  %s720_s0 = inlined_call_operand.vmem [shape: bf16[128,16], index: 0, kind: input, shape index: {}]   ;;  %s721_s1 = inlined_call_operand.vmem [shape: f32[1,16], index: 1, kind: input, shape index: {}]   ;;  %s722_s2 = inlined_call_operand.vmem [shape: f32[1,16], index: 2, kind: input, shape index: {}]   ;;  %s723_s4 = inlined_call_operand.vmem [shape: f32[1,8], index: 4, kind: input, shape index: {}]   ;;  %s724_s5 = inlined_call_operand.vmem [shape: f32[1,8], index: 5, kind: input, shape index: {}]   ;;  %s725_s6 = inlined_call_operand.vmem [shape: bf16[128,8], index: 6, kind: output, shape index: {}]  }
   0x1   :  { %v500_v0 = vld [vmem:[%s719_s3] sm:$0xff]   ;;  %v464_v6 = vld [vmem:[%s720_s0 + $0x8] sm:$0xff]   ;;  %v465_v29 = vld [vmem:[%s720_s0 + $0x10] sm:$0xff]  }
   0x2   :  { %v433_v1 = vld [vmem:[%s720_s0] sm:$0xff]   ;;  %480 = vmatprep.subr.bf16.mxu0 %v500_v0  ;;  %498 = vmatprep.subr.bf16.mxu1 %v500_v0  ;;  %v468_v7 = vld [vmem:[%s720_s0 + $0x28] sm:$0xff]   ;;  %v438_v11 = vunpack.c.l.bf16 %v464_v6  ;;  %v439_v12 = vunpack.c.h.bf16 %v464_v6  ;;  %v469_v34 = vld [vmem:[%s720_s0 + $0x30] sm:$0xff]   ;;  %v442_v43 = vunpack.c.l.bf16 %v465_v29  ;;  %v443_v47 = vunpack.c.h.bf16 %v465_v29 }
   0x3   :  { %v545_v2 = vld [vmem:[%s721_s1] ss:$0 sm:$0xff]  ;;  %v434_v3 = vunpack.c.l.bf16 %v433_v1  ;;  %v435_v4 = vunpack.c.h.bf16 %v433_v1  ;;  %481 = vmatpush3.bf16.msra.mxu0 %v500_v0  ;;  %499 = vmatpush3.bf16.msra.mxu1 %v500_v0  ;;  %v454_v15 = vunpack.c.l.bf16 %v468_v7  ;;  %v455_v16 = vunpack.c.h.bf16 %v468_v7  ;;  %v466_v39 = vld [vmem:[%s720_s0 + $0x18] sm:$0xff]  }
   0x4   :  { %v467_v5 = vld [vmem:[%s720_s0 + $0x20] sm:$0xff]   ;;  %v65_v19 = vmul.f32 %v438_v11, %v545_v2  ;;  %v66_v20 = vmul.f32 %v439_v12, %v545_v2  ;;  %v470_v44 = vld [vmem:[%s720_s0 + $0x38] sm:$0xff]   ;;  %v458_v48 = vunpack.c.l.bf16 %v469_v34  ;;  %v67_v50 = vmul.f32 %v442_v43, %v545_v2 }
   0x5   :  { %v559_v8 = vld [vmem:[%s722_s2] ss:$0 sm:$0xff]  ;;  %v450_v9 = vunpack.c.l.bf16 %v467_v5  ;;  %v451_v10 = vunpack.c.h.bf16 %v467_v5  ;;  %v63_v13 = vmul.f32 %v434_v3, %v545_v2  ;;  %v64_v14 = vmul.f32 %v435_v4, %v545_v2 }
   0x6   :  { %v73_v23 = vmul.f32 %v454_v15, %v545_v2  ;;  %v74_v24 = vmul.f32 %v455_v16, %v545_v2  ;;  %v88_v27 = vadd.f32 %v559_v8, %v65_v19  ;;  %v89_v28 = vadd.f32 %v559_v8, %v66_v20  ;;  %v616_v20 = vld [vmem:[%s723_s4] ss:$0 sm:$0xff] }
   0x7   :  { %v71_v17 = vmul.f32 %v450_v9, %v545_v2  ;;  %v72_v18 = vmul.f32 %v451_v10, %v545_v2  ;;  %v86_v21 = vadd.f32 %v559_v8, %v63_v13  ;;  %v87_v22 = vadd.f32 %v559_v8, %v64_v14 }
   0x8   :  { %v96_v32 = vadd.f32 %v559_v8, %v73_v23  ;;  %v97_v33 = vadd.f32 %v559_v8, %v74_v24  ;;  %v104_v37 = vmax.f32 %v88_v27, 0.0  ;;  %v105_v38 = vmax.f32 %v89_v28, 0.0 }
   0x9   :  { %v94_v25 = vadd.f32 %v559_v8, %v71_v17  ;;  %v95_v26 = vadd.f32 %v559_v8, %v72_v18  ;;  %v102_v30 = vmax.f32 %v86_v21, 0.0  ;;  %v103_v31 = vmax.f32 %v87_v22, 0.0  ;;  %v621_v21 = vld [vmem:[%s724_s5] ss:$0 sm:$0xff] }
   0xa   :  { %v112_v41 = vmax.f32 %v96_v32, 0.0  ;;  %v113_v42 = vmax.f32 %v97_v33, 0.0  ;;  %v119_v46 = vpack.c.bf16 %v105_v38, %v104_v37  ;;  %v459_v51 = vunpack.c.h.bf16 %v469_v34 }
   0xb   :  { %v110_v35 = vmax.f32 %v94_v25, 0.0  ;;  %v111_v36 = vmax.f32 %v95_v26, 0.0  ;;  %v118_v40 = vpack.c.bf16 %v103_v31, %v102_v30  ;;  %v446_v52 = vunpack.c.l.bf16 %v466_v39 }
   0xc   :  { %v123_v49 = vpack.c.bf16 %v113_v42, %v112_v41  ;;  %v68_v53 = vmul.f32 %v443_v47, %v545_v2  ;;  %v75_v54 = vmul.f32 %v458_v48, %v545_v2  ;;  %v447_v55 = vunpack.c.h.bf16 %v466_v39 }
   0xd   :  { %v122_v45 = vpack.c.bf16 %v111_v36, %v110_v35  ;;  %482 = vmatprep.mubr.msk.bf16.mxu0 %vm134_vm0, %v118_v40  ;;  %v462_v56 = vunpack.c.l.bf16 %v470_v44  ;;  %v90_v57 = vadd.f32 %v559_v8, %v67_v50  ;;  %v76_v58 = vmul.f32 %v459_v51, %v545_v2 }
   0xe   :  { %483 = vmatmul.mubr.msk.bf16.vlgmr.msra.gmra.mrb[0].mxu0 %vm134_vm0, %v119_v46  ;;  %v69_v59 = vmul.f32 %v446_v52, %v545_v2  ;;  %v463_v60 = vunpack.c.h.bf16 %v470_v44  ;;  %v91_v61 = vadd.f32 %v559_v8, %v68_v53  ;;  %v98_v62 = vadd.f32 %v559_v8, %v75_v54 }
   0xf   :  { %490 = vmatprep.mubr.msk.bf16.mxu1 %vm134_vm0, %v122_v45  ;;  %v70_v63 = vmul.f32 %v447_v55, %v545_v2  ;;  %v77_v0 = vmul.f32 %v462_v56, %v545_v2  ;;  %v106_v1 = vmax.f32 %v90_v57, 0.0  ;;  %v99_v3 = vadd.f32 %v559_v8, %v76_v58 }
  0x10   :  { %491 = vmatmul.mubr.msk.bf16.vlgmr.msra.gmra.mrb[0].mxu1 %vm134_vm0, %v123_v49  ;;  %v92_v4 = vadd.f32 %v559_v8, %v69_v59  ;;  %v78_v5 = vmul.f32 %v463_v60, %v545_v2  ;;  %v107_v6 = vmax.f32 %v91_v61, 0.0  ;;  %v114_v7 = vmax.f32 %v98_v62, 0.0 }
  0x11   :  { %v93_v9 = vadd.f32 %v559_v8, %v70_v63  ;;  %v100_v10 = vadd.f32 %v559_v8, %v77_v0  ;;  %v115_v11 = vmax.f32 %v99_v3, 0.0 }
  0x12   :  { %v108_v12 = vmax.f32 %v92_v4, 0.0  ;;  %v101_v13 = vadd.f32 %v559_v8, %v78_v5  ;;  %v120_v14 = vpack.c.bf16 %v107_v6, %v106_v1 }
  0x13   :  { %v109_v15 = vmax.f32 %v93_v9, 0.0  ;;  %v116_v16 = vmax.f32 %v100_v10, 0.0  ;;  %v124_v17 = vpack.c.bf16 %v115_v11, %v114_v7 }
  0x14   :  { %v117_v18 = vmax.f32 %v101_v13, 0.0  ;;  %486 = vmatprep.mubr.msk.bf16.mxu0 %vm134_vm0, %v120_v14 }
  0x15   :  { %v121_v19 = vpack.c.bf16 %v109_v15, %v108_v12  ;;  %494 = vmatprep.mubr.msk.bf16.mxu1 %vm134_vm0, %v124_v17 }
  0x16   :  { %v125_v2 = vpack.c.bf16 %v117_v18, %v116_v16 }
  0x17   :  { %487 = vmatmul.mubr.msk.bf16.gmra.mrb[4].mxu0 %vm134_vm0, %v121_v19 }
  0x18   :  { %495 = vmatmul.mubr.msk.bf16.gmra.mrb[4].mxu1 %vm134_vm0, %v125_v2 }
  0xe1   :  { %v484_v8 = vpop.f32.mrb[0].mxu0 }
  0xe2   :  { %v265_v22 = vmul.f32 %v484_v8, %v616_v20  ;;  %v193_v24 = vpop.f32.mrb[1].mxu0 }
  0xe3   :  { %v492_v23 = vpop.f32.mrb[0].mxu1  ;;  %v263_v26 = vmul.f32 %v616_v20, %v193_v24  ;;  %v485_v28 = vpop.f32.mrb[2].mxu0 }
  0xe4   :  { %v273_v25 = vmul.f32 %v492_v23, %v616_v20  ;;  %v225_v27 = vpop.f32.mrb[1].mxu1  ;;  %v288_v29 = vadd.f32 %v621_v21, %v265_v22  ;;  %v266_v31 = vmul.f32 %v485_v28, %v616_v20  ;;  %v196_v33 = vpop.f32.mrb[3].mxu0 }
  0xe5   :  { %v271_v30 = vmul.f32 %v616_v20, %v225_v27  ;;  %v493_v32 = vpop.f32.mrb[2].mxu1  ;;  %v286_v35 = vadd.f32 %v621_v21, %v263_v26  ;;  %v264_v37 = vmul.f32 %v616_v20, %v196_v33 }
  0xe6   :  { %v296_v34 = vadd.f32 %v621_v21, %v273_v25  ;;  %v274_v36 = vmul.f32 %v493_v32, %v616_v20  ;;  %v228_v38 = vpop.f32.mrb[3].mxu1  ;;  %v418_v39 = vpack.c.bf16 %v288_v29, %v288_v29  ;;  %v289_v41 = vadd.f32 %v621_v21, %v266_v31 }
  0xe7   :  { %v294_v40 = vadd.f32 %v621_v21, %v271_v30  ;;  %v272_v42 = vmul.f32 %v616_v20, %v228_v38  ;;  %v416_v44 = vpack.c.bf16 %v286_v35, %v286_v35  ;;  %v287_v46 = vadd.f32 %v621_v21, %v264_v37 }
  0xe8   :  { %v426_v43 = vpack.c.bf16 %v296_v34, %v296_v34  ;;  %v297_v45 = vadd.f32 %v621_v21, %v274_v36  ;;  %369 = vst.msk [vmem:[%s725_s6 + $0x8] sm:$0xf] %vm366_vm1, %v418_v39  ;;  %v419_v48 = vpack.c.bf16 %v289_v41, %v289_v41 }
  0xe9   :  { %v424_v47 = vpack.c.bf16 %v294_v40, %v294_v40  ;;  %v295_v49 = vadd.f32 %v621_v21, %v272_v42  ;;  %367 = vst.msk [vmem:[%s725_s6] sm:$0xf] %vm366_vm1, %v416_v44  ;;  %v417_v51 = vpack.c.bf16 %v287_v46, %v287_v46 }
  0xea   :  { %377 = vst.msk [vmem:[%s725_s6 + $0x28] sm:$0xf] %vm366_vm1, %v426_v43  ;;  %v427_v50 = vpack.c.bf16 %v297_v45, %v297_v45  ;;  %370 = vst.msk [vmem:[%s725_s6 + $0xc] sm:$0xf] %vm366_vm1, %v419_v48  ;;  %v488_v53 = vpop.f32.mrb[4].mxu0 }
  0xeb   :  { %375 = vst.msk [vmem:[%s725_s6 + $0x20] sm:$0xf] %vm366_vm1, %v424_v47  ;;  %v425_v52 = vpack.c.bf16 %v295_v49, %v295_v49  ;;  %368 = vst.msk [vmem:[%s725_s6 + $0x4] sm:$0xf] %vm366_vm1, %v417_v51  ;;  %v269_v54 = vmul.f32 %v488_v53, %v616_v20  ;;  %v496_v55 = vpop.f32.mrb[4].mxu1  ;;  %v209_v56 = vpop.f32.mrb[5].mxu0 }
  0xec   :  { %378 = vst.msk [vmem:[%s725_s6 + $0x2c] sm:$0xf] %vm366_vm1, %v427_v50  ;;  %v277_v57 = vmul.f32 %v496_v55, %v616_v20  ;;  %v267_v58 = vmul.f32 %v616_v20, %v209_v56  ;;  %v241_v59 = vpop.f32.mrb[5].mxu1  ;;  %v489_v60 = vpop.f32.mrb[6].mxu0 }
  0xed   :  { %376 = vst.msk [vmem:[%s725_s6 + $0x24] sm:$0xf] %vm366_vm1, %v425_v52  ;;  %v292_v61 = vadd.f32 %v621_v21, %v269_v54  ;;  %v275_v62 = vmul.f32 %v616_v20, %v241_v59  ;;  %v270_v63 = vmul.f32 %v489_v60, %v616_v20  ;;  %v497_v0 = vpop.f32.mrb[6].mxu1  ;;  %v212_v1 = vpop.f32.mrb[7].mxu0 }
  0xee   :  { %v300_v3 = vadd.f32 %v621_v21, %v277_v57  ;;  %v290_v4 = vadd.f32 %v621_v21, %v267_v58  ;;  %v278_v5 = vmul.f32 %v497_v0, %v616_v20  ;;  %v268_v6 = vmul.f32 %v616_v20, %v212_v1  ;;  %v244_v7 = vpop.f32.mrb[7].mxu1 }
  0xef   :  { %v422_v9 = vpack.c.bf16 %v292_v61, %v292_v61  ;;  %v298_v10 = vadd.f32 %v621_v21, %v275_v62  ;;  %v293_v11 = vadd.f32 %v621_v21, %v270_v63  ;;  %v276_v12 = vmul.f32 %v616_v20, %v244_v7 }
  0xf0   :  { %v430_v13 = vpack.c.bf16 %v300_v3, %v300_v3  ;;  %v420_v14 = vpack.c.bf16 %v290_v4, %v290_v4  ;;  %v301_v15 = vadd.f32 %v621_v21, %v278_v5  ;;  %v291_v16 = vadd.f32 %v621_v21, %v268_v6 }
  0xf1   :  { %373 = vst.msk [vmem:[%s725_s6 + $0x18] sm:$0xf] %vm366_vm1, %v422_v9  ;;  %v428_v17 = vpack.c.bf16 %v298_v10, %v298_v10  ;;  %v423_v18 = vpack.c.bf16 %v293_v11, %v293_v11  ;;  %v299_v19 = vadd.f32 %v621_v21, %v276_v12 }
  0xf2   :  { %381 = vst.msk [vmem:[%s725_s6 + $0x38] sm:$0xf] %vm366_vm1, %v430_v13  ;;  %371 = vst.msk [vmem:[%s725_s6 + $0x10] sm:$0xf] %vm366_vm1, %v420_v14  ;;  %v431_v2 = vpack.c.bf16 %v301_v15, %v301_v15  ;;  %v421_v20 = vpack.c.bf16 %v291_v16, %v291_v16 }
  0xf3   :  { %379 = vst.msk [vmem:[%s725_s6 + $0x30] sm:$0xf] %vm366_vm1, %v428_v17  ;;  %374 = vst.msk [vmem:[%s725_s6 + $0x1c] sm:$0xf] %vm366_vm1, %v423_v18  ;;  %v429_v8 = vpack.c.bf16 %v299_v19, %v299_v19 }
  0xf4   :  { %382 = vst.msk [vmem:[%s725_s6 + $0x3c] sm:$0xf] %vm366_vm1, %v431_v2  ;;  %372 = vst.msk [vmem:[%s725_s6 + $0x14] sm:$0xf] %vm366_vm1, %v421_v20 }
  0xf5   :  { %380 = vst.msk [vmem:[%s725_s6 + $0x34] sm:$0xf] %vm366_vm1, %v429_v8 }

// kernel: forward.29
= control target key start
LH: loop header
LB: loop body
LE: loop exit
PB: predicated region body
PF: predicated region fallthrough
CT: control target
= control target key end

     0   :  { %s956_s6 = smov 0   ;;  %s1179_s0 = inlined_call_operand.vmem [shape: bf16[2,8,8,8], index: 0, kind: input, shape index: {}]   ;;  %s1180_s1 = inlined_call_operand.vmem [shape: bf16[2,4,4,8], index: 1, kind: output, shape index: {}]  }
   0x1 LB: > { %s864_s7 = sadd.s32 4294967295, %s943_s6   ;;  %p868_p0 = scmp.ge.s32.totalorder %s943_s6, 1  ;;  %s943_s6 = sphi %s956_s6, %s11_s6  }
   0x2   : > { %p87_p1 = scmp.lt.s32.totalorder %s943_s6, 3 }
   0x4   : > { %p88_p2 = pnand %p868_p0, %p87_p1 }
   0x6   : > { %91 = sbr.rel (%p88_p2) target bundleno = 84 (0x54), region = 24 }
   0xd   : > { %p107_p3 = scmp.lt.s32.totalorder %s864_s7, 1  ;;  %v145_v0 = vlaneseq  ;;  %v945_v1 = vmov 1983009808   ;;  %vm742_vm0 = vcmask 1041409   ;;  %vm745_vm1 = vcmask 1042434  }
   0xe   : > { %v143_v2 = vunpack.c.l.s4 %v945_v1  ;;  %vm748_vm2 = vcmask 1043459   ;;  %vm804_vm3 = vcmask 58368  }
   0xf   : > { %s1219_s7 = smov (!%p107_p3, %s864_s7), 1  ;;  %v146_v3 = vshrl.u32 %v145_v0, 7 }
  0x10   : > { %v144_v4 = vunpack.c.0.s8 %v143_v2  ;;  %s907_s8 = sshll.u32 %s1219_s7, 5  ;;  %s908_s12 = sshll.u32 %s1219_s7, 3 }
  0x11   : > { %s111_s11 = scalar_lea.vmem %s1179_s0, %s907_s8  ;;  %s116_s15 = scalar_lea.vmem %s1180_s1, %s908_s12 }
  0x12   : > { %v970_v5 = vsub.s32 %v144_v4, %v146_v3  ;;  %v910_v6 = vld [vmem:[%s111_s11] sm:$0xff]   ;;  %v925_v7 = vld [vmem:[%s111_s11 + $0x8] sm:$0xff]   ;;  %v926_v8 = vld [vmem:[%s111_s11 + $0x10] sm:$0xff]  }
  0x13   : > { %v911_v9 = vunpack.c.l.bf16 %v910_v6  ;;  %v912_v10 = vunpack.c.h.bf16 %v910_v6  ;;  %v915_v11 = vunpack.c.l.bf16 %v925_v7  ;;  %v916_v12 = vunpack.c.h.bf16 %v925_v7  ;;  %v927_v13 = vld [vmem:[%s111_s11 + $0x18] sm:$0xff]  }
  0x14   : > { %1194 = vst [vmem:[#allocation2_spill] sm:$0xff] %v970_v5  ;;  %v919_v14 = vunpack.c.l.bf16 %v926_v8  ;;  %v920_v15 = vunpack.c.h.bf16 %v926_v8  ;;  %v923_v16 = vunpack.c.l.bf16 %v927_v13  ;;  %v924_v17 = vunpack.c.h.bf16 %v927_v13 }
  0x15   : > { %v141_v18 = vcombine.high %v911_v9, %v911_v9  ;;  %v973_v19 = vrot.slane %v911_v9, %v970_v5  ;;  %v158_v20 = vcombine.high %v912_v10, %v912_v10  ;;  %v976_v21 = vrot.slane %v912_v10, %v970_v5 }
  0x16   : > { %v175_v22 = vcombine.high %v915_v11, %v915_v11  ;;  %v979_v23 = vrot.slane %v915_v11, %v970_v5  ;;  %v192_v24 = vcombine.high %v916_v12, %v916_v12  ;;  %v982_v25 = vrot.slane %v916_v12, %v970_v5 }
  0x17   : > { %v985_v26 = vrot.slane %v141_v18, %v970_v5  ;;  %v989_v27 = vcombine.high %v973_v19, %v973_v19  ;;  %v992_v28 = vrot.slane %v158_v20, %v970_v5  ;;  %v996_v29 = vcombine.high %v976_v21, %v976_v21 }
  0x18   : > { %v999_v30 = vrot.slane %v175_v22, %v970_v5  ;;  %v1003_v31 = vcombine.high %v979_v23, %v979_v23  ;;  %v1006_v32 = vrot.slane %v192_v24, %v970_v5  ;;  %v1010_v33 = vcombine.high %v982_v25, %v982_v25 }
  0x19   : > { %v157_v34 = vcombine.high %v985_v26, %v985_v26  ;;  %v174_v35 = vcombine.high %v992_v28, %v992_v28  ;;  %v209_v36 = vcombine.high %v919_v14, %v919_v14  ;;  %v1017_v37 = vrot.slane %v919_v14, %v970_v5 }
  0x1a   : > { %v1021_v38 = vcombine.high %v999_v30, %v999_v30  ;;  %v1025_v39 = vcombine.high %v1006_v32, %v1006_v32  ;;  %v226_v40 = vcombine.high %v920_v15, %v920_v15  ;;  %v1028_v41 = vrot.slane %v920_v15, %v970_v5 }
  0x1b   : > { %v1031_v42 = vrot.slane %v209_v36, %v970_v5  ;;  %v1035_v43 = vcombine.high %v1017_v37, %v1017_v37  ;;  %v243_v44 = vcombine.high %v923_v16, %v923_v16  ;;  %v1038_v45 = vrot.slane %v923_v16, %v970_v5 }
  0x1c   : > { %1195 = vst [vmem:[#allocation3_spill] sm:$0xff] %v1028_v41  ;;  %v1041_v46 = vrot.slane %v226_v40, %v970_v5  ;;  %v1045_v47 = vcombine.high %v1028_v41, %v1028_v41  ;;  %v260_v48 = vcombine.high %v924_v17, %v924_v17  ;;  %v1048_v49 = vrot.slane %v924_v17, %v970_v5 }
  0x1d   : > { %1196 = vst [vmem:[#allocation4_spill] sm:$0xff] %v1031_v42  ;;  %1197 = vst [vmem:[#allocation5_spill] sm:$0xff] %v1035_v43  ;;  %v225_v50 = vcombine.high %v1031_v42, %v1031_v42  ;;  %v1053_v51 = vrot.slane %v243_v44, %v970_v5  ;;  %v1057_v52 = vcombine.high %v1038_v45, %v1038_v45  ;;  %v873_v53 = vrot.slane %v973_v19, 9 }
  0x1e   : > { %1198 = vst [vmem:[#allocation6_spill] sm:$0xff] %v1038_v45  ;;  %1199 = vst [vmem:[#allocation7_spill] sm:$0xff] %v1041_v46  ;;  %v242_v54 = vcombine.high %v1041_v46, %v1041_v46  ;;  %v1063_v55 = vrot.slane %v260_v48, %v970_v5  ;;  %v1067_v56 = vcombine.high %v1048_v49, %v1048_v49  ;;  %v874_v57 = vrot.slane %v989_v27, 9 }
  0x1f   : > { %1200 = vst [vmem:[#allocation8_spill] sm:$0xff] %v1045_v47  ;;  %1201 = vst [vmem:[#allocation9_spill] sm:$0xff] %v1048_v49  ;;  %v259_v58 = vcombine.high %v1053_v51, %v1053_v51  ;;  %v875_v59 = vrot.slane %v985_v26, 9  ;;  %v876_v60 = vrot.slane %v157_v34, 9  ;;  %v877_v61 = vrot.slane %v976_v21, 9 }
  0x20   : > { %1202 = vst [vmem:[#allocation10_spill] sm:$0xff] %v1053_v51  ;;  %1203 = vst [vmem:[#allocation11_spill] sm:$0xff] %v1057_v52  ;;  %v276_v62 = vcombine.high %v1063_v55, %v1063_v55  ;;  %v878_v63 = vrot.slane %v996_v29, 9  ;;  %v879_v0 = vrot.slane %v992_v28, 9  ;;  %v880_v1 = vrot.slane %v174_v35, 9 }
  0x21   : > { %1204 = vst [vmem:[#allocation12_spill] sm:$0xff] %v1063_v55  ;;  %1205 = vst [vmem:[#allocation13_spill] sm:$0xff] %v1067_v56  ;;  %v881_v2 = vrot.slane %v979_v23, 9  ;;  %v882_v3 = vrot.slane %v1003_v31, 9  ;;  %v883_v4 = vrot.slane %v999_v30, 9  ;;  %v884_v6 = vrot.slane %v1021_v38, 9 }
  0x22   : > { %v885_v7 = vrot.slane %v982_v25, 9  ;;  %v886_v8 = vrot.slane %v1010_v33, 9  ;;  %v887_v9 = vrot.slane %v1006_v32, 9  ;;  %v888_v10 = vrot.slane %v1025_v39, 9 }
  0x23   : > { %v889_v11 = vrot.slane %v1017_v37, 9  ;;  %v890_v12 = vrot.slane %v1035_v43, 9  ;;  %v891_v13 = vrot.slane %v1031_v42, 9  ;;  %v892_v14 = vrot.slane %v225_v50, 9 }
  0x24   : > { %v893_v15 = vrot.slane %v1028_v41, 9  ;;  %v894_v16 = vrot.slane %v1045_v47, 9  ;;  %v895_v17 = vrot.slane %v1041_v46, 9  ;;  %v896_v18 = vrot.slane %v242_v54, 9 }
  0x25   : > { %v897_v20 = vrot.slane %v1038_v45, 9  ;;  %v898_v22 = vrot.slane %v1057_v52, 9  ;;  %v899_v24 = vrot.slane %v1053_v51, 9  ;;  %v900_v36 = vrot.slane %v259_v58, 9 }
  0x26   : > { %v901_v40 = vrot.slane %v1048_v49, 9  ;;  %v902_v44 = vrot.slane %v1067_v56, 9  ;;  %v903_v48 = vrot.slane %v1063_v55, 9  ;;  %v904_v5 = vrot.slane %v276_v62, 9 }
  0x27   : > { %v405_v41 = vadd.f32 %v873_v53, %v973_v19  ;;  %v406_v47 = vadd.f32 %v874_v57, %v989_v27  ;;  %v407_v46 = vadd.f32 %v875_v59, %v985_v26  ;;  %v408_v42 = vadd.f32 %v876_v60, %v157_v34  ;;  %v1207_v53 = vld [vmem:[#allocation4_spill] sm:$0xff] }
  0x28   : > { %v409_v45 = vadd.f32 %v877_v61, %v976_v21  ;;  %v410_v52 = vadd.f32 %v878_v63, %v996_v29  ;;  %v411_v51 = vadd.f32 %v879_v0, %v992_v28  ;;  %v412_v43 = vadd.f32 %v880_v1, %v174_v35  ;;  %v1206_v28 = vld [vmem:[#allocation5_spill] sm:$0xff]  ;;  %v1211_v63 = vld [vmem:[#allocation6_spill] sm:$0xff]  ;;  %v1212_v0 = vld [vmem:[#allocation11_spill] sm:$0xff] }
  0x29   : > { %v413_v49 = vadd.f32 %v881_v2, %v979_v23  ;;  %v414_v56 = vadd.f32 %v882_v3, %v1003_v31  ;;  %v415_v55 = vadd.f32 %v883_v4, %v999_v30  ;;  %v416_v19 = vadd.f32 %v884_v6, %v1021_v38  ;;  %v1208_v31 = vld [vmem:[#allocation3_spill] sm:$0xff]  ;;  %v1209_v30 = vld [vmem:[#allocation8_spill] sm:$0xff]  ;;  %v1213_v1 = vld [vmem:[#allocation10_spill] sm:$0xff] }
  0x2a   : > { %v417_v27 = vadd.f32 %v885_v7, %v982_v25  ;;  %v418_v26 = vadd.f32 %v886_v8, %v1010_v33  ;;  %v419_v34 = vadd.f32 %v887_v9, %v1006_v32  ;;  %v420_v21 = vadd.f32 %v888_v10, %v1025_v39  ;;  %v1210_v38 = vld [vmem:[#allocation7_spill] sm:$0xff]  ;;  %v1215_v4 = vld [vmem:[#allocation13_spill] sm:$0xff]  ;;  %v1216_v7 = vld [vmem:[#allocation12_spill] sm:$0xff] }
  0x2b   : > { %v421_v29 = vadd.f32 %v889_v11, %v1017_v37  ;;  %v422_v35 = vadd.f32 %v890_v12, %v1206_v28  ;;  %v423_v23 = vadd.f32 %v891_v13, %v1207_v53  ;;  %v424_v57 = vadd.f32 %v892_v14, %v225_v50  ;;  %v1214_v37 = vld [vmem:[#allocation9_spill] sm:$0xff] }
  0x2c   : > { %v425_v59 = vadd.f32 %v893_v15, %v1208_v31  ;;  %v426_v60 = vadd.f32 %v894_v16, %v1209_v30  ;;  %v427_v61 = vadd.f32 %v895_v17, %v1210_v38  ;;  %v428_v25 = vadd.f32 %v896_v18, %v242_v54 }
  0x2d   : > { %v429_v33 = vadd.f32 %v897_v20, %v1211_v63  ;;  %v430_v32 = vadd.f32 %v898_v22, %v1212_v0  ;;  %v431_v39 = vadd.f32 %v899_v24, %v1213_v1  ;;  %v432_v2 = vadd.f32 %v900_v36, %v259_v58 }
  0x2e   : > { %v433_v3 = vadd.f32 %v901_v40, %v1214_v37  ;;  %v434_v6 = vadd.f32 %v902_v44, %v1215_v4  ;;  %v435_v50 = vadd.f32 %v903_v48, %v1216_v7  ;;  %v436_v8 = vadd.f32 %v904_v5, %v276_v62 }
  0x2f   : > { %v437_v9 = vadd.f32 %v409_v45, %v405_v41  ;;  %v438_v10 = vadd.f32 %v410_v52, %v406_v47  ;;  %v439_v11 = vadd.f32 %v411_v51, %v407_v46  ;;  %v440_v12 = vadd.f32 %v412_v43, %v408_v42 }
  0x30   : > { %v441_v13 = vadd.f32 %v417_v27, %v413_v49  ;;  %v442_v54 = vadd.f32 %v418_v26, %v414_v56  ;;  %v443_v14 = vadd.f32 %v419_v34, %v415_v55  ;;  %v444_v15 = vadd.f32 %v420_v21, %v416_v19 }
  0x31   : > { %v445_v16 = vadd.f32 %v425_v59, %v421_v29  ;;  %v446_v17 = vadd.f32 %v426_v60, %v422_v35  ;;  %v447_v18 = vadd.f32 %v427_v61, %v423_v23  ;;  %v448_v20 = vadd.f32 %v428_v25, %v424_v57  ;;  %v1217_v61 = vld [vmem:[#allocation2_spill] sm:$0xff] }
  0x32   : > { %v449_v58 = vadd.f32 %v433_v3, %v429_v33  ;;  %v450_v22 = vadd.f32 %v434_v6, %v430_v32  ;;  %v451_v24 = vadd.f32 %v435_v50, %v431_v39  ;;  %v452_v36 = vadd.f32 %v436_v8, %v432_v2 }
  0x33   : > { %v453_v40 = vmul.f32 0.25, %v437_v9  ;;  %v454_v44 = vmul.f32 0.25, %v438_v10  ;;  %v455_v48 = vmul.f32 0.25, %v439_v11  ;;  %v456_v5 = vmul.f32 0.25, %v440_v12 }
  0x34   : > { %v457_v41 = vmul.f32 0.25, %v441_v13  ;;  %v458_v45 = vmul.f32 0.25, %v442_v54  ;;  %v459_v46 = vmul.f32 0.25, %v443_v14  ;;  %v460_v42 = vmul.f32 0.25, %v444_v15 }
  0x35   : > { %v461_v43 = vmul.f32 0.25, %v445_v16  ;;  %v462_v47 = vmul.f32 0.25, %v446_v17  ;;  %v463_v49 = vmul.f32 0.25, %v447_v18  ;;  %v464_v51 = vmul.f32 0.25, %v448_v20 }
  0x36   : > { %v465_v52 = vmul.f32 0.25, %v449_v58  ;;  %v466_v55 = vmul.f32 0.25, %v450_v22  ;;  %v467_v56 = vmul.f32 0.25, %v451_v24  ;;  %v468_v62 = vmul.f32 0.25, %v452_v36 }
  0x37   : > { %v469_v19 = vpack.c.bf16 %v453_v40, %v453_v40  ;;  %v470_v27 = vpack.c.bf16 %v454_v44, %v454_v44  ;;  %v471_v26 = vpack.c.bf16 %v455_v48, %v455_v48  ;;  %v472_v34 = vpack.c.bf16 %v456_v5, %v456_v5 }
  0x38   : > { %v473_v21 = vpack.c.bf16 %v457_v41, %v457_v41  ;;  %v474_v29 = vpack.c.bf16 %v458_v45, %v458_v45  ;;  %v475_v28 = vpack.c.bf16 %v459_v46, %v459_v46  ;;  %v476_v35 = vpack.c.bf16 %v460_v42, %v460_v42 }
  0x39   : > { %v477_v53 = vpack.c.bf16 %v461_v43, %v461_v43  ;;  %v478_v23 = vpack.c.bf16 %v462_v47, %v462_v47  ;;  %v479_v57 = vpack.c.bf16 %v463_v49, %v463_v49  ;;  %v480_v31 = vpack.c.bf16 %v464_v51, %v464_v51 }
  0x3a   : > { %v481_v59 = vpack.c.bf16 %v465_v52, %v465_v52  ;;  %v482_v30 = vpack.c.bf16 %v466_v55, %v466_v55  ;;  %v483_v60 = vpack.c.bf16 %v467_v56, %v467_v56  ;;  %v484_v38 = vpack.c.bf16 %v468_v62, %v468_v62 }
  0x3b   : > { %v507_v25 = vrot.slane %v469_v19, %v1217_v61  ;;  %v514_v63 = vrot.slane %v470_v27, %v1217_v61  ;;  %v521_v33 = vrot.slane %v471_v26, %v1217_v61  ;;  %v528_v0 = vrot.slane %v472_v34, %v1217_v61 }
  0x3c   : > { %v535_v32 = vrot.slane %v473_v21, %v1217_v61  ;;  %v542_v1 = vrot.slane %v474_v29, %v1217_v61  ;;  %v549_v39 = vrot.slane %v475_v28, %v1217_v61  ;;  %v556_v2 = vrot.slane %v476_v35, %v1217_v61 }
  0x3d   : > { %v563_v37 = vrot.slane %v477_v53, %v1217_v61  ;;  %v570_v3 = vrot.slane %v478_v23, %v1217_v61  ;;  %v577_v4 = vrot.slane %v479_v57, %v1217_v61  ;;  %v584_v6 = vrot.slane %v480_v31, %v1217_v61 }
  0x3e   : > { %v591_v7 = vrot.slane %v481_v59, %v1217_v61  ;;  %v598_v50 = vrot.slane %v482_v30, %v1217_v61  ;;  %v605_v8 = vrot.slane %v483_v60, %v1217_v61  ;;  %v612_v9 = vrot.slane %v484_v38, %v1217_v61 }
  0x3f   : > { %v619_v10 = vrot.slane %v507_v25, %v1217_v61  ;;  %v626_v11 = vrot.slane %v514_v63, %v1217_v61  ;;  %v633_v12 = vrot.slane %v521_v33, %v1217_v61  ;;  %v640_v13 = vrot.slane %v528_v0, %v1217_v61 }
  0x40   : > { %v647_v54 = vrot.slane %v535_v32, %v1217_v61  ;;  %v654_v14 = vrot.slane %v542_v1, %v1217_v61  ;;  %v661_v15 = vrot.slane %v549_v39, %v1217_v61  ;;  %v668_v16 = vrot.slane %v556_v2, %v1217_v61 }
  0x41   : > { %v675_v17 = vrot.slane %v563_v37, %v1217_v61  ;;  %v682_v18 = vrot.slane %v570_v3, %v1217_v61  ;;  %v689_v20 = vrot.slane %v577_v4, %v1217_v61  ;;  %v696_v58 = vrot.slane %v584_v6, %v1217_v61 }
  0x42   : > { %v703_v22 = vrot.slane %v591_v7, %v1217_v61  ;;  %v710_v24 = vrot.slane %v598_v50, %v1217_v61  ;;  %v717_v36 = vrot.slane %v605_v8, %v1217_v61  ;;  %v724_v40 = vrot.slane %v612_v9, %v1217_v61 }
  0x43   : > { %v725_v44 = vunpack.c.l.b16 %v619_v10  ;;  %v726_v48 = vunpack.c.l.b16 %v626_v11  ;;  %v727_v5 = vunpack.c.l.b16 %v633_v12  ;;  %v728_v41 = vunpack.c.l.b16 %v640_v13 }
  0x44   : > { %v729_v45 = vunpack.c.l.b16 %v647_v54  ;;  %v730_v46 = vunpack.c.l.b16 %v654_v14  ;;  %v731_v42 = vunpack.c.l.b16 %v661_v15  ;;  %v732_v43 = vunpack.c.l.b16 %v668_v16 }
  0x45   : > { %v733_v47 = vunpack.c.l.b16 %v675_v17  ;;  %v734_v49 = vunpack.c.l.b16 %v682_v18  ;;  %v735_v51 = vunpack.c.l.b16 %v689_v20  ;;  %v736_v52 = vunpack.c.l.b16 %v696_v58 }
  0x46   : > { %v737_v55 = vunpack.c.l.b16 %v703_v22  ;;  %v738_v56 = vunpack.c.l.b16 %v710_v24  ;;  %v739_v62 = vunpack.c.l.b16 %v717_v36  ;;  %v740_v19 = vunpack.c.l.b16 %v724_v40 }
  0x47   : > { %v741_v27 = vrot.slane %v726_v48, 7  ;;  %v744_v26 = vrot.slane %v727_v5, 6  ;;  %v747_v34 = vrot.slane %v728_v41, 5  ;;  %v750_v21 = vrot.slane %v730_v46, 7 }
  0x48   : > { %v752_v29 = vrot.slane %v731_v42, 6  ;;  %v754_v28 = vrot.slane %v732_v43, 5  ;;  %v756_v35 = vrot.slane %v734_v49, 7  ;;  %v758_v53 = vrot.slane %v735_v51, 6 }
  0x49   : > { %v743_v23 = vsel %vm742_vm0, %v741_v27, %v725_v44  ;;  %v751_v57 = vsel %vm742_vm0, %v750_v21, %v729_v45  ;;  %v760_v31 = vrot.slane %v736_v52, 5  ;;  %v762_v59 = vrot.slane %v738_v56, 7 }
  0x4a   : > { %v746_v30 = vsel %vm745_vm1, %v744_v26, %v743_v23  ;;  %v753_v60 = vsel %vm745_vm1, %v752_v29, %v751_v57  ;;  %v757_v38 = vsel %vm742_vm0, %v756_v35, %v733_v47  ;;  %v764_v25 = vrot.slane %v739_v62, 6 }
  0x4b   : > { %v749_v63 = vsel %vm748_vm2, %v747_v34, %v746_v30  ;;  %v755_v33 = vsel %vm748_vm2, %v754_v28, %v753_v60  ;;  %v759_v0 = vsel %vm745_vm1, %v758_v53, %v757_v38  ;;  %v763_v32 = vsel %vm742_vm0, %v762_v59, %v737_v55 }
  0x4c   : > { %v761_v1 = vsel %vm748_vm2, %v760_v31, %v759_v0  ;;  %v765_v39 = vsel %vm745_vm1, %v764_v25, %v763_v32  ;;  %v766_v2 = vrot.slane %v740_v19, 5  ;;  %v768_v37 = vpack.c.b16 %v749_v63, %v749_v63 }
  0x4d   : > { %v769_v3 = vpack.c.b16 %v755_v33, %v755_v33  ;;  %v770_v4 = vpack.c.b16 %v761_v1, %v761_v1 }
  0x4e   : > { %v767_v6 = vsel %vm748_vm2, %v766_v2, %v765_v39  ;;  %v778_v7 = vrot.slane %v768_v37, %v1217_v61 }
  0x4f   : > { %v771_v50 = vpack.c.b16 %v767_v6, %v767_v6  ;;  %v785_v8 = vrot.slane %v769_v3, %v1217_v61  ;;  %v792_v9 = vrot.slane %v770_v4, %v1217_v61 }
  0x50   : > { %805 = vst.msk [vmem:[%s116_s15] sm:$0x3] %vm804_vm3, %v778_v7 }
  0x51   : > { %v799_v10 = vrot.slane %v771_v50, %v1217_v61  ;;  %806 = vst.msk [vmem:[%s116_s15 + $0x2] sm:$0x3] %vm804_vm3, %v785_v8  ;;  %807 = vst.msk [vmem:[%s116_s15 + $0x4] sm:$0x3] %vm804_vm3, %v792_v9 }
  0x53   : > { %808 = vst.msk [vmem:[%s116_s15 + $0x6] sm:$0x3] %vm804_vm3, %v799_v10 }
  0x54 PF: > { %s11_s6 = sadd.s32 1, %s943_s6  }
  0x55   : > { %p8_p4 = scmp.ge.s32.totalorder %s11_s6, 4  }
  0x57   :  { %10 = sbr.rel (!%p8_p4) target bundleno = 1 (0x1), region = 54 }

// kernel: forward.30
= control target key start
LH: loop header
LB: loop body
LE: loop exit
PB: predicated region body
PF: predicated region fallthrough
CT: control target
= control target key end

     0   :  { %vm44_vm0 = vcmask 195584   ;;  %vm51_vm1 = vcmask 1043456   ;;  %vm146_vm2 = vcmask 76800   ;;  %s243_s1 = inlined_call_operand.vmem [shape: bf16[24,10], index: 1, kind: input, shape index: {}]   ;;  %s244_s0 = inlined_call_operand.vmem [shape: bf16[32,24], index: 0, kind: input, shape index: {}]   ;;  %s245_s2 = inlined_call_operand.vmem [shape: f32[1,10], index: 2, kind: input, shape index: {}]   ;;  %s246_s3 = inlined_call_operand.vmem [shape: f32[1,10], index: 3, kind: input, shape index: {}]   ;;  %s247_s4 = inlined_call_operand.vmem [shape: bf16[32,10], index: 4, kind: output, shape index: {}]  }
   0x1   :  { %v184_v0 = vld [vmem:[%s243_s1] sm:$0xff]   ;;  %v185_v1 = vld [vmem:[%s243_s1 + $0x8] ss:$0 sps:$4 sm:$0xff]  }
   0x2   :  { %v186_v2 = vld [vmem:[%s244_s0] sm:$0xff]   ;;  %175 = vmatprep.subr.bf16.mxu0 %v184_v0  ;;  %v53_v3 = vsel %vm51_vm1, %v185_v1, 0  ;;  %v187_v4 = vld [vmem:[%s244_s0 + $0x8] sm:$0xff]  }
   0x3   :  { %176 = vmatpush3.bf16.msra.mxu0 %v184_v0  ;;  %179 = vmatprep.mubr.msk.bf16.mxu0 %vm44_vm0, %v186_v2  ;;  %v161_v5 = vld [vmem:[%s245_s2] ss:$0 sm:$0xff] }
   0x4   :  { %183 = vmatprep.subr.msk.bf16.mxu0 %vm51_vm1, %v185_v1  ;;  %v162_v7 = vld [vmem:[%s246_s3] ss:$0 sm:$0xff] }
   0x7   :  { %178 = vmatpush3.bf16.msra.mxu0 %v53_v3 }
   0xa   :  { %180 = vmatmul.mubr.msk.bf16.vlgmr.msra.gmra.mrb[0].mxu0 %vm44_vm0, %v187_v4 }
  0xdd   :  { %v181_v6 = vpop.f32.mrb[0].mxu0 }
  0xde   :  { %v113_v8 = vmul.f32 %v181_v6, %v161_v5  ;;  %v89_v9 = vpop.f32.mrb[1].mxu0 }
  0xdf   :  { %v111_v10 = vmul.f32 %v161_v5, %v89_v9  ;;  %v182_v11 = vpop.f32.mrb[2].mxu0 }
  0xe0   :  { %v124_v12 = vadd.f32 %v162_v7, %v113_v8  ;;  %v114_v13 = vmul.f32 %v182_v11, %v161_v5  ;;  %v92_v14 = vpop.f32.mrb[3].mxu0 }
  0xe1   :  { %v122_v15 = vadd.f32 %v162_v7, %v111_v10  ;;  %v112_v16 = vmul.f32 %v161_v5, %v92_v14 }
  0xe2   :  { %v128_v17 = vmax.f32 %v124_v12, 0.0  ;;  %v125_v18 = vadd.f32 %v162_v7, %v114_v13 }
  0xe3   :  { %v126_v19 = vmax.f32 %v122_v15, 0.0  ;;  %v123_v20 = vadd.f32 %v162_v7, %v112_v16 }
  0xe4   :  { %v169_v21 = vpack.c.bf16 %v128_v17, %v128_v17  ;;  %v129_v22 = vmax.f32 %v125_v18, 0.0 }
  0xe5   :  { %v167_v23 = vpack.c.bf16 %v126_v19, %v126_v19  ;;  %v127_v24 = vmax.f32 %v123_v20, 0.0 }
  0xe6   :  { %149 = vst.msk [vmem:[%s247_s4 + $0x8] sm:$0xf] %vm146_vm2, %v169_v21  ;;  %v170_v25 = vpack.c.bf16 %v129_v22, %v129_v22 }
  0xe7   :  { %147 = vst.msk [vmem:[%s247_s4] sm:$0xf] %vm146_vm2, %v167_v23  ;;  %v168_v26 = vpack.c.bf16 %v127_v24, %v127_v24 }
  0xe8   :  { %150 = vst.msk [vmem:[%s247_s4 + $0xc] sm:$0xf] %vm146_vm2, %v170_v25 }
  0xe9   :  { %148 = vst.msk [vmem:[%s247_s4 + $0x4] sm:$0xf] %vm146_vm2, %v168_v26 }

// kernel: forward.32
= control target key start
LH: loop header
LB: loop body
LE: loop exit
PB: predicated region body
PF: predicated region fallthrough
CT: control target
= control target key end

     0   :  { %s572_s15 = smov 0   ;;  %s628_s0 = inlined_call_operand.vmem [shape: bf16[2,6,6,24], index: 0, kind: input, shape index: {}]   ;;  %s629_s1 = inlined_call_operand.vmem [shape: bf16[24,2], index: 1, kind: input, shape index: {}]   ;;  %s630_s2 = inlined_call_operand.vmem [shape: f32[1,2], index: 2, kind: input, shape index: {}]   ;;  %s631_s3 = inlined_call_operand.vmem [shape: f32[1,2], index: 3, kind: input, shape index: {}]   ;;  %s632_s4 = inlined_call_operand.vmem [shape: bf16[2,4,4,2], index: 4, kind: output, shape index: {}]  }
   0x1 LB: > { %s493_s16 = sadd.s32 4294967295, %s542_s15   ;;  %p497_p0 = scmp.ge.s32.totalorder %s542_s15, 1  ;;  %s542_s15 = sphi %s572_s15, %s14_s15  }
   0x2   : > { %p162_p1 = scmp.lt.s32.totalorder %s542_s15, 3 }
   0x4   : > { %p163_p2 = pnand %p497_p0, %p162_p1 }
   0x5   : > { %v534_v0 = vld [vmem:[%s629_s1] sm:$0xff] (!%p163_p2)   ;;  %v544_v1 = vmov (!%p163_p2), 0.0   ;;  %v535_v2 = vld [vmem:[%s629_s1 + $0x8] ss:$0 sps:$4 sm:$0xff] (!%p163_p2)   ;;  %vm358_vm0 = vcmask (!%p163_p2), 1043456   ;;  %vm545_vm1 = vmmov (!%p163_p2), 0   ;;  %v333_v57 = vlaneseq (!%p163_p2) }
   0x6   : > { %166 = sbr.rel (%p163_p2) target bundleno = 275 (0x113), region = 36  ;;  %514 = vmatprep.subr.bf16.mxu0 (!%p163_p2), %v544_v1  ;;  %518 = vmatprep.mubr.msk.bf16.mxu0 (!%p163_p2), %vm545_vm1, %v544_v1  ;;  %p188_p3 = scmp.lt.s32.totalorder (!%p163_p2), %s493_s16, 1  ;;  %v360_v3 = vsel (!%p163_p2), %vm358_vm0, %v535_v2, 0  ;;  %vm354_vm2 = vcmask (!%p163_p2), 195584   ;;  %vm433_vm3 = vcmask (!%p163_p2), 9216  }
   0x7   : > { %515 = vmatpush3.bf16.msra.mxu0 (!%p163_p2), %v534_v0 }
   0x8   : > { %516 = vmatprep.subr.bf16.mxu0 (!%p163_p2), %v544_v1  ;;  %v546_v1 = vmov (!%p163_p2), 1983009808  }
   0x9   : > { %v331_v2 = vunpack.c.l.s4 (!%p163_p2), %v546_v1 }
   0xb   : > { %517 = vmatpush3.bf16.msra.mxu0 (!%p163_p2), %v360_v3 }
   0xd   : > { %s634_s16 = smov (!%p188_p3, %s493_s16), 1 }
   0xe   : > { %s522_s21 = smul.u32 24, %s634_s16  ;;  %s510_s29 = sshll.u32 %s634_s16, 3 }
   0xf   : > { %s197_s6 = scalar_lea.vmem %s632_s4, %s510_s29 }
  0x10   : > { %s192_s24 = scalar_lea.vmem %s628_s0, %s522_s21 }
  0x11   : > { %v199_v4 = vld [vmem:[%s192_s24] sm:$0x7]  ;;  %v592_v5 = vld [vmem:[%s192_s24 + $0x4] sm:$0x7]  ;;  %v594_v6 = vld [vmem:[%s192_s24 + $0x8] sm:$0x7] }
  0x12   : > { %v596_v7 = vld [vmem:[%s192_s24 + $0xc] sm:$0x7]  ;;  %v206_v8 = vshrl.u32 %v199_v4, 16  ;;  %v209_v9 = vshll.u32 %v199_v4, 16  ;;  %v215_v10 = vshrl.u32 %v592_v5, 16  ;;  %v218_v11 = vshll.u32 %v592_v5, 16 }
  0x13   : > { %v224_v12 = vshrl.u32 %v594_v6, 16  ;;  %v227_v13 = vshll.u32 %v594_v6, 16  ;;  %v233_v14 = vshrl.u32 %v596_v7, 16  ;;  %v236_v15 = vshll.u32 %v596_v7, 16  ;;  %v203_v20 = vld [vmem:[%s192_s24 + $0x10] sm:$0x7] }
  0x14   : > { %v208_v16 = vrot.slane %v206_v8, 4  ;;  %v211_v17 = vrot.slane %v209_v9, 5  ;;  %v217_v18 = vrot.slane %v215_v10, 4  ;;  %v220_v19 = vrot.slane %v218_v11, 5  ;;  %v204_v33 = vld [vmem:[%s192_s24 + $0x14] sm:$0x7] }
  0x15   : > { %v226_v21 = vrot.slane %v224_v12, 4  ;;  %v229_v22 = vrot.slane %v227_v13, 5  ;;  %v235_v23 = vrot.slane %v233_v14, 4  ;;  %v238_v24 = vrot.slane %v236_v15, 5 }
  0x16   : > { %v212_v25 = vor.u32 %v211_v17, %v208_v16  ;;  %v221_v26 = vor.u32 %v220_v19, %v217_v18  ;;  %v501_v27 = vrot.slane %v199_v4, 9  ;;  %v255_v28 = vrot.slane %v592_v5, 5 }
  0x17   : > { %v230_v29 = vor.u32 %v229_v22, %v226_v21  ;;  %v239_v30 = vor.u32 %v238_v24, %v235_v23  ;;  %v257_v31 = vrot.slane %v594_v6, 5  ;;  %v259_v32 = vrot.slane %v596_v7, 5 }
  0x18   : > { %v213_v34 = vrot.slane %v212_v25, 4  ;;  %v222_v35 = vrot.slane %v221_v26, 4  ;;  %v256_v36 = vrot.slane %v255_v28, 4  ;;  %v274_v37 = vshrl.u32 %v203_v20, 16 }
  0x19   : > { %v231_v38 = vrot.slane %v230_v29, 4  ;;  %v240_v39 = vrot.slane %v239_v30, 4  ;;  %v258_v40 = vrot.slane %v257_v31, 4  ;;  %v260_v41 = vrot.slane %v259_v32, 4 }
  0x1a   : > { %v245_v42 = vmax.bf16 %v213_v34, %v199_v4  ;;  %v246_v43 = vmax.bf16 %v222_v35, %v592_v5  ;;  %v276_v44 = vrot.slane %v274_v37, 4  ;;  %v277_v45 = vshll.u32 %v203_v20, 16  ;;  %v507_v37 = vld [vmem:[%s631_s3] ss:$0 sm:$0xff] }
  0x1b   : > { %v247_v46 = vmax.bf16 %v231_v38, %v594_v6  ;;  %v248_v47 = vmax.bf16 %v240_v39, %v596_v7  ;;  %v288_v48 = vrot.slane %v203_v20, 5  ;;  %v300_v49 = vshrl.u32 %v204_v33, 16 }
  0x1c   : > { %v265_v50 = vmax.bf16 %v501_v27, %v245_v42  ;;  %v266_v51 = vmax.bf16 %v256_v36, %v246_v43  ;;  %v279_v52 = vrot.slane %v277_v45, 5  ;;  %v303_v53 = vshll.u32 %v204_v33, 16 }
  0x1d   : > { %v267_v54 = vmax.bf16 %v258_v40, %v247_v46  ;;  %v268_v55 = vmax.bf16 %v260_v41, %v248_v47  ;;  %v302_v56 = vrot.slane %v300_v49, 4  ;;  %v289_v0 = vrot.slane %v288_v48, 4 }
  0x1e   : > { %v269_v58 = vmax.bf16 %v265_v50, %v592_v5  ;;  %v270_v59 = vmax.bf16 %v266_v51, %v594_v6  ;;  %v280_v60 = vor.u32 %v279_v52, %v276_v44  ;;  %v305_v61 = vrot.slane %v303_v53, 5 }
  0x1f   : > { %v271_v62 = vmax.bf16 %v267_v54, %v596_v7  ;;  %v272_v63 = vmax.bf16 %v268_v55, %v203_v20  ;;  %v332_v5 = vunpack.c.0.s8 %v331_v2  ;;  %v334_v15 = vshrl.u32 %v333_v57, 7 }
  0x20   : > { %v281_v3 = vrot.slane %v280_v60, 4  ;;  %v283_v4 = vmax.bf16 %v269_v58, %v222_v35  ;;  %v284_v8 = vmax.bf16 %v270_v59, %v231_v38  ;;  %v306_v9 = vor.u32 %v305_v61, %v302_v56 }
  0x21   : > { %v285_v10 = vmax.bf16 %v271_v62, %v240_v39  ;;  %v502_v25 = vrot.slane %v204_v33, 9  ;;  %v335_v30 = vsub.s32 %v332_v5, %v334_v15 }
  0x22   : > { %v286_v11 = vmax.bf16 %v281_v3, %v272_v63  ;;  %v291_v12 = vmax.bf16 %v283_v4, %v256_v36  ;;  %v292_v13 = vmax.bf16 %v284_v8, %v258_v40  ;;  %v307_v19 = vrot.slane %v306_v9, 4 }
  0x23   : > { %v293_v14 = vmax.bf16 %v285_v10, %v260_v41 }
  0x24   : > { %v294_v16 = vmax.bf16 %v289_v0, %v286_v11  ;;  %v295_v17 = vmax.bf16 %v291_v12, %v594_v6  ;;  %v296_v18 = vmax.bf16 %v292_v13, %v596_v7 }
  0x25   : > { %v297_v21 = vmax.bf16 %v293_v14, %v203_v20  ;;  %v506_v20 = vld [vmem:[%s630_s2] ss:$0 sm:$0xff] }
  0x26   : > { %v298_v22 = vmax.bf16 %v294_v16, %v204_v33  ;;  %v309_v23 = vmax.bf16 %v295_v17, %v231_v38  ;;  %v310_v24 = vmax.bf16 %v296_v18, %v240_v39 }
  0x27   : > { %v311_v26 = vmax.bf16 %v297_v21, %v281_v3 }
  0x28   : > { %v312_v27 = vmax.bf16 %v307_v19, %v298_v22  ;;  %v317_v28 = vmax.bf16 %v309_v23, %v258_v40  ;;  %v318_v29 = vmax.bf16 %v310_v24, %v260_v41 }
  0x29   : > { %v319_v31 = vmax.bf16 %v311_v26, %v289_v0 }
  0x2a   : > { %v320_v32 = vmax.bf16 %v502_v25, %v312_v27  ;;  %v328_v34 = vcombine.low %v317_v28, %v318_v29 }
  0x2c   : > { %v329_v35 = vcombine.low %v319_v31, %v320_v32  ;;  %v336_v36 = vrot.slane %v328_v34, %v335_v30 }
  0x2e   : > { %v343_v6 = vrot.slane %v329_v35, %v335_v30 }
  0x30   : > { %v344_v7 = vcombine.low %v336_v36, %v343_v6 }
  0x32   : > { %519 = vmatmul.mubr.msk.bf16.vlgmr.msra.gmra.mrb[0].mxu0 %vm354_vm2, %v344_v7 }
 0x105   : > { %v396_v33 = vpop.f32.mrb[0].mxu0 }
 0x106   : > { %v410_v38 = vmul.f32 %v506_v20, %v396_v33  ;;  %v520_v39 = vpop.f32.mrb[1].mxu0 }
 0x107   : > { %v399_v40 = vpop.f32.mrb[2].mxu0 }
 0x108   : > { %v419_v41 = vadd.f32 %v507_v37, %v410_v38  ;;  %v411_v42 = vmul.f32 %v506_v20, %v399_v40  ;;  %v521_v43 = vpop.f32.mrb[3].mxu0 }
 0x10a   : > { %v421_v44 = vmax.f32 %v419_v41, 0.0  ;;  %v420_v45 = vadd.f32 %v507_v37, %v411_v42 }
 0x10c   : > { %v425_v46 = vcombine.high %v421_v44, %v421_v44  ;;  %v429_v47 = vpack.c.bf16 %v421_v44, %v421_v44  ;;  %v422_v48 = vmax.f32 %v420_v45, 0.0 }
 0x10e   : > { %v430_v49 = vpack.c.bf16 %v425_v46, %v425_v46  ;;  %434 = vst.msk [vmem:[%s197_s6] sm:$0x3] %vm433_vm3, %v429_v47  ;;  %v426_v50 = vcombine.high %v422_v48, %v422_v48  ;;  %v431_v51 = vpack.c.bf16 %v422_v48, %v422_v48 }
 0x110   : > { %435 = vst.msk [vmem:[%s197_s6 + $0x2] sm:$0x3] %vm433_vm3, %v430_v49  ;;  %v432_v52 = vpack.c.bf16 %v426_v50, %v426_v50  ;;  %436 = vst.msk [vmem:[%s197_s6 + $0x4] sm:$0x3] %vm433_vm3, %v431_v51 }
 0x112   : > { %437 = vst.msk [vmem:[%s197_s6 + $0x6] sm:$0x3] %vm433_vm3, %v432_v52 }
 0x113 PF: > { %s14_s15 = sadd.s32 1, %s542_s15  }
 0x114   : > { %p11_p4 = scmp.ge.s32.totalorder %s14_s15, 4  }
 0x116   :  { %13 = sbr.rel (!%p11_p4) target bundleno = 1 (0x1), region = 66 }

// kernel: forward.31
= control target key start
LH: loop header
LB: loop body
LE: loop exit
PB: predicated region body
PF: predicated region fallthrough
CT: control target
= control target key end

     0   :  { %s1231_s15 = smov 0   ;;  %s1496_s0 = inlined_call_operand.vmem [shape: bf16[2,6,6,8], index: 0, kind: input, shape index: {}]   ;;  %s1497_s1 = inlined_call_operand.vmem [shape: bf16[9,8,4], index: 1, kind: input, shape index: {}]   ;;  %s1498_s2 = inlined_call_operand.vmem [shape: f32[1,4], index: 2, kind: input, shape index: {}]   ;;  %s1499_s3 = inlined_call_operand.vmem [shape: f32[1,4], index: 3, kind: input, shape index: {}]   ;;  %s1500_s4 = inlined_call_operand.vmem [shape: bf16[2,4,4,4], index: 4, kind: output, shape index: {}]  }
   0x1 LB: > { %s1048_s16 = sadd.s32 4294967295, %s1201_s15   ;;  %p1052_p0 = scmp.ge.s32.totalorder %s1201_s15, 1  ;;  %s1201_s15 = sphi %s1231_s15, %s14_s15  }
   0x2   : > { %p162_p1 = scmp.lt.s32.totalorder %s1201_s15, 3 }
   0x4   : > { %p163_p2 = pnand %p1052_p0, %p162_p1 }
   0x5   : > { %v209_v0 = vld [vmem:[%s1497_s1 + $0x10] sm:$0xf] (!%p163_p2)  ;;  %vm334_vm0 = vcmask (!%p163_p2), 1043456   ;;  %v206_v1 = vld [vmem:[%s1497_s1 + $0x4] sm:$0xf] (!%p163_p2)  ;;  %v221_v2 = vlaneseq (!%p163_p2)  ;;  %v1203_v3 = vmov (!%p163_p2), 0.0  }
   0x6   : > { %166 = sbr.rel (%p163_p2) target bundleno = 318 (0x13e), region = 36  ;;  %1118 = vmatprep.subr.bf16.mxu0 (!%p163_p2), %v1203_v3  ;;  %1094 = vmatprep.subr.bf16.mxu1 (!%p163_p2), %v1203_v3  ;;  %v642_v4 = vsel (!%p163_p2), %vm334_vm0, %v209_v0, 0  ;;  %v336_v5 = vsel (!%p163_p2), %vm334_vm0, %v206_v1, 0  ;;  %p188_p3 = scmp.lt.s32.totalorder (!%p163_p2), %s1048_s16, 1  ;;  %v1204_v6 = vmov (!%p163_p2), 1983009808  }
   0x7   : > { %1119 = vmatpush3.bf16.msra.mxu0 (!%p163_p2), %v642_v4  ;;  %1095 = vmatpush3.bf16.msra.mxu1 (!%p163_p2), %v336_v5  ;;  %v219_v7 = vunpack.c.l.s4 (!%p163_p2), %v1204_v6  ;;  %v222_v8 = vshrl.u32 (!%p163_p2), %v221_v2, 7  ;;  %vm1205_vm1 = vmmov (!%p163_p2), 0   ;;  %vm250_vm2 = vsmask.f32 (!%p163_p2), 1280 }
   0x8   : > { %1096 = vmatprep.mubr.msk.bf16.mxu1 (!%p163_p2), %vm1205_vm1, %v1203_v3  ;;  %1120 = vmatprep.mubr.msk.bf16.mxu0 (!%p163_p2), %vm1205_vm1, %v1203_v3  ;;  %vm251_vm3 = vsmask.f32 (!%p163_p2), 3336  ;;  %vm253_vm4 = vsmask.f32 (!%p163_p2), 5392  ;;  %vm255_vm5 = vsmask.f32 (!%p163_p2), 7448 }
   0x9   : > { %1124 = vmatprep.subr.bf16.mxu0 (!%p163_p2), %v1203_v3  ;;  %v220_v9 = vunpack.c.0.s8 (!%p163_p2), %v219_v7  ;;  %1100 = vmatprep.subr.bf16.mxu1 (!%p163_p2), %v1203_v3  ;;  %vm252_vm6 = vmor (!%p163_p2), %vm250_vm2, %vm251_vm3  ;;  %vm443_vm7 = vcmask (!%p163_p2), 1040384   ;;  %vm444_vm10 = vcmask (!%p163_p2), 1042434   ;;  %vm446_vm12 = vcmask (!%p163_p2), 1044484  }
   0xa   : > { %vm254_vm8 = vmor (!%p163_p2), %vm252_vm6, %vm253_vm4  ;;  %vm448_vm14 = vcmask (!%p163_p2), 1046534   ;;  %vm330_vm2 = vcmask (!%p163_p2), 64512  }
   0xb   : > { %v1258_v10 = vsub.s32 (!%p163_p2), %v220_v9, %v222_v8  ;;  %vm1330_vm9 = vmor (!%p163_p2), %vm254_vm8, %vm255_vm5 }
   0xc   : > { %vm445_vm11 = vmor (!%p163_p2), %vm443_vm7, %vm444_vm10 }
   0xd   : > { %s1506_s16 = smov (!%p188_p3, %s1048_s16), 1  ;;  %vm447_vm13 = vmor %vm445_vm11, %vm446_vm12 }
   0xe   : > { %s1178_s21 = smul.u32 24, %s1506_s16  ;;  %vm1367_vm15 = vmor %vm447_vm13, %vm448_vm14  ;;  %s1075_s19 = sshll.u32 %s1506_s16, 3 }
   0xf   : > { %s197_s22 = scalar_lea.vmem %s1500_s4, %s1075_s19 }
  0x10   : > { %s1263_s24 = scalar_lea.vmem %s1496_s0, %s1178_s21 }
  0x11   : > { %v1266_v11 = vld [vmem:[%s1263_s24] sm:$0x7]  ;;  %v1269_v12 = vld [vmem:[%s1263_s24 + $0x4] sm:$0x7]  ;;  %v1272_v13 = vld [vmem:[%s1263_s24 + $0x8] sm:$0x7] }
  0x12   : > { %v1275_v14 = vld [vmem:[%s1263_s24 + $0xc] sm:$0x7]  ;;  %v1278_v15 = vld [vmem:[%s1263_s24 + $0x10] sm:$0x7]  ;;  %v1282_v16 = vrot.slane %v1266_v11, %v1258_v10  ;;  %v1286_v17 = vrot.slane %v1269_v12, %v1258_v10  ;;  %v1290_v18 = vrot.slane %v1272_v13, %v1258_v10 }
  0x13   : > { %v1294_v19 = vrot.slane %v1275_v14, %v1258_v10  ;;  %v1298_v20 = vrot.slane %v1278_v15, %v1258_v10 }
  0x14   : > { %v1302_v21 = vcombine.high %v1282_v16, %v1282_v16  ;;  %v1306_v22 = vcombine.high %v1286_v17, %v1286_v17  ;;  %v1310_v23 = vcombine.high %v1290_v18, %v1290_v18  ;;  %v258_v24 = vshrl.u32 %v1282_v16, 16 }
  0x15   : > { %v1317_v25 = vcombine.high %v1294_v19, %v1294_v19  ;;  %v261_v26 = vshll.u32 %v1282_v16, 16  ;;  %v272_v27 = vshrl.u32 %v1286_v17, 16  ;;  %v275_v28 = vshll.u32 %v1286_v17, 16 }
  0x16   : > { %v260_v29 = vrot.slane %v258_v24, 6  ;;  %v267_v30 = vshll.u32 %v1302_v21, 16  ;;  %v281_v31 = vshll.u32 %v1306_v22, 16  ;;  %v286_v32 = vshrl.u32 %v1290_v18, 16 }
  0x17   : > { %v263_v33 = vrot.slane %v261_v26, 7  ;;  %v274_v34 = vrot.slane %v272_v27, 6  ;;  %v277_v35 = vrot.slane %v275_v28, 7  ;;  %v289_v36 = vshll.u32 %v1290_v18, 16 }
  0x18   : > { %v269_v37 = vrot.slane %v267_v30, 7  ;;  %v283_v38 = vrot.slane %v281_v31, 7  ;;  %v288_v39 = vrot.slane %v286_v32, 6  ;;  %v295_v40 = vshll.u32 %v1310_v23, 16 }
  0x19   : > { %v264_v41 = vor.u32 %v263_v33, %v260_v29  ;;  %v278_v42 = vor.u32 %v277_v35, %v274_v34  ;;  %v291_v43 = vrot.slane %v289_v36, 7  ;;  %v300_v44 = vshrl.u32 %v1294_v19, 16  ;;  %v205_v29 = vld [vmem:[%s1497_s1] sm:$0xf] }
  0x1a   : > { %v297_v46 = vrot.slane %v295_v40, 7  ;;  %v303_v47 = vshll.u32 %v1294_v19, 16  ;;  %v309_v48 = vshll.u32 %v1317_v25, 16  ;;  %v1338_v49 = vcombine.high %v1298_v20, %v1298_v20 }
  0x1b   : > { %v265_v50 = vrot.slane %v264_v41, 2  ;;  %v279_v51 = vrot.slane %v278_v42, 2  ;;  %v292_v52 = vor.u32 %v291_v43, %v288_v39  ;;  %v302_v53 = vrot.slane %v300_v44, 6 }
  0x1c   : > { %v305_v54 = vrot.slane %v303_v47, 7  ;;  %v608_v55 = vshrl.u32 %v1298_v20, 16  ;;  %v611_v56 = vshll.u32 %v1298_v20, 16  ;;  %v617_v60 = vshll.u32 %v1338_v49, 16 }
  0x1d   : > { %v270_v57 = vsel %vm1330_vm9, %v265_v50, %v269_v37  ;;  %v284_v58 = vsel %vm1330_vm9, %v279_v51, %v283_v38  ;;  %v293_v59 = vrot.slane %v292_v52, 2  ;;  %v311_v62 = vrot.slane %v309_v48, 7 }
  0x1e   : > { %v306_v61 = vor.u32 %v305_v54, %v302_v53  ;;  %v610_v63 = vrot.slane %v608_v55, 6  ;;  %v613_v0 = vrot.slane %v611_v56, 7  ;;  %v313_v2 = vcombine.low %v270_v57, %v284_v58 }
  0x1f   : > { %v298_v1 = vsel %vm1330_vm9, %v293_v59, %v297_v46  ;;  %v619_v6 = vrot.slane %v617_v60, 7  ;;  %v1059_v30 = vrot.slane %v1286_v17, 9  ;;  %v456_v31 = vrot.slane %v1306_v22, 7  ;;  %v210_v17 = vld [vmem:[%s1497_s1 + $0x14] sm:$0xf] }
  0x20   : > { %v307_v4 = vrot.slane %v306_v61, 2  ;;  %v614_v5 = vor.u32 %v613_v0, %v610_v63  ;;  %v621_v7 = vcombine.low %v284_v58, %v298_v1  ;;  %v321_v26 = vrot.slane %v313_v2, %v1258_v10  ;;  %v207_v58 = vld [vmem:[%s1497_s1 + $0x8] sm:$0xf]  ;;  %v211_v60 = vld [vmem:[%s1497_s1 + $0x18] sm:$0xf] }
  0x21   : > { %v1060_v35 = vrot.slane %v1290_v18, 9  ;;  %v460_v36 = vrot.slane %v1310_v23, 7  ;;  %v1061_v22 = vrot.slane %v1294_v19, 9  ;;  %v464_v37 = vrot.slane %v1317_v25, 7  ;;  %v204_v25 = vld [vmem:[%s1263_s24 + $0x14] sm:$0x7] }
  0x22   : > { %v312_v8 = vsel %vm1330_vm9, %v307_v4, %v311_v62  ;;  %v615_v9 = vrot.slane %v614_v5, 2  ;;  %v629_v28 = vrot.slane %v621_v7, %v1258_v10  ;;  %v400_v40 = vsel %vm334_vm0, %v205_v29, 0  ;;  %v208_v29 = vld [vmem:[%s1497_s1 + $0xc] sm:$0xf] }
  0x23   : > { %v314_v24 = vcombine.low %v298_v1, %v312_v8  ;;  %v1065_v41 = vrot.slane %v1298_v20, 9  ;;  %v457_v18 = vsel %vm1367_vm15, %v1059_v30, %v456_v31  ;;  %v461_v23 = vsel %vm1367_vm15, %v1060_v35, %v460_v36  ;;  %v212_v31 = vld [vmem:[%s1497_s1 + $0x1c] sm:$0xf] }
  0x24   : > { %v1355_v27 = vsel %vm1330_vm9, %v615_v9, %v619_v6  ;;  %v465_v42 = vsel %vm1367_vm15, %v1061_v22, %v464_v37  ;;  %v689_v19 = vrot.slane %v1338_v49, 7  ;;  %v712_v44 = vsel %vm334_vm0, %v210_v17, 0 }
  0x25   : > { %v1364_v32 = vrot.slane %v314_v24, %v1258_v10  ;;  %v622_v33 = vcombine.low %v312_v8, %v1355_v27  ;;  %v379_v20 = vcombine.low %v1266_v11, %v1269_v12  ;;  %v380_v46 = vcombine.low %v1272_v13, %v1275_v14 }
  0x26   : > { %v1400_v47 = vsel %vm1367_vm15, %v1065_v41, %v689_v19  ;;  %v691_v48 = vcombine.low %v457_v18, %v461_v23  ;;  %v1406_v11 = vrot.slane %v204_v25, %v1258_v10  ;;  %v1058_v52 = vrot.slane %v1282_v16, 9 }
  0x27   : > { %v329_v38 = vcombine.low %v321_v26, %v1364_v32  ;;  %v636_v39 = vrot.slane %v622_v33, %v1258_v10  ;;  %v692_v49 = vcombine.low %v465_v42, %v1400_v47  ;;  %v387_v50 = vrot.slane %v379_v20, %v1258_v10  ;;  %v1071_v20 = vld [vmem:[%s1498_s2] ss:$0 sm:$0xff] }
  0x28   : > { %v394_v51 = vrot.slane %v380_v46, %v1258_v10  ;;  %v452_v53 = vrot.slane %v1302_v21, 7  ;;  %v699_v54 = vrot.slane %v691_v48, %v1258_v10  ;;  %v825_v56 = vshrl.u32 %v1406_v11, 16 }
  0x29   : > { %1097 = vmatmul.mubr.msk.bf16.vlgmr.msra.gmra.mrb[0].mxu1 %vm330_vm2, %v329_v38  ;;  %v637_v43 = vcombine.low %v629_v28, %v636_v39  ;;  %v706_v55 = vrot.slane %v692_v49, %v1258_v10  ;;  %v828_v57 = vshll.u32 %v1406_v11, 16  ;;  %v487_v61 = vsel %vm334_vm0, %v207_v58, 0 }
  0x2a   : > { %1101 = vmatpush3.bf16.msra.mxu1 %v400_v40  ;;  %1102 = vmatprep.mubr.msk.bf16.mxu1 %vm1205_vm1, %v1203_v3  ;;  %v395_v59 = vcombine.low %v387_v50, %v394_v51  ;;  %v453_v16 = vsel %vm1367_vm15, %v1058_v52, %v452_v53  ;;  %v823_v62 = vcombine.high %v1406_v11, %v1406_v11  ;;  %v827_v63 = vrot.slane %v825_v56, 6 }
  0x2b   : > { %1121 = vmatmul.mubr.msk.bf16.vlgmr.msra.gmra.mrb[0].mxu0 %vm330_vm2, %v637_v43  ;;  %1106 = vmatprep.subr.bf16.mxu1 %v1203_v3  ;;  %v707_v21 = vcombine.low %v699_v54, %v706_v55  ;;  %v830_v0 = vrot.slane %v828_v57, 7  ;;  %v771_v1 = vsel %vm334_vm0, %v211_v60, 0  ;;  %v466_v2 = vcombine.low %v453_v16, %v457_v18 }
  0x2c   : > { %1125 = vmatpush3.bf16.msra.mxu0 %v712_v44  ;;  %1126 = vmatprep.mubr.msk.bf16.mxu0 %vm1205_vm1, %v1203_v3  ;;  %v467_v4 = vcombine.low %v461_v23, %v465_v42  ;;  %v758_v5 = vcombine.low %v1278_v15, %v204_v25  ;;  %v834_v7 = vshll.u32 %v823_v62, 16  ;;  %v554_v35 = vsel %vm334_vm0, %v208_v29, 0 }
  0x2d   : > { %1130 = vmatprep.subr.bf16.mxu0 %v1203_v3  ;;  %v831_v6 = vor.u32 %v830_v0, %v827_v63  ;;  %v474_v8 = vrot.slane %v466_v2, %v1258_v10  ;;  %v851_v17 = vsel %vm334_vm0, %v212_v31, 0  ;;  %v533_v22 = vcombine.low %v1269_v12, %v1272_v13 }
  0x2e   : > { %v481_v9 = vrot.slane %v467_v4, %v1258_v10  ;;  %v765_v24 = vrot.slane %v758_v5, %v1258_v10  ;;  %v836_v28 = vrot.slane %v834_v7, 7  ;;  %v534_v37 = vcombine.low %v1275_v14, %v1278_v15 }
  0x2f   : > { %v832_v26 = vrot.slane %v831_v6, 2  ;;  %v541_v45 = vrot.slane %v533_v22, %v1258_v10  ;;  %v1069_v14 = vrot.slane %v1406_v11, 9  ;;  %v898_v15 = vrot.slane %v823_v62, 7 }
  0x30   : > { %v482_v30 = vcombine.low %v474_v8, %v481_v9  ;;  %v766_v33 = vcombine.low %v394_v51, %v765_v24  ;;  %v548_v12 = vrot.slane %v534_v37, %v1258_v10 }
  0x31   : > { %v837_v36 = vsel %vm1330_vm9, %v832_v26, %v836_v28  ;;  %v899_v41 = vsel %vm1367_vm15, %v1069_v14, %v898_v15 }
  0x32   : > { %v838_v38 = vcombine.low %v1355_v27, %v837_v36  ;;  %v549_v39 = vcombine.low %v541_v45, %v548_v12  ;;  %v213_v27 = vld [vmem:[%s1497_s1 + $0x20] sm:$0xf]  ;;  %v900_v23 = vcombine.low %v1400_v47, %v899_v41 }
  0x33   : > { %v913_v18 = vsel %vm334_vm0, %v213_v27, 0  ;;  %vm988_vm0 = vcmask 25600  }
  0x34   : > { %v845_v13 = vrot.slane %v838_v38, %v1258_v10  ;;  %v907_v42 = vrot.slane %v900_v23, %v1258_v10 }
  0x35   : > { %1103 = vmatmul.mubr.msk.bf16.vlgmr.msra.gmra.mrb[0].mxu1 %vm330_vm2, %v395_v59 }
  0x36   : > { %1107 = vmatpush3.bf16.msra.mxu1 %v487_v61  ;;  %1108 = vmatprep.mubr.msk.bf16.mxu1 %vm1205_vm1, %v1203_v3  ;;  %v846_v40 = vcombine.low %v1364_v32, %v845_v13  ;;  %v908_v19 = vcombine.low %v481_v9, %v907_v42 }
  0x37   : > { %1127 = vmatmul.mubr.msk.bf16.vlgmr.msra.gmra.mrb[0].mxu0 %vm330_vm2, %v707_v21  ;;  %1112 = vmatprep.subr.bf16.mxu1 %v1203_v3 }
  0x38   : > { %1131 = vmatpush3.bf16.msra.mxu0 %v771_v1  ;;  %1132 = vmatprep.mubr.msk.bf16.mxu0 %vm1205_vm1, %v1203_v3 }
  0x39   : > { %1136 = vmatprep.subr.bf16.mxu0 %v1203_v3 }
  0x41   : > { %1109 = vmatmul.mubr.msk.bf16.vlgmr.msra.gmra.mrb[0].mxu1 %vm330_vm2, %v482_v30 }
  0x42   : > { %1113 = vmatpush3.bf16.msra.mxu1 %v554_v35  ;;  %1114 = vmatprep.mubr.msk.bf16.mxu1 %vm1205_vm1, %v1203_v3 }
  0x43   : > { %1133 = vmatmul.mubr.msk.bf16.vlgmr.msra.gmra.mrb[0].mxu0 %vm330_vm2, %v766_v33 }
  0x44   : > { %1137 = vmatpush3.bf16.msra.mxu0 %v851_v17  ;;  %1138 = vmatprep.mubr.msk.bf16.mxu0 %vm1205_vm1, %v1203_v3 }
  0x45   : > { %1142 = vmatprep.subr.bf16.mxu0 %v1203_v3 }
  0x4d   : > { %1115 = vmatmul.mubr.msk.bf16.vlgmr.msra.gmra.mrb[0].mxu1 %vm330_vm2, %v549_v39 }
  0x4f   : > { %1139 = vmatmul.mubr.msk.bf16.vlgmr.msra.gmra.mrb[0].mxu0 %vm330_vm2, %v846_v40 }
  0x50   : > { %1143 = vmatpush3.bf16.msra.mxu0 %v913_v18  ;;  %1144 = vmatprep.mubr.msk.bf16.mxu0 %vm1205_vm1, %v1203_v3  ;;  %v1072_v3 = vld [vmem:[%s1499_s3] ss:$0 sm:$0xff] }
  0x5b   : > { %1145 = vmatmul.mubr.msk.bf16.vlgmr.msra.gmra.mrb[0].mxu0 %vm330_vm2, %v908_v19 }
 0x120   : > { %v590_v32 = vpop.f32.mrb[0].mxu1 }
 0x121   : > { %v1116_v34 = vpop.f32.mrb[1].mxu1 }
 0x122   : > { %v593_v25 = vpop.f32.mrb[2].mxu1 }
 0x123   : > { %v1117_v43 = vpop.f32.mrb[3].mxu1 }
 0x12e   : > { %v949_v44 = vpop.f32.mrb[0].mxu0 }
 0x12f   : > { %v1148_v46 = vadd.f32 %v949_v44, %v590_v32  ;;  %v1146_v47 = vpop.f32.mrb[1].mxu0 }
 0x130   : > { %v952_v10 = vpop.f32.mrb[2].mxu0 }
 0x131   : > { %v965_v48 = vmul.f32 %v1148_v46, %v1071_v20  ;;  %v1149_v49 = vadd.f32 %v952_v10, %v593_v25  ;;  %v1147_v11 = vpop.f32.mrb[3].mxu0 }
 0x133   : > { %v974_v50 = vadd.f32 %v1072_v3, %v965_v48  ;;  %v966_v51 = vmul.f32 %v1149_v49, %v1071_v20 }
 0x135   : > { %v976_v52 = vmax.f32 %v974_v50, 0.0  ;;  %v975_v53 = vadd.f32 %v1072_v3, %v966_v51 }
 0x137   : > { %v980_v54 = vcombine.high %v976_v52, %v976_v52  ;;  %v984_v55 = vpack.c.bf16 %v976_v52, %v976_v52  ;;  %v977_v56 = vmax.f32 %v975_v53, 0.0 }
 0x139   : > { %v985_v57 = vpack.c.bf16 %v980_v54, %v980_v54  ;;  %989 = vst.msk [vmem:[%s197_s22] sm:$0x3] %vm988_vm0, %v984_v55  ;;  %v981_v58 = vcombine.high %v977_v56, %v977_v56  ;;  %v986_v59 = vpack.c.bf16 %v977_v56, %v977_v56 }
 0x13b   : > { %990 = vst.msk [vmem:[%s197_s22 + $0x2] sm:$0x3] %vm988_vm0, %v985_v57  ;;  %v987_v60 = vpack.c.bf16 %v981_v58, %v981_v58  ;;  %991 = vst.msk [vmem:[%s197_s22 + $0x4] sm:$0x3] %vm988_vm0, %v986_v59 }
 0x13d   : > { %992 = vst.msk [vmem:[%s197_s22 + $0x6] sm:$0x3] %vm988_vm0, %v987_v60 }
 0x13e PF: > { %s14_s15 = sadd.s32 1, %s1201_s15  }
 0x13f   : > { %p11_p4 = scmp.ge.s32.totalorder %s14_s15, 4  }
 0x141   :  { %13 = sbr.rel (!%p11_p4) target bundleno = 1 (0x1), region = 66 }

// kernel: forward.36
= control target key start
LH: loop header
LB: loop body
LE: loop exit
PB: predicated region body
PF: predicated region fallthrough
CT: control target
= control target key end

     0   :  { %vm47_vm0 = vcmask 195584   ;;  %vm54_vm1 = vcmask 1043456   ;;  %vm157_vm2 = vcmask 60416   ;;  %s274_s1 = inlined_call_operand.vmem [shape: bf16[24,8], index: 1, kind: input, shape index: {}]   ;;  %s275_s0 = inlined_call_operand.vmem [shape: bf16[32,24], index: 0, kind: input, shape index: {}]   ;;  %s276_s2 = inlined_call_operand.vmem [shape: f32[1,8], index: 2, kind: input, shape index: {}]   ;;  %s277_s4 = inlined_call_operand.vmem [shape: bf16[32,8], index: 4, kind: input, shape index: {}]   ;;  %s278_s3 = inlined_call_operand.vmem [shape: f32[1,8], index: 3, kind: input, shape index: {}]   ;;  %s279_s5 = inlined_call_operand.vmem [shape: bf16[32,8], index: 5, kind: output, shape index: {}]  }
   0x1   :  { %v204_v0 = vld [vmem:[%s274_s1] sm:$0xff]   ;;  %v205_v1 = vld [vmem:[%s274_s1 + $0x8] ss:$0 sps:$4 sm:$0xff]  }
   0x2   :  { %v206_v2 = vld [vmem:[%s275_s0] sm:$0xff]   ;;  %195 = vmatprep.subr.bf16.mxu0 %v204_v0  ;;  %v56_v3 = vsel %vm54_vm1, %v205_v1, 0  ;;  %v207_v4 = vld [vmem:[%s275_s0 + $0x8] sm:$0xff]  }
   0x3   :  { %196 = vmatpush3.bf16.msra.mxu0 %v204_v0  ;;  %199 = vmatprep.mubr.msk.bf16.mxu0 %vm47_vm0, %v206_v2  ;;  %v172_v5 = vld [vmem:[%s276_s2] ss:$0 sm:$0xff]  ;;  %v190_v6 = vld [vmem:[%s277_s4 + $0x8] sm:$0xff]  }
   0x4   :  { %203 = vmatprep.subr.msk.bf16.mxu0 %vm54_vm1, %v205_v1  ;;  %v183_v7 = vld [vmem:[%s277_s4] sm:$0xff]   ;;  %v188_v11 = vunpack.c.l.bf16 %v190_v6  ;;  %v189_v18 = vunpack.c.h.bf16 %v190_v6 }
   0x5   :  { %v173_v9 = vld [vmem:[%s278_s3] ss:$0 sm:$0xff]  ;;  %v184_v14 = vunpack.c.l.bf16 %v183_v7  ;;  %v185_v22 = vunpack.c.h.bf16 %v183_v7 }
   0x7   :  { %198 = vmatpush3.bf16.msra.mxu0 %v56_v3 }
   0xa   :  { %200 = vmatmul.mubr.msk.bf16.vlgmr.msra.gmra.mrb[0].mxu0 %vm47_vm0, %v207_v4 }
  0xdd   :  { %v201_v8 = vpop.f32.mrb[0].mxu0 }
  0xde   :  { %v116_v10 = vmul.f32 %v201_v8, %v172_v5  ;;  %v92_v12 = vpop.f32.mrb[1].mxu0 }
  0xdf   :  { %v114_v13 = vmul.f32 %v172_v5, %v92_v12  ;;  %v202_v15 = vpop.f32.mrb[2].mxu0 }
  0xe0   :  { %v127_v16 = vadd.f32 %v173_v9, %v116_v10  ;;  %v117_v17 = vmul.f32 %v202_v15, %v172_v5  ;;  %v95_v19 = vpop.f32.mrb[3].mxu0 }
  0xe1   :  { %v125_v20 = vadd.f32 %v173_v9, %v114_v13  ;;  %v115_v21 = vmul.f32 %v172_v5, %v95_v19 }
  0xe2   :  { %v139_v23 = vadd.f32 %v188_v11, %v127_v16  ;;  %v128_v24 = vadd.f32 %v173_v9, %v117_v17 }
  0xe3   :  { %v137_v25 = vadd.f32 %v184_v14, %v125_v20  ;;  %v126_v26 = vadd.f32 %v173_v9, %v115_v21 }
  0xe4   :  { %v180_v27 = vpack.c.bf16 %v139_v23, %v139_v23  ;;  %v140_v28 = vadd.f32 %v189_v18, %v128_v24 }
  0xe5   :  { %v178_v29 = vpack.c.bf16 %v137_v25, %v137_v25  ;;  %v138_v30 = vadd.f32 %v185_v22, %v126_v26 }
  0xe6   :  { %160 = vst.msk [vmem:[%s279_s5 + $0x8] sm:$0xf] %vm157_vm2, %v180_v27  ;;  %v181_v31 = vpack.c.bf16 %v140_v28, %v140_v28 }
  0xe7   :  { %158 = vst.msk [vmem:[%s279_s5] sm:$0xf] %vm157_vm2, %v178_v29  ;;  %v179_v32 = vpack.c.bf16 %v138_v30, %v138_v30 }
  0xe8   :  { %161 = vst.msk [vmem:[%s279_s5 + $0xc] sm:$0xf] %vm157_vm2, %v181_v31 }
  0xe9   :  { %159 = vst.msk [vmem:[%s279_s5 + $0x4] sm:$0xf] %vm157_vm2, %v179_v32 }

// kernel: forward.37
= control target key start
LH: loop header
LB: loop body
LE: loop exit
PB: predicated region body
PF: predicated region fallthrough
CT: control target
= control target key end

     0   :  { %v224_v3 = vmov 0.0   ;;  %vm225_vm0 = vmmov 0   ;;  %s292_s0 = inlined_call_operand.vmem [shape: bf16[2,16,8], index: 0, kind: input, shape index: {}]   ;;  %s293_s1 = inlined_call_operand.vmem [shape: f32[1,8], index: 1, kind: input, shape index: {}]   ;;  %s294_s2 = inlined_call_operand.vmem [shape: f32[1,8], index: 2, kind: input, shape index: {}]   ;;  %s295_s3 = inlined_call_operand.vmem [shape: f32[8,10], index: 3, kind: input, shape index: {}]   ;;  %s296_s4 = inlined_call_operand.vmem [shape: f32[1,10], index: 4, kind: input, shape index: {}]   ;;  %s297_s5 = inlined_call_operand.hbm [shape: f32[2,10], index: 5, kind: output, shape index: {}]  }
   0x1   :  { %v77_v0 = vld [vmem:[%s295_s3] sm:$0xff]  ;;  %v189_v2 = vld [vmem:[%s292_s0 + $0x8] sm:$0xff]   ;;  %192 = vmatprep.subr.mxu0 %v224_v3  ;;  %194 = vmatprep.mubr.msk.f32.mxu0 %vm225_vm0, %v224_v3 }
   0x2   :  { %v182_v1 = vld [vmem:[%s292_s0] sm:$0xff]   ;;  %v187_v6 = vunpack.c.l.bf16 %v189_v2  ;;  %v188_v7 = vunpack.c.h.bf16 %v189_v2  ;;  %193 = vmatpush3.msra.mxu0 %v77_v0 }
   0x3   :  { %v183_v4 = vunpack.c.l.bf16 %v182_v1  ;;  %v184_v5 = vunpack.c.h.bf16 %v182_v1  ;;  %v177_v8 = vld [vmem:[%s293_s1] ss:$0 sm:$0xff] }
   0x4   :  { %v178_v9 = vld [vmem:[%s294_s2] ss:$0 sm:$0xff] }
   0x5   :  { %10 = vsyncpa [#allocation3], 0  ;;  %v36_v10 = vmul.f32 %v183_v4, %v177_v8  ;;  %v37_v11 = vmul.f32 %v184_v5, %v177_v8  ;;  %v38_v12 = vmul.f32 %v187_v6, %v177_v8  ;;  %v39_v13 = vmul.f32 %v188_v7, %v177_v8  ;;  %v179_v43 = vld [vmem:[%s296_s4] ss:$0 sm:$0xff]  ;;  %s226_s2 = smov [#allocation2]  }
   0x6   :  { %vm55_vm1 = vcmask 64512   ;;  %vm87_vm2 = vcmask 1041409   ;;  %s169_s27 = sshll.u32 %s226_s2, 4  ;;  %vm161_vm3 = vcmask 74752   ;;  %s170_s27 = int_to_ptr.vmem [resolvable:$true] %s169_s27 }
   0x7   :  { %v47_v14 = vadd.f32 %v178_v9, %v36_v10  ;;  %v48_v15 = vadd.f32 %v178_v9, %v37_v11  ;;  %v49_v16 = vadd.f32 %v178_v9, %v38_v12  ;;  %v50_v17 = vadd.f32 %v178_v9, %v39_v13  ;;  %s200_s28 = scalar_lea.vmem %s170_s27, 32  ;;  %p205_p1 = scmp.lt.s32.totalorder %s170_s27, %s170_s27 }
   0x8   :  { %p201_p0 = scmp.ne.s32.totalorder %s170_s27, %s200_s28  ;;  %p206_p2 = scmp.lt.s32.totalorder %s200_s28, %s200_s28 }
   0x9   :  { %v51_v18 = vmax.f32 %v47_v14, 0.0  ;;  %v52_v19 = vmax.f32 %v48_v15, 0.0  ;;  %v53_v20 = vmax.f32 %v49_v16, 0.0  ;;  %v54_v21 = vmax.f32 %v50_v17, 0.0 }
   0xa   :  { %p207_p3 = por %p206_p2, %p205_p1 }
   0xb   :  { %v56_v22 = vsel %vm55_vm1, %v51_v18, 0.0  ;;  %v57_v23 = vsel %vm55_vm1, %v52_v19, 0.0  ;;  %v65_v24 = vsel %vm55_vm1, %v53_v20, 0.0  ;;  %v66_v25 = vsel %vm55_vm1, %v54_v21, 0.0 }
   0xc   :  { %v58_v26 = vadd.f32 %v57_v23, %v56_v22  ;;  %v67_v27 = vadd.f32 %v66_v25, %v65_v24  ;;  %p208_p4 = pnand %p207_p3, %p201_p0 }
   0xe   :  { %v59_v28 = vrot.slane %v58_v26, 4  ;;  %v68_v29 = vrot.slane %v67_v27, 4 }
  0x10   :  { %v60_v30 = vadd.f32 %v59_v28, %v58_v26  ;;  %v69_v31 = vadd.f32 %v68_v29, %v67_v27 }
  0x12   :  { %v61_v32 = vrot.slane %v60_v30, 2  ;;  %v70_v33 = vrot.slane %v69_v31, 2 }
  0x14   :  { %v62_v34 = vadd.f32 %v61_v32, %v60_v30  ;;  %v71_v35 = vadd.f32 %v70_v33, %v69_v31 }
  0x16   :  { %v63_v36 = vrot.slane %v62_v34, 1  ;;  %v72_v37 = vrot.slane %v71_v35, 1 }
  0x18   :  { %v64_v38 = vadd.f32 %v63_v36, %v62_v34  ;;  %v73_v39 = vadd.f32 %v72_v37, %v71_v35 }
  0x1a   :  { %v75_v40 = vmul.f32 0.0625, %v64_v38  ;;  %v76_v41 = vmul.f32 0.0625, %v73_v39 }
  0x1c   :  { %v88_v42 = vsel %vm87_vm2, %v76_v41, %v75_v40 }
  0x1d   :  { %195 = vmatmul.mubr.msk.f32.vlgmr.msra.gmra.mrb[0].mxu0 %vm55_vm1, %v88_v42 }
  0xf0   :  { %v157_v44 = vpop.f32.mrb[0].mxu0 }
  0xf1   :  { %v158_v45 = vadd.f32 %v179_v43, %v157_v44  ;;  %v196_v46 = vpop.f32.mrb[1].mxu0 }
  0xf3   :  { %162 = vst.msk [vmem:[#allocation2] sm:$0x3] %vm161_vm3, %v158_v45 }
  0xf4   :  { %211 = shalt.err (!%p208_p4)
}
  0xf5   :  { %s212_s6 = scalar_lea.hbm %s297_s5, 32 }
  0xf6   :  { %p213_p5 = scmp.ne.s32.totalorder %s297_s5, %s212_s6  ;;  %p216_p6 = scmp.lt.u32.totalorder %s212_s6, %s297_s5 }
  0xf8   :  { %p218_p7 = pnand %p216_p6, %p213_p5 }
  0xfa   :  { %221 = shalt.err (!%p218_p7)
}
  0xfb   :  { %172 = dma.vmem_to_hbm [thread:$0]  %s170_s27, 32, %s297_s5, [#allocation3]  }
  0xfc   :  { %222 = dma.done.wait [#allocation3], 32  }
  0xfd   :  { %223 = vsyncadd [#allocation3], 4294967264 }
  0xfe   :  { %176 = vsyncpa [#allocation3], 1 }

</bundles_post_ra>
